<compile_context>
chip_gen: v7x
topology: tpu7x:2x2x1
jax: 0.10.0
libtpu: 0.0.40
codegen_flags: <defaults>
</compile_context>

<pallas_src>
import functools

import jax
import jax.numpy as jnp
from jax.experimental import pallas as pl
from jax.experimental.pallas import tpu as pltpu

KERNEL_SIZES = (5, 9, 13)          # cascade below relies on exactly 5 -> 9 -> 13
MAX_PAD = max(KERNEL_SIZES) // 2   # 6
BN_EPS = 1e-5


def _silu(x):
    # x * sigmoid(x); tanh formulation is overflow-safe and maps to the EUP slot.
    return x * (0.5 * (jnp.tanh(0.5 * x) + 1.0))


def _fold_bn(gamma, beta, mean, var, eps=BN_EPS):
    scale = gamma / jnp.sqrt(var + eps)
    bias = beta - mean * scale
    return scale, bias


def _runmax5(t):
    """Separable 5x5 stride-1 running max: (Hc, Wc, C) -> (Hc-4, Wc-4, C)."""
    Ho = t.shape[0] - 4
    Wo = t.shape[1] - 4
    r = t[0:Ho]
    for d in range(1, 5):                      # row direction (outer dim, cheap)
        r = jnp.maximum(r, t[d:d + Ho])
    out = r[:, 0:Wo]
    for d in range(1, 5):                      # col direction (sublane shifts)
        # TODO(synk): pltpu.roll(r, -d, axis=1)[:, :Wo] would move this to the XLU.
        out = jnp.maximum(out, r[:, d:d + Wo])
    return out


# -------------------- fused conv1 + SPP pools + conv2 kernel ----------------
def _spp_fused_kernel(x_ref, w1_ref, b1_ref, w2_ref, b2_ref, o_ref, yp_ref,
                      *, H, W, lpad, compute_dtype, pool_dtype):
    # x_ref:  (1, H*W, Cin)  channels-last pixels of one batch element (compute_dtype)
    # w1_ref: (Cin, Ch)   b1: (1, Ch)      BN1 scale pre-folded into w1, bias kept
    # w2_ref: (4*Ch, Cout) b2: (1, Cout)   BN2 scale pre-folded into w2, bias kept
    # o_ref:  (1, H*W, Cout) f32
    # yp_ref: VMEM scratch (H+2P, lpad+W+P, Ch) pool_dtype, -inf padded conv1 output
    P = MAX_PAD
    Ch = w1_ref.shape[1]
    HW = H * W
    Wp = lpad + W + P

    # ---- conv1 (1x1 conv == channel matmul, BN scale folded) + bias + SiLU ----
    y = jnp.dot(x_ref[0], w1_ref[...], preferred_element_type=jnp.float32)  # (HW, Ch)
    y = _silu(y + b1_ref[...])                                              # f32
    y3 = y.astype(pool_dtype).reshape(H, W, Ch)

    # ---- -inf "same" halo: border strips only; interior written once, aligned ----
    def _neg(shape):
        return jnp.full(shape, -jnp.inf, dtype=pool_dtype)

    yp_ref[0:P, :, :] = _neg((P, Wp, Ch))                          # top
    yp_ref[P + H:P + H + P, :, :] = _neg((P, Wp, Ch))              # bottom
    yp_ref[P:P + H, 0:lpad, :] = _neg((H, lpad, Ch))               # left
    yp_ref[P:P + H, lpad + W:lpad + W + P, :] = _neg((H, P, Ch))   # right
    yp_ref[P:P + H, lpad:lpad + W, :] = y3                         # aligned interior
    yp = yp_ref[...]

    # ---- cascaded 5x5 stride-1 max pools (SPPF identity) ----
    t1 = _runmax5(yp)        # interior == pool5(y)
    t2 = _runmax5(t1)        # interior == pool9(y)
    t3 = _runmax5(t2)        #             pool13(y)
    p5 = t1[4:4 + H, lpad - 2:lpad - 2 + W]
    p9 = t2[2:2 + H, lpad - 4:lpad - 4 + W]
    p13 = t3[0:H, lpad - 6:lpad - 6 + W]
    branches = (y3, p5, p9, p13)   # same order as torch.cat([x, m5, m9, m13], dim=1)

    # ---- channel concat + conv2 (1x1) + bias + SiLU ----
    if Ch == 128:
        # only here does the long-K contraction pay for the concat copy (MXU depth 256)
        cat = jnp.concatenate([b.astype(compute_dtype) for b in branches], axis=-1)
        z = jnp.dot(cat.reshape(HW, 4 * Ch), w2_ref[...],
                    preferred_element_type=jnp.float32)
    else:
        # K-split: 4 dots of K=Ch, accumulated in f32; no concat materialization
        z = None
        for i, b in enumerate(branches):
            part = jnp.dot(b.reshape(HW, Ch).astype(compute_dtype),
                           w2_ref[i * Ch:(i + 1) * Ch, :],
                           preferred_element_type=jnp.float32)
            z = part if z is None else z + part

    z = _silu(z + b2_ref[...])
    o_ref[0] = z.astype(o_ref.dtype)


# --------------------------------- wrapper ----------------------------------
def _vmem_limit_bytes():
    try:
        cap = int(pltpu.get_tpu_info().vmem_capacity_bytes)
    except Exception:
        cap = 64 * 1024 * 1024
    return int(max(32 * 1024 * 1024, min(96 * 1024 * 1024, (cap * 3) // 4)))


@functools.partial(jax.jit, static_argnames=("compute_dtype", "pool_dtype"))
def spp_bottleneck(x_nchw, params, *, compute_dtype=jnp.bfloat16, pool_dtype=None):
    if pool_dtype is None:
        # on v5e (no bf16 VPU/EUP) pass pool_dtype=jnp.float32 explicitly
        pool_dtype = compute_dtype
    N, Cin, H, W = x_nchw.shape
    Ch = params["w1"].shape[1]
    Cout = params["w2"].shape[-1]
    P = MAX_PAD
    # sublane-aligned left pad for the scratch interior store (8 rows f32, 16 bf16)
    lpad = 8 if jnp.dtype(pool_dtype).itemsize >= 4 else 16

    # TODO(synk): eliminate this extra HBM pass with a transposed-LHS dot in-kernel;
    # for now the compute_dtype cast fuses into the transpose (half the bytes written).
    x = jnp.transpose(x_nchw, (0, 2, 3, 1)).reshape(N, H * W, Cin)
    x = x.astype(compute_dtype)

    # fold BN (eval mode) scale into the conv weights; only bias adds stay in-kernel
    s1, b1 = _fold_bn(params["bn1_gamma"], params["bn1_beta"],
                      params["bn1_mean"], params["bn1_var"])
    s2, b2 = _fold_bn(params["bn2_gamma"], params["bn2_beta"],
                      params["bn2_mean"], params["bn2_var"])
    w1f = (params["w1"].astype(jnp.float32) * s1[None, :]).astype(compute_dtype)
    w2f = (params["w2"].astype(jnp.float32) * s2[None, :]).astype(compute_dtype)
    b1 = b1.reshape(1, Ch).astype(jnp.float32)
    b2 = b2.reshape(1, Cout).astype(jnp.float32)

    kernel = functools.partial(_spp_fused_kernel, H=H, W=W, lpad=lpad,
                               compute_dtype=compute_dtype, pool_dtype=pool_dtype)

    out = pl.pallas_call(
        kernel,
        out_shape=jax.ShapeDtypeStruct((N, H * W, Cout), jnp.float32),
        grid=(N,),
        in_specs=[
            pl.BlockSpec((1, H * W, Cin), lambda b: (b, 0, 0)),
            pl.BlockSpec((Cin, Ch), lambda b: (0, 0)),
            pl.BlockSpec((1, Ch), lambda b: (0, 0)),
            pl.BlockSpec((4 * Ch, Cout), lambda b: (0, 0)),
            pl.BlockSpec((1, Cout), lambda b: (0, 0)),
        ],
        out_specs=pl.BlockSpec((1, H * W, Cout), lambda b: (b, 0, 0)),
        scratch_shapes=[pltpu.VMEM((H + 2 * P, lpad + W + P, Ch), pool_dtype)],
        compiler_params=pltpu.CompilerParams(
            dimension_semantics=("parallel",),
            vmem_limit_bytes=_vmem_limit_bytes(),
        ),
    )(x, w1f, b1, w2f, b2)

    out = out.reshape(N, H, W, Cout)
    return jnp.transpose(out, (0, 3, 1, 2))        # back to NCHW


# ---------------------------- pure-JAX reference ----------------------------
def spp_bottleneck_ref(x_nchw, params):
    x = jnp.transpose(x_nchw, (0, 2, 3, 1)).astype(jnp.float32)
    s1, b1 = _fold_bn(params["bn1_gamma"], params["bn1_beta"],
                      params["bn1_mean"], params["bn1_var"])
    s2, b2 = _fold_bn(params["bn2_gamma"], params["bn2_beta"],
                      params["bn2_mean"], params["bn2_var"])
    y = jnp.einsum("nhwc,cd->nhwd", x, params["w1"]) * s1 + b1
    y = _silu(y)
    pools = [y]
    for ks in KERNEL_SIZES:
        p = ks // 2
        pools.append(jax.lax.reduce_window(
            y, -jnp.inf, jax.lax.max,
            (1, ks, ks, 1), (1, 1, 1, 1),
            ((0, 0), (p, p), (p, p), (0, 0))))
    cat = jnp.concatenate(pools, axis=-1)
    z = jnp.einsum("nhwc,cd->nhwd", cat, params["w2"]) * s2 + b2
    z = _silu(z)
    return jnp.transpose(z, (0, 3, 1, 2))


if __name__ == "__main__":
    N, Cin, H, W = 2, 4, 16, 16
    Cout = 8
    Ch = Cin // 2                       # hidden_channels = in_channels // 2
    nb = len(KERNEL_SIZES) + 1          # 4 branches -> conv2 in-channels = 4*Ch

    key = jax.random.PRNGKey(0)
    k1, k2, kx = jax.random.split(key, 3)

    # deterministic synthetic parameters (PyTorch conv weights are (Cout, Cin, 1, 1);
    # stored here transposed as (Cin, Cout))
    params = {
        "w1": 0.5 * jax.random.normal(k1, (Cin, Ch), jnp.float32),
        "bn1_gamma": 1.0 + 0.10 * jnp.arange(Ch, dtype=jnp.float32),
        "bn1_beta": 0.05 * jnp.arange(Ch, dtype=jnp.float32),
        "bn1_mean": 0.02 * jnp.arange(Ch, dtype=jnp.float32),
        "bn1_var": 1.0 + 0.03 * jnp.arange(Ch, dtype=jnp.float32),
        "w2": 0.25 * jax.random.normal(k2, (nb * Ch, Cout), jnp.float32),
        "bn2_gamma": 1.0 + 0.07 * jnp.arange(Cout, dtype=jnp.float32),
        "bn2_beta": -0.03 * jnp.arange(Cout, dtype=jnp.float32),
        "bn2_mean": 0.01 * jnp.arange(Cout, dtype=jnp.float32),
        "bn2_var": 1.0 + 0.05 * jnp.arange(Cout, dtype=jnp.float32),
    }

    x = jax.random.normal(kx, (N, Cin, H, W), jnp.float32)
    ref = spp_bottleneck_ref(x, params)

    # full f32 path: exactness check against the reference
    out_f32 = jax.block_until_ready(
        spp_bottleneck(x, params, compute_dtype=jnp.float32))
    assert out_f32.shape == (N, Cout, H, W), out_f32.shape
    if not jnp.allclose(out_f32, ref, atol=1e-4, rtol=1e-4):
        raise SystemExit(
            "f32 mismatch vs reference: max abs err = "
            f"{float(jnp.max(jnp.abs(out_f32 - ref)))}")

    # default path: bf16 MXU operands + bf16 pooling (expected small precision loss)
    out_bf16 = jax.block_until_ready(spp_bottleneck(x, params))
    err = float(jnp.max(jnp.abs(out_bf16 - ref)))
    if not (err < 0.25):
        raise SystemExit(f"bf16 mismatch vs reference: max abs err = {err}")

    print("KERNEL_OK")
</pallas_src>

<mosaic_0001>
module attributes {stable_mosaic.version = 11 : i64} {
  func.func @_spp_fused_kernel(%arg0: i32, %arg1: memref<1x256x4xf32, #tpu.memory_space<vmem>>, %arg2: memref<4x2xf32, #tpu.memory_space<vmem>>, %arg3: memref<1x2xf32, #tpu.memory_space<vmem>>, %arg4: memref<8x8xf32, #tpu.memory_space<vmem>>, %arg5: memref<1x8xf32, #tpu.memory_space<vmem>>, %arg6: memref<1x256x8xf32, #tpu.memory_space<vmem>>, %arg7: memref<28x30x2xf32, #tpu.memory_space<vmem>>) attributes {dimension_semantics = [#tpu.dimension_semantics<parallel>], iteration_bounds = array<i64: 2>, scalar_prefetch = 0 : i64, scratch_operands = 1 : i64, tpu.core_type = #tpu.core_type<tc>, window_params = [{transform_indices = @transform_0, window_bounds = array<i64: 1, 256, 4>}, {pipeline_mode = #tpu.pipeline_mode<synchronous>, transform_indices = @transform_1, window_bounds = array<i64: 4, 2>}, {pipeline_mode = #tpu.pipeline_mode<synchronous>, transform_indices = @transform_2, window_bounds = array<i64: 1, 2>}, {pipeline_mode = #tpu.pipeline_mode<synchronous>, transform_indices = @transform_3, window_bounds = array<i64: 8, 8>}, {pipeline_mode = #tpu.pipeline_mode<synchronous>, transform_indices = @transform_4, window_bounds = array<i64: 1, 8>}, {transform_indices = @transform_5, window_bounds = array<i64: 1, 256, 8>}]} {
    %c0 = arith.constant 0 : index
    %c0_0 = arith.constant 0 : index
    %c0_1 = arith.constant 0 : index
    %0 = vector.load %arg1[%c0, %c0_0, %c0_1] : memref<1x256x4xf32, #tpu.memory_space<vmem>>, vector<1x256x4xf32>
    %1 = vector.shape_cast %0 : vector<1x256x4xf32> to vector<256x4xf32>
    %c0_2 = arith.constant 0 : index
    %c0_3 = arith.constant 0 : index
    %2 = vector.load %arg2[%c0_2, %c0_3] : memref<4x2xf32, #tpu.memory_space<vmem>>, vector<4x2xf32>
    %cst = arith.constant dense<0.000000e+00> : vector<256x2xf32>
    %3 = tpu.matmul %1, %2, %cst {dimension_numbers = #tpu.dot_dimension_numbers<[1], [0], [0], [1], [0, 0, 1, 1], [], []>} : vector<256x4xf32>, vector<4x2xf32>, vector<256x2xf32> -> vector<256x2xf32>
    %c0_4 = arith.constant 0 : index
    %c0_5 = arith.constant 0 : index
    %4 = vector.load %arg3[%c0_4, %c0_5] : memref<1x2xf32, #tpu.memory_space<vmem>>, vector<1x2xf32>
    %5 = vector.broadcast %4 : vector<1x2xf32> to vector<256x2xf32>
    %6 = arith.addf %3, %5 : vector<256x2xf32>
    %cst_6 = arith.constant 5.000000e-01 : f32
    %7 = vector.broadcast %cst_6 : f32 to vector<256x2xf32>
    %8 = arith.mulf %7, %6 : vector<256x2xf32>
    %9 = math.tanh %8 : vector<256x2xf32>
    %cst_7 = arith.constant 1.000000e+00 : f32
    %10 = vector.broadcast %cst_7 : f32 to vector<256x2xf32>
    %11 = arith.addf %9, %10 : vector<256x2xf32>
    %cst_8 = arith.constant 5.000000e-01 : f32
    %12 = vector.broadcast %cst_8 : f32 to vector<256x2xf32>
    %13 = arith.mulf %12, %11 : vector<256x2xf32>
    %14 = arith.mulf %6, %13 : vector<256x2xf32>
    %15 = vector.shape_cast %14 : vector<256x2xf32> to vector<16x16x2xf32>
    %cst_9 = arith.constant 0xFF800000 : f32
    %16 = vector.broadcast %cst_9 : f32 to vector<6x30x2xf32>
    %c0_10 = arith.constant 0 : index
    %c0_11 = arith.constant 0 : index
    %c0_12 = arith.constant 0 : index
    %17 = vector.load %arg7[%c0_10, %c0_11, %c0_12] : memref<28x30x2xf32, #tpu.memory_space<vmem>>, vector<6x30x2xf32>
    tpu.vector_store %arg7[%c0_10, %c0_11, %c0_12], %16 {strides = array<i32>} : memref<28x30x2xf32, #tpu.memory_space<vmem>>, vector<6x30x2xf32>,
    %cst_13 = arith.constant 0xFF800000 : f32
    %18 = vector.broadcast %cst_13 : f32 to vector<6x30x2xf32>
    %c22 = arith.constant 22 : index
    %c0_14 = arith.constant 0 : index
    %c0_15 = arith.constant 0 : index
    %19 = vector.load %arg7[%c22, %c0_14, %c0_15] : memref<28x30x2xf32, #tpu.memory_space<vmem>>, vector<6x30x2xf32>
    tpu.vector_store %arg7[%c22, %c0_14, %c0_15], %18 {strides = array<i32>} : memref<28x30x2xf32, #tpu.memory_space<vmem>>, vector<6x30x2xf32>,
    %cst_16 = arith.constant 0xFF800000 : f32
    %20 = vector.broadcast %cst_16 : f32 to vector<16x8x2xf32>
    %c6 = arith.constant 6 : index
    %c0_17 = arith.constant 0 : index
    %c0_18 = arith.constant 0 : index
    %21 = vector.load %arg7[%c6, %c0_17, %c0_18] : memref<28x30x2xf32, #tpu.memory_space<vmem>>, vector<16x8x2xf32>
    tpu.vector_store %arg7[%c6, %c0_17, %c0_18], %20 {strides = array<i32>} : memref<28x30x2xf32, #tpu.memory_space<vmem>>, vector<16x8x2xf32>,
    %cst_19 = arith.constant 0xFF800000 : f32
    %22 = vector.broadcast %cst_19 : f32 to vector<16x6x2xf32>
    %c6_20 = arith.constant 6 : index
    %c24 = arith.constant 24 : index
    %c0_21 = arith.constant 0 : index
    %23 = vector.load %arg7[%c6_20, %c24, %c0_21] : memref<28x30x2xf32, #tpu.memory_space<vmem>>, vector<16x6x2xf32>
    tpu.vector_store %arg7[%c6_20, %c24, %c0_21], %22 {strides = array<i32>} : memref<28x30x2xf32, #tpu.memory_space<vmem>>, vector<16x6x2xf32>,
    %c6_22 = arith.constant 6 : index
    %c8 = arith.constant 8 : index
    %c0_23 = arith.constant 0 : index
    %24 = vector.load %arg7[%c6_22, %c8, %c0_23] : memref<28x30x2xf32, #tpu.memory_space<vmem>>, vector<16x16x2xf32>
    tpu.vector_store %arg7[%c6_22, %c8, %c0_23], %15 {strides = array<i32>} : memref<28x30x2xf32, #tpu.memory_space<vmem>>, vector<16x16x2xf32>,
    %c0_24 = arith.constant 0 : index
    %c0_25 = arith.constant 0 : index
    %c0_26 = arith.constant 0 : index
    %25 = vector.load %arg7[%c0_24, %c0_25, %c0_26] : memref<28x30x2xf32, #tpu.memory_space<vmem>>, vector<28x30x2xf32>
    %26 = vector.extract_strided_slice %25 {offsets = [0, 0, 0], sizes = [24, 30, 2], strides = [1, 1, 1]} : vector<28x30x2xf32> to vector<24x30x2xf32>
    %27 = vector.extract_strided_slice %25 {offsets = [1, 0, 0], sizes = [24, 30, 2], strides = [1, 1, 1]} : vector<28x30x2xf32> to vector<24x30x2xf32>
    %28 = arith.maximumf %26, %27 : vector<24x30x2xf32>
    %29 = vector.extract_strided_slice %25 {offsets = [2, 0, 0], sizes = [24, 30, 2], strides = [1, 1, 1]} : vector<28x30x2xf32> to vector<24x30x2xf32>
    %30 = arith.maximumf %28, %29 : vector<24x30x2xf32>
    %31 = vector.extract_strided_slice %25 {offsets = [3, 0, 0], sizes = [24, 30, 2], strides = [1, 1, 1]} : vector<28x30x2xf32> to vector<24x30x2xf32>
    %32 = arith.maximumf %30, %31 : vector<24x30x2xf32>
    %33 = vector.extract_strided_slice %25 {offsets = [4, 0, 0], sizes = [24, 30, 2], strides = [1, 1, 1]} : vector<28x30x2xf32> to vector<24x30x2xf32>
    %34 = arith.maximumf %32, %33 : vector<24x30x2xf32>
    %35 = vector.extract_strided_slice %34 {offsets = [0, 0, 0], sizes = [24, 26, 2], strides = [1, 1, 1]} : vector<24x30x2xf32> to vector<24x26x2xf32>
    %36 = vector.extract_strided_slice %34 {offsets = [0, 1, 0], sizes = [24, 26, 2], strides = [1, 1, 1]} : vector<24x30x2xf32> to vector<24x26x2xf32>
    %37 = arith.maximumf %35, %36 : vector<24x26x2xf32>
    %38 = vector.extract_strided_slice %34 {offsets = [0, 2, 0], sizes = [24, 26, 2], strides = [1, 1, 1]} : vector<24x30x2xf32> to vector<24x26x2xf32>
    %39 = arith.maximumf %37, %38 : vector<24x26x2xf32>
    %40 = vector.extract_strided_slice %34 {offsets = [0, 3, 0], sizes = [24, 26, 2], strides = [1, 1, 1]} : vector<24x30x2xf32> to vector<24x26x2xf32>
    %41 = arith.maximumf %39, %40 : vector<24x26x2xf32>
    %42 = vector.extract_strided_slice %34 {offsets = [0, 4, 0], sizes = [24, 26, 2], strides = [1, 1, 1]} : vector<24x30x2xf32> to vector<24x26x2xf32>
    %43 = arith.maximumf %41, %42 : vector<24x26x2xf32>
    %44 = vector.extract_strided_slice %43 {offsets = [0, 0, 0], sizes = [20, 26, 2], strides = [1, 1, 1]} : vector<24x26x2xf32> to vector<20x26x2xf32>
    %45 = vector.extract_strided_slice %43 {offsets = [1, 0, 0], sizes = [20, 26, 2], strides = [1, 1, 1]} : vector<24x26x2xf32> to vector<20x26x2xf32>
    %46 = arith.maximumf %44, %45 : vector<20x26x2xf32>
    %47 = vector.extract_strided_slice %43 {offsets = [2, 0, 0], sizes = [20, 26, 2], strides = [1, 1, 1]} : vector<24x26x2xf32> to vector<20x26x2xf32>
    %48 = arith.maximumf %46, %47 : vector<20x26x2xf32>
    %49 = vector.extract_strided_slice %43 {offsets = [3, 0, 0], sizes = [20, 26, 2], strides = [1, 1, 1]} : vector<24x26x2xf32> to vector<20x26x2xf32>
    %50 = arith.maximumf %48, %49 : vector<20x26x2xf32>
    %51 = vector.extract_strided_slice %43 {offsets = [4, 0, 0], sizes = [20, 26, 2], strides = [1, 1, 1]} : vector<24x26x2xf32> to vector<20x26x2xf32>
    %52 = arith.maximumf %50, %51 : vector<20x26x2xf32>
    %53 = vector.extract_strided_slice %52 {offsets = [0, 0, 0], sizes = [20, 22, 2], strides = [1, 1, 1]} : vector<20x26x2xf32> to vector<20x22x2xf32>
    %54 = vector.extract_strided_slice %52 {offsets = [0, 1, 0], sizes = [20, 22, 2], strides = [1, 1, 1]} : vector<20x26x2xf32> to vector<20x22x2xf32>
    %55 = arith.maximumf %53, %54 : vector<20x22x2xf32>
    %56 = vector.extract_strided_slice %52 {offsets = [0, 2, 0], sizes = [20, 22, 2], strides = [1, 1, 1]} : vector<20x26x2xf32> to vector<20x22x2xf32>
    %57 = arith.maximumf %55, %56 : vector<20x22x2xf32>
    %58 = vector.extract_strided_slice %52 {offsets = [0, 3, 0], sizes = [20, 22, 2], strides = [1, 1, 1]} : vector<20x26x2xf32> to vector<20x22x2xf32>
    %59 = arith.maximumf %57, %58 : vector<20x22x2xf32>
    %60 = vector.extract_strided_slice %52 {offsets = [0, 4, 0], sizes = [20, 22, 2], strides = [1, 1, 1]} : vector<20x26x2xf32> to vector<20x22x2xf32>
    %61 = arith.maximumf %59, %60 : vector<20x22x2xf32>
    %62 = vector.extract_strided_slice %61 {offsets = [0, 0, 0], sizes = [16, 22, 2], strides = [1, 1, 1]} : vector<20x22x2xf32> to vector<16x22x2xf32>
    %63 = vector.extract_strided_slice %61 {offsets = [1, 0, 0], sizes = [16, 22, 2], strides = [1, 1, 1]} : vector<20x22x2xf32> to vector<16x22x2xf32>
    %64 = arith.maximumf %62, %63 : vector<16x22x2xf32>
    %65 = vector.extract_strided_slice %61 {offsets = [2, 0, 0], sizes = [16, 22, 2], strides = [1, 1, 1]} : vector<20x22x2xf32> to vector<16x22x2xf32>
    %66 = arith.maximumf %64, %65 : vector<16x22x2xf32>
    %67 = vector.extract_strided_slice %61 {offsets = [3, 0, 0], sizes = [16, 22, 2], strides = [1, 1, 1]} : vector<20x22x2xf32> to vector<16x22x2xf32>
    %68 = arith.maximumf %66, %67 : vector<16x22x2xf32>
    %69 = vector.extract_strided_slice %61 {offsets = [4, 0, 0], sizes = [16, 22, 2], strides = [1, 1, 1]} : vector<20x22x2xf32> to vector<16x22x2xf32>
    %70 = arith.maximumf %68, %69 : vector<16x22x2xf32>
    %71 = vector.extract_strided_slice %70 {offsets = [0, 0, 0], sizes = [16, 18, 2], strides = [1, 1, 1]} : vector<16x22x2xf32> to vector<16x18x2xf32>
    %72 = vector.extract_strided_slice %70 {offsets = [0, 1, 0], sizes = [16, 18, 2], strides = [1, 1, 1]} : vector<16x22x2xf32> to vector<16x18x2xf32>
    %73 = arith.maximumf %71, %72 : vector<16x18x2xf32>
    %74 = vector.extract_strided_slice %70 {offsets = [0, 2, 0], sizes = [16, 18, 2], strides = [1, 1, 1]} : vector<16x22x2xf32> to vector<16x18x2xf32>
    %75 = arith.maximumf %73, %74 : vector<16x18x2xf32>
    %76 = vector.extract_strided_slice %70 {offsets = [0, 3, 0], sizes = [16, 18, 2], strides = [1, 1, 1]} : vector<16x22x2xf32> to vector<16x18x2xf32>
    %77 = arith.maximumf %75, %76 : vector<16x18x2xf32>
    %78 = vector.extract_strided_slice %70 {offsets = [0, 4, 0], sizes = [16, 18, 2], strides = [1, 1, 1]} : vector<16x22x2xf32> to vector<16x18x2xf32>
    %79 = arith.maximumf %77, %78 : vector<16x18x2xf32>
    %80 = vector.extract_strided_slice %43 {offsets = [4, 6, 0], sizes = [16, 16, 2], strides = [1, 1, 1]} : vector<24x26x2xf32> to vector<16x16x2xf32>
    %81 = vector.extract_strided_slice %61 {offsets = [2, 4, 0], sizes = [16, 16, 2], strides = [1, 1, 1]} : vector<20x22x2xf32> to vector<16x16x2xf32>
    %82 = vector.extract_strided_slice %79 {offsets = [0, 2, 0], sizes = [16, 16, 2], strides = [1, 1, 1]} : vector<16x18x2xf32> to vector<16x16x2xf32>
    %83 = vector.shape_cast %15 : vector<16x16x2xf32> to vector<256x2xf32>
    %c0_27 = arith.constant 0 : index
    %c0_28 = arith.constant 0 : index
    %84 = vector.load %arg4[%c0_27, %c0_28] : memref<8x8xf32, #tpu.memory_space<vmem>>, vector<2x8xf32>
    %cst_29 = arith.constant dense<0.000000e+00> : vector<256x8xf32>
    %85 = tpu.matmul %83, %84, %cst_29 {dimension_numbers = #tpu.dot_dimension_numbers<[1], [0], [0], [1], [0, 0, 1, 1], [], []>} : vector<256x2xf32>, vector<2x8xf32>, vector<256x8xf32> -> vector<256x8xf32>
    %86 = vector.shape_cast %80 : vector<16x16x2xf32> to vector<256x2xf32>
    %c2 = arith.constant 2 : index
    %c0_30 = arith.constant 0 : index
    %87 = vector.load %arg4[%c2, %c0_30] : memref<8x8xf32, #tpu.memory_space<vmem>>, vector<2x8xf32>
    %cst_31 = arith.constant dense<0.000000e+00> : vector<256x8xf32>
    %88 = tpu.matmul %86, %87, %cst_31 {dimension_numbers = #tpu.dot_dimension_numbers<[1], [0], [0], [1], [0, 0, 1, 1], [], []>} : vector<256x2xf32>, vector<2x8xf32>, vector<256x8xf32> -> vector<256x8xf32>
    %89 = arith.addf %85, %88 : vector<256x8xf32>
    %90 = vector.shape_cast %81 : vector<16x16x2xf32> to vector<256x2xf32>
    %c4 = arith.constant 4 : index
    %c0_32 = arith.constant 0 : index
    %91 = vector.load %arg4[%c4, %c0_32] : memref<8x8xf32, #tpu.memory_space<vmem>>, vector<2x8xf32>
    %cst_33 = arith.constant dense<0.000000e+00> : vector<256x8xf32>
    %92 = tpu.matmul %90, %91, %cst_33 {dimension_numbers = #tpu.dot_dimension_numbers<[1], [0], [0], [1], [0, 0, 1, 1], [], []>} : vector<256x2xf32>, vector<2x8xf32>, vector<256x8xf32> -> vector<256x8xf32>
    %93 = arith.addf %89, %92 : vector<256x8xf32>
    %94 = vector.shape_cast %82 : vector<16x16x2xf32> to vector<256x2xf32>
    %c6_34 = arith.constant 6 : index
    %c0_35 = arith.constant 0 : index
    %95 = vector.load %arg4[%c6_34, %c0_35] : memref<8x8xf32, #tpu.memory_space<vmem>>, vector<2x8xf32>
    %cst_36 = arith.constant dense<0.000000e+00> : vector<256x8xf32>
    %96 = tpu.matmul %94, %95, %cst_36 {dimension_numbers = #tpu.dot_dimension_numbers<[1], [0], [0], [1], [0, 0, 1, 1], [], []>} : vector<256x2xf32>, vector<2x8xf32>, vector<256x8xf32> -> vector<256x8xf32>
    %97 = arith.addf %93, %96 : vector<256x8xf32>
    %c0_37 = arith.constant 0 : index
    %c0_38 = arith.constant 0 : index
    %98 = vector.load %arg5[%c0_37, %c0_38] : memref<1x8xf32, #tpu.memory_space<vmem>>, vector<1x8xf32>
    %99 = vector.broadcast %98 : vector<1x8xf32> to vector<256x8xf32>
    %100 = arith.addf %97, %99 : vector<256x8xf32>
    %cst_39 = arith.constant 5.000000e-01 : f32
    %101 = vector.broadcast %cst_39 : f32 to vector<256x8xf32>
    %102 = arith.mulf %101, %100 : vector<256x8xf32>
    %103 = math.tanh %102 : vector<256x8xf32>
    %cst_40 = arith.constant 1.000000e+00 : f32
    %104 = vector.broadcast %cst_40 : f32 to vector<256x8xf32>
    %105 = arith.addf %103, %104 : vector<256x8xf32>
    %cst_41 = arith.constant 5.000000e-01 : f32
    %106 = vector.broadcast %cst_41 : f32 to vector<256x8xf32>
    %107 = arith.mulf %106, %105 : vector<256x8xf32>
    %108 = arith.mulf %100, %107 : vector<256x8xf32>
    %c0_42 = arith.constant 0 : index
    %c0_43 = arith.constant 0 : index
    %c0_44 = arith.constant 0 : index
    %109 = vector.load %arg6[%c0_42, %c0_43, %c0_44] : memref<1x256x8xf32, #tpu.memory_space<vmem>>, vector<1x256x8xf32>
    %110 = vector.shape_cast %109 : vector<1x256x8xf32> to vector<256x8xf32>
    %111 = vector.shape_cast %108 : vector<256x8xf32> to vector<1x256x8xf32>
    tpu.vector_store %arg6[%c0_42, %c0_43, %c0_44], %111 {strides = array<i32>} : memref<1x256x8xf32, #tpu.memory_space<vmem>>, vector<1x256x8xf32>,
    return
  }
  func.func @transform_0(%arg0: i32) -> (i32, i32, i32) {
    %c0_i32 = arith.constant 0 : i32
    %c0_i32_0 = arith.constant 0 : i32
    %c0_i32_1 = arith.constant 0 : i32
    return %arg0, %c0_i32, %c0_i32_0 : i32, i32, i32
  }
  func.func @transform_1(%arg0: i32) -> (i32, i32) {
    %c0_i32 = arith.constant 0 : i32
    %c0_i32_0 = arith.constant 0 : i32
    %c0_i32_1 = arith.constant 0 : i32
    return %c0_i32, %c0_i32_0 : i32, i32
  }
  func.func @transform_2(%arg0: i32) -> (i32, i32) {
    %c0_i32 = arith.constant 0 : i32
    %c0_i32_0 = arith.constant 0 : i32
    %c0_i32_1 = arith.constant 0 : i32
    return %c0_i32, %c0_i32_0 : i32, i32
  }
  func.func @transform_3(%arg0: i32) -> (i32, i32) {
    %c0_i32 = arith.constant 0 : i32
    %c0_i32_0 = arith.constant 0 : i32
    %c0_i32_1 = arith.constant 0 : i32
    return %c0_i32, %c0_i32_0 : i32, i32
  }
  func.func @transform_4(%arg0: i32) -> (i32, i32) {
    %c0_i32 = arith.constant 0 : i32
    %c0_i32_0 = arith.constant 0 : i32
    %c0_i32_1 = arith.constant 0 : i32
    return %c0_i32, %c0_i32_0 : i32, i32
  }
  func.func @transform_5(%arg0: i32) -> (i32, i32, i32) {
    %c0_i32 = arith.constant 0 : i32
    %c0_i32_0 = arith.constant 0 : i32
    %c0_i32_1 = arith.constant 0 : i32
    return %arg0, %c0_i32, %c0_i32_0 : i32, i32, i32
  }
}

</mosaic_0001>

<bundles_post_ra>
// kernel: spp_bottleneck.1
= control target key start
LH: loop header
LB: loop body
LE: loop exit
PB: predicated region body
PF: predicated region fallthrough
CT: control target
= control target key end

     0   :  { %s8059_s18 = smov 0   ;;  %s13408_s0 = inlined_call_operand.vmem [shape: f32[2,256,4], index: 0, kind: input, shape index: {}]   ;;  %s13409_s1 = inlined_call_operand.vmem [shape: f32[4,2], index: 1, kind: input, shape index: {}]   ;;  %s13410_s2 = inlined_call_operand.vmem [shape: f32[1,2], index: 2, kind: input, shape index: {}]   ;;  %s13411_s3 = inlined_call_operand.vmem [shape: f32[8,8], index: 3, kind: input, shape index: {}]   ;;  %s13412_s4 = inlined_call_operand.vmem [shape: f32[1,8], index: 4, kind: input, shape index: {}]   ;;  %s13413_s5 = inlined_call_operand.vmem [shape: f32[2,256,8], index: 5, kind: output, shape index: {}]  }
   0x1 LB: > { %s7146_s19 = sadd.s32 4294967295, %s8026_s18   ;;  %p7150_p0 = scmp.ge.s32.totalorder %s8026_s18, 1  ;;  %s8026_s18 = sphi %s8059_s18, %s15_s18  }
   0x2   : > { %p187_p1 = scmp.lt.s32.totalorder %s8026_s18, 3 }
   0x4   : > { %p188_p2 = pnand %p7150_p0, %p187_p1 }
   0x6   : > { %191 = sbr.rel (%p188_p2) target bundleno = 1403 (0x57b), region = 40 }
   0xd   : > { %v257_v0 = vld [vmem:[%s13409_s1] sm:$0xf]  ;;  %vm362_vm0 = vcmask 1043456   ;;  %p215_p3 = scmp.lt.s32.totalorder %s7146_s19, 1  ;;  %vm265_vm1 = vcmask 31744   ;;  %vm751_vm2 = vcmask 15360  }
   0xe   : > { %7491 = vmatprep.subr.msk.mxu0 %vm362_vm0, %v257_v0  ;;  %v8028_v33 = vmov -inf   ;;  %vm1459_vm3 = vcmask 1046528   ;;  %vm1820_vm4 = vcmask 1045504   ;;  %vm2181_vm5 = vcmask 1044480  }
   0xf   : > { %7492 = vmatpush3.msk.msra.mxu0 %vm362_vm0, %v257_v0  ;;  %s14566_s19 = smov (!%p215_p3, %s7146_s19), 1  ;;  %754 = vst.msk [vmem:[#allocation2 + $0x10] sm:$0xff] %vm751_vm2, %v8028_v33  ;;  %759 = vst.msk [vmem:[#allocation2 + $0x30] sm:$0xff] %vm751_vm2, %v8028_v33  ;;  %vm755_vm6 = vcmask 13312   ;;  %vm5255_vm7 = vcmask 1041408   ;;  %vm7058_vm8 = vcmask 64512  }
  0x10   : > { %s7324_s22 = sshll.u32 %s14566_s19, 8  ;;  %763 = vst.msk [vmem:[#allocation2 + $0x50] sm:$0xff] %vm751_vm2, %v8028_v33  ;;  %767 = vst.msk [vmem:[#allocation2 + $0x70] sm:$0xff] %vm751_vm2, %v8028_v33 }
  0x11   : > { %s8080_s25 = scalar_lea.vmem %s13408_s0, %s7324_s22  ;;  %771 = vst.msk [vmem:[#allocation2 + $0x90] sm:$0xff] %vm751_vm2, %v8028_v33  ;;  %775 = vst.msk [vmem:[#allocation2 + $0xb0] sm:$0xff] %vm751_vm2, %v8028_v33  ;;  %s13283_s26 = scalar_lea.vmem %s13413_s5, %s7324_s22 }
  0x12   : > { %v225_v1 = vld [vmem:[%s8080_s25] sm:$0xff]  ;;  %v226_v2 = vld [vmem:[%s8080_s25 + $0x8] sm:$0xff]  ;;  %v227_v3 = vld [vmem:[%s8080_s25 + $0x10] sm:$0xff]  ;;  %752 = vst.msk [vmem:[#allocation2] sm:$0xff] %vm751_vm2, %v8028_v33 }
  0x13   : > { %7493 = vmatprep.mubr.msk.f32.mxu0 %vm265_vm1, %v225_v1  ;;  %v228_v4 = vld [vmem:[%s8080_s25 + $0x18] sm:$0xff]  ;;  %v229_v5 = vld [vmem:[%s8080_s25 + $0x20] sm:$0xff]  ;;  %v230_v6 = vld [vmem:[%s8080_s25 + $0x28] sm:$0xff]  ;;  %753 = vst.msk [vmem:[#allocation2 + $0x8] sm:$0xff] %vm751_vm2, %v8028_v33 }
  0x14   : > { %7494 = vmatmul.mubr.msk.f32.vlgmr.msra.gmra.mrb[0].mxu0 %vm265_vm1, %v226_v2  ;;  %v231_v7 = vld [vmem:[%s8080_s25 + $0x30] sm:$0xff]  ;;  %v232_v8 = vld [vmem:[%s8080_s25 + $0x38] sm:$0xff]  ;;  %v233_v9 = vld [vmem:[%s8080_s25 + $0x40] sm:$0xff]  ;;  %757 = vst.msk [vmem:[#allocation2 + $0x20] sm:$0xff] %vm751_vm2, %v8028_v33 }
  0x15   : > { %7496 = vmatprep.mubr.msk.f32.mxu0 %vm265_vm1, %v227_v3  ;;  %v234_v10 = vld [vmem:[%s8080_s25 + $0x48] sm:$0xff]  ;;  %v235_v11 = vld [vmem:[%s8080_s25 + $0x50] sm:$0xff]  ;;  %v236_v12 = vld [vmem:[%s8080_s25 + $0x58] sm:$0xff]  ;;  %758 = vst.msk [vmem:[#allocation2 + $0x28] sm:$0xff] %vm751_vm2, %v8028_v33 }
  0x16   : > { %v237_v13 = vld [vmem:[%s8080_s25 + $0x60] sm:$0xff]  ;;  %v238_v14 = vld [vmem:[%s8080_s25 + $0x68] sm:$0xff]  ;;  %v239_v15 = vld [vmem:[%s8080_s25 + $0x70] sm:$0xff]  ;;  %761 = vst.msk [vmem:[#allocation2 + $0x40] sm:$0xff] %vm751_vm2, %v8028_v33 }
  0x17   : > { %v240_v16 = vld [vmem:[%s8080_s25 + $0x78] sm:$0xff]  ;;  %v241_v17 = vld [vmem:[%s8080_s25 + $0x80] sm:$0xff]  ;;  %v242_v18 = vld [vmem:[%s8080_s25 + $0x88] sm:$0xff]  ;;  %762 = vst.msk [vmem:[#allocation2 + $0x48] sm:$0xff] %vm751_vm2, %v8028_v33 }
  0x18   : > { %7497 = vmatmul.mubr.msk.f32.gmra.mrb[2].mxu0 %vm265_vm1, %v228_v4  ;;  %v243_v19 = vld [vmem:[%s8080_s25 + $0x90] sm:$0xff]  ;;  %v244_v20 = vld [vmem:[%s8080_s25 + $0x98] sm:$0xff]  ;;  %v245_v21 = vld [vmem:[%s8080_s25 + $0xa0] sm:$0xff]  ;;  %765 = vst.msk [vmem:[#allocation2 + $0x60] sm:$0xff] %vm751_vm2, %v8028_v33 }
  0x19   : > { %7499 = vmatprep.mubr.msk.f32.mxu0 %vm265_vm1, %v229_v5  ;;  %v246_v22 = vld [vmem:[%s8080_s25 + $0xa8] sm:$0xff]  ;;  %v247_v23 = vld [vmem:[%s8080_s25 + $0xb0] sm:$0xff]  ;;  %v248_v24 = vld [vmem:[%s8080_s25 + $0xb8] sm:$0xff]  ;;  %766 = vst.msk [vmem:[#allocation2 + $0x68] sm:$0xff] %vm751_vm2, %v8028_v33 }
  0x1a   : > { %v249_v25 = vld [vmem:[%s8080_s25 + $0xc0] sm:$0xff]  ;;  %v250_v26 = vld [vmem:[%s8080_s25 + $0xc8] sm:$0xff]  ;;  %v251_v27 = vld [vmem:[%s8080_s25 + $0xd0] sm:$0xff]  ;;  %769 = vst.msk [vmem:[#allocation2 + $0x80] sm:$0xff] %vm751_vm2, %v8028_v33 }
  0x1b   : > { %v252_v28 = vld [vmem:[%s8080_s25 + $0xd8] sm:$0xff]  ;;  %v253_v29 = vld [vmem:[%s8080_s25 + $0xe0] sm:$0xff]  ;;  %v254_v30 = vld [vmem:[%s8080_s25 + $0xe8] sm:$0xff]  ;;  %770 = vst.msk [vmem:[#allocation2 + $0x88] sm:$0xff] %vm751_vm2, %v8028_v33 }
  0x1c   : > { %7500 = vmatmul.mubr.msk.f32.gmra.mrb[4].mxu0 %vm265_vm1, %v230_v6  ;;  %v255_v31 = vld [vmem:[%s8080_s25 + $0xf0] sm:$0xff]  ;;  %v256_v32 = vld [vmem:[%s8080_s25 + $0xf8] sm:$0xff]  ;;  %773 = vst.msk [vmem:[#allocation2 + $0xa0] sm:$0xff] %vm751_vm2, %v8028_v33  ;;  %774 = vst.msk [vmem:[#allocation2 + $0xa8] sm:$0xff] %vm751_vm2, %v8028_v33 }
  0x1d   : > { %7502 = vmatprep.mubr.msk.f32.mxu0 %vm265_vm1, %v231_v7  ;;  %778 = vst.msk [vmem:[#allocation2 + $0x2c0] sm:$0xff] %vm751_vm2, %v8028_v33  ;;  %779 = vst.msk [vmem:[#allocation2 + $0x2c8] sm:$0xff] %vm751_vm2, %v8028_v33  ;;  %v869_v34 = vld [vmem:[#allocation2 + $0x10] sm:$0xff]  ;;  %v868_v41 = vld [vmem:[#allocation2 + $0x8] sm:$0xff] }
  0x1e   : > { %780 = vst.msk [vmem:[#allocation2 + $0x2d0] sm:$0xff] %vm751_vm2, %v8028_v33  ;;  %782 = vst.msk [vmem:[#allocation2 + $0x2e0] sm:$0xff] %vm751_vm2, %v8028_v33  ;;  %v873_v35 = vld [vmem:[#allocation2 + $0x30] sm:$0xff]  ;;  %v872_v42 = vld [vmem:[#allocation2 + $0x28] sm:$0xff] }
  0x1f   : > { %783 = vst.msk [vmem:[#allocation2 + $0x2e8] sm:$0xff] %vm751_vm2, %v8028_v33  ;;  %784 = vst.msk [vmem:[#allocation2 + $0x2f0] sm:$0xff] %vm751_vm2, %v8028_v33  ;;  %v8250_v36 = vld [vmem:[#allocation2 + $0x50] sm:$0xff]  ;;  %v981_v39 = vmax.f32 %v869_v34, %v873_v35  ;;  %v8257_v43 = vld [vmem:[#allocation2 + $0x48] sm:$0xff]  ;;  %v980_v47 = vmax.f32 %v868_v41, %v872_v42 }
  0x20   : > { %7503 = vmatmul.mubr.msk.f32.gmra.mrb[6].mxu0 %vm265_vm1, %v232_v8  ;;  %786 = vst.msk [vmem:[#allocation2 + $0x300] sm:$0xff] %vm751_vm2, %v8028_v33  ;;  %787 = vst.msk [vmem:[#allocation2 + $0x308] sm:$0xff] %vm751_vm2, %v8028_v33  ;;  %v8252_v37 = vld [vmem:[#allocation2 + $0x70] sm:$0xff]  ;;  %v985_v40 = vmax.f32 %v873_v35, %v8250_v36  ;;  %v8261_v46 = vld [vmem:[#allocation2 + $0x68] sm:$0xff]  ;;  %v984_v48 = vmax.f32 %v872_v42, %v8257_v43 }
  0x21   : > { %7505 = vmatprep.mubr.msk.f32.mxu0 %vm265_vm1, %v233_v9  ;;  %788 = vst.msk [vmem:[#allocation2 + $0x310] sm:$0xff] %vm751_vm2, %v8028_v33  ;;  %790 = vst.msk [vmem:[#allocation2 + $0x320] sm:$0xff] %vm751_vm2, %v8028_v33  ;;  %v8254_v38 = vld [vmem:[#allocation2 + $0x90] sm:$0xff]  ;;  %v1077_v44 = vmax.f32 %v981_v39, %v8250_v36  ;;  %v1076_v52 = vmax.f32 %v980_v47, %v8257_v43  ;;  %v867_v58 = vld [vmem:[#allocation2] sm:$0xff] }
  0x22   : > { %791 = vst.msk [vmem:[#allocation2 + $0x328] sm:$0xff] %vm751_vm2, %v8028_v33  ;;  %792 = vst.msk [vmem:[#allocation2 + $0x330] sm:$0xff] %vm751_vm2, %v8028_v33  ;;  %v1081_v45 = vmax.f32 %v985_v40, %v8252_v37  ;;  %v8266_v51 = vld [vmem:[#allocation2 + $0x88] sm:$0xff]  ;;  %v1080_v53 = vmax.f32 %v984_v48, %v8261_v46  ;;  %v871_v59 = vld [vmem:[#allocation2 + $0x20] sm:$0xff] }
  0x23   : > { %794 = vst.msk [vmem:[#allocation2 + $0x340] sm:$0xff] %vm751_vm2, %v8028_v33  ;;  %795 = vst.msk [vmem:[#allocation2 + $0x348] sm:$0xff] %vm751_vm2, %v8028_v33  ;;  %v1173_v49 = vmax.f32 %v1077_v44, %v8252_v37  ;;  %v1172_v55 = vmax.f32 %v1076_v52, %v8261_v46  ;;  %v875_v60 = vld [vmem:[#allocation2 + $0x40] sm:$0xff]  ;;  %v8278_v61 = vld [vmem:[#allocation2 + $0xb0] sm:$0xff]  ;;  %v979_v62 = vmax.f32 %v867_v58, %v871_v59 }
  0x24   : > { %7506 = vmatmul.mubr.msk.f32.gmra.mrb[8].mxu0 %vm265_vm1, %v234_v10  ;;  %796 = vst.msk [vmem:[#allocation2 + $0x350] sm:$0xff] %vm751_vm2, %v8028_v33  ;;  %798 = vst.msk [vmem:[#allocation2 + $0x360] sm:$0xff] %vm751_vm2, %v8028_v33  ;;  %v1177_v50 = vmax.f32 %v1081_v45, %v8254_v38  ;;  %v1176_v56 = vmax.f32 %v1080_v53, %v8266_v51  ;;  %v983_v63 = vmax.f32 %v871_v59, %v875_v60  ;;  %v879_v0 = vld [vmem:[#allocation2 + $0x60] sm:$0xff]  ;;  %v8280_v1 = vld [vmem:[#allocation2 + $0xa8] sm:$0xff] }
  0x25   : > { %7508 = vmatprep.mubr.msk.f32.mxu0 %vm265_vm1, %v235_v11  ;;  %799 = vst.msk [vmem:[#allocation2 + $0x368] sm:$0xff] %vm751_vm2, %v8028_v33  ;;  %800 = vst.msk [vmem:[#allocation2 + $0x370] sm:$0xff] %vm751_vm2, %v8028_v33  ;;  %v8271_v54 = vmax.f32 %v1173_v49, %v8254_v38  ;;  %v8276_v57 = vmax.f32 %v1172_v55, %v8266_v51  ;;  %v987_v2 = vmax.f32 %v875_v60, %v879_v0  ;;  %v8285_v6 = vld [vmem:[#allocation2 + $0x80] sm:$0xff] }
  0x26   : > { %803 = vst.msk [vmem:[#allocation2 + $0xc0] sm:$0xff] %vm751_vm2, %v8028_v33  ;;  %804 = vst.msk [vmem:[#allocation2 + $0xe0] sm:$0xff] %vm751_vm2, %v8028_v33  ;;  %v1075_v3 = vmax.f32 %v979_v62, %v875_v60  ;;  %v1079_v4 = vmax.f32 %v983_v63, %v879_v0  ;;  %v8283_v5 = vmax.f32 %v1177_v50, %v8278_v61  ;;  %v8292_v11 = vld [vmem:[#allocation2 + $0xa0] sm:$0xff] }
  0x27   : > { %805 = vst.msk [vmem:[#allocation2 + $0x100] sm:$0xff] %vm751_vm2, %v8028_v33  ;;  %806 = vst.msk [vmem:[#allocation2 + $0x120] sm:$0xff] %vm751_vm2, %v8028_v33  ;;  %v1083_v7 = vmax.f32 %v987_v2, %v8285_v6  ;;  %v8290_v10 = vmax.f32 %v1176_v56, %v8280_v1  ;;  %v1822_v39 = vrot.slane %v8276_v57, 2  ;;  %v13419_v40 = vrot.slane %v8271_v54, 2 }
  0x28   : > { %7509 = vmatmul.mubr.msk.f32.gmra.mrb[10].mxu0 %vm265_vm1, %v236_v12  ;;  %807 = vst.msk [vmem:[#allocation2 + $0x140] sm:$0xff] %vm751_vm2, %v8028_v33  ;;  %808 = vst.msk [vmem:[#allocation2 + $0x160] sm:$0xff] %vm751_vm2, %v8028_v33  ;;  %v1171_v8 = vmax.f32 %v1075_v3, %v879_v0  ;;  %v1175_v9 = vmax.f32 %v1079_v4, %v8285_v6  ;;  %v991_v12 = vmax.f32 %v879_v0, %v8285_v6 }
  0x29   : > { %7511 = vmatprep.mubr.msk.f32.mxu0 %vm265_vm1, %v237_v13  ;;  %809 = vst.msk [vmem:[#allocation2 + $0x180] sm:$0xff] %vm751_vm2, %v8028_v33  ;;  %810 = vst.msk [vmem:[#allocation2 + $0x1a0] sm:$0xff] %vm751_vm2, %v8028_v33  ;;  %v1179_v13 = vmax.f32 %v1083_v7, %v8292_v11  ;;  %v1829_v42 = vrot.slane %v8290_v10, 2  ;;  %v13418_v44 = vrot.slane %v8283_v5, 2  ;;  %v1825_v47 = vsel %vm1820_vm4, %v1822_v39, %v13419_v40  ;;  %v5206_v7 = vld [vmem:[%s13411_s3] sm:$0x3] }
  0x2a   : > { %811 = vst.msk [vmem:[#allocation2 + $0x1c0] sm:$0xff] %vm751_vm2, %v8028_v33  ;;  %812 = vst.msk [vmem:[#allocation2 + $0x1e0] sm:$0xff] %vm751_vm2, %v8028_v33  ;;  %v13417_v50 = vrot.slane %v8271_v54, 3  ;;  %v13416_v52 = vrot.slane %v8283_v5, 3  ;;  %v2183_v55 = vrot.slane %v8276_v57, 3  ;;  %v2190_v58 = vrot.slane %v8290_v10, 3  ;;  %7741 = vmatprep.subr.msk.mxu1 %vm5255_vm7, %v5206_v7 }
  0x2b   : > { %813 = vst.msk [vmem:[#allocation2 + $0x200] sm:$0xff] %vm751_vm2, %v8028_v33  ;;  %814 = vst.msk [vmem:[#allocation2 + $0x220] sm:$0xff] %vm751_vm2, %v8028_v33  ;;  %v1832_v49 = vsel %vm1820_vm4, %v1829_v42, %v13418_v44  ;;  %7742 = vmatpush3.msk.msra.mxu1 %vm5255_vm7, %v5206_v7 }
  0x2c   : > { %7512 = vmatmul.mubr.msk.f32.gmra.mrb[12].mxu0 %vm265_vm1, %v238_v14  ;;  %815 = vst.msk [vmem:[#allocation2 + $0x240] sm:$0xff] %vm751_vm2, %v8028_v33  ;;  %816 = vst.msk [vmem:[#allocation2 + $0x260] sm:$0xff] %vm751_vm2, %v8028_v33  ;;  %v8297_v14 = vmax.f32 %v1171_v8, %v8285_v6  ;;  %v2186_v2 = vsel %vm2181_vm5, %v2183_v55, %v13417_v50  ;;  %v2193_v4 = vsel %vm2181_vm5, %v2190_v58, %v13416_v52  ;;  %v5336_v8 = vld [vmem:[%s13411_s3 + $0x2] sm:$0x3] }
  0x2d   : > { %7514 = vmatprep.mubr.msk.f32.mxu0 %vm265_vm1, %v239_v15  ;;  %817 = vst.msk [vmem:[#allocation2 + $0x280] sm:$0xff] %vm751_vm2, %v8028_v33  ;;  %818 = vst.msk [vmem:[#allocation2 + $0x2a0] sm:$0xff] %vm751_vm2, %v8028_v33  ;;  %v8300_v15 = vmax.f32 %v1175_v9, %v8292_v11  ;;  %7541 = vmatprep.subr.msk.mxu0 %vm5255_vm7, %v5336_v8 }
  0x2e   : > { %13784 = vst [vmem:[#allocation3_spill] sm:$0xff] %v8271_v54  ;;  %13785 = vst [vmem:[#allocation4_spill] sm:$0xff] %v8283_v5  ;;  %v1821_v35 = vrot.slane %v8297_v14, 2  ;;  %v2182_v53 = vrot.slane %v8297_v14, 3  ;;  %7542 = vmatpush3.msk.msra.mxu0 %vm5255_vm7, %v5336_v8  ;;  %v2542_v9 = vrot.slane %v8297_v14, 4 }
  0x2f   : > { %v1828_v41 = vrot.slane %v8300_v15, 2  ;;  %v2189_v56 = vrot.slane %v8300_v15, 3  ;;  %756 = vst.msk [vmem:[#allocation2 + $0x18] sm:$0x3f] %vm755_vm6, %v8028_v33  ;;  %760 = vst.msk [vmem:[#allocation2 + $0x38] sm:$0x3f] %vm755_vm6, %v8028_v33  ;;  %7591 = vmatprep.subr.msk.mxu0 %vm5255_vm7, %v5206_v7 }
  0x30   : > { %7515 = vmatmul.mubr.msk.f32.gmra.mrb[14].mxu0 %vm265_vm1, %v240_v16  ;;  %v8302_v16 = vld [vmem:[#allocation2 + $0xc0] sm:$0xff]  ;;  %v1823_v45 = vsel %vm1820_vm4, %v1821_v35, %v1822_v39  ;;  %v2184_v0 = vsel %vm2181_vm5, %v2182_v53, %v2183_v55  ;;  %764 = vst.msk [vmem:[#allocation2 + $0x58] sm:$0x3f] %vm755_vm6, %v8028_v33  ;;  %768 = vst.msk [vmem:[#allocation2 + $0x78] sm:$0x3f] %vm755_vm6, %v8028_v33 }
  0x31   : > { %7517 = vmatprep.mubr.msk.f32.mxu0 %vm265_vm1, %v241_v17  ;;  %v13421_v17 = vrot.slane %v8271_v54, 1  ;;  %v1830_v48 = vsel %vm1820_vm4, %v1828_v41, %v1829_v42  ;;  %v2191_v3 = vsel %vm2181_vm5, %v2189_v56, %v2190_v58  ;;  %772 = vst.msk [vmem:[#allocation2 + $0x98] sm:$0x3f] %vm755_vm6, %v8028_v33  ;;  %776 = vst.msk [vmem:[#allocation2 + $0xb8] sm:$0x3f] %vm755_vm6, %v8028_v33 }
  0x32   : > { %819 = vst.msk [vmem:[#allocation2 + $0xd8] sm:$0x3f] %vm755_vm6, %v8028_v33  ;;  %820 = vst.msk [vmem:[#allocation2 + $0xf8] sm:$0x3f] %vm755_vm6, %v8028_v33  ;;  %v995_v42 = vmax.f32 %v8285_v6, %v8292_v11  ;;  %v988_v6 = vmax.f32 %v8257_v43, %v8261_v46 }
  0x33   : > { %821 = vst.msk [vmem:[#allocation2 + $0x118] sm:$0x3f] %vm755_vm6, %v8028_v33  ;;  %781 = vst.msk [vmem:[#allocation2 + $0x2d8] sm:$0x3f] %vm755_vm6, %v8028_v33 }
  0x34   : > { %7518 = vmatmul.mubr.msk.f32.gmra.mrb[16].mxu0 %vm265_vm1, %v242_v18  ;;  %v13420_v18 = vrot.slane %v8283_v5, 1  ;;  %785 = vst.msk [vmem:[#allocation2 + $0x2f8] sm:$0x3f] %vm755_vm6, %v8028_v33  ;;  %789 = vst.msk [vmem:[#allocation2 + $0x318] sm:$0x3f] %vm755_vm6, %v8028_v33  ;;  %v1091_v53 = vmax.f32 %v995_v42, %v8302_v16 }
  0x35   : > { %7520 = vmatprep.mubr.msk.f32.mxu0 %vm265_vm1, %v243_v19  ;;  %v8307_v19 = vmax.f32 %v991_v12, %v8292_v11  ;;  %793 = vst.msk [vmem:[#allocation2 + $0x338] sm:$0x3f] %vm755_vm6, %v8028_v33  ;;  %797 = vst.msk [vmem:[#allocation2 + $0x358] sm:$0x3f] %vm755_vm6, %v8028_v33  ;;  %v2543_v12 = vrot.slane %v8276_v57, 4 }
  0x36   : > { %801 = vst.msk [vmem:[#allocation2 + $0x378] sm:$0x3f] %vm755_vm6, %v8028_v33  ;;  %822 = vst.msk [vmem:[#allocation2 + $0x138] sm:$0x3f] %vm755_vm6, %v8028_v33  ;;  %v870_v55 = vld [vmem:[#allocation2 + $0x18] sm:$0x3f] }
  0x37   : > { %823 = vst.msk [vmem:[#allocation2 + $0x158] sm:$0x3f] %vm755_vm6, %v8028_v33  ;;  %824 = vst.msk [vmem:[#allocation2 + $0x178] sm:$0x3f] %vm755_vm6, %v8028_v33  ;;  %v874_v56 = vld [vmem:[#allocation2 + $0x38] sm:$0x3f] }
  0x38   : > { %7521 = vmatmul.mubr.msk.f32.gmra.mrb[18].mxu0 %vm265_vm1, %v244_v20  ;;  %v8310_v20 = vmax.f32 %v1179_v13, %v8302_v16  ;;  %825 = vst.msk [vmem:[#allocation2 + $0x198] sm:$0x3f] %vm755_vm6, %v8028_v33  ;;  %826 = vst.msk [vmem:[#allocation2 + $0x1b8] sm:$0x3f] %vm755_vm6, %v8028_v33  ;;  %v2549_v13 = vrot.slane %v8300_v15, 4 }
  0x39   : > { %7523 = vmatprep.mubr.msk.f32.mxu0 %vm265_vm1, %v245_v21  ;;  %v1460_v21 = vrot.slane %v8297_v14, 1  ;;  %827 = vst.msk [vmem:[#allocation2 + $0x1d8] sm:$0x3f] %vm755_vm6, %v8028_v33  ;;  %828 = vst.msk [vmem:[#allocation2 + $0x1f8] sm:$0x3f] %vm755_vm6, %v8028_v33 }
  0x3a   : > { %829 = vst.msk [vmem:[#allocation2 + $0x218] sm:$0x3f] %vm755_vm6, %v8028_v33  ;;  %830 = vst.msk [vmem:[#allocation2 + $0x238] sm:$0x3f] %vm755_vm6, %v8028_v33  ;;  %v8451_v35 = vld [vmem:[#allocation2 + $0x98] sm:$0x3f] }
  0x3b   : > { %831 = vst.msk [vmem:[#allocation2 + $0x258] sm:$0x3f] %vm755_vm6, %v8028_v33  ;;  %832 = vst.msk [vmem:[#allocation2 + $0x278] sm:$0x3f] %vm755_vm6, %v8028_v33  ;;  %v8453_v39 = vld [vmem:[#allocation2 + $0xb8] sm:$0x3f] }
  0x3c   : > { %7524 = vmatmul.mubr.msk.f32.gmra.mrb[20].mxu0 %vm265_vm1, %v246_v22  ;;  %v1461_v22 = vrot.slane %v8276_v57, 1  ;;  %833 = vst.msk [vmem:[#allocation2 + $0x298] sm:$0x3f] %vm755_vm6, %v8028_v33  ;;  %834 = vst.msk [vmem:[#allocation2 + $0x2b8] sm:$0x3f] %vm755_vm6, %v8028_v33  ;;  %v13415_v33 = vrot.slane %v8271_v54, 4  ;;  %v998_v41 = vmax.f32 %v8451_v35, %v8453_v39 }
  0x3d   : > { %7526 = vmatprep.mubr.msk.f32.mxu0 %vm265_vm1, %v247_v23  ;;  %v1467_v23 = vrot.slane %v8300_v15, 1  ;;  %v8467_v58 = vld [vmem:[#allocation2 + $0xf8] sm:$0x3f] }
  0x3e   : > { %v882_v8 = vld [vmem:[#allocation2 + $0x78] sm:$0x3f] }
  0x40   : > { %7527 = vmatmul.mubr.msk.f32.gmra.mrb[22].mxu0 %vm265_vm1, %v248_v24  ;;  %v1468_v24 = vrot.slane %v8290_v10, 1 }
  0x41   : > { %7529 = vmatprep.mubr.msk.f32.mxu0 %vm265_vm1, %v249_v25  ;;  %v1183_v25 = vmax.f32 %v8307_v19, %v8302_v16 }
  0x44   : > { %7530 = vmatmul.mubr.msk.f32.gmra.mrb[24].mxu0 %vm265_vm1, %v250_v26  ;;  %v1462_v26 = vsel %vm1459_vm3, %v1460_v21, %v1461_v22  ;;  %v13414_v21 = vrot.slane %v8283_v5, 4 }
  0x45   : > { %7532 = vmatprep.mubr.msk.f32.mxu0 %vm265_vm1, %v251_v27  ;;  %v1464_v27 = vsel %vm1459_vm3, %v1461_v22, %v13421_v17 }
  0x48   : > { %7533 = vmatmul.mubr.msk.f32.gmra.mrb[26].mxu0 %vm265_vm1, %v252_v28  ;;  %v1469_v28 = vsel %vm1459_vm3, %v1467_v23, %v1468_v24 }
  0x49   : > { %7535 = vmatprep.mubr.msk.f32.mxu0 %vm265_vm1, %v253_v29  ;;  %v1471_v29 = vsel %vm1459_vm3, %v1468_v24, %v13420_v18 }
  0x4a   : > { %v1729_v34 = vmax.f32 %v8290_v10, %v1471_v29  ;;  %v2550_v29 = vrot.slane %v8290_v10, 4 }
  0x4c   : > { %7536 = vmatmul.mubr.msk.f32.gmra.mrb[28].mxu0 %vm265_vm1, %v254_v30  ;;  %v1724_v30 = vmax.f32 %v8297_v14, %v1462_v26  ;;  %v2090_v63 = vmax.f32 %v1729_v34, %v1832_v49  ;;  %v2551_v14 = vsel %vm362_vm0, %v2549_v13, %v2550_v29  ;;  %v989_v49 = vmax.f32 %v8250_v36, %v8252_v37 }
  0x4d   : > { %7538 = vmatprep.mubr.msk.f32.mxu0 %vm265_vm1, %v255_v31  ;;  %v1725_v31 = vmax.f32 %v8276_v57, %v1464_v27  ;;  %v2544_v27 = vsel %vm362_vm0, %v2542_v9, %v2543_v12  ;;  %v2553_v57 = vsel %vm362_vm0, %v2550_v29, %v13414_v21  ;;  %v999_v36 = vmax.f32 %v8292_v11, %v8302_v16  ;;  %v8485_v9 = vld [vmem:[#allocation2 + $0x100] sm:$0xff] }
  0x4e   : > { %v2085_v59 = vmax.f32 %v1724_v30, %v1823_v45  ;;  %v2451_v26 = vmax.f32 %v2090_v63, %v2193_v4  ;;  %v8459_v45 = vld [vmem:[#allocation2 + $0xd8] sm:$0x3f]  ;;  %v8473_v63 = vld [vmem:[#allocation2 + $0xe0] sm:$0xff]  ;;  %v8482_v4 = vmax.f32 %v989_v49, %v8254_v38  ;;  %v8492_v11 = vmax.f32 %v988_v6, %v8266_v51  ;;  %v969_v49 = vld [vmem:[#allocation2 + $0x330] sm:$0xff] }
  0x4f   : > { %v2086_v60 = vmax.f32 %v1725_v31, %v1825_v47  ;;  %v1002_v47 = vmax.f32 %v8453_v39, %v8459_v45  ;;  %v1187_v7 = vmax.f32 %v1091_v53, %v8473_v63 }
  0x50   : > { %7539 = vmatmul.mubr.msk.f32.gmra.mrb[30].mxu0 %vm265_vm1, %v256_v32  ;;  %v1728_v32 = vmax.f32 %v8300_v15, %v1469_v28  ;;  %v2446_v22 = vmax.f32 %v2085_v59, %v2184_v0  ;;  %v2546_v28 = vsel %vm362_vm0, %v2543_v12, %v13415_v33  ;;  %v878_v59 = vld [vmem:[#allocation2 + $0x58] sm:$0x3f]  ;;  %v994_v12 = vmax.f32 %v882_v8, %v8451_v35 }
  0x51   : > { %v2447_v23 = vmax.f32 %v2086_v60, %v2186_v2  ;;  %v1098_v60 = vmax.f32 %v1002_v47, %v8467_v58  ;;  %v8475_v0 = vld [vmem:[#allocation2 + $0x118] sm:$0x3f]  ;;  %v982_v2 = vmax.f32 %v870_v55, %v874_v56  ;;  %v986_v43 = vmax.f32 %v874_v56, %v878_v59 }
  0x52   : > { %v2089_v62 = vmax.f32 %v1728_v32, %v1830_v48  ;;  %v8439_v15 = vmax.f32 %v2446_v22, %v2544_v27  ;;  %v8445_v32 = vmax.f32 %v2451_v26, %v2553_v57  ;;  %v1094_v48 = vmax.f32 %v998_v41, %v8459_v45 }
  0x53   : > { %v8441_v30 = vmax.f32 %v2447_v23, %v2546_v28  ;;  %v1194_v13 = vmax.f32 %v1098_v60, %v8475_v0  ;;  %v992_v22 = vmax.f32 %v8261_v46, %v8266_v51  ;;  %v8497_v23 = vld [vmem:[#allocation2 + $0x138] sm:$0x3f]  ;;  %v8505_v26 = vmax.f32 %v1183_v25, %v8473_v63  ;;  %v6081_v46 = vld [vmem:[%s13411_s3 + $0x4] sm:$0x3] }
  0x54   : > { %v2450_v24 = vmax.f32 %v2089_v62, %v2191_v3  ;;  %v1190_v62 = vmax.f32 %v1094_v48, %v8467_v58  ;;  %v993_v3 = vmax.f32 %v8252_v37, %v8254_v38  ;;  %v1078_v27 = vmax.f32 %v982_v2, %v878_v59  ;;  %7641 = vmatprep.subr.msk.mxu1 %vm5255_vm7, %v6081_v46  ;;  %v965_v46 = vld [vmem:[#allocation2 + $0x310] sm:$0xff] }
  0x55   : > { %v1095_v28 = vmax.f32 %v999_v36, %v8473_v63  ;;  %v8517_v57 = vmax.f32 %v1187_v7, %v8485_v9  ;;  %v1082_v19 = vmax.f32 %v986_v43, %v882_v8  ;;  %v1090_v41 = vmax.f32 %v994_v12, %v8453_v39  ;;  %v903_v7 = vld [vmem:[#allocation2 + $0x120] sm:$0xff]  ;;  %v961_v36 = vld [vmem:[#allocation2 + $0x2f0] sm:$0xff] }
  0x56   : > { %v8443_v31 = vmax.f32 %v2450_v24, %v2551_v14  ;;  %v8495_v37 = vmax.f32 %v1190_v62, %v8475_v0  ;;  %v8512_v29 = vmax.f32 %v993_v3, %v8278_v61  ;;  %v8524_v42 = vmax.f32 %v1194_v13, %v8497_v23 }
  0x57   : > { %v1006_v47 = vmax.f32 %v8459_v45, %v8467_v58  ;;  %v8529_v48 = vmax.f32 %v992_v22, %v8280_v1  ;;  %v1174_v59 = vmax.f32 %v1078_v27, %v882_v8  ;;  %v1191_v60 = vmax.f32 %v1095_v28, %v8485_v9 }
  0x58   : > { %13786 = vst [vmem:[#allocation5_spill] sm:$0xff] %v8524_v42  ;;  %v13423_v55 = vrot.slane %v8495_v37, 1  ;;  %v1178_v3 = vmax.f32 %v1082_v19, %v8451_v35  ;;  %v1186_v43 = vmax.f32 %v1090_v41, %v8459_v45  ;;  %v13422_v12 = vrot.slane %v8524_v42, 1  ;;  %v8553_v19 = vld [vmem:[#allocation2 + $0x158] sm:$0x3f]  ;;  %v957_v45 = vld [vmem:[#allocation2 + $0x2d0] sm:$0xff] }
  0x59   : > { %v1102_v6 = vmax.f32 %v1006_v47, %v8475_v0  ;;  %v1003_v8 = vmax.f32 %v8302_v16, %v8473_v63  ;;  %v8557_v41 = vmax.f32 %v1174_v59, %v8451_v35  ;;  %v8559_v16 = vmax.f32 %v1191_v60, %v903_v7 }
  0x5a   : > { %v1743_v28 = vmax.f32 %v8495_v37, %v13423_v55  ;;  %v8572_v52 = vmax.f32 %v1178_v3, %v8453_v39  ;;  %v13424_v35 = vrot.slane %v8495_v37, 2  ;;  %v8576_v59 = vmax.f32 %v1186_v43, %v8467_v58 }
  0x5b   : > { %v1198_v13 = vmax.f32 %v1102_v6, %v8497_v23  ;;  %13787 = vst [vmem:[#allocation6_spill] sm:$0xff] %v8557_v41  ;;  %13788 = vst [vmem:[#allocation7_spill] sm:$0xff] %v8559_v16  ;;  %v8567_v6 = vld [vmem:[%s13410_s2] ss:$0 sm:$0xff]  ;;  %v1747_v60 = vmax.f32 %v8524_v42, %v13422_v12  ;;  %v13427_v3 = vrot.slane %v8495_v37, 3  ;;  %v1007_v43 = vmax.f32 %v8473_v63, %v8485_v9 }
  0x5c   : > { %13790 = vst [vmem:[#allocation9_spill] sm:$0xff] %v8572_v52  ;;  %13791 = vst [vmem:[#allocation10_spill] sm:$0xff] %v8576_v59  ;;  %v2104_v39 = vmax.f32 %v1743_v28, %v13424_v35  ;;  %v13432_v12 = vrot.slane %v8495_v37, 4  ;;  %v13426_v55 = vrot.slane %v8524_v42, 2  ;;  %v907_v28 = vld [vmem:[#allocation2 + $0x140] sm:$0xff]  ;;  %v1069_v22 = vmax.f32 %v957_v45, %v961_v36 }
  0x5d   : > { %v8562_v47 = vmax.f32 %v1198_v13, %v8553_v19  ;;  %v1099_v13 = vmax.f32 %v1003_v8, %v8485_v9  ;;  %v1103_v63 = vmax.f32 %v1007_v43, %v903_v7  ;;  %v1010_v43 = vmax.f32 %v8467_v58, %v8475_v0 }
  0x5e   : > { %v2108_v34 = vmax.f32 %v1747_v60, %v13426_v55  ;;  %v13429_v60 = vrot.slane %v8524_v42, 3  ;;  %v911_v55 = vld [vmem:[#allocation2 + $0x160] sm:$0xff]  ;;  %v1073_v62 = vmax.f32 %v961_v36, %v965_v46  ;;  %v1165_v25 = vmax.f32 %v1069_v22, %v965_v46 }
  0x5f   : > { %13789 = vst [vmem:[#allocation8_spill] sm:$0xff] %v8562_v47  ;;  %v13425_v50 = vrot.slane %v8562_v47, 1  ;;  %v1195_v8 = vmax.f32 %v1099_v13, %v903_v7  ;;  %v13428_v27 = vrot.slane %v8562_v47, 2  ;;  %v1199_v7 = vmax.f32 %v1103_v63, %v907_v28 }
  0x60   : > { %v1169_v14 = vmax.f32 %v1073_v62, %v969_v49  ;;  %v977_v62 = vld [vmem:[#allocation2 + $0x370] sm:$0xff] }
  0x61   : > { %v1751_v35 = vmax.f32 %v8562_v47, %v13425_v50 }
  0xe7   : > { %v7495_v44 = vpop.f32.mrb[0].mxu0 }
  0xe8   : > { %v8590_v18 = vadd.f32 %v7495_v44, %v8567_v6  ;;  %v432_v17 = vpop.f32.mrb[1].mxu0 }
  0xe9   : > { %v8596_v10 = vadd.f32 %v8567_v6, %v432_v17  ;;  %v2465_v17 = vmax.f32 %v2104_v39, %v13427_v3  ;;  %v2112_v39 = vmax.f32 %v1751_v35, %v13428_v27  ;;  %v1106_v3 = vmax.f32 %v1010_v43, %v8497_v23 }
  0xea   : > { %v592_v44 = vmul.f32 0.5, %v8590_v18  ;;  %v13430_v35 = vrot.slane %v8562_v47, 3 }
  0xeb   : > { %v591_v40 = vmul.f32 0.5, %v8596_v10  ;;  %v7498_v33 = vpop.f32.mrb[2].mxu0  ;;  %v1202_v23 = vmax.f32 %v1106_v3, %v8553_v19 }
  0xec   : > { %7848 = vtanh.f32 %v592_v44  ;;  %v8613_v50 = vadd.f32 %v7498_v33, %v8567_v6  ;;  %v442_v9 = vpop.f32.mrb[3].mxu0  ;;  %v2469_v33 = vmax.f32 %v2108_v34, %v13429_v60  ;;  %v8626_v44 = vmax.f32 %v1195_v8, %v907_v28  ;;  %v914_v28 = vld [vmem:[#allocation2 + $0x178] sm:$0x3f] }
  0xed   : > { %7850 = vtanh.f32 %v591_v40  ;;  %v8617_v13 = vadd.f32 %v8567_v6, %v442_v9  ;;  %v8631_v9 = vmax.f32 %v2465_v17, %v13432_v12  ;;  %v13431_v34 = vrot.slane %v8524_v42, 4 }
  0xee   : > { %v594_v58 = vmul.f32 0.5, %v8613_v50  ;;  %13792 = vst [vmem:[#allocation11_spill] sm:$0xff] %v8626_v44  ;;  %v8639_v8 = vmax.f32 %v1199_v7, %v911_v55  ;;  %v2473_v17 = vmax.f32 %v2112_v39, %v13430_v35  ;;  %v8646_v0 = vmax.f32 %v1202_v23, %v914_v28 }
  0xef   : > { %v593_v40 = vmul.f32 0.5, %v8617_v13  ;;  %v7501_v63 = vpop.f32.mrb[4].mxu0  ;;  %13793 = vst [vmem:[#allocation12_spill] sm:$0xff] %v8631_v9  ;;  %v8651_v3 = vmax.f32 %v2469_v33, %v13431_v34 }
  0xf0   : > { %7852 = vtanh.f32 %v594_v58  ;;  %v8636_v43 = vadd.f32 %v7501_v63, %v8567_v6  ;;  %v452_v27 = vpop.f32.mrb[5].mxu0  ;;  %13794 = vst [vmem:[#allocation13_spill] sm:$0xff] %v8639_v8  ;;  %13795 = vst [vmem:[#allocation14_spill] sm:$0xff] %v8646_v0  ;;  %v13433_v63 = vrot.slane %v8562_v47, 4  ;;  %v13434_v39 = vrot.slane %v8646_v0, 1 }
  0xf1   : > { %7854 = vtanh.f32 %v593_v40  ;;  %v8642_v60 = vadd.f32 %v8567_v6, %v452_v27  ;;  %13796 = vst [vmem:[#allocation15_spill] sm:$0xff] %v8651_v3  ;;  %v13435_v33 = vrot.slane %v8646_v0, 2  ;;  %v13439_v58 = vrot.slane %v8646_v0, 3 }
  0xf2   : > { %v596_v19 = vmul.f32 0.5, %v8636_v43  ;;  %v8669_v27 = vmax.f32 %v2473_v17, %v13433_v63  ;;  %v1755_v17 = vmax.f32 %v8646_v0, %v13434_v39 }
  0xf3   : > { %v595_v7 = vmul.f32 0.5, %v8642_v60  ;;  %v7504_v40 = vpop.f32.mrb[6].mxu0 }
  0xf4   : > { %7856 = vtanh.f32 %v596_v19  ;;  %v8660_v23 = vadd.f32 %v7504_v40, %v8567_v6  ;;  %v462_v28 = vpop.f32.mrb[7].mxu0  ;;  %13797 = vst [vmem:[#allocation16_spill] sm:$0xff] %v8669_v27 }
  0xf5   : > { %7858 = vtanh.f32 %v595_v7  ;;  %v8665_v55 = vadd.f32 %v8567_v6, %v462_v28 }
  0xf6   : > { %v7849_v34 = vpop.eup %7848  ;;  %v598_v19 = vmul.f32 0.5, %v8660_v23 }
  0xf7   : > { %v7851_v35 = vpop.eup %7850  ;;  %v656_v7 = vadd.f32 1.0, %v7849_v34  ;;  %v597_v28 = vmul.f32 0.5, %v8665_v55  ;;  %v7507_v21 = vpop.f32.mrb[8].mxu0 }
  0xf8   : > { %v655_v63 = vadd.f32 1.0, %v7851_v35  ;;  %7860 = vtanh.f32 %v598_v19  ;;  %v8682_v40 = vadd.f32 %v7507_v21, %v8567_v6  ;;  %v472_v12 = vpop.f32.mrb[9].mxu0  ;;  %v2116_v35 = vmax.f32 %v1755_v17, %v13435_v33 }
  0xf9   : > { %v688_v34 = vmul.f32 0.5, %v656_v7  ;;  %7862 = vtanh.f32 %v597_v28  ;;  %v8685_v2 = vadd.f32 %v8567_v6, %v472_v12  ;;  %v973_v12 = vld [vmem:[#allocation2 + $0x350] sm:$0xff]  ;;  %v1261_v17 = vmax.f32 %v1165_v25, %v969_v49 }
  0xfa   : > { %v7853_v56 = vpop.eup %7852  ;;  %v687_v53 = vmul.f32 0.5, %v655_v63  ;;  %v600_v39 = vmul.f32 0.5, %v8682_v40 }
  0xfb   : > { %v7855_v21 = vpop.eup %7854  ;;  %v8691_v19 = vmul.f32 %v688_v34, %v8590_v18  ;;  %v658_v45 = vadd.f32 1.0, %v7853_v56  ;;  %v599_v7 = vmul.f32 0.5, %v8685_v2  ;;  %v7510_v28 = vpop.f32.mrb[10].mxu0  ;;  %v8713_v25 = vmax.f32 %v1261_v17, %v973_v12  ;;  %v8732_v17 = vld [vmem:[#allocation2 + $0x308] sm:$0xff] }
  0xfc   : > { %v8695_v36 = vmul.f32 %v687_v53, %v8596_v10  ;;  %v657_v63 = vadd.f32 1.0, %v7855_v21  ;;  %7864 = vtanh.f32 %v600_v39  ;;  %v8698_v22 = vadd.f32 %v7510_v28, %v8567_v6  ;;  %v482_v46 = vpop.f32.mrb[11].mxu0  ;;  %13806 = vst [vmem:[#allocation25_spill] sm:$0xff] %v8732_v17 }
  0xfd   : > { %13798 = vst [vmem:[#allocation17_spill] sm:$0xff] %v8691_v19  ;;  %836 = vst.msk [vmem:[#allocation2 + $0xd0] sm:$0xff] %vm751_vm2, %v8691_v19  ;;  %v690_v18 = vmul.f32 0.5, %v658_v45  ;;  %7866 = vtanh.f32 %v599_v7  ;;  %v8703_v56 = vadd.f32 %v8567_v6, %v482_v46  ;;  %v1265_v39 = vmax.f32 %v1169_v14, %v973_v12  ;;  %v8728_v12 = vld [vmem:[#allocation2 + $0x2c8] sm:$0xff] }
  0xfe   : > { %13799 = vst [vmem:[#allocation18_spill] sm:$0xff] %v8695_v36  ;;  %v7857_v34 = vpop.eup %7856  ;;  %835 = vst.msk [vmem:[#allocation2 + $0xc8] sm:$0xff] %vm751_vm2, %v8695_v36  ;;  %v689_v10 = vmul.f32 0.5, %v657_v63  ;;  %v602_v53 = vmul.f32 0.5, %v8698_v22 }
  0xff   : > { %v7859_v28 = vpop.eup %7858  ;;  %v8710_v33 = vmul.f32 %v690_v18, %v8613_v50  ;;  %v660_v45 = vadd.f32 1.0, %v7857_v34  ;;  %v601_v7 = vmul.f32 0.5, %v8703_v56  ;;  %v7513_v46 = vpop.f32.mrb[12].mxu0  ;;  %13801 = vst [vmem:[#allocation20_spill] sm:$0xff] %v8713_v25  ;;  %v8726_v34 = vmax.f32 %v1265_v39, %v977_v62  ;;  %13804 = vst [vmem:[#allocation23_spill] sm:$0xff] %v8728_v12 }
 0x100   : > { %v8716_v49 = vmul.f32 %v689_v10, %v8617_v13  ;;  %v659_v63 = vadd.f32 1.0, %v7859_v28  ;;  %7868 = vtanh.f32 %v602_v53  ;;  %v8719_v24 = vadd.f32 %v7513_v46, %v8567_v6  ;;  %v492_v14 = vpop.f32.mrb[13].mxu0  ;;  %v8730_v13 = vld [vmem:[#allocation2 + $0x2e8] sm:$0xff] }
 0x101   : > { %13800 = vst [vmem:[#allocation19_spill] sm:$0xff] %v8710_v33  ;;  %838 = vst.msk [vmem:[#allocation2 + $0xf0] sm:$0xff] %vm751_vm2, %v8710_v33  ;;  %v692_v50 = vmul.f32 0.5, %v660_v45  ;;  %7870 = vtanh.f32 %v601_v7  ;;  %v8724_v18 = vadd.f32 %v8567_v6, %v492_v14 }
 0x102   : > { %13802 = vst [vmem:[#allocation21_spill] sm:$0xff] %v8716_v49  ;;  %13803 = vst [vmem:[#allocation22_spill] sm:$0xff] %v8726_v34  ;;  %v7861_v10 = vpop.eup %7860  ;;  %v691_v53 = vmul.f32 0.5, %v659_v63  ;;  %v604_v28 = vmul.f32 0.5, %v8719_v24  ;;  %v8749_v63 = vmax.f32 %v2116_v35, %v13439_v58  ;;  %v13811_v58 = vmax.f32 %v8482_v4, %v8278_v61 }
 0x103   : > { %13805 = vst [vmem:[#allocation24_spill] sm:$0xff] %v8730_v13  ;;  %837 = vst.msk [vmem:[#allocation2 + $0xe8] sm:$0xff] %vm751_vm2, %v8716_v49  ;;  %v7863_v39 = vpop.eup %7862  ;;  %v8742_v7 = vmul.f32 %v692_v50, %v8636_v43  ;;  %v662_v46 = vadd.f32 1.0, %v7861_v10  ;;  %v8745_v14 = vmul.f32 0.5, %v8724_v18  ;;  %v7516_v21 = vpop.f32.mrb[14].mxu0  ;;  %v13810_v10 = vmax.f32 %v8254_v38, %v8278_v61 }
 0x104   : > { %13808 = vst [vmem:[#allocation27_spill] sm:$0xff] %v8749_v63  ;;  %v893_v34 = vld [vmem:[#allocation2 + $0xd0] sm:$0xff]  ;;  %v8752_v25 = vmul.f32 %v691_v53, %v8642_v60  ;;  %v661_v45 = vadd.f32 1.0, %v7863_v39  ;;  %7872 = vtanh.f32 %v604_v28  ;;  %v8755_v62 = vadd.f32 %v7516_v21, %v8567_v6  ;;  %v8757_v43 = vpop.f32.mrb[15].mxu0 }
 0x105   : > { %13807 = vst [vmem:[#allocation26_spill] sm:$0xff] %v8742_v7  ;;  %v1001_v50 = vmax.f32 %v8278_v61, %v893_v34  ;;  %v1093_v33 = vmax.f32 %v13810_v10, %v893_v34  ;;  %v1185_v35 = vmax.f32 %v8512_v29, %v893_v34  ;;  %v8767_v60 = vmax.f32 %v13811_v58, %v893_v34  ;;  %v892_v53 = vld [vmem:[#allocation2 + $0xc8] sm:$0xff] }
 0x106   : > { %13809 = vst [vmem:[#allocation28_spill] sm:$0xff] %v8752_v25  ;;  %840 = vst.msk [vmem:[#allocation2 + $0x110] sm:$0xff] %vm751_vm2, %v8742_v7  ;;  %v7865_v21 = vpop.eup %7864  ;;  %v1000_v28 = vmax.f32 %v8280_v1, %v892_v53  ;;  %v13812_v39 = vmax.f32 %v8266_v51, %v8280_v1  ;;  %v1184_v38 = vmax.f32 %v8529_v48, %v892_v53  ;;  %7874 = vtanh.f32 %v8745_v14 }
 0x107   : > { %v13813_v29 = vmax.f32 %v8492_v11, %v8280_v1  ;;  %839 = vst.msk [vmem:[#allocation2 + $0x108] sm:$0xff] %vm751_vm2, %v8752_v25  ;;  %v7867_v61 = vpop.eup %7866  ;;  %v13814_v11 = vrot.slane %v8767_v60, 1 }
 0x108   : > { %v1092_v49 = vmax.f32 %v13812_v39, %v892_v53  ;;  %v8787_v39 = vpop.f32.mrb[16].mxu0  ;;  %v8793_v25 = vld [vmem:[#allocation2 + $0xf0] sm:$0xff] }
 0x109   : > { %v8779_v10 = vmax.f32 %v13813_v29, %v892_v53  ;;  %v8795_v19 = vpop.f32.mrb[17].mxu0  ;;  %v1005_v58 = vmax.f32 %v893_v34, %v8793_v25  ;;  %v8799_v7 = vmax.f32 %v1001_v50, %v8793_v25  ;;  %v1189_v51 = vmax.f32 %v1093_v33, %v8793_v25 }
 0x10a   : > { %v8803_v4 = vmax.f32 %v1185_v35, %v8793_v25  ;;  %v8805_v48 = vld [vmem:[#allocation2 + $0xe8] sm:$0xff]  ;;  %v7869_v1 = vpop.eup %7868 }
 0x10b   : > { %v13815_v29 = vrot.slane %v8779_v10, 1  ;;  %v1004_v34 = vmax.f32 %v892_v53, %v8805_v48  ;;  %v8816_v50 = vmax.f32 %v1000_v28, %v8805_v48  ;;  %v1188_v33 = vmax.f32 %v1092_v49, %v8805_v48  ;;  %v7871_v27 = vpop.eup %7870  ;;  %v7522_v59 = vpop.f32.mrb[18].mxu0 }
 0x10c   : > { %v8826_v53 = vmax.f32 %v1184_v38, %v8805_v48  ;;  %v693_v49 = vmul.f32 0.5, %v661_v45  ;;  %v522_v52 = vpop.f32.mrb[19].mxu0  ;;  %v13816_v54 = vrot.slane %v8803_v4, 1  ;;  %v666_v8 = vadd.f32 1.0, %v7869_v1 }
 0x10d   : > { %v8812_v36 = vsel %vm1459_vm3, %v13815_v29, %v13814_v11  ;;  %v8828_v28 = vld [vmem:[#allocation2 + $0x110] sm:$0xff]  ;;  %v694_v29 = vmul.f32 0.5, %v662_v46  ;;  %v665_v47 = vadd.f32 1.0, %v7871_v27 }
 0x10e   : > { %v8833_v3 = vmax.f32 %v1005_v58, %v8828_v28  ;;  %v8838_v9 = vmax.f32 %v1189_v51, %v8828_v28  ;;  %v8840_v11 = vld [vmem:[#allocation2 + $0x108] sm:$0xff]  ;;  %v7873_v38 = vpop.eup %7872  ;;  %v13817_v45 = vrot.slane %v8826_v53, 1  ;;  %v664_v58 = vadd.f32 1.0, %v7865_v21 }
 0x10f   : > { %v8849_v41 = vmax.f32 %v1004_v34, %v8840_v11  ;;  %v8854_v5 = vmax.f32 %v1188_v33, %v8840_v11  ;;  %v7525_v63 = vpop.f32.mrb[20].mxu0  ;;  %v8864_v35 = vmul.f32 %v694_v29, %v8660_v23  ;;  %v8867_v34 = vmul.f32 %v693_v49, %v8665_v55 }
 0x110   : > { %v8861_v46 = vsel %vm1459_vm3, %v13817_v45, %v13816_v54  ;;  %v532_v0 = vpop.f32.mrb[21].mxu0  ;;  %v663_v51 = vadd.f32 1.0, %v7867_v61  ;;  %v696_v54 = vmul.f32 0.5, %v664_v58  ;;  %v668_v23 = vadd.f32 1.0, %v7873_v38 }
 0x111   : > { %13818 = vst [vmem:[#allocation29_spill] sm:$0xff] %v8864_v35  ;;  %13819 = vst [vmem:[#allocation30_spill] sm:$0xff] %v8867_v34  ;;  %v606_v55 = vmul.f32 0.5, %v8755_v62  ;;  %v698_v29 = vmul.f32 0.5, %v666_v8  ;;  %v697_v49 = vmul.f32 0.5, %v665_v47  ;;  %v8879_v61 = vadd.f32 %v8567_v6, %v8757_v43 }
 0x112   : > { %842 = vst.msk [vmem:[#allocation2 + $0x130] sm:$0xff] %vm751_vm2, %v8864_v35  ;;  %841 = vst.msk [vmem:[#allocation2 + $0x128] sm:$0xff] %vm751_vm2, %v8867_v34  ;;  %v695_v21 = vmul.f32 0.5, %v663_v51  ;;  %v8882_v1 = vmul.f32 %v696_v54, %v8682_v40  ;;  %v700_v45 = vmul.f32 0.5, %v668_v23  ;;  %v8886_v38 = vadd.f32 %v8787_v39, %v8567_v6 }
 0x113   : > { %v7528_v27 = vpop.f32.mrb[22].mxu0  ;;  %7876 = vtanh.f32 %v606_v55  ;;  %v8892_v47 = vmul.f32 %v698_v29, %v8698_v22  ;;  %v8895_v8 = vmul.f32 %v697_v49, %v8703_v56  ;;  %v605_v43 = vmul.f32 0.5, %v8879_v61 }
 0x114   : > { %13820 = vst [vmem:[#allocation31_spill] sm:$0xff] %v8882_v1  ;;  %v542_v14 = vpop.f32.mrb[23].mxu0  ;;  %v8889_v58 = vmul.f32 %v695_v21, %v8685_v2  ;;  %844 = vst.msk [vmem:[#allocation2 + $0x150] sm:$0xff] %vm751_vm2, %v8882_v1  ;;  %v8901_v40 = vmul.f32 %v700_v45, %v8719_v24  ;;  %v608_v39 = vmul.f32 0.5, %v8886_v38  ;;  %v8906_v2 = vadd.f32 %v8567_v6, %v8795_v19 }
 0x115   : > { %13822 = vst [vmem:[#allocation33_spill] sm:$0xff] %v8892_v47  ;;  %13823 = vst [vmem:[#allocation34_spill] sm:$0xff] %v8895_v8  ;;  %v8909_v22 = vadd.f32 %v7522_v59, %v8567_v6  ;;  %7878 = vtanh.f32 %v605_v43  ;;  %v8918_v24 = vadd.f32 %v8567_v6, %v522_v52  ;;  %v8921_v56 = vadd.f32 %v7525_v63, %v8567_v6 }
 0x116   : > { %13821 = vst [vmem:[#allocation32_spill] sm:$0xff] %v8889_v58  ;;  %13824 = vst [vmem:[#allocation35_spill] sm:$0xff] %v8901_v40  ;;  %v8924_v19 = vadd.f32 %v8567_v6, %v532_v0  ;;  %7880 = vtanh.f32 %v608_v39  ;;  %v607_v51 = vmul.f32 0.5, %v8906_v2  ;;  %v8931_v23 = vadd.f32 %v7528_v27, %v8567_v6 }
 0x117   : > { %843 = vst.msk [vmem:[#allocation2 + $0x148] sm:$0xff] %vm751_vm2, %v8889_v58  ;;  %846 = vst.msk [vmem:[#allocation2 + $0x170] sm:$0xff] %vm751_vm2, %v8892_v47  ;;  %v7531_v59 = vpop.f32.mrb[24].mxu0  ;;  %v610_v54 = vmul.f32 0.5, %v8909_v22  ;;  %v609_v63 = vmul.f32 0.5, %v8918_v24  ;;  %v8935_v0 = vmul.f32 0.5, %v8921_v56  ;;  %v8941_v49 = vadd.f32 %v8567_v6, %v542_v14 }
 0x118   : > { %845 = vst.msk [vmem:[#allocation2 + $0x168] sm:$0xff] %vm751_vm2, %v8895_v8  ;;  %848 = vst.msk [vmem:[#allocation2 + $0x190] sm:$0xff] %vm751_vm2, %v8901_v40  ;;  %v552_v52 = vpop.f32.mrb[25].mxu0  ;;  %v8938_v29 = vmul.f32 0.5, %v8924_v19  ;;  %v13825_v27 = vmax.f32 %v8793_v25, %v8828_v28  ;;  %v13826_v33 = vmax.f32 %v8799_v7, %v8828_v28  ;;  %v13828_v8 = vmax.f32 %v8805_v48, %v8840_v11 }
 0x119   : > { %v905_v55 = vld [vmem:[#allocation2 + $0x130] sm:$0xff]  ;;  %v904_v21 = vld [vmem:[#allocation2 + $0x128] sm:$0xff]  ;;  %v13829_v58 = vmax.f32 %v8816_v50, %v8840_v11  ;;  %7882 = vtanh.f32 %v607_v51  ;;  %v8964_v7 = vmul.f32 0.5, %v8931_v23  ;;  %v8973_v50 = vadd.f32 %v8567_v6, %v552_v52 }
 0x11a   : > { %v1013_v45 = vmax.f32 %v8828_v28, %v905_v55  ;;  %v1105_v43 = vmax.f32 %v13825_v27, %v905_v55  ;;  %v1197_v39 = vmax.f32 %v8833_v3, %v905_v55  ;;  %v8951_v40 = vmax.f32 %v13826_v33, %v905_v55  ;;  %v7875_v3 = vpop.eup %7874 }
 0x11b   : > { %v1012_v47 = vmax.f32 %v8840_v11, %v904_v21  ;;  %v1104_v14 = vmax.f32 %v13828_v8, %v904_v21  ;;  %v1196_v1 = vmax.f32 %v8849_v41, %v904_v21  ;;  %v8961_v25 = vmax.f32 %v13829_v58, %v904_v21  ;;  %v7534_v27 = vpop.f32.mrb[26].mxu0  ;;  %v909_v8 = vld [vmem:[#allocation2 + $0x150] sm:$0xff] }
 0x11c   : > { %13827 = vst [vmem:[#allocation36_spill] sm:$0xff] %v8951_v40  ;;  %v8967_v28 = vmul.f32 0.5, %v8941_v49  ;;  %v8970_v33 = vadd.f32 %v7531_v59, %v8567_v6  ;;  %v562_v48 = vpop.f32.mrb[27].mxu0  ;;  %v667_v41 = vadd.f32 1.0, %v7875_v3  ;;  %7884 = vtanh.f32 %v610_v54 }
 0x11d   : > { %v8976_v11 = vadd.f32 %v7534_v27, %v8567_v6  ;;  %v7877_v58 = vpop.eup %7876  ;;  %v1017_v51 = vmax.f32 %v905_v55, %v909_v8  ;;  %v1109_v35 = vmax.f32 %v1013_v45, %v909_v8  ;;  %v1201_v34 = vmax.f32 %v1105_v43, %v909_v8 }
 0x11e   : > { %v8978_v44 = vmax.f32 %v1197_v39, %v909_v8  ;;  %v8980_v13 = vld [vmem:[#allocation2 + $0x148] sm:$0xff]  ;;  %v8982_v59 = vld [vmem:[#allocation2 + $0x170] sm:$0xff]  ;;  %v670_v42 = vadd.f32 1.0, %v7877_v58  ;;  %7886 = vtanh.f32 %v609_v63  ;;  %v13838_v63 = vrot.slane %v8779_v10, 1 }
 0x11f   : > { %v8984_v12 = vld [vmem:[#allocation2 + $0x168] sm:$0xff]  ;;  %v1016_v54 = vmax.f32 %v904_v21, %v8980_v13  ;;  %v8988_v52 = vmax.f32 %v1012_v47, %v8980_v13  ;;  %v1200_v27 = vmax.f32 %v1104_v14, %v8980_v13  ;;  %v8992_v3 = vmax.f32 %v1196_v1, %v8980_v13  ;;  %v8994_v55 = vld [vmem:[#allocation2 + $0x190] sm:$0xff]  ;;  %v8996_v45 = vpop.f32.mrb[28].mxu0  ;;  %v7879_v14 = vpop.eup %7878 }
 0x120   : > { %13830 = vst [vmem:[#allocation37_spill] sm:$0xff] %v8978_v44  ;;  %v1021_v43 = vmax.f32 %v909_v8, %v8982_v59  ;;  %v9000_v39 = vmax.f32 %v1017_v51, %v8982_v59  ;;  %v1205_v44 = vmax.f32 %v1109_v35, %v8982_v59  ;;  %v9004_v21 = vmax.f32 %v1201_v34, %v8982_v59  ;;  %v9006_v47 = vpop.f32.mrb[29].mxu0  ;;  %v7881_v17 = vpop.eup %7880 }
 0x121   : > { %13831 = vst [vmem:[#allocation38_spill] sm:$0xff] %v8992_v3  ;;  %v9011_v3 = vmax.f32 %v1016_v54, %v8984_v12  ;;  %v9016_v51 = vmax.f32 %v1200_v27, %v8984_v12  ;;  %v699_v54 = vmul.f32 0.5, %v667_v41  ;;  %v669_v16 = vadd.f32 1.0, %v7879_v14 }
 0x122   : > { %13832 = vst [vmem:[#allocation39_spill] sm:$0xff] %v9004_v21  ;;  %v9021_v34 = vmax.f32 %v1021_v43, %v8994_v55  ;;  %v9026_v1 = vmax.f32 %v1205_v44, %v8994_v55  ;;  %v672_v8 = vadd.f32 1.0, %v7881_v17  ;;  %v616_v27 = vmul.f32 0.5, %v8970_v33 }
 0x123   : > { %13833 = vst [vmem:[#allocation40_spill] sm:$0xff] %v9016_v51  ;;  %v9028_v40 = vpop.f32.mrb[30].mxu0  ;;  %v615_v35 = vmul.f32 0.5, %v8973_v50  ;;  %v618_v43 = vmul.f32 0.5, %v8976_v11  ;;  %v9036_v21 = vmul.f32 %v699_v54, %v8724_v18  ;;  %v702_v44 = vmul.f32 0.5, %v670_v42  ;;  %v9038_v58 = vpop.eup %7882 }
 0x124   : > { %13834 = vst [vmem:[#allocation41_spill] sm:$0xff] %v9026_v1  ;;  %13835 = vst [vmem:[#allocation42_spill] sm:$0xff] %v9028_v40  ;;  %v9033_v51 = vpop.f32.mrb[31].mxu0  ;;  %v701_v1 = vmul.f32 0.5, %v669_v16  ;;  %v704_v41 = vmul.f32 0.5, %v672_v8  ;;  %7888 = vtanh.f32 %v8935_v0  ;;  %v9042_v17 = vadd.f32 %v8567_v6, %v562_v48 }
 0x125   : > { %13836 = vst [vmem:[#allocation43_spill] sm:$0xff] %v9033_v51  ;;  %13837 = vst [vmem:[#allocation44_spill] sm:$0xff] %v9036_v21  ;;  %v13839_v14 = vrot.slane %v8310_v20, 1  ;;  %v13840_v51 = vrot.slane %v8826_v53, 1  ;;  %v13841_v18 = vrot.slane %v8505_v26, 1  ;;  %v9057_v0 = vmul.f32 %v702_v44, %v8755_v62 }
 0x126   : > { %v7885_v16 = vpop.eup %7884  ;;  %847 = vst.msk [vmem:[#allocation2 + $0x188] sm:$0xff] %vm751_vm2, %v9036_v21  ;;  %v9060_v6 = vmul.f32 %v701_v1, %v8879_v61  ;;  %v9063_v48 = vmul.f32 %v704_v41, %v8886_v38  ;;  %7890 = vtanh.f32 %v8938_v29  ;;  %v1489_v54 = vrot.slane %v8854_v5, 1 }
 0x127   : > { %v1476_v40 = vsel %vm1459_vm3, %v13839_v14, %v13838_v63  ;;  %v1483_v42 = vsel %vm1459_vm3, %v13841_v18, %v13840_v51  ;;  %13842 = vst [vmem:[#allocation45_spill] sm:$0xff] %v9057_v0  ;;  %v674_v8 = vadd.f32 1.0, %v7885_v16  ;;  %7892 = vtanh.f32 %v8964_v7  ;;  %850 = vst.msk [vmem:[#allocation2 + $0x1b0] sm:$0xff] %vm751_vm2, %v9057_v0 }
 0x128   : > { %13843 = vst [vmem:[#allocation46_spill] sm:$0xff] %v9060_v6  ;;  %v617_v51 = vmul.f32 0.5, %v9042_v17  ;;  %849 = vst.msk [vmem:[#allocation2 + $0x1a8] sm:$0xff] %vm751_vm2, %v9060_v6  ;;  %7894 = vtanh.f32 %v8967_v28  ;;  %v13485_v62 = vrot.slane %v8838_v9, 1  ;;  %v1732_v61 = vmax.f32 %v8310_v20, %v1476_v40 }
 0x129   : > { %852 = vst.msk [vmem:[#allocation2 + $0x1d0] sm:$0xff] %vm751_vm2, %v9063_v48  ;;  %v1736_v38 = vmax.f32 %v8505_v26, %v1483_v42  ;;  %v706_v29 = vmul.f32 0.5, %v674_v8  ;;  %7896 = vtanh.f32 %v616_v27  ;;  %v13844_v7 = vrot.slane %v8517_v57, 1 }
 0x12a   : > { %v13845_v44 = vrot.slane %v8779_v10, 2  ;;  %v13846_v41 = vrot.slane %v8310_v20, 2  ;;  %7898 = vtanh.f32 %v615_v35  ;;  %v1492_v28 = vsel %vm1459_vm3, %v1489_v54, %v13485_v62 }
 0x12b   : > { %v1490_v1 = vsel %vm1459_vm3, %v13844_v7, %v1489_v54  ;;  %v13847_v14 = vrot.slane %v8767_v60, 2  ;;  %v9097_v42 = vmul.f32 %v706_v29, %v8909_v22  ;;  %7900 = vtanh.f32 %v618_v43  ;;  %v7887_v43 = vpop.eup %7886 }
 0x12c   : > { %v1837_v63 = vsel %vm1820_vm4, %v13846_v41, %v13845_v44  ;;  %v1740_v40 = vmax.f32 %v8517_v57, %v1490_v1  ;;  %v13848_v27 = vmov %v13845_v44  ;;  %v1741_v16 = vmax.f32 %v8854_v5, %v1492_v28 }
 0x12d   : > { %v1839_v18 = vsel %vm1820_vm4, %v13848_v27, %v13847_v14  ;;  %v13849_v35 = vrot.slane %v8826_v53, 2  ;;  %v13850_v8 = vrot.slane %v8505_v26, 2  ;;  %7902 = vtanh.f32 %v617_v51  ;;  %v9112_v29 = vld [vmem:[#allocation2 + $0x188] sm:$0xff]  ;;  %854 = vst.msk [vmem:[#allocation2 + $0x1f0] sm:$0xff] %vm751_vm2, %v9097_v42 }
 0x12e   : > { %v13851_v7 = vrot.slane %v8803_v4, 2  ;;  %v1850_v41 = vrot.slane %v8854_v5, 2  ;;  %v13488_v22 = vrot.slane %v8838_v9, 2  ;;  %13853 = vst [vmem:[#allocation47_spill] sm:$0xff] %v9112_v29  ;;  %v9116_v28 = vmax.f32 %v1732_v61, %v1837_v63 }
 0x12f   : > { %v1844_v54 = vsel %vm1820_vm4, %v13850_v8, %v13849_v35  ;;  %v13852_v1 = vmov %v13849_v35  ;;  %v13854_v51 = vmax.f32 %v8779_v10, %v8812_v36  ;;  %v13855_v35 = vmax.f32 %v8826_v53, %v8861_v46  ;;  %v7889_v46 = vpop.eup %7888 }
 0x130   : > { %v1846_v44 = vsel %vm1820_vm4, %v13852_v1, %v13851_v7  ;;  %v9123_v27 = vmax.f32 %v1736_v38, %v1844_v54  ;;  %v1024_v7 = vmax.f32 %v8984_v12, %v9112_v29  ;;  %v13856_v61 = vmax.f32 %v8980_v13, %v8984_v12  ;;  %v921_v54 = vld [vmem:[#allocation2 + $0x1b0] sm:$0xff]  ;;  %v9146_v1 = vld [vmem:[#allocation2 + $0x1a8] sm:$0xff] }
 0x131   : > { %v9121_v14 = vmax.f32 %v13854_v51, %v1839_v18  ;;  %v9128_v8 = vmax.f32 %v13855_v35, %v1846_v44  ;;  %v1208_v36 = vmax.f32 %v9011_v3, %v9112_v29  ;;  %v13858_v38 = vmax.f32 %v8988_v52, %v8984_v12  ;;  %v9148_v44 = vld [vmem:[#allocation2 + $0x1d0] sm:$0xff] }
 0x132   : > { %v9136_v63 = vmax.f32 %v13856_v61, %v9112_v29  ;;  %v673_v51 = vadd.f32 1.0, %v7887_v43  ;;  %v13860_v13 = vrot.slane %v8517_v57, 2  ;;  %v1853_v3 = vsel %vm1820_vm4, %v1850_v41, %v13488_v22 }
 0x133   : > { %v9144_v18 = vmax.f32 %v13858_v38, %v9112_v29  ;;  %v13861_v61 = vrot.slane %v8779_v10, 3  ;;  %v13862_v12 = vrot.slane %v8310_v20, 3  ;;  %v7891_v38 = vpop.eup %7890  ;;  %v1029_v62 = vmax.f32 %v8994_v55, %v921_v54 }
 0x134   : > { %13857 = vst [vmem:[#allocation48_spill] sm:$0xff] %v9136_v63  ;;  %v1851_v35 = vsel %vm1820_vm4, %v13860_v13, %v1850_v41  ;;  %v13863_v43 = vmax.f32 %v8982_v59, %v8994_v55  ;;  %v1213_v13 = vmax.f32 %v9021_v34, %v921_v54  ;;  %v13864_v6 = vmax.f32 %v9000_v39, %v8994_v55  ;;  %v7893_v22 = vpop.eup %7892  ;;  %v9191_v63 = vld [vmem:[#allocation2 + $0x1f0] sm:$0xff] }
 0x135   : > { %13859 = vst [vmem:[#allocation49_spill] sm:$0xff] %v9144_v18  ;;  %v9161_v52 = vsel %vm2181_vm5, %v13862_v12, %v13861_v61  ;;  %v9176_v61 = vmax.f32 %v1024_v7, %v9146_v1  ;;  %v9181_v59 = vmax.f32 %v1208_v36, %v9146_v1  ;;  %v1033_v34 = vmax.f32 %v921_v54, %v9148_v44 }
 0x136   : > { %v1121_v0 = vmax.f32 %v13863_v43, %v921_v54  ;;  %v9171_v41 = vmax.f32 %v13864_v6, %v921_v54  ;;  %v7895_v43 = vpop.eup %7894  ;;  %v9185_v55 = vmax.f32 %v1029_v62, %v9148_v44  ;;  %v9189_v6 = vmax.f32 %v1213_v13, %v9148_v44 }
 0x137   : > { %13866 = vst [vmem:[#allocation51_spill] sm:$0xff] %v9176_v61  ;;  %13867 = vst [vmem:[#allocation52_spill] sm:$0xff] %v9181_v59  ;;  %v7897_v21 = vpop.eup %7896  ;;  %v705_v7 = vmul.f32 0.5, %v673_v51  ;;  %v675_v18 = vadd.f32 1.0, %v7891_v38  ;;  %v678_v61 = vadd.f32 1.0, %v7893_v22  ;;  %v677_v36 = vadd.f32 1.0, %v7895_v43 }
 0x138   : > { %13865 = vst [vmem:[#allocation50_spill] sm:$0xff] %v9171_v41  ;;  %v1217_v39 = vmax.f32 %v1121_v0, %v9148_v44  ;;  %v676_v41 = vadd.f32 1.0, %v7889_v46  ;;  %v7899_v12 = vpop.eup %7898  ;;  %v680_v59 = vadd.f32 1.0, %v7897_v21  ;;  %v9193_v29 = vmax.f32 %v1740_v40, %v1851_v35 }
 0x139   : > { %v9195_v54 = vmax.f32 %v1741_v16, %v1853_v3  ;;  %v7901_v62 = vpop.eup %7900  ;;  %v9200_v13 = vmax.f32 %v1033_v34, %v9191_v63  ;;  %v9208_v21 = vmul.f32 %v705_v7, %v8918_v24  ;;  %v707_v16 = vmul.f32 0.5, %v675_v18 }
 0x13a   : > { %v9205_v22 = vmax.f32 %v1217_v39, %v9191_v63  ;;  %v7903_v51 = vpop.eup %7902  ;;  %v708_v40 = vmul.f32 0.5, %v676_v41  ;;  %v710_v35 = vmul.f32 0.5, %v678_v61  ;;  %v709_v3 = vmul.f32 0.5, %v677_v36 }
 0x13b   : > { %v712_v38 = vmul.f32 0.5, %v680_v59  ;;  %v679_v43 = vadd.f32 1.0, %v7899_v12  ;;  %v682_v0 = vadd.f32 1.0, %v7901_v62  ;;  %853 = vst.msk [vmem:[#allocation2 + $0x1e8] sm:$0xff] %vm751_vm2, %v9208_v21  ;;  %v9216_v39 = vmul.f32 %v707_v16, %v8924_v19 }
 0x13c   : > { %v9213_v34 = vmul.f32 %v708_v40, %v8921_v56  ;;  %v9219_v46 = vmul.f32 %v710_v35, %v8931_v23  ;;  %v681_v24 = vadd.f32 1.0, %v7903_v51  ;;  %v9222_v18 = vmul.f32 %v709_v3, %v8941_v49 }
 0x13d   : > { %v9225_v41 = vmul.f32 %v712_v38, %v8970_v33  ;;  %v711_v61 = vmul.f32 0.5, %v679_v43  ;;  %v714_v12 = vmul.f32 0.5, %v682_v0  ;;  %855 = vst.msk [vmem:[#allocation2 + $0x208] sm:$0xff] %vm751_vm2, %v9216_v39  ;;  %v13868_v19 = vrot.slane %v8767_v60, 3 }
 0x13e   : > { %856 = vst.msk [vmem:[#allocation2 + $0x210] sm:$0xff] %vm751_vm2, %v9213_v34  ;;  %858 = vst.msk [vmem:[#allocation2 + $0x230] sm:$0xff] %vm751_vm2, %v9219_v46  ;;  %v713_v56 = vmul.f32 0.5, %v681_v24  ;;  %v13869_v23 = vrot.slane %v8779_v10, 3  ;;  %v13870_v33 = vrot.slane %v8826_v53, 3  ;;  %v13871_v59 = vrot.slane %v8505_v26, 3 }
 0x13f   : > { %v13872_v36 = vrot.slane %v8803_v4, 3  ;;  %857 = vst.msk [vmem:[#allocation2 + $0x228] sm:$0xff] %vm751_vm2, %v9222_v18  ;;  %860 = vst.msk [vmem:[#allocation2 + $0x250] sm:$0xff] %vm751_vm2, %v9225_v41  ;;  %v9253_v51 = vmul.f32 %v711_v61, %v8973_v50  ;;  %v9256_v40 = vmul.f32 %v714_v12, %v8976_v11  ;;  %v2211_v16 = vrot.slane %v8854_v5, 3 }
 0x140   : > { %v2200_v49 = vsel %vm2181_vm5, %v13869_v23, %v13868_v19  ;;  %v2205_v7 = vsel %vm2181_vm5, %v13871_v59, %v13870_v33  ;;  %v13873_v62 = vmov %v13870_v33  ;;  %v2213_v35 = vrot.slane %v8838_v9, 3 }
 0x141   : > { %v2207_v0 = vsel %vm2181_vm5, %v13873_v62, %v13872_v36  ;;  %v9261_v3 = vmul.f32 %v713_v56, %v9042_v17  ;;  %v2454_v38 = vmax.f32 %v9116_v28, %v9161_v52  ;;  %v2455_v43 = vmax.f32 %v9121_v14, %v2200_v49  ;;  %859 = vst.msk [vmem:[#allocation2 + $0x248] sm:$0xff] %vm751_vm2, %v9253_v51 }
 0x142   : > { %v2458_v24 = vmax.f32 %v9123_v27, %v2205_v7  ;;  %862 = vst.msk [vmem:[#allocation2 + $0x270] sm:$0xff] %vm751_vm2, %v9256_v40  ;;  %v13874_v50 = vrot.slane %v8517_v57, 3  ;;  %v2214_v17 = vsel %vm2181_vm5, %v2211_v16, %v2213_v35  ;;  %v2459_v28 = vmax.f32 %v9128_v8, %v2207_v0 }
 0x143   : > { %v13875_v14 = vrot.slane %v8779_v10, 4  ;;  %v13876_v27 = vrot.slane %v8310_v20, 4  ;;  %861 = vst.msk [vmem:[#allocation2 + $0x268] sm:$0xff] %vm751_vm2, %v9261_v3  ;;  %v2463_v12 = vmax.f32 %v9195_v54, %v2214_v17  ;;  %v13877_v56 = vrot.slane %v8767_v60, 4  ;;  %v9327_v17 = vld [vmem:[#allocation2 + $0x1e8] sm:$0xff] }
 0x144   : > { %v2212_v11 = vsel %vm2181_vm5, %v13874_v50, %v2211_v16  ;;  %v13879_v8 = vrot.slane %v8826_v53, 4  ;;  %v13880_v49 = vrot.slane %v8505_v26, 4  ;;  %v13881_v33 = vrot.slane %v8803_v4, 4  ;;  %v9313_v50 = vld [vmem:[#allocation2 + $0x208] sm:$0xff]  ;;  %13886 = vst [vmem:[#allocation54_spill] sm:$0xff] %v9327_v17 }
 0x145   : > { %v2558_v52 = vsel %vm362_vm0, %v13876_v27, %v13875_v14  ;;  %v2462_v61 = vmax.f32 %v9193_v29, %v2212_v11  ;;  %v13878_v19 = vmov %v13875_v14  ;;  %v2571_v54 = vrot.slane %v8854_v5, 4  ;;  %v933_v16 = vld [vmem:[#allocation2 + $0x210] sm:$0xff]  ;;  %13883 = vst [vmem:[#allocation53_spill] sm:$0xff] %v9313_v50 }
 0x146   : > { %v2560_v23 = vsel %vm362_vm0, %v13878_v19, %v13877_v56  ;;  %v2565_v20 = vsel %vm362_vm0, %v13880_v49, %v13879_v8  ;;  %v13882_v59 = vmov %v13879_v8  ;;  %v2573_v7 = vrot.slane %v8838_v9, 4  ;;  %v937_v53 = vld [vmem:[#allocation2 + $0x230] sm:$0xff]  ;;  %v9339_v19 = vld [vmem:[#allocation2 + $0x228] sm:$0xff] }
 0x147   : > { %v2567_v29 = vsel %vm362_vm0, %v13882_v59, %v13881_v33  ;;  %v9304_v36 = vmax.f32 %v2454_v38, %v2558_v52  ;;  %v9306_v10 = vmax.f32 %v2455_v43, %v2560_v23  ;;  %v9308_v62 = vmax.f32 %v2458_v24, %v2565_v20  ;;  %13890 = vst [vmem:[#allocation56_spill] sm:$0xff] %v9339_v19  ;;  %v9341_v23 = vld [vmem:[#allocation2 + $0x250] sm:$0xff] }
 0x148   : > { %v9310_v0 = vmax.f32 %v2459_v28, %v2567_v29  ;;  %v671_v26 = vadd.f32 1.0, %v9038_v58  ;;  %v13884_v11 = vrot.slane %v8517_v57, 4  ;;  %v2574_v38 = vsel %vm362_vm0, %v2571_v54, %v2573_v7 }
 0x149   : > { %v2906_v43 = vmax.f32 %v8443_v31, %v9304_v36  ;;  %v13885_v24 = vmax.f32 %v8439_v15, %v8443_v31  ;;  %v1041_v28 = vmax.f32 %v9191_v63, %v933_v16  ;;  %v13887_v57 = vmax.f32 %v9148_v44, %v9191_v63 }
 0x14a   : > { %v2572_v5 = vsel %vm362_vm0, %v13884_v11, %v2571_v54  ;;  %v1225_v27 = vmax.f32 %v9200_v13, %v933_v16  ;;  %v13888_v52 = vmax.f32 %v9185_v55, %v9191_v63  ;;  %v1040_v15 = vmax.f32 %v9327_v17, %v9313_v50  ;;  %v9350_v63 = vld [vmem:[#allocation2 + $0x248] sm:$0xff]  ;;  %v9352_v55 = vld [vmem:[#allocation2 + $0x270] sm:$0xff] }
 0x14b   : > { %v2982_v58 = vmax.f32 %v13885_v24, %v9304_v36  ;;  %v1133_v14 = vmax.f32 %v13887_v57, %v933_v16  ;;  %v1045_v31 = vmax.f32 %v933_v16, %v937_v53  ;;  %v1044_v8 = vmax.f32 %v9313_v50, %v9339_v19  ;;  %v9365_v11 = vld [vmem:[#allocation2 + $0x268] sm:$0xff] }
 0x14c   : > { %v9337_v56 = vmax.f32 %v13888_v52, %v933_v16  ;;  %v1049_v44 = vmax.f32 %v937_v53, %v9341_v23  ;;  %v1137_v49 = vmax.f32 %v1041_v28, %v937_v53  ;;  %v9348_v20 = vmax.f32 %v1225_v27, %v937_v53 }
 0x14d   : > { %v1229_v13 = vmax.f32 %v1133_v14, %v937_v53  ;;  %v9354_v33 = vmax.f32 %v2462_v61, %v2572_v5  ;;  %v1136_v59 = vmax.f32 %v1040_v15, %v9339_v19  ;;  %v9358_v29 = vmax.f32 %v1045_v31, %v9341_v23 }
 0x14e   : > { %13889 = vst [vmem:[#allocation55_spill] sm:$0xff] %v9337_v56  ;;  %13891 = vst [vmem:[#allocation57_spill] sm:$0xff] %v9348_v20  ;;  %v1048_v54 = vmax.f32 %v9339_v19, %v9350_v63  ;;  %v9363_v16 = vmax.f32 %v1044_v8, %v9350_v63  ;;  %v1233_v53 = vmax.f32 %v1137_v49, %v9341_v23  ;;  %v13899_v57 = vrot.slane %v8495_v37, 2  ;;  %v13913_v20 = vld [vmem:[#allocation47_spill] sm:$0xff] }
 0x14f   : > { %v9369_v24 = vmax.f32 %v1229_v13, %v9341_v23  ;;  %v9374_v5 = vmax.f32 %v1049_v44, %v9352_v55  ;;  %v1232_v28 = vmax.f32 %v1136_v59, %v9350_v63  ;;  %v9389_v31 = vmax.f32 %v2463_v12, %v2574_v38 }
 0x150   : > { %v9382_v27 = vmax.f32 %v1048_v54, %v9365_v11  ;;  %v9385_v52 = vmax.f32 %v1233_v53, %v9352_v55  ;;  %v2907_v8 = vmax.f32 %v8445_v32, %v9306_v10  ;;  %v13895_v13 = vmax.f32 %v8441_v30, %v8445_v32 }
 0x151   : > { %13892 = vst [vmem:[#allocation58_spill] sm:$0xff] %v9369_v24  ;;  %v9394_v44 = vmax.f32 %v1232_v28, %v9365_v11  ;;  %v9403_v54 = vmax.f32 %v2906_v43, %v9308_v62  ;;  %v3062_v53 = vmax.f32 %v2982_v58, %v9308_v62  ;;  %v5256_v28 = vrot.slane %v9354_v33, 6  ;;  %v9424_v58 = vld [vmem:[%s13410_s2] ss:$0 sm:$0xff] }
 0x152   : > { %13893 = vst [vmem:[#allocation59_spill] sm:$0xff] %v9385_v52  ;;  %v2983_v59 = vmax.f32 %v13895_v13, %v9306_v10  ;;  %v9408_v38 = vmax.f32 %v2907_v8, %v9310_v0  ;;  %v13495_v30 = vrot.slane %v9389_v31, 6  ;;  %v703_v32 = vmul.f32 0.5, %v671_v26 }
 0x153   : > { %13894 = vst [vmem:[#allocation60_spill] sm:$0xff] %v9394_v44  ;;  %v9419_v13 = vmax.f32 %v3062_v53, %v9354_v33  ;;  %v9428_v8 = vadd.f32 %v9424_v58, %v8996_v45  ;;  %v13897_v12 = vrot.slane %v8838_v9, 1  ;;  %v13900_v61 = vrot.slane %v8838_v9, 2 }
 0x154   : > { %v3063_v49 = vmax.f32 %v2983_v59, %v9310_v0  ;;  %v13896_v59 = vrot.slane %v8495_v37, 1  ;;  %v5258_v53 = vsel %vm5255_vm7, %v5256_v28, %v13495_v30  ;;  %v735_v15 = vmul.f32 %v703_v32, %v8906_v2 }
 0x155   : > { %7543 = vmatprep.mubr.msk.f32.mxu0 %vm751_vm2, %v5258_v53  ;;  %v620_v45 = vmul.f32 0.5, %v9428_v8  ;;  %v13902_v2 = vrot.slane %v8495_v37, 4  ;;  %v13914_v56 = vmax.f32 %v13913_v20, %v9146_v1 }
 0x156   : > { %v1494_v26 = vsel %vm1459_vm3, %v13897_v12, %v13896_v59  ;;  %v9436_v43 = vmax.f32 %v3063_v49, %v9389_v31  ;;  %v1855_v12 = vsel %vm1820_vm4, %v13900_v61, %v13899_v57  ;;  %v13901_v49 = vrot.slane %v8495_v37, 3  ;;  %851 = vst.msk [vmem:[#allocation2 + $0x1c8] sm:$0xff] %vm751_vm2, %v735_v15  ;;  %7617 = vmatprep.mubr.msk.f32.mxu1 %vm751_vm2, %v735_v15  ;;  %v13904_v15 = vld [vmem:[#allocation7_spill] sm:$0xff] }
 0x157   : > { %v1742_v14 = vmax.f32 %v8838_v9, %v1494_v26  ;;  %v2576_v32 = vsel %vm362_vm0, %v2573_v7, %v13902_v2  ;;  %v9464_v61 = vadd.f32 %v9424_v58, %v9006_v47  ;;  %v1496_v57 = vrot.slane %v8961_v25, 1  ;;  %v13903_v26 = vld [vmem:[#allocation36_spill] sm:$0xff]  ;;  %7618 = vmatmul.mubr.msk.f32.vlgmr.msra.gmra.mrb[0].mxu1 %vm751_vm2, %v9063_v48  ;;  %v7977_v47 = vld [vmem:[%s13411_s3 + $0x4] sm:$0x3] }
 0x158   : > { %13898 = vst [vmem:[#allocation61_spill] sm:$0xff] %v9436_v43  ;;  %v2216_v28 = vsel %vm2181_vm5, %v2213_v35, %v13901_v49  ;;  %v1498_v53 = vrot.slane %v13903_v26, 1  ;;  %7904 = vtanh.f32 %v620_v45  ;;  %v1857_v37 = vrot.slane %v8961_v25, 2  ;;  %7642 = vmatpush3.msk.msra.mxu1 %vm5255_vm7, %v7977_v47  ;;  %7620 = vmatprep.mubr.msk.f32.mxu1 %vm751_vm2, %v9208_v21  ;;  %v13917_v43 = vld [vmem:[#allocation48_spill] sm:$0xff] }
 0x159   : > { %v2103_v59 = vmax.f32 %v1742_v14, %v1855_v12  ;;  %v1859_v9 = vrot.slane %v13903_v26, 2  ;;  %v2218_v35 = vrot.slane %v8961_v25, 3  ;;  %v619_v14 = vmul.f32 0.5, %v9464_v61 }
 0x15a   : > { %v13905_v45 = vrot.slane %v13904_v15, 1  ;;  %v1499_v48 = vsel %vm1459_vm3, %v1496_v57, %v1498_v53  ;;  %v13906_v2 = vrot.slane %v13904_v15, 2  ;;  %v2220_v52 = vrot.slane %v13903_v26, 3 }
 0x15b   : > { %v2464_v7 = vmax.f32 %v2103_v59, %v2216_v28  ;;  %v1745_v28 = vmax.f32 %v8961_v25, %v1499_v48  ;;  %v1860_v47 = vsel %vm1820_vm4, %v1857_v37, %v1859_v9  ;;  %7906 = vtanh.f32 %v619_v14  ;;  %7621 = vmatmul.mubr.msk.f32.gmra.mrb[2].mxu1 %vm751_vm2, %v9097_v42 }
 0x15c   : > { %v1497_v12 = vsel %vm1459_vm3, %v13905_v45, %v1496_v57  ;;  %v1858_v59 = vsel %vm1820_vm4, %v13906_v2, %v1857_v37  ;;  %v13908_v45 = vrot.slane %v13904_v15, 3  ;;  %v2580_v48 = vrot.slane %v13903_v26, 4  ;;  %v13910_v2 = vld [vmem:[#allocation5_spill] sm:$0xff]  ;;  %7623 = vmatprep.mubr.msk.f32.mxu1 %vm751_vm2, %v9216_v39 }
 0x15d   : > { %v1744_v49 = vmax.f32 %v13904_v15, %v1497_v12  ;;  %v9490_v30 = vmax.f32 %v2464_v7, %v2576_v32  ;;  %v2106_v44 = vmax.f32 %v1745_v28, %v1860_v47  ;;  %v2578_v12 = vrot.slane %v8961_v25, 4  ;;  %v13909_v7 = vld [vmem:[#allocation42_spill] sm:$0xff]  ;;  %v924_v25 = vld [vmem:[#allocation2 + $0x1c8] sm:$0xff] }
 0x15e   : > { %v2219_v57 = vsel %vm2181_vm5, %v13908_v45, %v2218_v35  ;;  %v2221_v32 = vsel %vm2181_vm5, %v2218_v35, %v2220_v52  ;;  %v9504_v14 = vadd.f32 %v9424_v58, %v13909_v7  ;;  %v13911_v45 = vrot.slane %v13910_v2, 1 }
 0x15f   : > { %13907 = vst [vmem:[#allocation36_spill] sm:$0xff] %v9490_v30  ;;  %v2105_v21 = vmax.f32 %v1744_v49, %v1858_v59  ;;  %v5259_v37 = vrot.slane %v9490_v30, 6  ;;  %v2467_v59 = vmax.f32 %v2106_v44, %v2221_v32  ;;  %v13912_v42 = vrot.slane %v13904_v15, 4  ;;  %7624 = vmatmul.mubr.msk.f32.gmra.mrb[4].mxu1 %vm751_vm2, %v9213_v34 }
 0x160   : > { %v1501_v49 = vsel %vm1459_vm3, %v1498_v53, %v13911_v45  ;;  %v2581_v35 = vsel %vm362_vm0, %v2578_v12, %v2580_v48  ;;  %v1032_v24 = vmax.f32 %v9146_v1, %v924_v25  ;;  %v1036_v7 = vmax.f32 %v924_v25, %v9327_v17  ;;  %v13916_v45 = vld [vmem:[#allocation51_spill] sm:$0xff]  ;;  %7626 = vmatprep.mubr.msk.f32.mxu1 %vm751_vm2, %v9222_v18 }
 0x161   : > { %v2466_v28 = vmax.f32 %v2105_v21, %v2219_v57  ;;  %v2579_v47 = vsel %vm362_vm0, %v13912_v42, %v2578_v12  ;;  %v9520_v53 = vmax.f32 %v13914_v56, %v924_v25  ;;  %v1216_v39 = vmax.f32 %v13916_v45, %v924_v25 }
 0x162   : > { %v13918_v44 = vmax.f32 %v13917_v43, %v9146_v1  ;;  %v13919_v15 = vrot.slane %v9389_v31, 6  ;;  %v9533_v32 = vmax.f32 %v2467_v59, %v2581_v35  ;;  %v9538_v56 = vmax.f32 %v1032_v24, %v9327_v17  ;;  %v7978_v59 = vld [vmem:[%s13411_s3] sm:$0x3]  ;;  %v13931_v1 = vld [vmem:[#allocation38_spill] sm:$0xff] }
 0x163   : > { %13915 = vst [vmem:[#allocation7_spill] sm:$0xff] %v9520_v53  ;;  %v9531_v12 = vmax.f32 %v2466_v28, %v2579_v47  ;;  %v9541_v20 = vmax.f32 %v1036_v7, %v9313_v50  ;;  %v9546_v43 = vmax.f32 %v1216_v39, %v9327_v17  ;;  %v622_v7 = vmul.f32 0.5, %v9504_v14  ;;  %7627 = vmatmul.mubr.msk.f32.gmra.mrb[6].mxu1 %vm751_vm2, %v9219_v46 }
 0x164   : > { %v9526_v57 = vmax.f32 %v13918_v44, %v924_v25  ;;  %v5260_v21 = vsel %vm5255_vm7, %v13919_v15, %v5259_v37  ;;  %13920 = vst [vmem:[#allocation42_spill] sm:$0xff] %v9538_v56  ;;  %v7905_v37 = vpop.eup %7904  ;;  %v5262_v28 = vrot.slane %v9533_v32, 6  ;;  %v1746_v39 = vmax.f32 %v13903_v26, %v1501_v49  ;;  %v13925_v49 = vld [vmem:[#allocation43_spill] sm:$0xff]  ;;  %7629 = vmatprep.mubr.msk.f32.mxu1 %vm751_vm2, %v9253_v51  ;;  %v13932_v51 = vld [vmem:[#allocation37_spill] sm:$0xff] }
 0x165   : > { %13921 = vst [vmem:[#allocation5_spill] sm:$0xff] %v9541_v20  ;;  %7544 = vmatmul.mubr.msk.f32.vlgmr.msra.gmra.mrb[32].mxu0 %vm751_vm2, %v5260_v21  ;;  %v5261_v24 = vrot.slane %v9531_v12, 6  ;;  %v684_v35 = vadd.f32 1.0, %v7905_v37  ;;  %v13922_v18 = vrot.slane %v13910_v2, 2  ;;  %v13923_v15 = vrot.slane %v13910_v2, 3  ;;  %v9945_v56 = vld [vmem:[#allocation2 + $0x1a0] sm:$0xff] }
 0x166   : > { %7592 = vmatpush3.msk.msra.mxu0 %vm5255_vm7, %v7978_v59  ;;  %v7907_v59 = vpop.eup %7906  ;;  %7908 = vtanh.f32 %v622_v7  ;;  %v13924_v37 = vrot.slane %v13910_v2, 4  ;;  %v1503_v34 = vrot.slane %v13931_v1, 1 }
 0x167   : > { %v5263_v45 = vsel %vm5255_vm7, %v5261_v24, %v5262_v28  ;;  %v1862_v44 = vsel %vm1820_vm4, %v1859_v9, %v13922_v18  ;;  %v2223_v21 = vsel %vm2181_vm5, %v2220_v52, %v13923_v15  ;;  %v716_v47 = vmul.f32 0.5, %v684_v35  ;;  %v9584_v9 = vld [vmem:[#allocation2 + $0x328] sm:$0xff]  ;;  %v13926_v35 = vld [vmem:[#allocation25_spill] sm:$0xff]  ;;  %v13927_v15 = vld [vmem:[#allocation23_spill] sm:$0xff]  ;;  %7630 = vmatmul.mubr.msk.f32.gmra.mrb[8].mxu1 %vm751_vm2, %v9225_v41 }
 0x168   : > { %7546 = vmatprep.mubr.msk.f32.mxu0 %vm751_vm2, %v5263_v45  ;;  %v2583_v26 = vsel %vm362_vm0, %v2580_v48, %v13924_v37  ;;  %v9582_v24 = vadd.f32 %v9424_v58, %v13925_v49  ;;  %v972_v18 = vld [vmem:[#allocation2 + $0x348] sm:$0xff]  ;;  %v683_v46 = vadd.f32 1.0, %v7907_v59  ;;  %v2107_v52 = vmax.f32 %v1746_v39, %v1862_v44  ;;  %7632 = vmatprep.mubr.msk.f32.mxu1 %vm751_vm2, %v9261_v3 }
 0x169   : > { %v13928_v45 = vld [vmem:[#allocation24_spill] sm:$0xff]  ;;  %v748_v58 = vmul.f32 %v716_v47, %v9428_v8  ;;  %v1505_v59 = vrot.slane %v13932_v51, 1 }
 0x16a   : > { %v13929_v7 = vmax.f32 %v13927_v15, %v13928_v45  ;;  %v13930_v48 = vmax.f32 %v13928_v45, %v13926_v35  ;;  %v621_v37 = vmul.f32 0.5, %v9582_v24  ;;  %v976_v49 = vld [vmem:[#allocation2 + $0x368] sm:$0xff]  ;;  %v715_v39 = vmul.f32 0.5, %v683_v46 }
 0x16b   : > { %v2468_v44 = vmax.f32 %v2107_v52, %v2223_v21  ;;  %864 = vst.msk [vmem:[#allocation2 + $0x290] sm:$0xff] %vm751_vm2, %v748_v58  ;;  %v1506_v45 = vsel %vm1459_vm3, %v1503_v34, %v1505_v59  ;;  %7633 = vmatmul.mubr.msk.f32.gmra.mrb[10].mxu1 %vm751_vm2, %v9256_v40 }
 0x16c   : > { %v1164_v42 = vmax.f32 %v13929_v7, %v13926_v35  ;;  %v1168_v2 = vmax.f32 %v13930_v48, %v9584_v9  ;;  %7910 = vtanh.f32 %v621_v37  ;;  %v13933_v35 = vld [vmem:[#allocation11_spill] sm:$0xff]  ;;  %v1864_v7 = vrot.slane %v13931_v1, 2 }
 0x16d   : > { %v13934_v8 = vrot.slane %v13933_v35, 1  ;;  %v9612_v21 = vmax.f32 %v2468_v44, %v2583_v26  ;;  %v1749_v48 = vmax.f32 %v13931_v1, %v1506_v45  ;;  %v1866_v37 = vrot.slane %v13932_v51, 2 }
 0x16e   : > { %v1260_v25 = vmax.f32 %v1164_v42, %v9584_v9  ;;  %v1264_v15 = vmax.f32 %v1168_v2, %v972_v18  ;;  %v747_v42 = vmul.f32 %v715_v39, %v9464_v61  ;;  %v13938_v2 = vrot.slane %v13933_v35, 2 }
 0x16f   : > { %v1504_v47 = vsel %vm1459_vm3, %v13934_v8, %v1503_v34  ;;  %13935 = vst [vmem:[#allocation47_spill] sm:$0xff] %v9612_v21  ;;  %v5264_v61 = vrot.slane %v9612_v21, 6  ;;  %v2227_v26 = vrot.slane %v13932_v51, 3  ;;  %v2585_v39 = vrot.slane %v13931_v1, 4 }
 0x170   : > { %v9614_v46 = vmax.f32 %v1260_v25, %v972_v18  ;;  %v9616_v41 = vmax.f32 %v1264_v15, %v976_v49  ;;  %v1748_v52 = vmax.f32 %v13933_v35, %v1504_v47  ;;  %v1865_v34 = vsel %vm1820_vm4, %v13938_v2, %v1864_v7  ;;  %863 = vst.msk [vmem:[#allocation2 + $0x288] sm:$0xff] %vm751_vm2, %v747_v42  ;;  %v7909_v3 = vpop.eup %7908 }
 0x171   : > { %v2225_v25 = vrot.slane %v13931_v1, 3  ;;  %v1867_v18 = vsel %vm1820_vm4, %v1864_v7, %v1866_v37  ;;  %v2587_v44 = vrot.slane %v13932_v51, 4  ;;  %7635 = vmatprep.mubr.msk.f32.mxu1 %vm751_vm2, %v747_v42  ;;  %v5265_v15 = vsel %vm5255_vm7, %v5262_v28, %v5264_v61  ;;  %v13941_v42 = vld [vmem:[#allocation8_spill] sm:$0xff] }
 0x172   : > { %13936 = vst [vmem:[#allocation51_spill] sm:$0xff] %v9614_v46  ;;  %13937 = vst [vmem:[#allocation48_spill] sm:$0xff] %v9616_v41  ;;  %v2109_v49 = vmax.f32 %v1748_v52, %v1865_v34  ;;  %v2110_v8 = vmax.f32 %v1749_v48, %v1867_v18  ;;  %v13939_v47 = vrot.slane %v13933_v35, 3  ;;  %7547 = vmatmul.mubr.msk.f32.gmra.mrb[34].mxu0 %vm751_vm2, %v5265_v15  ;;  %v13940_v7 = vrot.slane %v13933_v35, 4  ;;  %v9649_v48 = vld [vmem:[#allocation2 + $0x290] sm:$0xff] }
 0x173   : > { %v2228_v2 = vsel %vm2181_vm5, %v2225_v25, %v2227_v26  ;;  %v2588_v52 = vsel %vm362_vm0, %v2585_v39, %v2587_v44  ;;  %v13942_v34 = vrot.slane %v13941_v42, 1  ;;  %v686_v61 = vadd.f32 1.0, %v7909_v3  ;;  %7636 = vmatmul.mubr.msk.f32.gmra.mrb[12].mxu1 %vm751_vm2, %v748_v58 }
 0x174   : > { %v2226_v45 = vsel %vm2181_vm5, %v13939_v47, %v2225_v25  ;;  %v2586_v1 = vsel %vm362_vm0, %v13940_v7, %v2585_v39  ;;  %v2471_v18 = vmax.f32 %v2110_v8, %v2228_v2  ;;  %v13943_v47 = vrot.slane %v13941_v42, 2 }
 0x175   : > { %v2470_v40 = vmax.f32 %v2109_v49, %v2226_v45  ;;  %v1508_v28 = vsel %vm1459_vm3, %v1505_v59, %v13942_v34  ;;  %v13944_v39 = vmax.f32 %v9341_v23, %v9352_v55  ;;  %v13950_v23 = vrot.slane %v13941_v42, 3 }
 0x176   : > { %v1750_v25 = vmax.f32 %v13932_v51, %v1508_v28  ;;  %v1869_v49 = vsel %vm1820_vm4, %v1866_v37, %v13943_v47  ;;  %v13946_v51 = vmax.f32 %v9358_v29, %v9352_v55  ;;  %v718_v37 = vmul.f32 0.5, %v686_v61  ;;  %v7911_v2 = vpop.eup %7910  ;;  %v13952_v29 = vld [vmem:[#allocation40_spill] sm:$0xff] }
 0x177   : > { %v9662_v59 = vmax.f32 %v13944_v39, %v9649_v48  ;;  %v9672_v58 = vmax.f32 %v2470_v40, %v2586_v1  ;;  %v9674_v8 = vmax.f32 %v2471_v18, %v2588_v52  ;;  %v9676_v7 = vld [vmem:[#allocation2 + $0x288] sm:$0xff]  ;;  %v2230_v34 = vsel %vm2181_vm5, %v2227_v26, %v13950_v23  ;;  %v13962_v26 = vld [vmem:[#allocation13_spill] sm:$0xff] }
 0x178   : > { %v9670_v15 = vmax.f32 %v13946_v51, %v9649_v48  ;;  %v2111_v45 = vmax.f32 %v1750_v25, %v1869_v49  ;;  %v13951_v28 = vrot.slane %v13941_v42, 4  ;;  %v1510_v39 = vrot.slane %v13952_v29, 1  ;;  %v13953_v51 = vld [vmem:[#allocation39_spill] sm:$0xff] }
 0x179   : > { %13945 = vst [vmem:[#allocation43_spill] sm:$0xff] %v9662_v59  ;;  %13948 = vst [vmem:[#allocation23_spill] sm:$0xff] %v9672_v58  ;;  %v1512_v61 = vrot.slane %v13953_v51, 1  ;;  %v13954_v1 = vmax.f32 %v9350_v63, %v9365_v11  ;;  %v750_v18 = vmul.f32 %v718_v37, %v9504_v14  ;;  %v685_v25 = vadd.f32 1.0, %v7911_v2 }
 0x17a   : > { %13947 = vst [vmem:[#allocation25_spill] sm:$0xff] %v9670_v15  ;;  %13949 = vst [vmem:[#allocation24_spill] sm:$0xff] %v9674_v8  ;;  %v2590_v47 = vsel %vm362_vm0, %v2587_v44, %v13951_v28  ;;  %v13956_v44 = vmax.f32 %v9363_v16, %v9365_v11  ;;  %v2922_v49 = vmax.f32 %v9531_v12, %v9672_v58  ;;  %v5266_v14 = vrot.slane %v9672_v58, 6 }
 0x17b   : > { %v9692_v52 = vmax.f32 %v13954_v1, %v9676_v7  ;;  %v2923_v63 = vmax.f32 %v9533_v32, %v9674_v8  ;;  %v13958_v23 = vmax.f32 %v9354_v33, %v9531_v12  ;;  %v13960_v16 = vmax.f32 %v9389_v31, %v9533_v32  ;;  %866 = vst.msk [vmem:[#allocation2 + $0x2b0] sm:$0xff] %vm751_vm2, %v750_v18 }
 0x17c   : > { %v9700_v42 = vmax.f32 %v13956_v44, %v9676_v7  ;;  %v5267_v37 = vrot.slane %v9674_v8, 6  ;;  %v717_v2 = vmul.f32 0.5, %v685_v25  ;;  %v2472_v44 = vmax.f32 %v2111_v45, %v2230_v34 }
 0x17d   : > { %13955 = vst [vmem:[#allocation38_spill] sm:$0xff] %v9692_v52  ;;  %v9711_v28 = vmax.f32 %v13958_v23, %v9672_v58  ;;  %v9717_v1 = vmax.f32 %v13960_v16, %v9674_v8  ;;  %v13963_v40 = vrot.slane %v13962_v26, 1  ;;  %v1513_v23 = vsel %vm1459_vm3, %v1510_v39, %v1512_v61 }
 0x17e   : > { %13957 = vst [vmem:[#allocation37_spill] sm:$0xff] %v9700_v42  ;;  %v5268_v35 = vsel %vm5255_vm7, %v5266_v14, %v5267_v37  ;;  %v1753_v16 = vmax.f32 %v13952_v29, %v1513_v23  ;;  %v1871_v46 = vrot.slane %v13952_v29, 2  ;;  %v749_v15 = vmul.f32 %v717_v2, %v9582_v24 }
 0x17f   : > { %13959 = vst [vmem:[#allocation11_spill] sm:$0xff] %v9711_v28  ;;  %13961 = vst [vmem:[#allocation8_spill] sm:$0xff] %v9717_v1  ;;  %v1511_v3 = vsel %vm1459_vm3, %v13963_v40, %v1510_v39  ;;  %7549 = vmatprep.mubr.msk.f32.mxu0 %vm751_vm2, %v5268_v35  ;;  %v9732_v25 = vmax.f32 %v2472_v44, %v2590_v47  ;;  %v1873_v45 = vrot.slane %v13953_v51, 2  ;;  %v2232_v34 = vrot.slane %v13952_v29, 3 }
 0x180   : > { %v1752_v41 = vmax.f32 %v13962_v26, %v1511_v3  ;;  %v13965_v39 = vrot.slane %v13962_v26, 2  ;;  %v2234_v3 = vrot.slane %v13953_v51, 3  ;;  %v2592_v14 = vrot.slane %v13952_v29, 4  ;;  %865 = vst.msk [vmem:[#allocation2 + $0x2a8] sm:$0xff] %vm751_vm2, %v749_v15  ;;  %7638 = vmatprep.mubr.msk.f32.mxu1 %vm751_vm2, %v749_v15 }
 0x181   : > { %13964 = vst [vmem:[#allocation40_spill] sm:$0xff] %v9732_v25  ;;  %v13966_v35 = vmax.f32 %v9490_v30, %v9612_v21  ;;  %v5269_v2 = vrot.slane %v9732_v25, 6  ;;  %v1874_v44 = vsel %vm1820_vm4, %v1871_v46, %v1873_v45  ;;  %v13968_v23 = vrot.slane %v13962_v26, 3  ;;  %7639 = vmatmul.mubr.msk.f32.gmra.mrb[14].mxu1 %vm751_vm2, %v750_v18 }
 0x182   : > { %v1872_v40 = vsel %vm1820_vm4, %v13965_v39, %v1871_v46  ;;  %v2114_v39 = vmax.f32 %v1753_v16, %v1874_v44  ;;  %v2235_v24 = vsel %vm2181_vm5, %v2232_v34, %v2234_v3  ;;  %v13970_v46 = vrot.slane %v13953_v51, 4  ;;  %v9769_v44 = vld [vmem:[#allocation2 + $0x2b0] sm:$0xff] }
 0x183   : > { %v9749_v47 = vmax.f32 %v13966_v35, %v9732_v25  ;;  %v2113_v29 = vmax.f32 %v1752_v41, %v1872_v40  ;;  %v2233_v42 = vsel %vm2181_vm5, %v13968_v23, %v2232_v34  ;;  %v5270_v19 = vsel %vm5255_vm7, %v5267_v37, %v5269_v2  ;;  %v13971_v41 = vld [vmem:[#allocation14_spill] sm:$0xff]  ;;  %13973 = vst [vmem:[#allocation13_spill] sm:$0xff] %v9769_v44 }
 0x184   : > { %v13969_v35 = vrot.slane %v13962_v26, 4  ;;  %v2595_v15 = vsel %vm362_vm0, %v2592_v14, %v13970_v46  ;;  %v13972_v16 = vrot.slane %v13971_v41, 1  ;;  %7550 = vmatmul.mubr.msk.f32.gmra.mrb[36].mxu0 %vm751_vm2, %v5270_v19  ;;  %v2475_v18 = vmax.f32 %v2114_v39, %v2235_v24 }
 0x185   : > { %13967 = vst [vmem:[#allocation39_spill] sm:$0xff] %v9749_v47  ;;  %v2474_v34 = vmax.f32 %v2113_v29, %v2233_v42  ;;  %v13974_v26 = vrot.slane %v13971_v41, 2  ;;  %v1061_v2 = vmax.f32 %v9649_v48, %v9769_v44  ;;  %v13976_v19 = vmax.f32 %v9352_v55, %v9649_v48  ;;  %v9927_v47 = vld [vmem:[#allocation2 + $0x158] sm:$0x3f] }
 0x186   : > { %v2593_v20 = vsel %vm362_vm0, %v13969_v35, %v2592_v14  ;;  %v1515_v40 = vsel %vm1459_vm3, %v1512_v61, %v13972_v16  ;;  %v9778_v14 = vld [vmem:[#allocation2 + $0x2d0] sm:$0xff]  ;;  %v9798_v35 = vmax.f32 %v2475_v18, %v2595_v15 }
 0x187   : > { %v1754_v37 = vmax.f32 %v13953_v51, %v1515_v40  ;;  %v1876_v23 = vsel %vm1820_vm4, %v1873_v45, %v13974_v26  ;;  %13975 = vst [vmem:[#allocation14_spill] sm:$0xff] %v9778_v14  ;;  %v1065_v61 = vmax.f32 %v9769_v44, %v9778_v14  ;;  %v9786_v42 = vmax.f32 %v13976_v19, %v9769_v44  ;;  %v7980_v40 = vld [vmem:[#allocation2 + $0x2f0] sm:$0xff]  ;;  %v9806_v59 = vld [vmem:[#allocation2 + $0x2a8] sm:$0xff] }
 0x188   : > { %v13978_v45 = vmax.f32 %v9374_v5, %v9649_v48  ;;  %v9796_v39 = vmax.f32 %v2474_v34, %v2593_v20  ;;  %13981 = vst [vmem:[#allocation65_spill] sm:$0xff] %v9798_v35  ;;  %v1157_v16 = vmax.f32 %v1061_v2, %v9778_v14  ;;  %v13982_v19 = vrot.slane %v13971_v41, 3  ;;  %13983 = vst [vmem:[#allocation66_spill] sm:$0xff] %v9806_v59  ;;  %v7981_v18 = vld [vmem:[#allocation2 + $0x310] sm:$0xff]  ;;  %v13996_v14 = vld [vmem:[#allocation27_spill] sm:$0xff] }
 0x189   : > { %13977 = vst [vmem:[#allocation62_spill] sm:$0xff] %v9786_v42  ;;  %v2115_v46 = vmax.f32 %v1754_v37, %v1876_v23  ;;  %v1161_v55 = vmax.f32 %v1065_v61, %v7980_v40  ;;  %v9816_v15 = vmax.f32 %v2923_v63, %v9798_v35  ;;  %v9820_v23 = vld [vmem:[#allocation2 + $0x2c8] sm:$0xff]  ;;  %v13987_v61 = vmax.f32 %v9365_v11, %v9676_v7 }
 0x18a   : > { %v9794_v29 = vmax.f32 %v13978_v45, %v9769_v44  ;;  %13980 = vst [vmem:[#allocation64_spill] sm:$0xff] %v9796_v39  ;;  %v2237_v24 = vsel %vm2181_vm5, %v2234_v3, %v13982_v19  ;;  %v9813_v48 = vmax.f32 %v2922_v49, %v9796_v39  ;;  %v1253_v34 = vmax.f32 %v1157_v16, %v7980_v40  ;;  %v7983_v19 = vld [vmem:[#allocation2 + $0x330] sm:$0xff] }
 0x18b   : > { %13985 = vst [vmem:[#allocation68_spill] sm:$0xff] %v9816_v15  ;;  %v1257_v37 = vmax.f32 %v1161_v55, %v7981_v18  ;;  %v1060_v3 = vmax.f32 %v9676_v7, %v9806_v59  ;;  %13986 = vst [vmem:[#allocation69_spill] sm:$0xff] %v9820_v23  ;;  %v1064_v2 = vmax.f32 %v9806_v59, %v9820_v23  ;;  %v13993_v20 = vrot.slane %v13971_v41, 4 }
 0x18c   : > { %13979 = vst [vmem:[#allocation63_spill] sm:$0xff] %v9794_v29  ;;  %13984 = vst [vmem:[#allocation67_spill] sm:$0xff] %v9813_v48  ;;  %v9828_v49 = vmax.f32 %v13987_v61, %v9806_v59  ;;  %v13989_v45 = vmax.f32 %v9382_v27, %v9676_v7  ;;  %v9840_v55 = vmax.f32 %v1253_v34, %v7981_v18  ;;  %v7984_v61 = vld [vmem:[#allocation2 + $0x2e8] sm:$0xff]  ;;  %v5271_v7 = vrot.slane %v9796_v39, 6 }
 0x18d   : > { %v9842_v26 = vmax.f32 %v1257_v37, %v7983_v19  ;;  %v1156_v11 = vmax.f32 %v1060_v3, %v9820_v23  ;;  %v1160_v5 = vmax.f32 %v1064_v2, %v7984_v61  ;;  %v7985_v19 = vld [vmem:[#allocation2 + $0x308] sm:$0xff]  ;;  %v2476_v2 = vmax.f32 %v2115_v46, %v2237_v24  ;;  %v7987_v24 = vld [vmem:[#allocation2 + $0x120] sm:$0xff] }
 0x18e   : > { %13988 = vst [vmem:[#allocation70_spill] sm:$0xff] %v9828_v49  ;;  %v9836_v16 = vmax.f32 %v13989_v45, %v9806_v59  ;;  %13991 = vst [vmem:[#allocation72_spill] sm:$0xff] %v9840_v55  ;;  %v5272_v45 = vrot.slane %v9798_v35, 6  ;;  %v13994_v63 = vrot.slane %v13953_v51, 4  ;;  %v7990_v49 = vld [vmem:[#allocation2 + $0x118] sm:$0x3f] }
 0x18f   : > { %13992 = vst [vmem:[#allocation73_spill] sm:$0xff] %v9842_v26  ;;  %v1252_v37 = vmax.f32 %v1156_v11, %v7984_v61  ;;  %v1256_v40 = vmax.f32 %v1160_v5, %v7985_v19  ;;  %v13995_v26 = vmov %v13993_v20  ;;  %v7986_v5 = vld [vmem:[#allocation2 + $0x100] sm:$0xff]  ;;  %v14000_v61 = vld [vmem:[#allocation49_spill] sm:$0xff]  ;;  %v14006_v59 = vld [vmem:[#allocation50_spill] sm:$0xff] }
 0x190   : > { %13990 = vst [vmem:[#allocation71_spill] sm:$0xff] %v9836_v16  ;;  %v5273_v3 = vsel %vm5255_vm7, %v5271_v7, %v5272_v45  ;;  %v2597_v27 = vsel %vm362_vm0, %v13994_v63, %v13993_v20  ;;  %v9862_v42 = vmax.f32 %v13996_v14, %v13995_v26  ;;  %v1011_v46 = vmax.f32 %v7986_v5, %v7987_v24  ;;  %v14002_v20 = vld [vmem:[#allocation41_spill] sm:$0xff]  ;;  %v9897_v26 = vld [vmem:[#allocation2 + $0x180] sm:$0xff] }
 0x191   : > { %v9864_v34 = vmax.f32 %v1252_v37, %v7985_v19  ;;  %v9867_v11 = vmax.f32 %v1256_v40, %v9584_v9  ;;  %7552 = vmatprep.mubr.msk.f32.mxu0 %vm751_vm2, %v5273_v3  ;;  %v1517_v7 = vrot.slane %v14000_v61, 1  ;;  %v9871_v51 = vmax.f32 %v2476_v2, %v2597_v27  ;;  %v6534_v9 = vld [vmem:[%s13411_s3 + $0x6] sm:$0x3] }
 0x192   : > { %13997 = vst [vmem:[#allocation27_spill] sm:$0xff] %v9862_v42  ;;  %v13518_v63 = vrot.slane %v14002_v20, 1  ;;  %v1878_v41 = vrot.slane %v14000_v61, 2  ;;  %v13520_v14 = vrot.slane %v14002_v20, 2  ;;  %v9881_v37 = vld [vmem:[#allocation2 + $0x140] sm:$0xff]  ;;  %v2239_v27 = vrot.slane %v14000_v61, 3  ;;  %7691 = vmatprep.subr.msk.mxu1 %vm5255_vm7, %v6534_v9 }
 0x193   : > { %13998 = vst [vmem:[#allocation74_spill] sm:$0xff] %v9864_v34  ;;  %13999 = vst [vmem:[#allocation75_spill] sm:$0xff] %v9867_v11  ;;  %v1107_v19 = vmax.f32 %v1011_v46, %v9881_v37  ;;  %v14003_v2 = vmax.f32 %v9612_v21, %v9732_v25  ;;  %v5274_v18 = vrot.slane %v9871_v51, 6  ;;  %v9899_v46 = vld [vmem:[#allocation2 + $0x160] sm:$0xff]  ;;  %v13526_v11 = vrot.slane %v14002_v20, 3 }
 0x194   : > { %14001 = vst [vmem:[#allocation49_spill] sm:$0xff] %v9871_v51  ;;  %v1520_v3 = vsel %vm1459_vm3, %v1517_v7, %v13518_v63  ;;  %v2599_v55 = vrot.slane %v14000_v61, 4  ;;  %v13529_v23 = vrot.slane %v14002_v20, 4 }
 0x195   : > { %v9892_v5 = vmax.f32 %v14003_v2, %v9871_v51  ;;  %v1203_v9 = vmax.f32 %v1107_v19, %v9899_v46  ;;  %v1881_v2 = vsel %vm1820_vm4, %v1878_v41, %v13520_v14  ;;  %v5275_v40 = vsel %vm5255_vm7, %v5272_v45, %v5274_v18  ;;  %v9918_v14 = vld [vmem:[#allocation2 + $0x138] sm:$0x3f] }
 0x196   : > { %v1757_v34 = vmax.f32 %v14000_v61, %v1520_v3  ;;  %7553 = vmatmul.mubr.msk.f32.gmra.mrb[38].mxu0 %vm751_vm2, %v5275_v40  ;;  %v2242_v63 = vsel %vm2181_vm5, %v2239_v27, %v13526_v11  ;;  %v1014_v44 = vmax.f32 %v7990_v49, %v9918_v14  ;;  %v1015_v45 = vmax.f32 %v7987_v24, %v9881_v37  ;;  %v14005_v3 = vld [vmem:[#allocation52_spill] sm:$0xff] }
 0x197   : > { %14004 = vst [vmem:[#allocation41_spill] sm:$0xff] %v9892_v5  ;;  %v1299_v19 = vmax.f32 %v1203_v9, %v9897_v26  ;;  %v2602_v61 = vsel %vm362_vm0, %v2599_v55, %v13529_v23  ;;  %v1524_v40 = vrot.slane %v14005_v3, 1  ;;  %v13534_v9 = vrot.slane %v14006_v59, 1 }
 0x198   : > { %v2118_v18 = vmax.f32 %v1757_v34, %v1881_v2  ;;  %v1110_v49 = vmax.f32 %v1014_v44, %v9927_v47  ;;  %v1111_v24 = vmax.f32 %v1015_v45, %v9899_v46  ;;  %v9942_v44 = vld [vmem:[#allocation2 + $0x178] sm:$0x3f] }
 0x199   : > { %v1516_v52 = vrot.slane %v1299_v19, 1  ;;  %v1877_v29 = vrot.slane %v1299_v19, 2  ;;  %v2238_v16 = vrot.slane %v1299_v19, 3  ;;  %v2598_v11 = vrot.slane %v1299_v19, 4 }
 0x19a   : > { %v2479_v42 = vmax.f32 %v2118_v18, %v2242_v63  ;;  %v1527_v34 = vsel %vm1459_vm3, %v1524_v40, %v13534_v9  ;;  %v9940_v18 = vld [vmem:[#allocation2 + $0x198] sm:$0x3f]  ;;  %v1206_v45 = vmax.f32 %v1110_v49, %v9942_v44  ;;  %v1207_v9 = vmax.f32 %v1111_v24, %v9897_v26 }
 0x19b   : > { %v1518_v2 = vsel %vm1459_vm3, %v1516_v52, %v1517_v7  ;;  %v1879_v23 = vsel %vm1820_vm4, %v1877_v29, %v1878_v41  ;;  %v2240_v1 = vsel %vm2181_vm5, %v2238_v16, %v2239_v27  ;;  %v2600_v28 = vsel %vm362_vm0, %v2598_v11, %v2599_v55 }
 0x19c   : > { %v1756_v50 = vmax.f32 %v1299_v19, %v1518_v2  ;;  %v9938_v63 = vmax.f32 %v2479_v42, %v2602_v61  ;;  %v1761_v52 = vmax.f32 %v14005_v3, %v1527_v34  ;;  %v1885_v29 = vrot.slane %v14005_v3, 2 }
 0x19d   : > { %v13540_v16 = vrot.slane %v14006_v59, 2  ;;  %v2246_v55 = vrot.slane %v14005_v3, 3  ;;  %v14008_v7 = vmax.f32 %v9674_v8, %v9798_v35  ;;  %v1302_v61 = vmax.f32 %v1206_v45, %v9940_v18 }
 0x19e   : > { %14007 = vst [vmem:[#allocation52_spill] sm:$0xff] %v9938_v63  ;;  %v2117_v42 = vmax.f32 %v1756_v50, %v1879_v23  ;;  %v1303_v49 = vmax.f32 %v1207_v9, %v9945_v56  ;;  %v2606_v2 = vrot.slane %v14005_v3, 4  ;;  %v14011_v9 = vrot.slane %v14002_v20, 1 }
 0x19f   : > { %v9958_v41 = vmax.f32 %v14008_v7, %v9938_v63  ;;  %v1888_v50 = vsel %vm1820_vm4, %v1885_v29, %v13540_v16  ;;  %v1521_v7 = vrot.slane %v1302_v61, 1  ;;  %v1882_v11 = vrot.slane %v1302_v61, 2 }
 0x1a0   : > { %v2478_v23 = vmax.f32 %v2117_v42, %v2240_v1  ;;  %v2122_v24 = vmax.f32 %v1761_v52, %v1888_v50  ;;  %v2243_v17 = vrot.slane %v1302_v61, 3  ;;  %v2603_v27 = vrot.slane %v1302_v61, 4 }
 0x1a1   : > { %14009 = vst [vmem:[#allocation50_spill] sm:$0xff] %v9958_v41  ;;  %v1523_v19 = vrot.slane %v1303_v49, 1  ;;  %v1884_v45 = vrot.slane %v1303_v49, 2  ;;  %v2245_v53 = vrot.slane %v1303_v49, 3  ;;  %v1522_v21 = vsel %vm1459_vm3, %v14011_v9, %v1521_v7 }
 0x1a2   : > { %v9970_v15 = vmax.f32 %v2478_v23, %v2600_v28  ;;  %v1759_v16 = vmax.f32 %v1302_v61, %v1521_v7  ;;  %v14012_v1 = vrot.slane %v14002_v20, 2  ;;  %v14013_v3 = vrot.slane %v14002_v20, 3 }
 0x1a3   : > { %v14014_v50 = vmax.f32 %v9672_v58, %v9796_v39  ;;  %v1758_v9 = vmax.f32 %v14002_v20, %v1522_v21  ;;  %v14016_v34 = vrot.slane %v14002_v20, 4  ;;  %v1525_v8 = vsel %vm1459_vm3, %v1523_v19, %v1524_v40 }
 0x1a4   : > { %14010 = vst [vmem:[#allocation76_spill] sm:$0xff] %v9970_v15  ;;  %v1883_v52 = vsel %vm1820_vm4, %v14012_v1, %v1882_v11  ;;  %v2244_v42 = vsel %vm2181_vm5, %v14013_v3, %v2243_v17  ;;  %v2930_v28 = vmax.f32 %v9796_v39, %v9970_v15  ;;  %v5276_v7 = vrot.slane %v9970_v15, 6 }
 0x1a5   : > { %v9987_v23 = vmax.f32 %v14014_v50, %v9970_v15  ;;  %v2120_v1 = vmax.f32 %v1759_v16, %v1882_v11  ;;  %v2604_v3 = vsel %vm362_vm0, %v14016_v34, %v2603_v27  ;;  %v14017_v30 = vrot.slane %v9938_v63, 6 }
 0x1a6   : > { %v1760_v50 = vmax.f32 %v1303_v49, %v1525_v8  ;;  %v1886_v58 = vsel %vm1820_vm4, %v1884_v45, %v1885_v29  ;;  %v2247_v61 = vsel %vm2181_vm5, %v2245_v53, %v2246_v55  ;;  %v2119_v48 = vmax.f32 %v1758_v9, %v1883_v52 }
 0x1a7   : > { %14015 = vst [vmem:[#allocation77_spill] sm:$0xff] %v9987_v23  ;;  %v5278_v39 = vsel %vm5255_vm7, %v5276_v7, %v14017_v30  ;;  %v2481_v21 = vmax.f32 %v2120_v1, %v2243_v17  ;;  %v14018_v16 = vrot.slane %v14006_v59, 3  ;;  %v2605_v11 = vrot.slane %v1303_v49, 4 }
 0x1a8   : > { %7555 = vmatprep.mubr.msk.f32.mxu0 %vm751_vm2, %v5278_v39  ;;  %v2121_v34 = vmax.f32 %v1760_v50, %v1886_v58  ;;  %v2608_v19 = vrot.slane %v14006_v59, 4  ;;  %v1018_v30 = vmax.f32 %v9918_v14, %v9927_v47  ;;  %v2480_v8 = vmax.f32 %v2119_v48, %v2244_v42 }
 0x1a9   : > { %v2249_v20 = vsel %vm2181_vm5, %v2246_v55, %v14018_v16  ;;  %v10009_v29 = vmax.f32 %v2481_v21, %v2603_v27  ;;  %v2607_v53 = vsel %vm362_vm0, %v2605_v11, %v2606_v2  ;;  %v1019_v17 = vmax.f32 %v9881_v37, %v9899_v46 }
 0x1aa   : > { %v2483_v40 = vmax.f32 %v2122_v24, %v2249_v20  ;;  %v2482_v39 = vmax.f32 %v2121_v34, %v2247_v61  ;;  %v2609_v45 = vsel %vm362_vm0, %v2606_v2, %v2608_v19  ;;  %v1114_v55 = vmax.f32 %v1018_v30, %v9942_v44 }
 0x1ab   : > { %14019 = vst [vmem:[#allocation78_spill] sm:$0xff] %v10009_v29  ;;  %v1531_v58 = vrot.slane %v9526_v57, 1  ;;  %v10017_v49 = vmax.f32 %v2480_v8, %v2604_v3  ;;  %v1115_v48 = vmax.f32 %v1019_v17, %v9897_v26  ;;  %v13551_v14 = vrot.slane %v9189_v6, 1  ;;  %v10039_v3 = vld [vmem:[#allocation2 + $0x1b8] sm:$0x3f] }
 0x1ac   : > { %v10019_v24 = vmax.f32 %v2483_v40, %v2609_v45  ;;  %v10023_v27 = vmax.f32 %v2482_v39, %v2607_v53  ;;  %v1210_v52 = vmax.f32 %v1114_v55, %v9940_v18  ;;  %v1892_v37 = vrot.slane %v9526_v57, 2  ;;  %v10065_v39 = vld [vmem:[#allocation2 + $0x1c0] sm:$0xff] }
 0x1ad   : > { %14020 = vst [vmem:[#allocation79_spill] sm:$0xff] %v10017_v49  ;;  %v13550_v2 = vrot.slane %v9189_v6, 2  ;;  %v14023_v61 = vmax.f32 %v9732_v25, %v9871_v51  ;;  %v5279_v1 = vrot.slane %v10017_v49, 6  ;;  %v14026_v20 = vmax.f32 %v9798_v35, %v9938_v63 }
 0x1ae   : > { %14021 = vst [vmem:[#allocation80_spill] sm:$0xff] %v10019_v24  ;;  %14022 = vst [vmem:[#allocation81_spill] sm:$0xff] %v10023_v27  ;;  %v10046_v16 = vmax.f32 %v2930_v28, %v10023_v27  ;;  %v14028_v34 = vrot.slane %v9938_v63, 6  ;;  %v5281_v53 = vrot.slane %v10023_v27, 6  ;;  %v13552_v28 = vrot.slane %v10019_v24, 6 }
 0x1af   : > { %v10034_v7 = vmax.f32 %v14023_v61, %v10017_v49  ;;  %v10052_v11 = vmax.f32 %v14026_v20, %v10019_v24  ;;  %v1306_v17 = vmax.f32 %v1210_v52, %v10039_v3  ;;  %v1211_v45 = vmax.f32 %v1115_v48, %v9945_v56 }
 0x1b0   : > { %14025 = vst [vmem:[#allocation83_spill] sm:$0xff] %v10046_v16  ;;  %v5280_v40 = vsel %vm5255_vm7, %v14028_v34, %v5279_v1  ;;  %v1534_v55 = vsel %vm1459_vm3, %v1531_v58, %v13551_v14  ;;  %v1895_v1 = vsel %vm1820_vm4, %v1892_v37, %v13550_v2  ;;  %v2253_v20 = vrot.slane %v9526_v57, 3 }
 0x1b1   : > { %14024 = vst [vmem:[#allocation82_spill] sm:$0xff] %v10034_v7  ;;  %14027 = vst [vmem:[#allocation84_spill] sm:$0xff] %v10052_v11  ;;  %7556 = vmatmul.mubr.msk.f32.gmra.mrb[40].mxu0 %vm751_vm2, %v5280_v40  ;;  %v1765_v61 = vmax.f32 %v9526_v57, %v1534_v55  ;;  %v13554_v34 = vrot.slane %v9189_v6, 3  ;;  %v5283_v52 = vsel %vm5255_vm7, %v5281_v53, %v13552_v28  ;;  %v1528_v40 = vrot.slane %v1306_v17, 1 }
 0x1b2   : > { %v1889_v48 = vrot.slane %v1306_v17, 2  ;;  %v2250_v8 = vrot.slane %v1306_v17, 3  ;;  %7558 = vmatprep.mubr.msk.f32.mxu0 %vm751_vm2, %v5283_v52  ;;  %v2610_v30 = vrot.slane %v1306_v17, 4  ;;  %v1307_v55 = vmax.f32 %v1211_v45, %v10065_v39 }
 0x1b3   : > { %v2126_v9 = vmax.f32 %v1765_v61, %v1895_v1  ;;  %v2256_v2 = vsel %vm2181_vm5, %v2253_v20, %v13554_v34  ;;  %v14029_v14 = vrot.slane %v14006_v59, 1  ;;  %v1763_v21 = vmax.f32 %v1306_v17, %v1528_v40 }
 0x1b4   : > { %v14030_v53 = vrot.slane %v14006_v59, 2  ;;  %v14031_v42 = vrot.slane %v14006_v59, 3  ;;  %v2611_v61 = vsel %vm362_vm0, %v2608_v19, %v2610_v30  ;;  %v1530_v1 = vrot.slane %v1307_v55, 1 }
 0x1b5   : > { %v1529_v50 = vsel %vm1459_vm3, %v14029_v14, %v1528_v40  ;;  %v1891_v41 = vrot.slane %v1307_v55, 2  ;;  %v2124_v34 = vmax.f32 %v1763_v21, %v1889_v48  ;;  %v2252_v23 = vrot.slane %v1307_v55, 3 }
 0x1b6   : > { %v1890_v28 = vsel %vm1820_vm4, %v14030_v53, %v1889_v48  ;;  %v2251_v52 = vsel %vm2181_vm5, %v14031_v42, %v2250_v8  ;;  %v1762_v45 = vmax.f32 %v14006_v59, %v1529_v50  ;;  %v2487_v29 = vmax.f32 %v2126_v9, %v2256_v2 }
 0x1b7   : > { %v2612_v5 = vrot.slane %v1307_v55, 4  ;;  %v1532_v17 = vsel %vm1459_vm3, %v1530_v1, %v1531_v58  ;;  %v1893_v40 = vsel %vm1820_vm4, %v1891_v41, %v1892_v37  ;;  %v2613_v53 = vrot.slane %v9526_v57, 4  ;;  %v10142_v1 = vld [vmem:[#allocation2 + $0x1d8] sm:$0x3f] }
 0x1b8   : > { %v2123_v14 = vmax.f32 %v1762_v45, %v1890_v28  ;;  %v2485_v35 = vmax.f32 %v2124_v34, %v2250_v8  ;;  %v1764_v25 = vmax.f32 %v1307_v55, %v1532_v17  ;;  %v2254_v42 = vsel %vm2181_vm5, %v2252_v23, %v2253_v20 }
 0x1b9   : > { %v2615_v59 = vrot.slane %v9189_v6, 4  ;;  %v2614_v50 = vsel %vm362_vm0, %v2612_v5, %v2613_v53  ;;  %v1022_v2 = vmax.f32 %v9927_v47, %v9942_v44  ;;  %v1023_v9 = vmax.f32 %v9899_v46, %v9897_v26 }
 0x1ba   : > { %v2484_v19 = vmax.f32 %v2123_v14, %v2251_v52  ;;  %v10106_v58 = vmax.f32 %v2485_v35, %v2610_v30  ;;  %v2125_v41 = vmax.f32 %v1764_v25, %v1893_v40  ;;  %v1538_v37 = vrot.slane %v9546_v43, 1  ;;  %v10144_v14 = vld [vmem:[#allocation2 + $0x1e0] sm:$0xff] }
 0x1bb   : > { %v2616_v57 = vsel %vm362_vm0, %v2613_v53, %v2615_v59  ;;  %v1118_v8 = vmax.f32 %v1022_v2, %v9940_v18  ;;  %v1119_v5 = vmax.f32 %v1023_v9, %v9945_v56  ;;  %v13562_v47 = vrot.slane %v9205_v22, 1 }
 0x1bc   : > { %14032 = vst [vmem:[#allocation85_spill] sm:$0xff] %v10106_v58  ;;  %v10110_v21 = vmax.f32 %v2484_v19, %v2611_v61  ;;  %v10112_v23 = vmax.f32 %v2487_v29, %v2616_v57  ;;  %v2486_v28 = vmax.f32 %v2125_v41, %v2254_v42  ;;  %v1899_v46 = vrot.slane %v9546_v43, 2 }
 0x1bd   : > { %v13563_v35 = vrot.slane %v9205_v22, 2  ;;  %v14034_v30 = vmax.f32 %v9871_v51, %v10017_v49  ;;  %v14036_v52 = vmax.f32 %v9938_v63, %v10019_v24  ;;  %v14038_v17 = vrot.slane %v10019_v24, 6 }
 0x1be   : > { %14033 = vst [vmem:[#allocation86_spill] sm:$0xff] %v10110_v21  ;;  %v5284_v34 = vrot.slane %v10110_v21, 6  ;;  %v10130_v48 = vmax.f32 %v2486_v28, %v2614_v50  ;;  %v13564_v53 = vrot.slane %v10112_v23, 6  ;;  %v1214_v42 = vmax.f32 %v1118_v8, %v10039_v3 }
 0x1bf   : > { %v10125_v29 = vmax.f32 %v14034_v30, %v10110_v21  ;;  %v10138_v45 = vmax.f32 %v14036_v52, %v10112_v23  ;;  %v1215_v19 = vmax.f32 %v1119_v5, %v10065_v39  ;;  %v14039_v2 = vmax.f32 %v9970_v15, %v10023_v27 }
 0x1c0   : > { %v5285_v40 = vsel %vm5255_vm7, %v14038_v17, %v5284_v34  ;;  %v5286_v57 = vrot.slane %v10130_v48, 6  ;;  %v1310_v8 = vmax.f32 %v1214_v42, %v10142_v1  ;;  %v1541_v28 = vsel %vm1459_vm3, %v1538_v37, %v13562_v47 }
 0x1c1   : > { %14035 = vst [vmem:[#allocation87_spill] sm:$0xff] %v10125_v29  ;;  %14037 = vst [vmem:[#allocation88_spill] sm:$0xff] %v10138_v45  ;;  %7559 = vmatmul.mubr.msk.f32.gmra.mrb[42].mxu0 %vm751_vm2, %v5285_v40  ;;  %v10159_v9 = vmax.f32 %v14039_v2, %v10130_v48  ;;  %v1311_v5 = vmax.f32 %v1215_v19, %v10144_v14  ;;  %v1902_v30 = vsel %vm1820_vm4, %v1899_v46, %v13563_v35 }
 0x1c2   : > { %v5288_v34 = vsel %vm5255_vm7, %v5286_v57, %v13564_v53  ;;  %v1769_v52 = vmax.f32 %v9546_v43, %v1541_v28  ;;  %v2260_v17 = vrot.slane %v9546_v43, 3  ;;  %v1535_v42 = vrot.slane %v1310_v8, 1 }
 0x1c3   : > { %14040 = vst [vmem:[#allocation89_spill] sm:$0xff] %v10159_v9  ;;  %7561 = vmatprep.mubr.msk.f32.mxu0 %vm751_vm2, %v5288_v34  ;;  %v1896_v19 = vrot.slane %v1310_v8, 2  ;;  %v2257_v2 = vrot.slane %v1310_v8, 3  ;;  %v2617_v61 = vrot.slane %v1310_v8, 4  ;;  %v1537_v41 = vrot.slane %v1311_v5, 1 }
 0x1c4   : > { %v1898_v20 = vrot.slane %v1311_v5, 2  ;;  %v2130_v47 = vmax.f32 %v1769_v52, %v1902_v30  ;;  %v2259_v35 = vrot.slane %v1311_v5, 3  ;;  %v14041_v55 = vrot.slane %v9189_v6, 1 }
 0x1c5   : > { %v1767_v53 = vmax.f32 %v1310_v8, %v1535_v42  ;;  %v14042_v28 = vrot.slane %v9189_v6, 2  ;;  %v14043_v25 = vrot.slane %v9189_v6, 3  ;;  %v2618_v11 = vsel %vm362_vm0, %v2615_v59, %v2617_v61 }
 0x1c6   : > { %v1536_v57 = vsel %vm1459_vm3, %v14041_v55, %v1535_v42  ;;  %v1539_v30 = vsel %vm1459_vm3, %v1537_v41, %v1538_v37  ;;  %v1900_v52 = vsel %vm1820_vm4, %v1898_v20, %v1899_v46  ;;  %v2261_v55 = vsel %vm2181_vm5, %v2259_v35, %v2260_v17  ;;  %v7994_v35 = vld [vmem:[#allocation2 + $0x58] sm:$0x3f] }
 0x1c7   : > { %v1897_v50 = vsel %vm1820_vm4, %v14042_v28, %v1896_v19  ;;  %v2258_v34 = vsel %vm2181_vm5, %v14043_v25, %v2257_v2  ;;  %v1766_v40 = vmax.f32 %v9189_v6, %v1536_v57  ;;  %v2128_v16 = vmax.f32 %v1767_v53, %v1896_v19  ;;  %v7995_v53 = vld [vmem:[#allocation2 + $0x78] sm:$0x3f] }
 0x1c8   : > { %v1768_v58 = vmax.f32 %v1311_v5, %v1539_v30  ;;  %v14044_v8 = vrot.slane %v9205_v22, 3  ;;  %v2619_v63 = vrot.slane %v1311_v5, 4  ;;  %v2620_v25 = vrot.slane %v9546_v43, 4  ;;  %v14045_v19 = vld [vmem:[#allocation6_spill] sm:$0xff] }
 0x1c9   : > { %v2127_v28 = vmax.f32 %v1766_v40, %v1897_v50  ;;  %v2489_v6 = vmax.f32 %v2128_v16, %v2257_v2  ;;  %v2622_v59 = vrot.slane %v9205_v22, 4  ;;  %v1026_v37 = vmax.f32 %v9942_v44, %v9940_v18  ;;  %v7996_v44 = vld [vmem:[#allocation2 + $0x98] sm:$0x3f] }
 0x1ca   : > { %v2263_v42 = vsel %vm2181_vm5, %v2260_v17, %v14044_v8  ;;  %v2129_v57 = vmax.f32 %v1768_v58, %v1900_v52  ;;  %v2621_v20 = vsel %vm362_vm0, %v2619_v63, %v2620_v25  ;;  %v990_v41 = vmax.f32 %v7994_v35, %v7995_v53  ;;  %v14047_v63 = vld [vmem:[#allocation3_spill] sm:$0xff]  ;;  %v14049_v52 = vld [vmem:[#allocation9_spill] sm:$0xff]  ;;  %v14050_v8 = vld [vmem:[#allocation10_spill] sm:$0xff] }
 0x1cb   : > { %v2491_v7 = vmax.f32 %v2130_v47, %v2263_v42  ;;  %v2488_v46 = vmax.f32 %v2127_v28, %v2258_v34  ;;  %v13571_v17 = vrot.slane %v14045_v19, 1  ;;  %v10202_v50 = vmax.f32 %v2489_v6, %v2617_v61 }
 0x1cc   : > { %v2490_v47 = vmax.f32 %v2129_v57, %v2261_v55  ;;  %v2623_v43 = vsel %vm362_vm0, %v2620_v25, %v2622_v59  ;;  %v1122_v16 = vmax.f32 %v1026_v37, %v10039_v3  ;;  %v1086_v40 = vmax.f32 %v990_v41, %v7996_v44  ;;  %v10231_v57 = vld [vmem:[#allocation2 + $0x1f8] sm:$0x3f]  ;;  %v14058_v37 = vld [vmem:[#allocation4_spill] sm:$0xff] }
 0x1cd   : > { %14046 = vst [vmem:[#allocation6_spill] sm:$0xff] %v10202_v50  ;;  %v10206_v58 = vmax.f32 %v2488_v46, %v2618_v11  ;;  %v10208_v5 = vmax.f32 %v2491_v7, %v2623_v43  ;;  %v14048_v2 = vrot.slane %v14047_v63, 1  ;;  %v13572_v55 = vrot.slane %v14049_v52, 1 }
 0x1ce   : > { %v10215_v30 = vmax.f32 %v2490_v47, %v2621_v20  ;;  %v1218_v61 = vmax.f32 %v1122_v16, %v10142_v1  ;;  %v13574_v42 = vrot.slane %v14050_v8, 1  ;;  %v14051_v11 = vmax.f32 %v10017_v49, %v10110_v21 }
 0x1cf   : > { %v1466_v34 = vsel %vm1459_vm3, %v14048_v2, %v13571_v17  ;;  %v5289_v6 = vrot.slane %v10206_v58, 6  ;;  %v14053_v20 = vmax.f32 %v10023_v27, %v10130_v48  ;;  %v14055_v53 = vmax.f32 %v10019_v24, %v10112_v23 }
 0x1d0   : > { %v10226_v28 = vmax.f32 %v14051_v11, %v10206_v58  ;;  %v14057_v47 = vrot.slane %v10112_v23, 6  ;;  %v5291_v2 = vrot.slane %v10215_v30, 6  ;;  %v13575_v11 = vrot.slane %v10208_v5, 6 }
 0x1d1   : > { %v10241_v35 = vmax.f32 %v14053_v20, %v10215_v30  ;;  %v10247_v41 = vmax.f32 %v14055_v53, %v10208_v5  ;;  %v1314_v20 = vmax.f32 %v1218_v61, %v10231_v57  ;;  %v7997_v53 = vld [vmem:[#allocation2 + $0xb8] sm:$0x3f]  ;;  %v14060_v44 = vrot.slane %v8803_v4, 1 }
 0x1d2   : > { %14052 = vst [vmem:[#allocation3_spill] sm:$0xff] %v10226_v28  ;;  %v5290_v43 = vsel %vm5255_vm7, %v14057_v47, %v5289_v6  ;;  %v1182_v25 = vmax.f32 %v1086_v40, %v7997_v53  ;;  %v14059_v6 = vrot.slane %v14058_v37, 1  ;;  %v13579_v61 = vrot.slane %v14045_v19, 2 }
 0x1d3   : > { %14054 = vst [vmem:[#allocation9_spill] sm:$0xff] %v10241_v35  ;;  %14056 = vst [vmem:[#allocation10_spill] sm:$0xff] %v10247_v41  ;;  %7562 = vmatmul.mubr.msk.f32.gmra.mrb[44].mxu0 %vm751_vm2, %v5290_v43  ;;  %v1487_v16 = vsel %vm1459_vm3, %v14060_v44, %v13574_v42  ;;  %v1726_v43 = vmax.f32 %v14047_v63, %v1466_v34  ;;  %v5293_v40 = vsel %vm5255_vm7, %v5291_v2, %v13575_v11 }
 0x1d4   : > { %v1473_v47 = vsel %vm1459_vm3, %v14059_v6, %v13572_v55  ;;  %v1542_v53 = vrot.slane %v1314_v20, 1  ;;  %v1903_v17 = vrot.slane %v1314_v20, 2  ;;  %v2264_v7 = vrot.slane %v1314_v20, 3  ;;  %7564 = vmatprep.mubr.msk.f32.mxu0 %vm751_vm2, %v5293_v40  ;;  %v7998_v55 = vld [vmem:[#allocation2 + $0xd8] sm:$0x3f] }
 0x1d5   : > { %v1730_v46 = vmax.f32 %v14058_v37, %v1473_v47  ;;  %v2624_v6 = vrot.slane %v1314_v20, 4  ;;  %v10277_v45 = vmax.f32 %v1182_v25, %v7998_v55  ;;  %v1738_v44 = vmax.f32 %v8803_v4, %v1487_v16 }
 0x1d6   : > { %v14061_v34 = vrot.slane %v14047_v63, 2  ;;  %v14062_v42 = vrot.slane %v9205_v22, 1  ;;  %v1771_v11 = vmax.f32 %v1314_v20, %v1542_v53  ;;  %v14063_v9 = vrot.slane %v9205_v22, 2 }
 0x1d7   : > { %v14064_v55 = vrot.slane %v9205_v22, 3  ;;  %v2625_v29 = vsel %vm362_vm0, %v2622_v59, %v2624_v6  ;;  %v13582_v50 = vrot.slane %v10277_v45, 1  ;;  %v13590_v20 = vrot.slane %v14050_v8, 2 }
 0x1d8   : > { %v1827_v47 = vsel %vm1820_vm4, %v14061_v34, %v13579_v61  ;;  %v1543_v2 = vsel %vm1459_vm3, %v14062_v42, %v1542_v53  ;;  %v1904_v40 = vsel %vm1820_vm4, %v14063_v9, %v1903_v17  ;;  %v13583_v34 = vrot.slane %v14049_v52, 2 }
 0x1d9   : > { %v2265_v25 = vsel %vm2181_vm5, %v14064_v55, %v2264_v7  ;;  %v1770_v16 = vmax.f32 %v9205_v22, %v1543_v2  ;;  %v2132_v61 = vmax.f32 %v1771_v11, %v1903_v17  ;;  %v13584_v42 = vrot.slane %v10277_v45, 2 }
 0x1da   : > { %v2087_v53 = vmax.f32 %v1726_v43, %v1827_v47  ;;  %v14065_v9 = vrot.slane %v8767_v60, 1  ;;  %v14066_v22 = vrot.slane %v14058_v37, 2  ;;  %v13589_v17 = vrot.slane %v14045_v19, 3 }
 0x1db   : > { %v2131_v24 = vmax.f32 %v1770_v16, %v1904_v40  ;;  %v2493_v11 = vmax.f32 %v2132_v61, %v2264_v7  ;;  %v14067_v43 = vrot.slane %v8767_v60, 2  ;;  %v14068_v40 = vrot.slane %v8803_v4, 2 }
 0x1dc   : > { %v1480_v55 = vsel %vm1459_vm3, %v14065_v9, %v13582_v50  ;;  %v1834_v59 = vsel %vm1820_vm4, %v14066_v22, %v13583_v34  ;;  %v14069_v7 = vrot.slane %v14047_v63, 3 }
 0x1dd   : > { %v1734_v2 = vmax.f32 %v8767_v60, %v1480_v55  ;;  %v1841_v47 = vsel %vm1820_vm4, %v14067_v43, %v13584_v42  ;;  %v1848_v16 = vsel %vm1820_vm4, %v14068_v40, %v13590_v20  ;;  %v2492_v9 = vmax.f32 %v2131_v24, %v2265_v25 }
 0x1de   : > { %v2091_v50 = vmax.f32 %v1730_v46, %v1834_v59  ;;  %v2099_v22 = vmax.f32 %v1738_v44, %v1848_v16  ;;  %v2188_v61 = vsel %vm2181_vm5, %v14069_v7, %v13589_v17  ;;  %v10327_v55 = vmax.f32 %v2493_v11, %v2624_v6 }
 0x1df   : > { %v2095_v34 = vmax.f32 %v1734_v2, %v1841_v47  ;;  %v13588_v43 = vrot.slane %v14049_v52, 3  ;;  %v13587_v42 = vrot.slane %v10277_v45, 3  ;;  %v10331_v27 = vmax.f32 %v2492_v9, %v2625_v29 }
 0x1e0   : > { %14070 = vst [vmem:[#allocation4_spill] sm:$0xff] %v10327_v55  ;;  %v13595_v40 = vrot.slane %v14050_v8, 3  ;;  %v2448_v24 = vmax.f32 %v2087_v53, %v2188_v61  ;;  %v13594_v46 = vrot.slane %v14045_v19, 4  ;;  %v14071_v44 = vrot.slane %v14058_v37, 3 }
 0x1e1   : > { %v14072_v6 = vrot.slane %v8767_v60, 3  ;;  %v13593_v29 = vrot.slane %v14049_v52, 4  ;;  %v13592_v11 = vrot.slane %v10277_v45, 4  ;;  %v14073_v2 = vmax.f32 %v10110_v21, %v10206_v58 }
 0x1e2   : > { %v2195_v25 = vsel %vm2181_vm5, %v14071_v44, %v13588_v43  ;;  %v5294_v9 = vrot.slane %v10331_v27, 6  ;;  %v14075_v7 = vrot.slane %v8803_v4, 3  ;;  %v14076_v53 = vrot.slane %v14047_v63, 4 }
 0x1e3   : > { %v2202_v59 = vsel %vm2181_vm5, %v14072_v6, %v13587_v42  ;;  %v10353_v47 = vmax.f32 %v14073_v2, %v10331_v27  ;;  %v2452_v44 = vmax.f32 %v2091_v50, %v2195_v25  ;;  %v14077_v42 = vrot.slane %v10208_v5, 6 }
 0x1e4   : > { %v2209_v61 = vsel %vm2181_vm5, %v14075_v7, %v13595_v40  ;;  %v2456_v6 = vmax.f32 %v2095_v34, %v2202_v59  ;;  %v2548_v2 = vsel %vm362_vm0, %v14076_v53, %v13594_v46  ;;  %v14078_v17 = vrot.slane %v14058_v37, 4 }
 0x1e5   : > { %14074 = vst [vmem:[#allocation90_spill] sm:$0xff] %v10353_v47  ;;  %v5295_v16 = vsel %vm5255_vm7, %v14077_v42, %v5294_v9  ;;  %v2460_v43 = vmax.f32 %v2099_v22, %v2209_v61  ;;  %v14079_v50 = vrot.slane %v8767_v60, 4  ;;  %v13591_v63 = vrot.slane %v14050_v8, 4 }
 0x1e6   : > { %v2555_v20 = vsel %vm362_vm0, %v14078_v17, %v13593_v29  ;;  %7565 = vmatmul.mubr.msk.f32.gmra.mrb[46].mxu0 %vm751_vm2, %v5295_v16  ;;  %v2808_v25 = vmax.f32 %v2448_v24, %v2548_v2  ;;  %v2910_v22 = vmax.f32 %v9304_v36, %v9308_v62  ;;  %v2911_v37 = vmax.f32 %v9306_v10, %v9310_v0 }
 0x1e7   : > { %v2562_v34 = vsel %vm362_vm0, %v14079_v50, %v13592_v11  ;;  %v2812_v59 = vmax.f32 %v2452_v44, %v2555_v20  ;;  %v14080_v17 = vmax.f32 %v9403_v54, %v9354_v33  ;;  %v14081_v53 = vmax.f32 %v9408_v38, %v9389_v31  ;;  %v14083_v44 = vld [vmem:[#allocation61_spill] sm:$0xff] }
 0x1e8   : > { %v2816_v42 = vmax.f32 %v2456_v6, %v2562_v34  ;;  %v14082_v20 = vrot.slane %v8803_v4, 4  ;;  %v3282_v9 = vrot.slane %v9419_v13, 1  ;;  %v2990_v54 = vmax.f32 %v2910_v22, %v9354_v33 }
 0x1e9   : > { %v10391_v60 = vmax.f32 %v14080_v17, %v9531_v12  ;;  %v10397_v16 = vmax.f32 %v14081_v53, %v9533_v32  ;;  %v2904_v24 = vmax.f32 %v2808_v25, %v2812_v59  ;;  %v2991_v61 = vmax.f32 %v2911_v37, %v9389_v31 }
 0x1ea   : > { %v2569_v36 = vsel %vm362_vm0, %v14082_v20, %v13591_v63  ;;  %v2908_v10 = vmax.f32 %v2812_v59, %v2816_v42  ;;  %v3283_v38 = vrot.slane %v14083_v44, 1  ;;  %v3502_v4 = vrot.slane %v9419_v13, 2  ;;  %v14084_v20 = vld [vmem:[#allocation36_spill] sm:$0xff]  ;;  %v14085_v63 = vld [vmem:[#allocation23_spill] sm:$0xff] }
 0x1eb   : > { %v10405_v7 = vmax.f32 %v2460_v43, %v2569_v36  ;;  %v2984_v6 = vmax.f32 %v2904_v24, %v2816_v42  ;;  %v3287_v2 = vrot.slane %v10391_v60, 1  ;;  %v3288_v50 = vrot.slane %v10397_v16, 1 }
 0x1ec   : > { %v3070_v43 = vmax.f32 %v2990_v54, %v9531_v12  ;;  %v3071_v59 = vmax.f32 %v2991_v61, %v9533_v32  ;;  %v3284_v37 = vsel %vm1459_vm3, %v3282_v9, %v3283_v38  ;;  %v3503_v53 = vrot.slane %v14083_v44, 2 }
 0x1ed   : > { %v2912_v34 = vmax.f32 %v2816_v42, %v10405_v7  ;;  %v2988_v25 = vmax.f32 %v2908_v10, %v10405_v7  ;;  %v3064_v22 = vmax.f32 %v2984_v6, %v10405_v7  ;;  %v3289_v17 = vsel %vm1459_vm3, %v3287_v2, %v3288_v50  ;;  %v14086_v10 = vld [vmem:[#allocation24_spill] sm:$0xff]  ;;  %v14087_v2 = vld [vmem:[#allocation47_spill] sm:$0xff] }
 0x1ee   : > { %v10424_v42 = vmax.f32 %v3070_v43, %v14085_v63  ;;  %v10427_v11 = vmax.f32 %v3071_v59, %v14086_v10  ;;  %v3442_v61 = vmax.f32 %v9419_v13, %v3284_v37  ;;  %v3445_v9 = vmax.f32 %v10391_v60, %v3289_v17  ;;  %v14088_v17 = vld [vmem:[#allocation40_spill] sm:$0xff] }
 0x1ef   : > { %v2992_v36 = vmax.f32 %v2912_v34, %v14084_v20  ;;  %v3068_v24 = vmax.f32 %v2988_v25, %v14084_v20  ;;  %v10430_v54 = vmax.f32 %v3064_v22, %v14084_v20  ;;  %v3504_v6 = vsel %vm1820_vm4, %v3502_v4, %v3503_v53 }
 0x1f0   : > { %v3292_v25 = vrot.slane %v10424_v42, 1  ;;  %v3293_v43 = vrot.slane %v10427_v11, 1  ;;  %v3507_v46 = vrot.slane %v10391_v60, 2  ;;  %v3508_v37 = vrot.slane %v10397_v16, 2 }
 0x1f1   : > { %v3072_v29 = vmax.f32 %v2992_v36, %v14087_v2  ;;  %v10437_v34 = vmax.f32 %v3068_v24, %v14087_v2  ;;  %v13604_v59 = vrot.slane %v10430_v54, 1  ;;  %v13605_v22 = vrot.slane %v10430_v54, 2 }
 0x1f2   : > { %v3294_v36 = vsel %vm1459_vm3, %v3292_v25, %v3293_v43  ;;  %v3509_v49 = vsel %vm1820_vm4, %v3507_v46, %v3508_v37  ;;  %v3742_v10 = vrot.slane %v9419_v13, 3  ;;  %v3743_v63 = vrot.slane %v14083_v44, 3 }
 0x1f3   : > { %v10446_v40 = vmax.f32 %v3072_v29, %v14088_v17  ;;  %v13606_v4 = vrot.slane %v10437_v34, 1  ;;  %v3286_v28 = vsel %vm1459_vm3, %v3283_v38, %v13604_v59  ;;  %v3448_v55 = vmax.f32 %v10424_v42, %v3294_v36 }
 0x1f4   : > { %v3506_v21 = vsel %vm1820_vm4, %v3503_v53, %v13605_v22  ;;  %v3443_v24 = vmax.f32 %v14083_v44, %v3286_v28  ;;  %v14089_v15 = vrot.slane %v10437_v34, 2  ;;  %v3512_v59 = vrot.slane %v10424_v42, 2 }
 0x1f5   : > { %v3291_v29 = vsel %vm1459_vm3, %v3288_v50, %v13606_v4  ;;  %v13618_v25 = vrot.slane %v10446_v40, 1  ;;  %v3513_v53 = vrot.slane %v10427_v11, 2  ;;  %v13611_v46 = vrot.slane %v10446_v40, 2 }
 0x1f6   : > { %v3511_v38 = vsel %vm1820_vm4, %v3508_v37, %v14089_v15  ;;  %v3446_v36 = vmax.f32 %v10397_v16, %v3291_v29  ;;  %v3662_v22 = vmax.f32 %v3442_v61, %v3504_v6  ;;  %v3663_v4 = vmax.f32 %v3443_v24, %v3506_v21 }
 0x1f7   : > { %v3296_v50 = vsel %vm1459_vm3, %v3293_v43, %v13618_v25  ;;  %v3665_v51 = vmax.f32 %v3445_v9, %v3509_v49  ;;  %v3514_v17 = vsel %vm1820_vm4, %v3512_v59, %v3513_v53  ;;  %v3516_v15 = vsel %vm1820_vm4, %v3513_v53, %v13611_v46  ;;  %v10579_v25 = vld [vmem:[#allocation2 + $0x218] sm:$0x3f] }
 0x1f8   : > { %v3449_v28 = vmax.f32 %v10427_v11, %v3296_v50  ;;  %v3666_v37 = vmax.f32 %v3446_v36, %v3511_v38  ;;  %v3668_v29 = vmax.f32 %v3448_v55, %v3514_v17  ;;  %v13610_v2 = vrot.slane %v10430_v54, 3 }
 0x1f9   : > { %v3749_v21 = vrot.slane %v10391_v60, 3  ;;  %v3750_v49 = vrot.slane %v10397_v16, 3  ;;  %v13612_v61 = vrot.slane %v10437_v34, 3  ;;  %v3744_v9 = vsel %vm2181_vm5, %v3742_v10, %v3743_v63 }
 0x1fa   : > { %v3669_v43 = vmax.f32 %v3449_v28, %v3516_v15  ;;  %v3746_v6 = vsel %vm2181_vm5, %v3743_v63, %v13610_v2  ;;  %v3756_v55 = vrot.slane %v10424_v42, 3  ;;  %v3757_v59 = vrot.slane %v10427_v11, 3 }
 0x1fb   : > { %v3751_v17 = vsel %vm2181_vm5, %v3749_v21, %v3750_v49  ;;  %v3753_v24 = vsel %vm2181_vm5, %v3750_v49, %v13612_v61  ;;  %v13615_v38 = vrot.slane %v10446_v40, 3  ;;  %v3942_v36 = vmax.f32 %v3662_v22, %v3744_v9 }
 0x1fc   : > { %v3758_v53 = vsel %vm2181_vm5, %v3756_v55, %v3757_v59  ;;  %v3943_v10 = vmax.f32 %v3663_v4, %v3746_v6  ;;  %v3945_v50 = vmax.f32 %v3665_v51, %v3751_v17  ;;  %v3946_v28 = vmax.f32 %v3666_v37, %v3753_v24  ;;  %v7999_v24 = vld [vmem:[#allocation2 + $0x208] sm:$0xff] }
 0x1fd   : > { %v3760_v63 = vsel %vm2181_vm5, %v3757_v59, %v13615_v38  ;;  %v3948_v15 = vmax.f32 %v3668_v29, %v3758_v53  ;;  %v4002_v2 = vrot.slane %v9419_v13, 4  ;;  %v4003_v21 = vrot.slane %v14083_v44, 4  ;;  %v14095_v53 = vld [vmem:[#allocation54_spill] sm:$0xff] }
 0x1fe   : > { %v3949_v46 = vmax.f32 %v3669_v43, %v3760_v63  ;;  %v13617_v49 = vrot.slane %v10430_v54, 4  ;;  %v4009_v61 = vrot.slane %v10391_v60, 4  ;;  %v4010_v22 = vrot.slane %v10397_v16, 4  ;;  %v14097_v63 = vld [vmem:[#allocation55_spill] sm:$0xff] }
 0x1ff   : > { %v4004_v4 = vsel %vm362_vm0, %v4002_v2, %v4003_v21  ;;  %v13616_v51 = vrot.slane %v10437_v34, 4  ;;  %v4016_v37 = vrot.slane %v10424_v42, 4  ;;  %v4017_v9 = vrot.slane %v10427_v11, 4 }
 0x200   : > { %v4006_v13 = vsel %vm362_vm0, %v4003_v21, %v13617_v49  ;;  %v4011_v44 = vsel %vm362_vm0, %v4009_v61, %v4010_v22  ;;  %v13614_v29 = vrot.slane %v10446_v40, 4  ;;  %v4202_v43 = vmax.f32 %v3942_v36, %v4004_v4  ;;  %v14094_v36 = vld [vmem:[#allocation7_spill] sm:$0xff] }
 0x201   : > { %v4013_v60 = vsel %vm362_vm0, %v4010_v22, %v13616_v51  ;;  %v4018_v16 = vsel %vm362_vm0, %v4016_v37, %v4017_v9  ;;  %v4203_v2 = vmax.f32 %v3943_v10, %v4006_v13  ;;  %v10518_v6 = vmax.f32 %v3945_v50, %v4011_v44  ;;  %v10547_v37 = vld [vmem:[#allocation2 + $0x200] sm:$0xff] }
 0x202   : > { %v4020_v11 = vsel %vm362_vm0, %v4017_v9, %v13614_v29  ;;  %v10523_v42 = vmax.f32 %v3946_v28, %v4013_v60  ;;  %v10525_v55 = vmax.f32 %v3948_v15, %v4018_v16  ;;  %v1027_v61 = vmax.f32 %v9897_v26, %v9945_v56 }
 0x203   : > { %14090 = vst [vmem:[#allocation61_spill] sm:$0xff] %v10518_v6  ;;  %v10529_v59 = vmax.f32 %v3949_v46, %v4020_v11  ;;  %v4262_v17 = vmax.f32 %v4202_v43, %v10518_v6  ;;  %v14096_v10 = vmax.f32 %v14094_v36, %v14095_v53  ;;  %v13619_v21 = vrot.slane %v14097_v63, 1 }
 0x204   : > { %14091 = vst [vmem:[#allocation36_spill] sm:$0xff] %v10523_v42  ;;  %14092 = vst [vmem:[#allocation91_spill] sm:$0xff] %v10525_v55  ;;  %v4263_v22 = vmax.f32 %v4203_v2, %v10523_v42  ;;  %v6001_v15 = vrot.slane %v10525_v55, 4  ;;  %v1123_v56 = vmax.f32 %v1027_v61, %v10065_v39  ;;  %v1908_v60 = vrot.slane %v14097_v63, 2 }
 0x205   : > { %14093 = vst [vmem:[#allocation92_spill] sm:$0xff] %v10529_v59  ;;  %v1316_v50 = vmax.f32 %v14096_v10, %v7999_v24  ;;  %v10544_v46 = vmax.f32 %v4262_v17, %v10525_v55  ;;  %v13613_v4 = vrot.slane %v10529_v59, 4  ;;  %v2269_v61 = vrot.slane %v14097_v63, 3 }
 0x206   : > { %v10550_v13 = vmax.f32 %v4263_v22, %v10529_v59  ;;  %v1219_v44 = vmax.f32 %v1123_v56, %v10144_v14  ;;  %v2629_v22 = vrot.slane %v14097_v63, 4  ;;  %v14100_v56 = vrot.slane %v14045_v19, 1 }
 0x207   : > { %14098 = vst [vmem:[#allocation7_spill] sm:$0xff] %v10544_v46  ;;  %v1545_v9 = vrot.slane %v1316_v50, 1  ;;  %v1906_v43 = vrot.slane %v1316_v50, 2  ;;  %v6003_v16 = vsel %vm362_vm0, %v6001_v15, %v13613_v4  ;;  %v2267_v11 = vrot.slane %v1316_v50, 3 }
 0x208   : > { %14099 = vst [vmem:[#allocation54_spill] sm:$0xff] %v10550_v13  ;;  %7643 = vmatprep.mubr.msk.f32.mxu1 %vm751_vm2, %v6003_v16  ;;  %v1315_v17 = vmax.f32 %v1219_v44, %v10547_v37  ;;  %v2627_v53 = vrot.slane %v1316_v50, 4  ;;  %v1030_v15 = vmax.f32 %v9940_v18, %v10039_v3  ;;  %v1727_v26 = vmax.f32 %v14045_v19, %v14100_v56 }
 0x209   : > { %v1548_v2 = vsel %vm1459_vm3, %v1545_v9, %v13619_v21  ;;  %v1909_v36 = vsel %vm1820_vm4, %v1906_v43, %v1908_v60  ;;  %v2270_v10 = vsel %vm2181_vm5, %v2267_v11, %v2269_v61  ;;  %v14101_v38 = vrot.slane %v14049_v52, 1 }
 0x20a   : > { %v1773_v24 = vmax.f32 %v1316_v50, %v1548_v2  ;;  %v1544_v28 = vrot.slane %v1315_v17, 1  ;;  %v1905_v4 = vrot.slane %v1315_v17, 2  ;;  %v2266_v29 = vrot.slane %v1315_v17, 3 }
 0x20b   : > { %v2626_v44 = vrot.slane %v1315_v17, 4  ;;  %v2630_v2 = vsel %vm362_vm0, %v2627_v53, %v2629_v22  ;;  %v1126_v50 = vmax.f32 %v1030_v15, %v10142_v1  ;;  %v1731_v51 = vmax.f32 %v14049_v52, %v14101_v38 }
 0x20c   : > { %v2134_v16 = vmax.f32 %v1773_v24, %v1909_v36  ;;  %v1546_v49 = vsel %vm1459_vm3, %v1544_v28, %v1545_v9  ;;  %v1907_v18 = vsel %vm1820_vm4, %v1905_v4, %v1906_v43  ;;  %v2268_v3 = vsel %vm2181_vm5, %v2266_v29, %v2267_v11 }
 0x20d   : > { %v1772_v24 = vmax.f32 %v1315_v17, %v1546_v49  ;;  %v2628_v36 = vsel %vm362_vm0, %v2626_v44, %v2627_v53  ;;  %v1222_v21 = vmax.f32 %v1126_v50, %v10231_v57  ;;  %v14102_v15 = vrot.slane %v10277_v45, 1 }
 0x20e   : > { %v2495_v56 = vmax.f32 %v2134_v16, %v2270_v10  ;;  %v14103_v38 = vrot.slane %v14050_v8, 1  ;;  %v14104_v29 = vrot.slane %v14045_v19, 2  ;;  %v14105_v9 = vrot.slane %v14049_v52, 2 }
 0x20f   : > { %v1735_v42 = vmax.f32 %v10277_v45, %v14102_v15  ;;  %v2133_v43 = vmax.f32 %v1772_v24, %v1907_v18  ;;  %v1318_v11 = vmax.f32 %v1222_v21, %v10579_v25  ;;  %v14106_v17 = vrot.slane %v10277_v45, 2 }
 0x210   : > { %v10586_v55 = vmax.f32 %v2495_v56, %v2630_v2  ;;  %v1739_v28 = vmax.f32 %v14050_v8, %v14103_v38  ;;  %v2088_v4 = vmax.f32 %v1727_v26, %v14104_v29  ;;  %v2092_v49 = vmax.f32 %v1731_v51, %v14105_v9 }
 0x211   : > { %v2096_v53 = vmax.f32 %v1735_v42, %v14106_v17  ;;  %v14107_v10 = vrot.slane %v10430_v54, 1  ;;  %v14108_v26 = vmax.f32 %v10112_v23, %v10208_v5  ;;  %v2494_v50 = vmax.f32 %v2133_v43, %v2268_v3 }
 0x212   : > { %v5297_v21 = vrot.slane %v10586_v55, 6  ;;  %v1549_v42 = vrot.slane %v1318_v11, 1  ;;  %v1910_v18 = vrot.slane %v1318_v11, 2  ;;  %v2271_v56 = vrot.slane %v1318_v11, 3 }
 0x213   : > { %v3444_v16 = vmax.f32 %v10430_v54, %v14107_v10  ;;  %v10607_v2 = vmax.f32 %v14108_v26, %v10586_v55  ;;  %v2631_v24 = vrot.slane %v1318_v11, 4  ;;  %v14110_v15 = vrot.slane %v14050_v8, 2 }
 0x214   : > { %v14111_v29 = vrot.slane %v14045_v19, 3  ;;  %v14112_v17 = vrot.slane %v14049_v52, 3  ;;  %v10618_v26 = vmax.f32 %v2494_v50, %v2628_v36  ;;  %v14113_v51 = vrot.slane %v14097_v63, 1 }
 0x215   : > { %14109 = vst [vmem:[#allocation55_spill] sm:$0xff] %v10607_v2  ;;  %v2100_v38 = vmax.f32 %v1739_v28, %v14110_v15  ;;  %v1775_v3 = vmax.f32 %v1318_v11, %v1549_v42  ;;  %v1911_v43 = vsel %vm1820_vm4, %v1908_v60, %v1910_v18  ;;  %v2272_v13 = vsel %vm2181_vm5, %v2269_v61, %v2271_v56  ;;  %v11018_v2 = vld [vmem:[#allocation2 + $0x258] sm:$0x3f] }
 0x216   : > { %v2449_v9 = vmax.f32 %v2088_v4, %v14111_v29  ;;  %v2453_v10 = vmax.f32 %v2092_v49, %v14112_v17  ;;  %v1550_v44 = vsel %vm1459_vm3, %v14113_v51, %v1549_v42  ;;  %v2632_v28 = vsel %vm362_vm0, %v2629_v22, %v2631_v24 }
 0x217   : > { %v1774_v6 = vmax.f32 %v14097_v63, %v1550_v44  ;;  %v14114_v4 = vrot.slane %v10277_v45, 3  ;;  %v14115_v49 = vmax.f32 %v10130_v48, %v10215_v30  ;;  %v5296_v63 = vrot.slane %v10618_v26, 6 }
 0x218   : > { %v2136_v11 = vmax.f32 %v1775_v3, %v1910_v18  ;;  %v14117_v22 = vrot.slane %v14050_v8, 3  ;;  %v14119_v29 = vrot.slane %v14049_v52, 4  ;;  %v14121_v60 = vrot.slane %v10437_v34, 1 }
 0x219   : > { %v2457_v15 = vmax.f32 %v2096_v53, %v14114_v4  ;;  %v10635_v51 = vmax.f32 %v14115_v49, %v10618_v26  ;;  %v2135_v61 = vmax.f32 %v1774_v6, %v1911_v43  ;;  %v14118_v53 = vrot.slane %v14045_v19, 4 }
 0x21a   : > { %v2461_v44 = vmax.f32 %v2100_v38, %v14117_v22  ;;  %v5298_v42 = vsel %vm5255_vm7, %v5296_v63, %v5297_v21  ;;  %v2813_v17 = vmax.f32 %v2453_v10, %v14119_v29  ;;  %v14120_v4 = vrot.slane %v10277_v45, 4 }
 0x21b   : > { %14116 = vst [vmem:[#allocation93_spill] sm:$0xff] %v10635_v51  ;;  %v2809_v50 = vmax.f32 %v2449_v9, %v14118_v53  ;;  %v3447_v36 = vmax.f32 %v10437_v34, %v14121_v60  ;;  %7567 = vmatprep.mubr.msk.f32.mxu0 %vm751_vm2, %v5298_v42  ;;  %v2496_v6 = vmax.f32 %v2135_v61, %v2272_v13  ;;  %v14122_v38 = vrot.slane %v14050_v8, 4 }
 0x21c   : > { %v2817_v49 = vmax.f32 %v2457_v15, %v14120_v4  ;;  %v2497_v18 = vmax.f32 %v2136_v11, %v2271_v56  ;;  %v14123_v9 = vrot.slane %v10446_v40, 1  ;;  %v14124_v45 = vrot.slane %v10430_v54, 2  ;;  %v14132_v4 = vld [vmem:[#allocation47_spill] sm:$0xff] }
 0x21d   : > { %v10655_v19 = vmax.f32 %v2461_v44, %v14122_v38  ;;  %v2905_v10 = vmax.f32 %v2809_v50, %v2813_v17  ;;  %v14125_v15 = vrot.slane %v10437_v34, 2  ;;  %v10664_v63 = vmax.f32 %v2496_v6, %v2632_v28  ;;  %v14133_v6 = vld [vmem:[#allocation23_spill] sm:$0xff] }
 0x21e   : > { %v3450_v52 = vmax.f32 %v10446_v40, %v14123_v9  ;;  %v2909_v3 = vmax.f32 %v2813_v17, %v2817_v49  ;;  %v3664_v43 = vmax.f32 %v3444_v16, %v14124_v45  ;;  %v10666_v13 = vmax.f32 %v2497_v18, %v2631_v24  ;;  %v8000_v38 = vld [vmem:[#allocation2 + $0x1a0] sm:$0xff] }
 0x21f   : > { %v3667_v60 = vmax.f32 %v3447_v36, %v14125_v15  ;;  %v2913_v8 = vmax.f32 %v2817_v49, %v10655_v19  ;;  %v14126_v56 = vrot.slane %v10446_v40, 2  ;;  %v2985_v11 = vmax.f32 %v2905_v10, %v2817_v49  ;;  %v14135_v15 = vld [vmem:[#allocation24_spill] sm:$0xff] }
 0x220   : > { %v2989_v22 = vmax.f32 %v2909_v3, %v10655_v19  ;;  %v2916_v44 = vmax.f32 %v10405_v7, %v14084_v20  ;;  %v14127_v16 = vmax.f32 %v9308_v62, %v9354_v33  ;;  %v14128_v28 = vmax.f32 %v10206_v58, %v10331_v27  ;;  %v14130_v7 = vld [vmem:[#allocation12_spill] sm:$0xff] }
 0x221   : > { %v3670_v61 = vmax.f32 %v3450_v52, %v14126_v56  ;;  %v5299_v42 = vrot.slane %v10664_v63, 6  ;;  %v2993_v20 = vmax.f32 %v2913_v8, %v14130_v7  ;;  %v3065_v29 = vmax.f32 %v2985_v11, %v10655_v19  ;;  %v14134_v52 = vld [vmem:[#allocation15_spill] sm:$0xff]  ;;  %v8001_v11 = vld [vmem:[#allocation2 + $0x228] sm:$0xff] }
 0x222   : > { %v2994_v36 = vmax.f32 %v14127_v16, %v9531_v12  ;;  %v10684_v53 = vmax.f32 %v14128_v28, %v10664_v63  ;;  %v3069_v62 = vmax.f32 %v2989_v22, %v14130_v7  ;;  %v14131_v33 = vmax.f32 %v9310_v0, %v9389_v31  ;;  %v14136_v31 = vld [vmem:[#allocation40_spill] sm:$0xff]  ;;  %v14139_v22 = vld [vmem:[#allocation53_spill] sm:$0xff] }
 0x223   : > { %v5300_v17 = vsel %vm5255_vm7, %v5297_v21, %v5299_v42  ;;  %v2996_v49 = vmax.f32 %v2916_v44, %v14132_v4  ;;  %v1031_v9 = vmax.f32 %v8000_v38, %v10065_v39  ;;  %v3073_v10 = vmax.f32 %v2993_v20, %v14134_v52  ;;  %v14137_v21 = vld [vmem:[#allocation64_spill] sm:$0xff]  ;;  %v14138_v39 = vld [vmem:[#allocation42_spill] sm:$0xff] }
 0x224   : > { %14129 = vst [vmem:[#allocation94_spill] sm:$0xff] %v10684_v53  ;;  %v2995_v12 = vmax.f32 %v14131_v33, %v9533_v32  ;;  %v3074_v18 = vmax.f32 %v2994_v36, %v14133_v6  ;;  %7568 = vmatmul.mubr.msk.f32.gmra.mrb[48].mxu0 %vm751_vm2, %v5300_v17  ;;  %v3145_v3 = vmax.f32 %v3065_v29, %v14130_v7  ;;  %v14141_v36 = vld [vmem:[#allocation16_spill] sm:$0xff]  ;;  %v14142_v33 = vld [vmem:[#allocation65_spill] sm:$0xff] }
 0x225   : > { %v3149_v45 = vmax.f32 %v3069_v62, %v14134_v52  ;;  %v3076_v32 = vmax.f32 %v2996_v49, %v14136_v31  ;;  %v10710_v56 = vmax.f32 %v1031_v9, %v10144_v14  ;;  %v14140_v44 = vmax.f32 %v14138_v39, %v14139_v22  ;;  %v14143_v17 = vld [vmem:[#allocation49_spill] sm:$0xff] }
 0x226   : > { %v3075_v0 = vmax.f32 %v2995_v12, %v14135_v15  ;;  %v10707_v8 = vmax.f32 %v3074_v18, %v14137_v21  ;;  %v3153_v28 = vmax.f32 %v3073_v10, %v14141_v36  ;;  %v3747_v42 = vrot.slane %v3145_v3, 3 }
 0x227   : > { %v10715_v16 = vmax.f32 %v14140_v44, %v8001_v11  ;;  %v3754_v20 = vrot.slane %v3149_v45, 3  ;;  %v4007_v29 = vrot.slane %v3145_v3, 4  ;;  %v4014_v62 = vrot.slane %v3149_v45, 4 }
 0x228   : > { %v3155_v12 = vmax.f32 %v3075_v0, %v14142_v33  ;;  %v10720_v4 = vmax.f32 %v3076_v32, %v14143_v17  ;;  %v3297_v14 = vrot.slane %v10707_v8, 1  ;;  %v14144_v49 = vrot.slane %v10430_v54, 3 }
 0x229   : > { %v14145_v18 = vrot.slane %v10437_v34, 3  ;;  %v3761_v9 = vrot.slane %v3153_v28, 3  ;;  %v14146_v10 = vrot.slane %v10430_v54, 4  ;;  %v14147_v0 = vrot.slane %v10437_v34, 4 }
 0x22a   : > { %v3748_v6 = vsel %vm2181_vm5, %v14144_v49, %v3747_v42  ;;  %v4021_v32 = vrot.slane %v3153_v28, 4  ;;  %v14148_v11 = vrot.slane %v10446_v40, 3  ;;  %v3298_v22 = vrot.slane %v3155_v12, 1 }
 0x22b   : > { %v3755_v38 = vsel %vm2181_vm5, %v14145_v18, %v3754_v20  ;;  %v4008_v3 = vsel %vm362_vm0, %v14146_v10, %v4007_v29  ;;  %v3944_v45 = vmax.f32 %v3664_v43, %v3748_v6  ;;  %v4015_v31 = vsel %vm362_vm0, %v14147_v0, %v4014_v62 }
 0x22c   : > { %v3947_v15 = vmax.f32 %v3667_v60, %v3755_v38  ;;  %v3762_v39 = vsel %vm2181_vm5, %v14148_v11, %v3761_v9  ;;  %v3300_v44 = vrot.slane %v10720_v4, 1  ;;  %v3517_v42 = vrot.slane %v10707_v8, 2 }
 0x22d   : > { %v3950_v20 = vmax.f32 %v3670_v61, %v3762_v39  ;;  %v14149_v54 = vrot.slane %v10446_v40, 4  ;;  %v4204_v60 = vmax.f32 %v3944_v45, %v4008_v3  ;;  %v3299_v34 = vsel %vm1459_vm3, %v3297_v14, %v3298_v22 }
 0x22e   : > { %v10743_v29 = vmax.f32 %v3947_v15, %v4015_v31  ;;  %v3301_v28 = vsel %vm1459_vm3, %v3298_v22, %v3300_v44  ;;  %v3518_v62 = vrot.slane %v3155_v12, 2  ;;  %v3520_v49 = vrot.slane %v10720_v4, 2 }
 0x22f   : > { %v4022_v43 = vsel %vm362_vm0, %v14149_v54, %v4021_v32  ;;  %v3451_v40 = vmax.f32 %v10707_v8, %v3299_v34  ;;  %v3452_v18 = vmax.f32 %v3155_v12, %v3301_v28  ;;  %v3763_v9 = vrot.slane %v10707_v8, 3 }
 0x230   : > { %14150 = vst [vmem:[#allocation12_spill] sm:$0xff] %v10743_v29  ;;  %v10750_v6 = vmax.f32 %v3950_v20, %v4022_v43  ;;  %v4264_v61 = vmax.f32 %v4204_v60, %v10743_v29  ;;  %v3519_v38 = vsel %vm1820_vm4, %v3517_v42, %v3518_v62  ;;  %v3521_v14 = vsel %vm1820_vm4, %v3518_v62, %v3520_v49  ;;  %v10772_v60 = vld [vmem:[#allocation2 + $0x220] sm:$0xff]  ;;  %v14154_v62 = vld [vmem:[#allocation57_spill] sm:$0xff] }
 0x231   : > { %v3764_v10 = vrot.slane %v3155_v12, 3  ;;  %v3671_v0 = vmax.f32 %v3451_v40, %v3519_v38  ;;  %v3672_v31 = vmax.f32 %v3452_v18, %v3521_v14  ;;  %v13625_v11 = vrot.slane %v10720_v4, 3 }
 0x232   : > { %14151 = vst [vmem:[#allocation47_spill] sm:$0xff] %v10750_v6  ;;  %v10762_v45 = vmax.f32 %v4264_v61, %v10750_v6  ;;  %v6004_v15 = vrot.slane %v10750_v6, 4  ;;  %v4023_v39 = vrot.slane %v10707_v8, 4  ;;  %v14153_v22 = vrot.slane %v10529_v59, 4 }
 0x233   : > { %v3765_v32 = vsel %vm2181_vm5, %v3763_v9, %v3764_v10  ;;  %v4024_v54 = vrot.slane %v3155_v12, 4  ;;  %v13624_v43 = vrot.slane %v10720_v4, 4  ;;  %v3767_v34 = vsel %vm2181_vm5, %v3764_v10, %v13625_v11  ;;  %v8002_v12 = vld [vmem:[%s13411_s3 + $0x6] sm:$0x3] }
 0x234   : > { %14152 = vst [vmem:[#allocation23_spill] sm:$0xff] %v10762_v45  ;;  %v6005_v42 = vsel %vm362_vm0, %v14153_v22, %v6004_v15  ;;  %v3951_v20 = vmax.f32 %v3671_v0, %v3765_v32  ;;  %v1223_v28 = vmax.f32 %v10710_v56, %v10547_v37  ;;  %v1552_v8 = vrot.slane %v10715_v16, 1 }
 0x235   : > { %7644 = vmatmul.mubr.msk.f32.vlgmr.msra.gmra.mrb[16].mxu1 %vm751_vm2, %v6005_v42  ;;  %v1554_v61 = vrot.slane %v14154_v62, 1  ;;  %v3952_v40 = vmax.f32 %v3672_v31, %v3767_v34  ;;  %v4025_v18 = vsel %vm362_vm0, %v4023_v39, %v4024_v54  ;;  %v4027_v38 = vsel %vm362_vm0, %v4024_v54, %v13624_v43 }
 0x236   : > { %7692 = vmatpush3.msk.msra.mxu1 %vm5255_vm7, %v8002_v12  ;;  %v1913_v14 = vrot.slane %v10715_v16, 2  ;;  %v10791_v56 = vmax.f32 %v3951_v20, %v4025_v18  ;;  %v1319_v9 = vmax.f32 %v1223_v28, %v10772_v60  ;;  %v13628_v15 = vrot.slane %v14154_v62, 2 }
 0x237   : > { %v1555_v10 = vsel %vm1459_vm3, %v1552_v8, %v1554_v61  ;;  %v10798_v0 = vmax.f32 %v3952_v40, %v4027_v38  ;;  %v2274_v32 = vrot.slane %v10715_v16, 3  ;;  %v13627_v39 = vrot.slane %v14154_v62, 3 }
 0x238   : > { %14155 = vst [vmem:[#allocation15_spill] sm:$0xff] %v10791_v56  ;;  %v1777_v31 = vmax.f32 %v10715_v16, %v1555_v10  ;;  %v6006_v22 = vrot.slane %v10791_v56, 4  ;;  %v1551_v42 = vrot.slane %v1319_v9, 1  ;;  %v1912_v20 = vrot.slane %v1319_v9, 2 }
 0x239   : > { %14156 = vst [vmem:[#allocation24_spill] sm:$0xff] %v10798_v0  ;;  %v1916_v54 = vsel %vm1820_vm4, %v1913_v14, %v13628_v15  ;;  %v13626_v34 = vrot.slane %v10798_v0, 4  ;;  %v2273_v12 = vrot.slane %v1319_v9, 3  ;;  %v2277_v40 = vsel %vm2181_vm5, %v2274_v32, %v13627_v39 }
 0x23a   : > { %v2138_v28 = vmax.f32 %v1777_v31, %v1916_v54  ;;  %v1553_v18 = vsel %vm1459_vm3, %v1551_v42, %v1552_v8  ;;  %v1914_v38 = vsel %vm1820_vm4, %v1912_v20, %v1913_v14  ;;  %v2633_v10 = vrot.slane %v1319_v9, 4  ;;  %v8003_v8 = vld [vmem:[#allocation2 + $0x1b8] sm:$0x3f] }
 0x23b   : > { %v2634_v3 = vrot.slane %v10715_v16, 4  ;;  %v6008_v50 = vsel %vm362_vm0, %v6006_v22, %v13626_v34  ;;  %v1776_v24 = vmax.f32 %v1319_v9, %v1553_v18  ;;  %v2275_v43 = vsel %vm2181_vm5, %v2273_v12, %v2274_v32  ;;  %v14157_v22 = vld [vmem:[#allocation76_spill] sm:$0xff]  ;;  %v14158_v32 = vld [vmem:[#allocation11_spill] sm:$0xff] }
 0x23c   : > { %v2499_v31 = vmax.f32 %v2138_v28, %v2277_v40  ;;  %7646 = vmatprep.mubr.msk.f32.mxu1 %vm751_vm2, %v6008_v50  ;;  %v2636_v11 = vrot.slane %v14154_v62, 4  ;;  %v1034_v14 = vmax.f32 %v8003_v8, %v10142_v1  ;;  %v2917_v16 = vmax.f32 %v10655_v19, %v14130_v7  ;;  %v14160_v28 = vld [vmem:[#allocation52_spill] sm:$0xff] }
 0x23d   : > { %v2635_v54 = vsel %vm362_vm0, %v2633_v10, %v2634_v3  ;;  %v2137_v42 = vmax.f32 %v1776_v24, %v1914_v38  ;;  %v3453_v9 = vmax.f32 %v10720_v4, %v3300_v44  ;;  %v14159_v20 = vmax.f32 %v14158_v32, %v14137_v21  ;;  %v14161_v12 = vld [vmem:[#allocation8_spill] sm:$0xff]  ;;  %v14163_v38 = vld [vmem:[#allocation79_spill] sm:$0xff] }
 0x23e   : > { %v14162_v40 = vmax.f32 %v14161_v12, %v14142_v33  ;;  %v2637_v1 = vsel %vm362_vm0, %v2634_v3, %v2636_v11  ;;  %v1130_v19 = vmax.f32 %v1034_v14, %v10231_v57  ;;  %v2997_v24 = vmax.f32 %v2917_v16, %v14134_v52  ;;  %v14164_v44 = vld [vmem:[#allocation39_spill] sm:$0xff] }
 0x23f   : > { %v10831_v50 = vmax.f32 %v14159_v20, %v14157_v22  ;;  %v14165_v10 = vmax.f32 %v14164_v44, %v14143_v17  ;;  %v2498_v21 = vmax.f32 %v2137_v42, %v2275_v43  ;;  %v10848_v32 = vmax.f32 %v2499_v31, %v2637_v1  ;;  %v10850_v20 = vld [vmem:[#allocation2 + $0x238] sm:$0x3f] }
 0x240   : > { %v10837_v18 = vmax.f32 %v14162_v40, %v14160_v28  ;;  %v3673_v33 = vmax.f32 %v3453_v9, %v3520_v49  ;;  %v1226_v14 = vmax.f32 %v1130_v19, %v10579_v25  ;;  %v3077_v16 = vmax.f32 %v2997_v24, %v14141_v36  ;;  %v14168_v19 = vld [vmem:[#allocation27_spill] sm:$0xff] }
 0x241   : > { %v10846_v8 = vmax.f32 %v14165_v10, %v14163_v38  ;;  %v3302_v3 = vrot.slane %v10831_v50, 1  ;;  %v10859_v40 = vmax.f32 %v2498_v21, %v2635_v54  ;;  %v14166_v31 = vmax.f32 %v10208_v5, %v10586_v55 }
 0x242   : > { %v3303_v12 = vrot.slane %v10837_v18, 1  ;;  %v13634_v9 = vrot.slane %v10848_v32, 6  ;;  %v1322_v1 = vmax.f32 %v1226_v14, %v10850_v20  ;;  %v3157_v24 = vmax.f32 %v3077_v16, %v14168_v19 }
 0x243   : > { %v13635_v17 = vrot.slane %v10846_v8, 1  ;;  %v10867_v49 = vmax.f32 %v14166_v31, %v10848_v32  ;;  %v14169_v10 = vmax.f32 %v10215_v30, %v10618_v26  ;;  %v5301_v42 = vrot.slane %v10859_v40, 6 }
 0x244   : > { %v3304_v54 = vsel %vm1459_vm3, %v3302_v3, %v3303_v12  ;;  %v1556_v43 = vrot.slane %v1322_v1, 1  ;;  %v1917_v14 = vrot.slane %v1322_v1, 2  ;;  %v2278_v34 = vrot.slane %v1322_v1, 3 }
 0x245   : > { %14167 = vst [vmem:[#allocation40_spill] sm:$0xff] %v10867_v49  ;;  %v10881_v21 = vmax.f32 %v14169_v10, %v10859_v40  ;;  %v2638_v16 = vrot.slane %v1322_v1, 4  ;;  %v5303_v3 = vsel %vm5255_vm7, %v5301_v42, %v13634_v9  ;;  %v3768_v44 = vrot.slane %v3157_v24, 3 }
 0x246   : > { %v4028_v39 = vrot.slane %v3157_v24, 4  ;;  %v3306_v10 = vsel %vm1459_vm3, %v3303_v12, %v13635_v17  ;;  %7570 = vmatprep.mubr.msk.f32.mxu0 %vm751_vm2, %v5303_v3  ;;  %v1557_v31 = vsel %vm1459_vm3, %v1554_v61, %v1556_v43  ;;  %v1779_v15 = vmax.f32 %v1322_v1, %v1556_v43 }
 0x247   : > { %14170 = vst [vmem:[#allocation64_spill] sm:$0xff] %v10881_v21  ;;  %v14171_v6 = vrot.slane %v14154_v62, 2  ;;  %v14172_v59 = vrot.slane %v14154_v62, 3  ;;  %v1778_v24 = vmax.f32 %v14154_v62, %v1557_v31  ;;  %v2639_v9 = vsel %vm362_vm0, %v2636_v11, %v2638_v16 }
 0x248   : > { %v14173_v12 = vrot.slane %v10720_v4, 3  ;;  %v14174_v17 = vrot.slane %v10720_v4, 4  ;;  %v2140_v43 = vmax.f32 %v1779_v15, %v1917_v14  ;;  %v3455_v45 = vmax.f32 %v10837_v18, %v3306_v10 }
 0x249   : > { %v1918_v29 = vsel %vm1820_vm4, %v14171_v6, %v1917_v14  ;;  %v2279_v42 = vsel %vm2181_vm5, %v14172_v59, %v2278_v34  ;;  %v3454_v6 = vmax.f32 %v10831_v50, %v3304_v54  ;;  %v3522_v59 = vrot.slane %v10831_v50, 2 }
 0x24a   : > { %v3769_v3 = vsel %vm2181_vm5, %v14173_v12, %v3768_v44  ;;  %v4029_v61 = vsel %vm362_vm0, %v14174_v17, %v4028_v39  ;;  %v2139_v46 = vmax.f32 %v1778_v24, %v1918_v29  ;;  %v3523_v62 = vrot.slane %v10837_v18, 2 }
 0x24b   : > { %v3953_v1 = vmax.f32 %v3673_v33, %v3769_v3  ;;  %v13643_v11 = vrot.slane %v10846_v8, 2  ;;  %v2501_v31 = vmax.f32 %v2140_v43, %v2278_v34  ;;  %v3770_v4 = vrot.slane %v10831_v50, 3 }
 0x24c   : > { %v3771_v39 = vrot.slane %v10837_v18, 3  ;;  %v2500_v15 = vmax.f32 %v2139_v46, %v2279_v42  ;;  %v3524_v33 = vsel %vm1820_vm4, %v3522_v59, %v3523_v62  ;;  %v13639_v17 = vrot.slane %v10846_v8, 3 }
 0x24d   : > { %v10915_v56 = vmax.f32 %v3953_v1, %v4029_v61  ;;  %v3526_v29 = vsel %vm1820_vm4, %v3523_v62, %v13643_v11  ;;  %v10924_v54 = vmax.f32 %v2501_v31, %v2638_v16  ;;  %v3674_v34 = vmax.f32 %v3454_v6, %v3524_v33  ;;  %v8004_v62 = vld [vmem:[#allocation2 + $0x1c0] sm:$0xff]  ;;  %v14182_v33 = vld [vmem:[#allocation56_spill] sm:$0xff] }
 0x24e   : > { %v3675_v14 = vmax.f32 %v3455_v45, %v3526_v29  ;;  %v10927_v10 = vmax.f32 %v2500_v15, %v2639_v9  ;;  %v3772_v24 = vsel %vm2181_vm5, %v3770_v4, %v3771_v39  ;;  %v3774_v46 = vsel %vm2181_vm5, %v3771_v39, %v13639_v17  ;;  %v10952_v31 = vld [vmem:[#allocation2 + $0x1e0] sm:$0xff]  ;;  %v8006_v39 = vld [vmem:[#allocation2 + $0x248] sm:$0xff]  ;;  %v14181_v15 = vld [vmem:[#allocation5_spill] sm:$0xff] }
 0x24f   : > { %14175 = vst [vmem:[#allocation42_spill] sm:$0xff] %v10915_v56  ;;  %14176 = vst [vmem:[#allocation53_spill] sm:$0xff] %v10924_v54  ;;  %v6009_v44 = vrot.slane %v10915_v56, 4  ;;  %v4030_v42 = vrot.slane %v10831_v50, 4  ;;  %v14178_v12 = vrot.slane %v10798_v0, 4  ;;  %v3954_v16 = vmax.f32 %v3674_v34, %v3772_v24  ;;  %v14190_v11 = vld [vmem:[#allocation67_spill] sm:$0xff] }
 0x250   : > { %14177 = vst [vmem:[#allocation16_spill] sm:$0xff] %v10927_v10  ;;  %v3955_v61 = vmax.f32 %v3675_v14, %v3774_v46  ;;  %v4031_v43 = vrot.slane %v10837_v18, 4  ;;  %v14179_v9 = vmax.f32 %v10331_v27, %v10664_v63  ;;  %v5304_v6 = vrot.slane %v10927_v10, 6  ;;  %v14186_v46 = vld [vmem:[#allocation58_spill] sm:$0xff] }
 0x251   : > { %v6010_v3 = vsel %vm362_vm0, %v14178_v12, %v6009_v44  ;;  %v13638_v18 = vrot.slane %v10846_v8, 4  ;;  %v1035_v4 = vmax.f32 %v8004_v62, %v10952_v31  ;;  %v14183_v29 = vmax.f32 %v14181_v15, %v14182_v33  ;;  %v8007_v45 = vld [vmem:[#allocation2 + $0x1d8] sm:$0x3f] }
 0x252   : > { %v10944_v1 = vmax.f32 %v14179_v9, %v10927_v10  ;;  %7647 = vmatmul.mubr.msk.f32.gmra.mrb[18].mxu1 %vm751_vm2, %v6010_v3  ;;  %v4032_v59 = vsel %vm362_vm0, %v4030_v42, %v4031_v43  ;;  %v14184_v34 = vrot.slane %v10848_v32, 6  ;;  %v13641_v42 = vrot.slane %v14186_v46, 1 }
 0x253   : > { %v1324_v44 = vmax.f32 %v14183_v29, %v8006_v39  ;;  %v10961_v24 = vmax.f32 %v3954_v16, %v4032_v59  ;;  %v13640_v12 = vrot.slane %v14186_v46, 2  ;;  %v4034_v3 = vsel %vm362_vm0, %v4031_v43, %v13638_v18  ;;  %v10973_v16 = vld [vmem:[#allocation2 + $0x240] sm:$0xff] }
 0x254   : > { %14180 = vst [vmem:[#allocation65_spill] sm:$0xff] %v10944_v1  ;;  %v5305_v14 = vsel %vm5255_vm7, %v14184_v34, %v5304_v6  ;;  %v1131_v9 = vmax.f32 %v1035_v4, %v10547_v37  ;;  %v10970_v15 = vmax.f32 %v3955_v61, %v4034_v3  ;;  %v13642_v33 = vrot.slane %v14186_v46, 3 }
 0x255   : > { %14185 = vst [vmem:[#allocation49_spill] sm:$0xff] %v10961_v24  ;;  %7571 = vmatmul.mubr.msk.f32.gmra.mrb[50].mxu0 %vm751_vm2, %v5305_v14  ;;  %v1559_v62 = vrot.slane %v1324_v44, 1  ;;  %v1920_v39 = vrot.slane %v1324_v44, 2  ;;  %v6011_v6 = vrot.slane %v10961_v24, 4  ;;  %v2281_v59 = vrot.slane %v1324_v44, 3 }
 0x256   : > { %14187 = vst [vmem:[#allocation57_spill] sm:$0xff] %v10970_v15  ;;  %v1227_v29 = vmax.f32 %v1131_v9, %v10772_v60  ;;  %v2641_v4 = vrot.slane %v1324_v44, 4  ;;  %v13650_v61 = vrot.slane %v10970_v15, 4  ;;  %v13651_v50 = vrot.slane %v14186_v46, 4 }
 0x257   : > { %v1562_v34 = vsel %vm1459_vm3, %v1559_v62, %v13641_v42  ;;  %v1923_v43 = vsel %vm1820_vm4, %v1920_v39, %v13640_v12  ;;  %v2284_v3 = vsel %vm2181_vm5, %v2281_v59, %v13642_v33  ;;  %v1038_v18 = vmax.f32 %v8007_v45, %v10231_v57 }
 0x258   : > { %v1781_v14 = vmax.f32 %v1324_v44, %v1562_v34  ;;  %v1323_v9 = vmax.f32 %v1227_v29, %v10973_v16  ;;  %v2921_v17 = vmax.f32 %v14130_v7, %v14134_v52  ;;  %v14188_v12 = vrot.slane %v10846_v8, 1  ;;  %v14189_v29 = vld [vmem:[#allocation81_spill] sm:$0xff] }
 0x259   : > { %v6013_v44 = vsel %vm362_vm0, %v6011_v6, %v13650_v61  ;;  %v2644_v33 = vsel %vm362_vm0, %v2641_v4, %v13651_v50  ;;  %v14191_v57 = vmax.f32 %v14190_v11, %v14157_v22  ;;  %v1134_v6 = vmax.f32 %v1038_v18, %v10579_v25 }
 0x25a   : > { %v3456_v42 = vmax.f32 %v10846_v8, %v14188_v12  ;;  %v2142_v34 = vmax.f32 %v1781_v14, %v1923_v43  ;;  %7649 = vmatprep.mubr.msk.f32.mxu1 %vm751_vm2, %v6013_v44  ;;  %v1558_v7 = vrot.slane %v1323_v9, 1  ;;  %v1919_v24 = vrot.slane %v1323_v9, 2 }
 0x25b   : > { %v11005_v45 = vmax.f32 %v14191_v57, %v14189_v29  ;;  %v2280_v12 = vrot.slane %v1323_v9, 3  ;;  %v2640_v56 = vrot.slane %v1323_v9, 4  ;;  %v3001_v43 = vmax.f32 %v2921_v17, %v14141_v36 }
 0x25c   : > { %v2503_v0 = vmax.f32 %v2142_v34, %v2284_v3  ;;  %v14192_v14 = vrot.slane %v10846_v8, 2  ;;  %v1560_v50 = vsel %vm1459_vm3, %v1558_v7, %v1559_v62  ;;  %v1921_v22 = vsel %vm1820_vm4, %v1919_v24, %v1920_v39  ;;  %v14194_v3 = vld [vmem:[#allocation80_spill] sm:$0xff]  ;;  %v14197_v24 = vld [vmem:[#allocation86_spill] sm:$0xff]  ;;  %v14198_v39 = vld [vmem:[#allocation41_spill] sm:$0xff] }
 0x25d   : > { %v2282_v11 = vsel %vm2181_vm5, %v2280_v12, %v2281_v59  ;;  %v2642_v44 = vsel %vm362_vm0, %v2640_v56, %v2641_v4  ;;  %v1780_v57 = vmax.f32 %v1323_v9, %v1560_v50  ;;  %v1230_v18 = vmax.f32 %v1134_v6, %v10850_v20  ;;  %v14195_v34 = vld [vmem:[#allocation68_spill] sm:$0xff]  ;;  %v14202_v6 = vld [vmem:[#allocation78_spill] sm:$0xff] }
 0x25e   : > { %v3676_v61 = vmax.f32 %v3456_v42, %v14192_v14  ;;  %v11016_v53 = vmax.f32 %v2503_v0, %v2644_v33  ;;  %v3081_v17 = vmax.f32 %v3001_v43, %v14168_v19  ;;  %v14196_v42 = vmax.f32 %v14195_v34, %v14160_v28 }
 0x25f   : > { %v14199_v59 = vmax.f32 %v14198_v39, %v14163_v38  ;;  %v3307_v0 = vrot.slane %v11005_v45, 1  ;;  %v3527_v50 = vrot.slane %v11005_v45, 2  ;;  %v2141_v33 = vmax.f32 %v1780_v57, %v1921_v22 }
 0x260   : > { %14193 = vst [vmem:[#allocation76_spill] sm:$0xff] %v11016_v53  ;;  %v11026_v62 = vmax.f32 %v14196_v42, %v14194_v3  ;;  %v14200_v28 = vmax.f32 %v10586_v55, %v10848_v32  ;;  %v1326_v12 = vmax.f32 %v1230_v18, %v11018_v2  ;;  %v3161_v43 = vmax.f32 %v3081_v17, %v14202_v6 }
 0x261   : > { %v11032_v56 = vmax.f32 %v14199_v59, %v14197_v24  ;;  %v2502_v22 = vmax.f32 %v2141_v33, %v2282_v11  ;;  %v14203_v17 = vrot.slane %v14186_v46, 1  ;;  %v14204_v57 = vrot.slane %v14186_v46, 2 }
 0x262   : > { %v11042_v9 = vmax.f32 %v14200_v28, %v11016_v53  ;;  %v3308_v14 = vrot.slane %v11026_v62, 1  ;;  %v3528_v34 = vrot.slane %v11026_v62, 2  ;;  %v1563_v39 = vrot.slane %v1326_v12, 1 }
 0x263   : > { %v1924_v59 = vrot.slane %v1326_v12, 2  ;;  %v2285_v28 = vrot.slane %v1326_v12, 3  ;;  %v2645_v4 = vrot.slane %v1326_v12, 4  ;;  %v11053_v7 = vmax.f32 %v2502_v22, %v2642_v44 }
 0x264   : > { %14201 = vst [vmem:[#allocation11_spill] sm:$0xff] %v11042_v9  ;;  %v3775_v38 = vrot.slane %v3161_v43, 3  ;;  %v4035_v49 = vrot.slane %v3161_v43, 4  ;;  %v3309_v18 = vsel %vm1459_vm3, %v3307_v0, %v3308_v14  ;;  %v1564_v11 = vsel %vm1459_vm3, %v14203_v17, %v1563_v39 }
 0x265   : > { %v1783_v33 = vmax.f32 %v1326_v12, %v1563_v39  ;;  %v1925_v54 = vsel %vm1820_vm4, %v14204_v57, %v1924_v59  ;;  %v14205_v42 = vrot.slane %v14186_v46, 3  ;;  %v14206_v0 = vmax.f32 %v10618_v26, %v10859_v40 }
 0x266   : > { %v5306_v22 = vrot.slane %v11053_v7, 6  ;;  %v1782_v57 = vmax.f32 %v14186_v46, %v1564_v11  ;;  %v14208_v17 = vrot.slane %v14186_v46, 4  ;;  %v14209_v44 = vrot.slane %v10846_v8, 3 }
 0x267   : > { %v2286_v51 = vsel %vm2181_vm5, %v14205_v42, %v2285_v28  ;;  %v11071_v43 = vmax.f32 %v14206_v0, %v11053_v7  ;;  %v2144_v39 = vmax.f32 %v1783_v33, %v1924_v59  ;;  %v14210_v41 = vrot.slane %v11016_v53, 6 }
 0x268   : > { %v2646_v42 = vsel %vm362_vm0, %v14208_v17, %v2645_v4  ;;  %v3776_v47 = vsel %vm2181_vm5, %v14209_v44, %v3775_v38  ;;  %v14211_v12 = vrot.slane %v10846_v8, 4  ;;  %v14212_v11 = vrot.slane %v11032_v56, 1 }
 0x269   : > { %14207 = vst [vmem:[#allocation52_spill] sm:$0xff] %v11071_v43  ;;  %v5308_v0 = vsel %vm5255_vm7, %v5306_v22, %v14210_v41  ;;  %v3956_v35 = vmax.f32 %v3676_v61, %v3776_v47  ;;  %v2143_v46 = vmax.f32 %v1782_v57, %v1925_v54  ;;  %v2505_v33 = vmax.f32 %v2144_v39, %v2285_v28 }
 0x26a   : > { %v4036_v21 = vsel %vm362_vm0, %v14211_v12, %v4035_v49  ;;  %v3311_v59 = vsel %vm1459_vm3, %v3308_v14, %v14212_v11  ;;  %7573 = vmatprep.mubr.msk.f32.mxu0 %vm751_vm2, %v5308_v0  ;;  %v3457_v17 = vmax.f32 %v11005_v45, %v3309_v18  ;;  %v3529_v41 = vsel %vm1820_vm4, %v3527_v50, %v3528_v34 }
 0x26b   : > { %v3458_v38 = vmax.f32 %v11026_v62, %v3311_v59  ;;  %v11095_v44 = vmax.f32 %v3956_v35, %v4036_v21  ;;  %v14214_v47 = vrot.slane %v11032_v56, 2  ;;  %v3777_v49 = vrot.slane %v11005_v45, 3 }
 0x26c   : > { %v2504_v61 = vmax.f32 %v2143_v46, %v2286_v51  ;;  %v11102_v14 = vmax.f32 %v2505_v33, %v2645_v4  ;;  %v3677_v12 = vmax.f32 %v3457_v17, %v3529_v41  ;;  %v3778_v18 = vrot.slane %v11026_v62, 3 }
 0x26d   : > { %14213 = vst [vmem:[#allocation8_spill] sm:$0xff] %v11095_v44  ;;  %v3531_v8 = vsel %vm1820_vm4, %v3528_v34, %v14214_v47  ;;  %v6014_v28 = vrot.slane %v11095_v44, 4  ;;  %v13662_v35 = vrot.slane %v11032_v56, 3  ;;  %v4037_v21 = vrot.slane %v11005_v45, 4  ;;  %v14217_v45 = vld [vmem:[#allocation60_spill] sm:$0xff] }
 0x26e   : > { %14215 = vst [vmem:[#allocation79_spill] sm:$0xff] %v11102_v14  ;;  %v3678_v54 = vmax.f32 %v3458_v38, %v3531_v8  ;;  %v11108_v50 = vmax.f32 %v2504_v61, %v2646_v42  ;;  %v4038_v22 = vrot.slane %v11026_v62, 4  ;;  %v13661_v34 = vrot.slane %v11032_v56, 4 }
 0x26f   : > { %v1039_v51 = vmax.f32 %v10952_v31, %v10547_v37  ;;  %v14216_v4 = vrot.slane %v10970_v15, 4  ;;  %v3779_v39 = vsel %vm2181_vm5, %v3777_v49, %v3778_v18  ;;  %v3781_v0 = vsel %vm2181_vm5, %v3778_v18, %v13662_v35  ;;  %v14221_v49 = vld [vmem:[#allocation59_spill] sm:$0xff] }
 0x270   : > { %v1566_v42 = vrot.slane %v14217_v45, 1  ;;  %v14218_v11 = vmax.f32 %v10664_v63, %v10927_v10  ;;  %v5309_v59 = vrot.slane %v11108_v50, 6  ;;  %v3957_v46 = vmax.f32 %v3677_v12, %v3779_v39  ;;  %v11149_v18 = vld [vmem:[#allocation2 + $0x260] sm:$0xff] }
 0x271   : > { %v6015_v57 = vsel %vm362_vm0, %v14216_v4, %v6014_v28  ;;  %v3958_v33 = vmax.f32 %v3678_v54, %v3781_v0  ;;  %v4039_v17 = vsel %vm362_vm0, %v4037_v21, %v4038_v22  ;;  %v4041_v38 = vsel %vm362_vm0, %v4038_v22, %v13661_v34 }
 0x272   : > { %v11128_v37 = vmax.f32 %v14218_v11, %v11108_v50  ;;  %7650 = vmatmul.mubr.msk.f32.gmra.mrb[20].mxu1 %vm751_vm2, %v6015_v57  ;;  %v14220_v41 = vrot.slane %v11016_v53, 6  ;;  %v1135_v8 = vmax.f32 %v1039_v51, %v10772_v60  ;;  %v13664_v61 = vrot.slane %v14221_v49, 1 }
 0x273   : > { %v1927_v28 = vrot.slane %v14217_v45, 2  ;;  %v11145_v12 = vmax.f32 %v3957_v46, %v4039_v17  ;;  %v11147_v54 = vmax.f32 %v3958_v33, %v4041_v38  ;;  %v13663_v21 = vrot.slane %v14221_v49, 2 }
 0x274   : > { %14219 = vst [vmem:[#allocation39_spill] sm:$0xff] %v11128_v37  ;;  %v5310_v47 = vsel %vm5255_vm7, %v14220_v41, %v5309_v59  ;;  %v2288_v22 = vrot.slane %v14217_v45, 3  ;;  %v1231_v4 = vmax.f32 %v1135_v8, %v10973_v16  ;;  %v1569_v51 = vsel %vm1459_vm3, %v1566_v42, %v13664_v61  ;;  %v8008_v41 = vld [vmem:[#allocation2 + $0x1f8] sm:$0x3f] }
 0x275   : > { %7574 = vmatmul.mubr.msk.f32.gmra.mrb[52].mxu0 %vm751_vm2, %v5310_v47  ;;  %14222 = vst [vmem:[#allocation27_spill] sm:$0xff] %v11145_v12  ;;  %14223 = vst [vmem:[#allocation5_spill] sm:$0xff] %v11147_v54  ;;  %v2290_v57 = vrot.slane %v14221_v49, 3  ;;  %v2648_v39 = vrot.slane %v14217_v45, 4  ;;  %v6016_v0 = vrot.slane %v11145_v12, 4  ;;  %v13665_v11 = vrot.slane %v11147_v54, 4 }
 0x276   : > { %v1785_v59 = vmax.f32 %v14217_v45, %v1569_v51  ;;  %v1930_v46 = vsel %vm1820_vm4, %v1927_v28, %v13663_v21  ;;  %v1327_v33 = vmax.f32 %v1231_v4, %v11149_v18  ;;  %v2650_v38 = vrot.slane %v14221_v49, 4  ;;  %v11187_v12 = vld [vmem:[#allocation2 + $0x278] sm:$0x3f] }
 0x277   : > { %v2291_v17 = vsel %vm2181_vm5, %v2288_v22, %v2290_v57  ;;  %v1042_v47 = vmax.f32 %v8008_v41, %v10579_v25  ;;  %v6018_v8 = vsel %vm362_vm0, %v6016_v0, %v13665_v11  ;;  %v2925_v45 = vmax.f32 %v14134_v52, %v14141_v36 }
 0x278   : > { %v2146_v31 = vmax.f32 %v1785_v59, %v1930_v46  ;;  %v14224_v51 = vrot.slane %v11032_v56, 1  ;;  %7652 = vmatprep.mubr.msk.f32.mxu1 %vm751_vm2, %v6018_v8  ;;  %v1565_v4 = vrot.slane %v1327_v33, 1  ;;  %v1926_v34 = vrot.slane %v1327_v33, 2 }
 0x279   : > { %v2287_v35 = vrot.slane %v1327_v33, 3  ;;  %v2647_v21 = vrot.slane %v1327_v33, 4  ;;  %v2651_v25 = vsel %vm362_vm0, %v2648_v39, %v2650_v38  ;;  %v1138_v41 = vmax.f32 %v1042_v47, %v10850_v20 }
 0x27a   : > { %v3459_v62 = vmax.f32 %v11032_v56, %v14224_v51  ;;  %v2507_v61 = vmax.f32 %v2146_v31, %v2291_v17  ;;  %v3005_v0 = vmax.f32 %v2925_v45, %v14168_v19  ;;  %v1567_v59 = vsel %vm1459_vm3, %v1565_v4, %v1566_v42  ;;  %v14226_v42 = vld [vmem:[#allocation77_spill] sm:$0xff] }
 0x27b   : > { %v1928_v52 = vsel %vm1820_vm4, %v1926_v34, %v1927_v28  ;;  %v2289_v46 = vsel %vm2181_vm5, %v2287_v35, %v2288_v22  ;;  %v2649_v51 = vsel %vm362_vm0, %v2647_v21, %v2648_v39  ;;  %v1784_v8 = vmax.f32 %v1327_v33, %v1567_v59  ;;  %v14228_v35 = vld [vmem:[#allocation50_spill] sm:$0xff] }
 0x27c   : > { %v11185_v11 = vmax.f32 %v2507_v61, %v2651_v25  ;;  %v1234_v31 = vmax.f32 %v1138_v41, %v11018_v2  ;;  %v3085_v17 = vmax.f32 %v3005_v0, %v14202_v6  ;;  %v14225_v47 = vrot.slane %v11032_v56, 2  ;;  %v14230_v22 = vld [vmem:[#allocation82_spill] sm:$0xff] }
 0x27d   : > { %v14227_v34 = vmax.f32 %v14226_v42, %v14189_v29  ;;  %v14229_v61 = vmax.f32 %v14228_v35, %v14194_v3  ;;  %v14231_v39 = vmax.f32 %v14230_v22, %v14197_v24  ;;  %v2145_v4 = vmax.f32 %v1784_v8, %v1928_v52  ;;  %v14234_v24 = vld [vmem:[#allocation85_spill] sm:$0xff] }
 0x27e   : > { %v3679_v45 = vmax.f32 %v3459_v62, %v14225_v47  ;;  %v14232_v29 = vmax.f32 %v10848_v32, %v11016_v53  ;;  %v1330_v0 = vmax.f32 %v1234_v31, %v11187_v12  ;;  %v3165_v59 = vmax.f32 %v3085_v17, %v14234_v24 }
 0x27f   : > { %v11197_v28 = vmax.f32 %v14227_v34, %v10130_v48  ;;  %v11203_v21 = vmax.f32 %v14229_v61, %v10112_v23  ;;  %v11209_v33 = vmax.f32 %v14231_v39, %v10206_v58  ;;  %v2506_v8 = vmax.f32 %v2145_v4, %v2289_v46 }
 0x280   : > { %v11217_v25 = vmax.f32 %v14232_v29, %v11185_v11  ;;  %v1570_v35 = vrot.slane %v1330_v0, 1  ;;  %v1931_v61 = vrot.slane %v1330_v0, 2  ;;  %v2292_v22 = vrot.slane %v1330_v0, 3 }
 0x281   : > { %v3312_v52 = vrot.slane %v11197_v28, 1  ;;  %v3313_v47 = vrot.slane %v11203_v21, 1  ;;  %v3532_v34 = vrot.slane %v11197_v28, 2  ;;  %v2652_v39 = vrot.slane %v1330_v0, 4 }
 0x282   : > { %14233 = vst [vmem:[#allocation56_spill] sm:$0xff] %v11217_v25  ;;  %v11228_v29 = vmax.f32 %v2506_v8, %v2649_v51  ;;  %v3782_v3 = vrot.slane %v3165_v59, 3  ;;  %v4042_v62 = vrot.slane %v3165_v59, 4  ;;  %v14235_v17 = vrot.slane %v14221_v49, 1 }
 0x283   : > { %v3314_v31 = vsel %vm1459_vm3, %v3312_v52, %v3313_v47  ;;  %v1787_v4 = vmax.f32 %v1330_v0, %v1570_v35  ;;  %v14236_v41 = vrot.slane %v14221_v49, 2  ;;  %v2293_v44 = vsel %vm2181_vm5, %v2290_v57, %v2292_v22 }
 0x284   : > { %v1571_v46 = vsel %vm1459_vm3, %v14235_v17, %v1570_v35  ;;  %v14237_v51 = vmax.f32 %v10859_v40, %v11053_v7  ;;  %v5311_v0 = vrot.slane %v11228_v29, 6  ;;  %v14239_v57 = vrot.slane %v11032_v56, 3 }
 0x285   : > { %v1932_v42 = vsel %vm1820_vm4, %v14236_v41, %v1931_v61  ;;  %v1786_v8 = vmax.f32 %v14221_v49, %v1571_v46  ;;  %v2148_v35 = vmax.f32 %v1787_v4, %v1931_v61  ;;  %v2653_v41 = vsel %vm362_vm0, %v2650_v38, %v2652_v39 }
 0x286   : > { %v11244_v59 = vmax.f32 %v14237_v51, %v11228_v29  ;;  %v3783_v17 = vsel %vm2181_vm5, %v14239_v57, %v3782_v3  ;;  %v14240_v15 = vrot.slane %v11185_v11, 6  ;;  %v14241_v14 = vrot.slane %v11032_v56, 4 }
 0x287   : > { %v3959_v51 = vmax.f32 %v3679_v45, %v3783_v17  ;;  %v14242_v43 = vrot.slane %v11209_v33, 1  ;;  %v2147_v38 = vmax.f32 %v1786_v8, %v1932_v42  ;;  %v2509_v61 = vmax.f32 %v2148_v35, %v2292_v22 }
 0x288   : > { %14238 = vst [vmem:[#allocation58_spill] sm:$0xff] %v11244_v59  ;;  %v5313_v9 = vsel %vm5255_vm7, %v5311_v0, %v14240_v15  ;;  %v4043_v52 = vsel %vm362_vm0, %v14241_v14, %v4042_v62  ;;  %v3460_v46 = vmax.f32 %v11197_v28, %v3314_v31  ;;  %v3533_v15 = vrot.slane %v11203_v21, 2 }
 0x289   : > { %v3316_v49 = vsel %vm1459_vm3, %v3313_v47, %v14242_v43  ;;  %7576 = vmatprep.mubr.msk.f32.mxu0 %vm751_vm2, %v5313_v9  ;;  %v11266_v4 = vmax.f32 %v3959_v51, %v4043_v52  ;;  %v13679_v56 = vrot.slane %v11209_v33, 2  ;;  %v3784_v14 = vrot.slane %v11197_v28, 3 }
 0x28a   : > { %v3461_v3 = vmax.f32 %v11203_v21, %v3316_v49  ;;  %v2508_v45 = vmax.f32 %v2147_v38, %v2293_v44  ;;  %v11271_v62 = vmax.f32 %v2509_v61, %v2652_v39  ;;  %v3785_v43 = vrot.slane %v11203_v21, 3 }
 0x28b   : > { %14243 = vst [vmem:[#allocation81_spill] sm:$0xff] %v11266_v4  ;;  %v13676_v9 = vrot.slane %v11209_v33, 3  ;;  %v6019_v47 = vrot.slane %v11266_v4, 4  ;;  %v3534_v42 = vsel %vm1820_vm4, %v3532_v34, %v3533_v15  ;;  %v3536_v22 = vsel %vm1820_vm4, %v3533_v15, %v13679_v56  ;;  %v14254_v56 = vld [vmem:[#allocation83_spill] sm:$0xff] }
 0x28c   : > { %14244 = vst [vmem:[#allocation67_spill] sm:$0xff] %v11271_v62  ;;  %v4044_v31 = vrot.slane %v11197_v28, 4  ;;  %v11281_v52 = vmax.f32 %v2508_v45, %v2653_v41  ;;  %v3680_v0 = vmax.f32 %v3460_v46, %v3534_v42  ;;  %v3681_v44 = vmax.f32 %v3461_v3, %v3536_v22  ;;  %v8009_v45 = vld [vmem:[#allocation2 + $0x200] sm:$0xff]  ;;  %v14250_v22 = vld [vmem:[#allocation25_spill] sm:$0xff] }
 0x28d   : > { %v3786_v39 = vsel %vm2181_vm5, %v3784_v14, %v3785_v43  ;;  %v14245_v8 = vrot.slane %v11147_v54, 4  ;;  %v3788_v34 = vsel %vm2181_vm5, %v3785_v43, %v13676_v9  ;;  %v4045_v57 = vrot.slane %v11203_v21, 4 }
 0x28e   : > { %v13675_v17 = vrot.slane %v11209_v33, 4  ;;  %v14246_v41 = vmax.f32 %v10927_v10, %v11108_v50  ;;  %v5314_v38 = vrot.slane %v11281_v52, 6  ;;  %v3960_v61 = vmax.f32 %v3680_v0, %v3786_v39 }
 0x28f   : > { %v6020_v35 = vsel %vm362_vm0, %v14245_v8, %v6019_v47  ;;  %v3961_v21 = vmax.f32 %v3681_v44, %v3788_v34  ;;  %v4046_v46 = vsel %vm362_vm0, %v4044_v31, %v4045_v57  ;;  %v14248_v15 = vrot.slane %v11185_v11, 6  ;;  %v14249_v47 = vld [vmem:[#allocation37_spill] sm:$0xff] }
 0x290   : > { %v11298_v51 = vmax.f32 %v14246_v41, %v11281_v52  ;;  %7653 = vmatmul.mubr.msk.f32.gmra.mrb[22].mxu1 %vm751_vm2, %v6020_v35  ;;  %v4048_v3 = vsel %vm362_vm0, %v4045_v57, %v13675_v17  ;;  %v1043_v43 = vmax.f32 %v8009_v45, %v10772_v60  ;;  %v1573_v42 = vrot.slane %v14249_v47, 1  ;;  %v8010_v17 = vld [vmem:[#allocation2 + $0x218] sm:$0x3f] }
 0x291   : > { %v5315_v14 = vsel %vm5255_vm7, %v14248_v15, %v5314_v38  ;;  %v13678_v8 = vrot.slane %v14250_v22, 1  ;;  %v11315_v0 = vmax.f32 %v3960_v61, %v4046_v46  ;;  %v11317_v31 = vmax.f32 %v3961_v21, %v4048_v3  ;;  %v11329_v21 = vld [vmem:[#allocation2 + $0x280] sm:$0xff] }
 0x292   : > { %14247 = vst [vmem:[#allocation80_spill] sm:$0xff] %v11298_v51  ;;  %7577 = vmatmul.mubr.msk.f32.gmra.mrb[54].mxu0 %vm751_vm2, %v5315_v14  ;;  %v1934_v44 = vrot.slane %v14249_v47, 2  ;;  %v13677_v39 = vrot.slane %v14250_v22, 2  ;;  %v1139_v35 = vmax.f32 %v1043_v43, %v10973_v16  ;;  %v2295_v57 = vrot.slane %v14249_v47, 3 }
 0x293   : > { %14251 = vst [vmem:[#allocation68_spill] sm:$0xff] %v11315_v0  ;;  %14252 = vst [vmem:[#allocation86_spill] sm:$0xff] %v11317_v31  ;;  %v1576_v34 = vsel %vm1459_vm3, %v1573_v42, %v13678_v8  ;;  %v2297_v41 = vrot.slane %v14250_v22, 3  ;;  %v6021_v38 = vrot.slane %v11315_v0, 4  ;;  %v13680_v61 = vrot.slane %v11317_v31, 4 }
 0x294   : > { %v1789_v46 = vmax.f32 %v14249_v47, %v1576_v34  ;;  %v1937_v3 = vsel %vm1820_vm4, %v1934_v44, %v13677_v39  ;;  %v1235_v15 = vmax.f32 %v1139_v35, %v11149_v18  ;;  %v2655_v45 = vrot.slane %v14249_v47, 4 }
 0x295   : > { %v2298_v14 = vsel %vm2181_vm5, %v2295_v57, %v2297_v41  ;;  %v2657_v43 = vrot.slane %v14250_v22, 4  ;;  %v6023_v49 = vsel %vm362_vm0, %v6021_v38, %v13680_v61  ;;  %v1046_v34 = vmax.f32 %v8010_v17, %v10850_v20 }
 0x296   : > { %v2150_v28 = vmax.f32 %v1789_v46, %v1937_v3  ;;  %v2929_v9 = vmax.f32 %v14141_v36, %v14168_v19  ;;  %7655 = vmatprep.mubr.msk.f32.mxu1 %vm751_vm2, %v6023_v49  ;;  %v1331_v35 = vmax.f32 %v1235_v15, %v11329_v21  ;;  %v14253_v47 = vrot.slane %v11209_v33, 1  ;;  %v14256_v49 = vld [vmem:[#allocation84_spill] sm:$0xff] }
 0x297   : > { %v2658_v39 = vsel %vm362_vm0, %v2655_v45, %v2657_v43  ;;  %v14255_v38 = vmax.f32 %v14254_v56, %v10130_v48  ;;  %v1142_v3 = vmax.f32 %v1046_v34, %v11018_v2  ;;  %v14257_v15 = vmax.f32 %v14256_v49, %v10112_v23  ;;  %v11367_v48 = vld [vmem:[#allocation2 + $0x298] sm:$0x3f] }
 0x298   : > { %v3462_v8 = vmax.f32 %v11209_v33, %v14253_v47  ;;  %v2511_v17 = vmax.f32 %v2150_v28, %v2298_v14  ;;  %v3009_v36 = vmax.f32 %v2929_v9, %v14202_v6  ;;  %v1572_v0 = vrot.slane %v1331_v35, 1 }
 0x299   : > { %v11355_v46 = vmax.f32 %v14255_v38, %v10215_v30  ;;  %v11363_v61 = vmax.f32 %v14257_v15, %v10208_v5  ;;  %v1933_v4 = vrot.slane %v1331_v35, 2  ;;  %v2294_v47 = vrot.slane %v1331_v35, 3 }
 0x29a   : > { %v2654_v54 = vrot.slane %v1331_v35, 4  ;;  %v11365_v62 = vmax.f32 %v2511_v17, %v2658_v39  ;;  %v1238_v56 = vmax.f32 %v1142_v3, %v11187_v12  ;;  %v3089_v28 = vmax.f32 %v3009_v36, %v14234_v24 }
 0x29b   : > { %v14258_v9 = vrot.slane %v11209_v33, 2  ;;  %v1574_v34 = vsel %vm1459_vm3, %v1572_v0, %v1573_v42  ;;  %v1935_v23 = vsel %vm1820_vm4, %v1933_v4, %v1934_v44  ;;  %v2296_v38 = vsel %vm2181_vm5, %v2294_v47, %v2295_v57  ;;  %v14261_v0 = vld [vmem:[#allocation6_spill] sm:$0xff] }
 0x29c   : > { %v2656_v49 = vsel %vm362_vm0, %v2654_v54, %v2655_v45  ;;  %v1788_v15 = vmax.f32 %v1331_v35, %v1574_v34  ;;  %v14259_v17 = vmax.f32 %v11016_v53, %v11185_v11  ;;  %v1334_v4 = vmax.f32 %v1238_v56, %v11367_v48  ;;  %v14262_v54 = vld [vmem:[#allocation87_spill] sm:$0xff] }
 0x29d   : > { %v3682_v14 = vmax.f32 %v3462_v8, %v14258_v9  ;;  %v3169_v44 = vmax.f32 %v3089_v28, %v14261_v0  ;;  %v14263_v57 = vmax.f32 %v14262_v54, %v10206_v58  ;;  %v3317_v36 = vrot.slane %v11355_v46, 1 }
 0x29e   : > { %v11383_v3 = vmax.f32 %v14259_v17, %v11365_v62  ;;  %v2149_v35 = vmax.f32 %v1788_v15, %v1935_v23  ;;  %v3318_v47 = vrot.slane %v11363_v61, 1  ;;  %v3537_v9 = vrot.slane %v11355_v46, 2 }
 0x29f   : > { %v11394_v45 = vmax.f32 %v14263_v57, %v10331_v27  ;;  %v1577_v34 = vrot.slane %v1334_v4, 1  ;;  %v1938_v17 = vrot.slane %v1334_v4, 2  ;;  %v2299_v8 = vrot.slane %v1334_v4, 3 }
 0x2a0   : > { %14260 = vst [vmem:[#allocation41_spill] sm:$0xff] %v11383_v3  ;;  %v2659_v39 = vrot.slane %v1334_v4, 4  ;;  %v2510_v56 = vmax.f32 %v2149_v35, %v2296_v38  ;;  %v3789_v42 = vrot.slane %v3169_v44, 3  ;;  %v4049_v28 = vrot.slane %v3169_v44, 4 }
 0x2a1   : > { %v3319_v25 = vsel %vm1459_vm3, %v3317_v36, %v3318_v47  ;;  %v14264_v58 = vrot.slane %v14250_v22, 1  ;;  %v1791_v23 = vmax.f32 %v1334_v4, %v1577_v34  ;;  %v14265_v15 = vrot.slane %v14250_v22, 2 }
 0x2a2   : > { %v2300_v37 = vsel %vm2181_vm5, %v2297_v41, %v2299_v8  ;;  %v11407_v1 = vmax.f32 %v2510_v56, %v2656_v49  ;;  %v2660_v38 = vsel %vm362_vm0, %v2657_v43, %v2659_v39  ;;  %v14266_v44 = vrot.slane %v11209_v33, 3  ;;  %v11503_v49 = vld [vmem:[#allocation2 + $0x2b8] sm:$0x3f] }
 0x2a3   : > { %v1578_v54 = vsel %vm1459_vm3, %v14264_v58, %v1577_v34  ;;  %v1939_v57 = vsel %vm1820_vm4, %v14265_v15, %v1938_v17  ;;  %v2152_v36 = vmax.f32 %v1791_v23, %v1938_v17  ;;  %v14267_v4 = vrot.slane %v11209_v33, 4 }
 0x2a4   : > { %v1790_v53 = vmax.f32 %v14250_v22, %v1578_v54  ;;  %v3790_v35 = vsel %vm2181_vm5, %v14266_v44, %v3789_v42  ;;  %v13698_v58 = vrot.slane %v11394_v45, 1  ;;  %v14268_v22 = vmax.f32 %v11053_v7, %v11228_v29 }
 0x2a5   : > { %v3962_v10 = vmax.f32 %v3682_v14, %v3790_v35  ;;  %v4050_v34 = vsel %vm362_vm0, %v14267_v4, %v4049_v28  ;;  %v5316_v14 = vrot.slane %v11407_v1, 6  ;;  %v2513_v33 = vmax.f32 %v2152_v36, %v2299_v8 }
 0x2a6   : > { %v11424_v43 = vmax.f32 %v14268_v22, %v11407_v1  ;;  %v2151_v42 = vmax.f32 %v1790_v53, %v1939_v57  ;;  %v3321_v56 = vsel %vm1459_vm3, %v3318_v47, %v13698_v58  ;;  %v14270_v28 = vrot.slane %v11365_v62, 6 }
 0x2a7   : > { %v11429_v17 = vmax.f32 %v3962_v10, %v4050_v34  ;;  %v3463_v23 = vmax.f32 %v11355_v46, %v3319_v25  ;;  %v3464_v15 = vmax.f32 %v11363_v61, %v3321_v56  ;;  %v3538_v44 = vrot.slane %v11363_v61, 2 }
 0x2a8   : > { %v5318_v54 = vsel %vm5255_vm7, %v5316_v14, %v14270_v28  ;;  %v2512_v53 = vmax.f32 %v2151_v42, %v2300_v37  ;;  %v11441_v8 = vmax.f32 %v2513_v33, %v2659_v39  ;;  %v13697_v57 = vrot.slane %v11394_v45, 2  ;;  %v11463_v33 = vld [vmem:[#allocation2 + $0x2a0] sm:$0xff] }
 0x2a9   : > { %14269 = vst [vmem:[#allocation78_spill] sm:$0xff] %v11429_v17  ;;  %7579 = vmatprep.mubr.msk.f32.mxu0 %vm751_vm2, %v5318_v54  ;;  %v6024_v10 = vrot.slane %v11429_v17, 4  ;;  %v3539_v47 = vsel %vm1820_vm4, %v3537_v9, %v3538_v44  ;;  %v3791_v35 = vrot.slane %v11355_v46, 3  ;;  %v3792_v36 = vrot.slane %v11363_v61, 3 }
 0x2aa   : > { %14271 = vst [vmem:[#allocation60_spill] sm:$0xff] %v11441_v8  ;;  %v13696_v25 = vrot.slane %v11394_v45, 3  ;;  %v11449_v4 = vmax.f32 %v2512_v53, %v2660_v38  ;;  %v14272_v34 = vrot.slane %v11317_v31, 4  ;;  %v3541_v39 = vsel %vm1820_vm4, %v3538_v44, %v13697_v57 }
 0x2ab   : > { %v3683_v22 = vmax.f32 %v3463_v23, %v3539_v47  ;;  %v3684_v9 = vmax.f32 %v3464_v15, %v3541_v39  ;;  %v3793_v14 = vsel %vm2181_vm5, %v3791_v35, %v3792_v36  ;;  %v4051_v38 = vrot.slane %v11355_v46, 4 }
 0x2ac   : > { %v6025_v37 = vsel %vm362_vm0, %v14272_v34, %v6024_v10  ;;  %v3795_v42 = vsel %vm2181_vm5, %v3792_v36, %v13696_v25  ;;  %v14273_v28 = vmax.f32 %v11108_v50, %v11281_v52  ;;  %v5319_v15 = vrot.slane %v11449_v4, 6 }
 0x2ad   : > { %7656 = vmatmul.mubr.msk.f32.gmra.mrb[24].mxu1 %vm751_vm2, %v6025_v37  ;;  %v3963_v44 = vmax.f32 %v3683_v22, %v3793_v14  ;;  %v3964_v53 = vmax.f32 %v3684_v9, %v3795_v42  ;;  %v4052_v46 = vrot.slane %v11363_v61, 4  ;;  %v13695_v10 = vrot.slane %v11394_v45, 4  ;;  %v14276_v37 = vld [vmem:[#allocation71_spill] sm:$0xff] }
 0x2ae   : > { %v11471_v54 = vmax.f32 %v14273_v28, %v11449_v4  ;;  %v14275_v47 = vrot.slane %v11365_v62, 6  ;;  %v1047_v36 = vmax.f32 %v10772_v60, %v10973_v16  ;;  %v1580_v39 = vrot.slane %v14276_v37, 1  ;;  %v14277_v9 = vld [vmem:[#allocation63_spill] sm:$0xff] }
 0x2af   : > { %v4053_v22 = vsel %vm362_vm0, %v4051_v38, %v4052_v46  ;;  %v4055_v61 = vsel %vm362_vm0, %v4052_v46, %v13695_v10  ;;  %v1582_v14 = vrot.slane %v14277_v9, 1  ;;  %v1941_v42 = vrot.slane %v14276_v37, 2 }
 0x2b0   : > { %14274 = vst [vmem:[#allocation59_spill] sm:$0xff] %v11471_v54  ;;  %v5320_v35 = vsel %vm5255_vm7, %v14275_v47, %v5319_v15  ;;  %v11493_v28 = vmax.f32 %v3963_v44, %v4053_v22  ;;  %v11495_v60 = vmax.f32 %v3964_v53, %v4055_v61  ;;  %v1143_v15 = vmax.f32 %v1047_v36, %v11149_v18 }
 0x2b1   : > { %7580 = vmatmul.mubr.msk.f32.gmra.mrb[56].mxu0 %vm751_vm2, %v5320_v35  ;;  %v1943_v47 = vrot.slane %v14277_v9, 2  ;;  %v1583_v35 = vsel %vm1459_vm3, %v1580_v39, %v1582_v14  ;;  %v2302_v38 = vrot.slane %v14276_v37, 3  ;;  %v2304_v23 = vrot.slane %v14277_v9, 3 }
 0x2b2   : > { %14278 = vst [vmem:[#allocation77_spill] sm:$0xff] %v11493_v28  ;;  %14279 = vst [vmem:[#allocation50_spill] sm:$0xff] %v11495_v60  ;;  %v2662_v46 = vrot.slane %v14276_v37, 4  ;;  %v6026_v56 = vrot.slane %v11493_v28, 4  ;;  %v13701_v44 = vrot.slane %v11495_v60, 4  ;;  %v1239_v53 = vmax.f32 %v1143_v15, %v11329_v21 }
 0x2b3   : > { %v1793_v36 = vmax.f32 %v14276_v37, %v1583_v35  ;;  %v1944_v22 = vsel %vm1820_vm4, %v1941_v42, %v1943_v47  ;;  %v2305_v61 = vsel %vm2181_vm5, %v2302_v38, %v2304_v23  ;;  %v2664_v10 = vrot.slane %v14277_v9, 4 }
 0x2b4   : > { %v1050_v41 = vmax.f32 %v10850_v20, %v11018_v2  ;;  %v6028_v34 = vsel %vm362_vm0, %v6026_v56, %v13701_v44  ;;  %v1335_v25 = vmax.f32 %v1239_v53, %v11463_v33  ;;  %v2933_v58 = vmax.f32 %v14168_v19, %v14202_v6 }
 0x2b5   : > { %v2154_v57 = vmax.f32 %v1793_v36, %v1944_v22  ;;  %7658 = vmatprep.mubr.msk.f32.mxu1 %vm751_vm2, %v6028_v34  ;;  %v2665_v37 = vsel %vm362_vm0, %v2662_v46, %v2664_v10  ;;  %v14280_v20 = vrot.slane %v11394_v45, 1  ;;  %v14281_v17 = vrot.slane %v11394_v45, 2 }
 0x2b6   : > { %v1146_v35 = vmax.f32 %v1050_v41, %v11187_v12  ;;  %v1579_v56 = vrot.slane %v1335_v25, 1  ;;  %v1940_v44 = vrot.slane %v1335_v25, 2  ;;  %v2301_v53 = vrot.slane %v1335_v25, 3 }
 0x2b7   : > { %v3465_v28 = vmax.f32 %v11394_v45, %v14280_v20  ;;  %v2515_v36 = vmax.f32 %v2154_v57, %v2305_v61  ;;  %v2661_v22 = vrot.slane %v1335_v25, 4  ;;  %v3013_v34 = vmax.f32 %v2933_v58, %v14234_v24 }
 0x2b8   : > { %v1242_v15 = vmax.f32 %v1146_v35, %v11367_v48  ;;  %v1581_v41 = vsel %vm1459_vm3, %v1579_v56, %v1580_v39  ;;  %v1942_v19 = vsel %vm1820_vm4, %v1940_v44, %v1941_v42  ;;  %v2303_v8 = vsel %vm2181_vm5, %v2301_v53, %v2302_v38  ;;  %v11540_v35 = vld [vmem:[#allocation2 + $0x2c0] sm:$0xff] }
 0x2b9   : > { %v3685_v31 = vmax.f32 %v3465_v28, %v14281_v17  ;;  %v11535_v51 = vmax.f32 %v2515_v36, %v2665_v37  ;;  %v1792_v20 = vmax.f32 %v1335_v25, %v1581_v41  ;;  %v2663_v59 = vsel %vm362_vm0, %v2661_v22, %v2662_v46  ;;  %v14285_v37 = vld [vmem:[#allocation4_spill] sm:$0xff] }
 0x2ba   : > { %v1338_v57 = vmax.f32 %v1242_v15, %v11503_v49  ;;  %v3093_v61 = vmax.f32 %v3013_v34, %v14261_v0  ;;  %v14283_v17 = vmax.f32 %v11185_v11, %v11365_v62  ;;  %v1051_v53 = vmax.f32 %v10973_v16, %v11149_v18 }
 0x2bb   : > { %14282 = vst [vmem:[#allocation82_spill] sm:$0xff] %v11535_v51  ;;  %v5322_v42 = vrot.slane %v11535_v51, 6  ;;  %v2153_v28 = vmax.f32 %v1792_v20, %v1942_v19 }
 0x2bc   : > { %v11548_v39 = vmax.f32 %v14283_v17, %v11535_v51  ;;  %v1584_v38 = vrot.slane %v1338_v57, 1  ;;  %v1945_v46 = vrot.slane %v1338_v57, 2  ;;  %v2306_v44 = vrot.slane %v1338_v57, 3 }
 0x2bd   : > { %v2666_v15 = vrot.slane %v1338_v57, 4  ;;  %v3173_v56 = vmax.f32 %v3093_v61, %v14285_v37  ;;  %v2514_v22 = vmax.f32 %v2153_v28, %v2303_v8  ;;  %v1147_v51 = vmax.f32 %v1051_v53, %v11329_v21 }
 0x2be   : > { %14284 = vst [vmem:[#allocation85_spill] sm:$0xff] %v11548_v39  ;;  %v1585_v34 = vsel %vm1459_vm3, %v1582_v14, %v1584_v38  ;;  %v1795_v41 = vmax.f32 %v1338_v57, %v1584_v38  ;;  %v1946_v17 = vsel %vm1820_vm4, %v1943_v47, %v1945_v46  ;;  %v2307_v20 = vsel %vm2181_vm5, %v2304_v23, %v2306_v44  ;;  %v8011_v23 = vld [vmem:[#allocation2 + $0x2c8] sm:$0xff]  ;;  %v14289_v57 = vld [vmem:[#allocation66_spill] sm:$0xff] }
 0x2bf   : > { %v1794_v19 = vmax.f32 %v14277_v9, %v1585_v34  ;;  %v2667_v58 = vsel %vm362_vm0, %v2664_v10, %v2666_v15  ;;  %v3796_v25 = vrot.slane %v3173_v56, 3  ;;  %v11563_v61 = vmax.f32 %v2514_v22, %v2663_v59  ;;  %v14288_v10 = vld [vmem:[#allocation38_spill] sm:$0xff] }
 0x2c0   : > { %v2156_v3 = vmax.f32 %v1795_v41, %v1945_v46  ;;  %v4056_v16 = vrot.slane %v3173_v56, 4  ;;  %v14286_v8 = vrot.slane %v11394_v45, 3  ;;  %v14287_v9 = vmax.f32 %v11329_v21, %v11463_v33 }
 0x2c1   : > { %v2155_v36 = vmax.f32 %v1794_v19, %v1946_v17  ;;  %v14290_v59 = vmax.f32 %v14288_v10, %v14289_v57  ;;  %v14291_v46 = vmax.f32 %v11228_v29, %v11407_v1  ;;  %v5321_v53 = vrot.slane %v11563_v61, 6  ;;  %v14294_v10 = vld [vmem:[#allocation43_spill] sm:$0xff]  ;;  %v14295_v57 = vld [vmem:[#allocation13_spill] sm:$0xff] }
 0x2c2   : > { %v3797_v14 = vsel %vm2181_vm5, %v14286_v8, %v3796_v25  ;;  %v11573_v47 = vmax.f32 %v14287_v9, %v11540_v35  ;;  %v2517_v34 = vmax.f32 %v2156_v3, %v2306_v44  ;;  %v14293_v17 = vrot.slane %v11394_v45, 4 }
 0x2c3   : > { %v1340_v28 = vmax.f32 %v14290_v59, %v8011_v23  ;;  %v11584_v56 = vmax.f32 %v14291_v46, %v11563_v61  ;;  %v2516_v22 = vmax.f32 %v2155_v36, %v2307_v20  ;;  %v3965_v41 = vmax.f32 %v3685_v31, %v3797_v14  ;;  %v8012_v23 = vld [vmem:[#allocation2 + $0x2d0] sm:$0xff] }
 0x2c4   : > { %v4057_v19 = vsel %vm362_vm0, %v14293_v17, %v4056_v16  ;;  %v5323_v8 = vsel %vm5255_vm7, %v5321_v53, %v5322_v42  ;;  %v1243_v9 = vmax.f32 %v1147_v51, %v11463_v33  ;;  %v14296_v59 = vmax.f32 %v14294_v10, %v14295_v57 }
 0x2c5   : > { %14292 = vst [vmem:[#allocation37_spill] sm:$0xff] %v11584_v56  ;;  %v1587_v38 = vrot.slane %v1340_v28, 1  ;;  %7582 = vmatprep.mubr.msk.f32.mxu0 %vm751_vm2, %v5323_v8  ;;  %v11600_v36 = vmax.f32 %v2516_v22, %v2667_v58  ;;  %v11602_v31 = vmax.f32 %v2517_v34, %v2666_v15  ;;  %v11604_v3 = vmax.f32 %v3965_v41, %v4057_v19  ;;  %v8014_v56 = vld [vmem:[#allocation2 + $0x2f0] sm:$0xff] }
 0x2c6   : > { %v11597_v46 = vmax.f32 %v14296_v59, %v8012_v23  ;;  %v1948_v45 = vrot.slane %v1340_v28, 2  ;;  %v1339_v44 = vmax.f32 %v1243_v9, %v11540_v35  ;;  %v2309_v16 = vrot.slane %v1340_v28, 3 }
 0x2c7   : > { %14297 = vst [vmem:[#allocation25_spill] sm:$0xff] %v11602_v31  ;;  %14298 = vst [vmem:[#allocation83_spill] sm:$0xff] %v11604_v3  ;;  %v14299_v58 = vmax.f32 %v11281_v52, %v11449_v4  ;;  %v5324_v22 = vrot.slane %v11600_v36, 6  ;;  %v6029_v34 = vrot.slane %v11604_v3, 4  ;;  %v14300_v57 = vrot.slane %v11495_v60, 4  ;;  %v14320_v31 = vld [vmem:[#allocation14_spill] sm:$0xff] }
 0x2c8   : > { %v13715_v51 = vrot.slane %v11597_v46, 1  ;;  %v13712_v20 = vrot.slane %v11597_v46, 2  ;;  %v1586_v41 = vrot.slane %v1339_v44, 1  ;;  %v1947_v19 = vrot.slane %v1339_v44, 2 }
 0x2c9   : > { %v11615_v53 = vmax.f32 %v14299_v58, %v11600_v36  ;;  %v5325_v8 = vsel %vm5255_vm7, %v5322_v42, %v5324_v22  ;;  %v2308_v10 = vrot.slane %v1339_v44, 3  ;;  %v6030_v59 = vsel %vm362_vm0, %v14300_v57, %v6029_v34 }
 0x2ca   : > { %v1590_v17 = vsel %vm1459_vm3, %v1587_v38, %v13715_v51  ;;  %v1951_v23 = vsel %vm1820_vm4, %v1948_v45, %v13712_v20  ;;  %7583 = vmatmul.mubr.msk.f32.gmra.mrb[58].mxu0 %vm751_vm2, %v5325_v8  ;;  %v1588_v58 = vsel %vm1459_vm3, %v1586_v41, %v1587_v38  ;;  %v1949_v14 = vsel %vm1820_vm4, %v1947_v19, %v1948_v45  ;;  %v14301_v38 = vld [vmem:[#allocation89_spill] sm:$0xff] }
 0x2cb   : > { %v1797_v9 = vmax.f32 %v1340_v28, %v1590_v17  ;;  %v13714_v15 = vrot.slane %v11597_v46, 3  ;;  %7659 = vmatmul.mubr.msk.f32.gmra.mrb[26].mxu1 %vm751_vm2, %v6030_v59  ;;  %v1796_v42 = vmax.f32 %v1339_v44, %v1588_v58  ;;  %v2310_v17 = vsel %vm2181_vm5, %v2308_v10, %v2309_v16  ;;  %v14303_v59 = vld [vmem:[#allocation88_spill] sm:$0xff] }
 0x2cc   : > { %v2668_v25 = vrot.slane %v1339_v44, 4  ;;  %v2669_v20 = vrot.slane %v1340_v28, 4  ;;  %v13713_v34 = vrot.slane %v11597_v46, 4  ;;  %v14302_v45 = vmax.f32 %v14301_v38, %v10215_v30  ;;  %v14305_v44 = vld [vmem:[#allocation3_spill] sm:$0xff] }
 0x2cd   : > { %v2158_v22 = vmax.f32 %v1797_v9, %v1951_v23  ;;  %v2312_v8 = vsel %vm2181_vm5, %v2309_v16, %v13714_v15  ;;  %v2157_v19 = vmax.f32 %v1796_v42, %v1949_v14  ;;  %v14304_v9 = vmax.f32 %v14303_v59, %v10208_v5 }
 0x2ce   : > { %v3174_v41 = vmax.f32 %v14302_v45, %v10618_v26  ;;  %v14306_v10 = vmax.f32 %v14305_v44, %v10331_v27  ;;  %v2670_v28 = vsel %vm362_vm0, %v2668_v25, %v2669_v20  ;;  %v2672_v30 = vsel %vm362_vm0, %v2669_v20, %v13713_v34  ;;  %v11676_v25 = vld [vmem:[#allocation2 + $0x2d8] sm:$0x3f] }
 0x2cf   : > { %v2519_v57 = vmax.f32 %v2158_v22, %v2312_v8  ;;  %v3175_v23 = vmax.f32 %v14304_v9, %v10586_v55  ;;  %v2518_v42 = vmax.f32 %v2157_v19, %v2310_v17  ;;  %v14315_v3 = vrot.slane %v11597_v46, 4 }
 0x2d0   : > { %v11653_v16 = vmax.f32 %v14306_v10, %v10664_v63  ;;  %v3322_v58 = vrot.slane %v3174_v41, 1  ;;  %v3542_v14 = vrot.slane %v3174_v41, 2  ;;  %v3798_v27 = vrot.slane %v3174_v41, 3 }
 0x2d1   : > { %v11659_v22 = vmax.f32 %v2519_v57, %v2672_v30  ;;  %v3323_v8 = vrot.slane %v3175_v23, 1  ;;  %v3543_v38 = vrot.slane %v3175_v23, 2  ;;  %v3799_v59 = vrot.slane %v3175_v23, 3 }
 0x2d2   : > { %v3325_v5 = vrot.slane %v11653_v16, 1  ;;  %v3545_v45 = vrot.slane %v11653_v16, 2  ;;  %v11663_v9 = vmax.f32 %v2518_v42, %v2670_v28  ;;  %v4058_v51 = vrot.slane %v3174_v41, 4 }
 0x2d3   : > { %v13716_v20 = vrot.slane %v11659_v22, 6  ;;  %v3324_v44 = vsel %vm1459_vm3, %v3322_v58, %v3323_v8  ;;  %v3544_v57 = vsel %vm1820_vm4, %v3542_v14, %v3543_v38  ;;  %v3800_v34 = vsel %vm2181_vm5, %v3798_v27, %v3799_v59 }
 0x2d4   : > { %v3326_v17 = vsel %vm1459_vm3, %v3323_v8, %v3325_v5  ;;  %v3466_v19 = vmax.f32 %v3174_v41, %v3324_v44  ;;  %v3546_v10 = vsel %vm1820_vm4, %v3543_v38, %v3545_v45  ;;  %v5326_v28 = vrot.slane %v11663_v9, 6 }
 0x2d5   : > { %v3467_v42 = vmax.f32 %v3175_v23, %v3326_v17  ;;  %v13717_v58 = vrot.slane %v11653_v16, 3  ;;  %v4059_v8 = vrot.slane %v3175_v23, 4  ;;  %v4061_v44 = vrot.slane %v11653_v16, 4  ;;  %v967_v23 = vld [vmem:[#allocation2 + $0x320] sm:$0xff] }
 0x2d6   : > { %v3686_v15 = vmax.f32 %v3466_v19, %v3544_v57  ;;  %v5328_v14 = vsel %vm5255_vm7, %v5326_v28, %v13716_v20  ;;  %v1054_v30 = vmax.f32 %v11018_v2, %v11187_v12  ;;  %v14307_v2 = vmax.f32 %v11367_v48, %v11503_v49 }
 0x2d7   : > { %v3687_v38 = vmax.f32 %v3467_v42, %v3546_v10  ;;  %7585 = vmatprep.mubr.msk.f32.mxu0 %vm751_vm2, %v5328_v14  ;;  %v3802_v27 = vsel %vm2181_vm5, %v3799_v59, %v13717_v58  ;;  %v4060_v41 = vsel %vm362_vm0, %v4058_v51, %v4059_v8  ;;  %v4062_v57 = vsel %vm362_vm0, %v4059_v8, %v4061_v44  ;;  %v963_v59 = vld [vmem:[#allocation2 + $0x300] sm:$0xff] }
 0x2d8   : > { %v3966_v17 = vmax.f32 %v3686_v15, %v3800_v34  ;;  %v1150_v10 = vmax.f32 %v1054_v30, %v11367_v48  ;;  %v11698_v12 = vmax.f32 %v14307_v2, %v11676_v25  ;;  %v2937_v15 = vmax.f32 %v14202_v6, %v14234_v24  ;;  %v959_v34 = vld [vmem:[#allocation2 + $0x2e0] sm:$0xff] }
 0x2d9   : > { %v3967_v19 = vmax.f32 %v3687_v38, %v3802_v27  ;;  %v3468_v51 = vmax.f32 %v11653_v16, %v3325_v5  ;;  %v1055_v42 = vmax.f32 %v11149_v18, %v11329_v21  ;;  %v1067_v14 = vmax.f32 %v11540_v35, %v959_v34  ;;  %v971_v18 = vld [vmem:[#allocation2 + $0x340] sm:$0xff] }
 0x2da   : > { %v11700_v28 = vmax.f32 %v3966_v17, %v4060_v41  ;;  %v1246_v30 = vmax.f32 %v1150_v10, %v11503_v49  ;;  %v1071_v38 = vmax.f32 %v959_v34, %v963_v59  ;;  %v3017_v17 = vmax.f32 %v2937_v15, %v14261_v0 }
 0x2db   : > { %v11707_v8 = vmax.f32 %v3967_v19, %v4062_v57  ;;  %v3688_v41 = vmax.f32 %v3468_v51, %v3545_v45  ;;  %v1151_v6 = vmax.f32 %v1055_v42, %v11463_v33  ;;  %v14310_v21 = vmax.f32 %v11463_v33, %v11540_v35 }
 0x2dc   : > { %14308 = vst [vmem:[#allocation84_spill] sm:$0xff] %v11700_v28  ;;  %v6031_v27 = vrot.slane %v11700_v28, 4  ;;  %v1342_v2 = vmax.f32 %v1246_v30, %v11676_v25  ;;  %v1163_v57 = vmax.f32 %v1067_v14, %v963_v59  ;;  %v3097_v10 = vmax.f32 %v3017_v17, %v14285_v37 }
 0x2dd   : > { %14309 = vst [vmem:[#allocation6_spill] sm:$0xff] %v11707_v8  ;;  %v13720_v5 = vrot.slane %v11707_v8, 4  ;;  %v11719_v19 = vmax.f32 %v14310_v21, %v959_v34  ;;  %v1167_v20 = vmax.f32 %v1071_v38, %v967_v23  ;;  %v1247_v15 = vmax.f32 %v1151_v6, %v11540_v35 }
 0x2de   : > { %v1251_v45 = vmax.f32 %v11573_v47, %v959_v34  ;;  %v1591_v42 = vrot.slane %v1342_v2, 1  ;;  %v1952_v30 = vrot.slane %v1342_v2, 2  ;;  %v2313_v58 = vrot.slane %v1342_v2, 3 }
 0x2df   : > { %14311 = vst [vmem:[#allocation87_spill] sm:$0xff] %v11719_v19  ;;  %v6033_v51 = vsel %vm362_vm0, %v6031_v27, %v13720_v5  ;;  %v2673_v33 = vrot.slane %v1342_v2, 4  ;;  %v3177_v21 = vmax.f32 %v3097_v10, %v10666_v13  ;;  %v1259_v14 = vmax.f32 %v1163_v57, %v967_v23  ;;  %v975_v10 = vld [vmem:[#allocation2 + $0x360] sm:$0xff]  ;;  %v14317_v19 = vld [vmem:[#allocation69_spill] sm:$0xff] }
 0x2e0   : > { %7661 = vmatprep.mubr.msk.f32.mxu1 %vm751_vm2, %v6033_v51  ;;  %v1263_v28 = vmax.f32 %v1167_v20, %v971_v18  ;;  %v14312_v38 = vrot.slane %v11597_v46, 1  ;;  %v1799_v17 = vmax.f32 %v1342_v2, %v1591_v42  ;;  %v14313_v47 = vrot.slane %v11597_v46, 2  ;;  %v8013_v2 = vld [vmem:[#allocation2 + $0x2e8] sm:$0xff] }
 0x2e1   : > { %v14314_v27 = vrot.slane %v11597_v46, 3  ;;  %v2674_v23 = vsel %vm362_vm0, %v14315_v3, %v2673_v33  ;;  %v3803_v20 = vrot.slane %v3177_v21, 3  ;;  %v4063_v57 = vrot.slane %v3177_v21, 4 }
 0x2e2   : > { %v1592_v35 = vsel %vm1459_vm3, %v14312_v38, %v1591_v42  ;;  %v1953_v6 = vsel %vm1820_vm4, %v14313_v47, %v1952_v30  ;;  %v2160_v60 = vmax.f32 %v1799_v17, %v1952_v30  ;;  %v11742_v38 = vmax.f32 %v1247_v15, %v959_v34  ;;  %v14316_v42 = vld [vmem:[#allocation70_spill] sm:$0xff] }
 0x2e3   : > { %v2314_v5 = vsel %vm2181_vm5, %v14314_v27, %v2313_v58  ;;  %v1798_v51 = vmax.f32 %v11597_v46, %v1592_v35  ;;  %v14318_v47 = vmax.f32 %v14316_v42, %v14317_v19  ;;  %v14319_v27 = vld [vmem:[#allocation62_spill] sm:$0xff]  ;;  %v14322_v3 = vrot.slane %v11653_v16, 3 }
 0x2e4   : > { %v14321_v35 = vmax.f32 %v14319_v27, %v14320_v31  ;;  %v4064_v34 = vsel %vm362_vm0, %v4061_v44, %v4063_v57  ;;  %v11758_v15 = vmax.f32 %v1251_v45, %v963_v59  ;;  %v2521_v30 = vmax.f32 %v2160_v60, %v2313_v58  ;;  %v14325_v59 = vld [vmem:[#allocation72_spill] sm:$0xff]  ;;  %v14327_v58 = vld [vmem:[#allocation74_spill] sm:$0xff] }
 0x2e5   : > { %v11747_v39 = vmax.f32 %v14318_v47, %v8013_v2  ;;  %v2159_v46 = vmax.f32 %v1798_v51, %v1953_v6  ;;  %v3804_v21 = vsel %vm2181_vm5, %v14322_v3, %v3803_v20  ;;  %v11760_v19 = vmax.f32 %v1259_v14, %v971_v18 }
 0x2e6   : > { %v11752_v54 = vmax.f32 %v14321_v35, %v8014_v56  ;;  %v3968_v17 = vmax.f32 %v3688_v41, %v3804_v21  ;;  %v11762_v2 = vmax.f32 %v1263_v28, %v975_v10  ;;  %v1593_v31 = vrot.slane %v11742_v38, 1 }
 0x2e7   : > { %v2520_v42 = vmax.f32 %v2159_v46, %v2314_v5  ;;  %v1594_v56 = vrot.slane %v11747_v39, 1  ;;  %v11767_v16 = vmax.f32 %v2521_v30, %v2673_v33  ;;  %v1600_v44 = vrot.slane %v11758_v15, 1 }
 0x2e8   : > { %14323 = vst [vmem:[#allocation71_spill] sm:$0xff] %v11762_v2  ;;  %v1596_v6 = vrot.slane %v11752_v54, 1  ;;  %v11769_v51 = vmax.f32 %v3968_v17, %v4064_v34  ;;  %v14326_v60 = vrot.slane %v14325_v59, 1  ;;  %v14328_v41 = vrot.slane %v14327_v58, 1  ;;  %v14353_v2 = vld [vmem:[#allocation76_spill] sm:$0xff] }
 0x2e9   : > { %v11777_v18 = vmax.f32 %v2520_v42, %v2674_v23  ;;  %v1595_v5 = vsel %vm1459_vm3, %v1593_v31, %v1594_v56  ;;  %v1954_v46 = vrot.slane %v11742_v38, 2  ;;  %v14330_v3 = vrot.slane %v11707_v8, 4 }
 0x2ea   : > { %14324 = vst [vmem:[#allocation63_spill] sm:$0xff] %v11769_v51  ;;  %v1604_v28 = vsel %vm1459_vm3, %v14328_v41, %v14326_v60  ;;  %v1597_v45 = vsel %vm1459_vm3, %v1594_v56, %v1596_v6  ;;  %v6034_v14 = vrot.slane %v11769_v51, 4  ;;  %v14329_v20 = vmov %v14328_v41 }
 0x2eb   : > { %v1805_v33 = vmax.f32 %v14327_v58, %v1604_v28  ;;  %v1602_v57 = vsel %vm1459_vm3, %v1600_v44, %v14329_v20  ;;  %v1800_v10 = vmax.f32 %v11742_v38, %v1595_v5  ;;  %v1801_v47 = vmax.f32 %v11747_v39, %v1597_v45 }
 0x2ec   : > { %v5329_v27 = vrot.slane %v11777_v18, 6  ;;  %v1804_v35 = vmax.f32 %v11758_v15, %v1602_v57  ;;  %v6035_v21 = vsel %vm362_vm0, %v14330_v3, %v6034_v14  ;;  %v1955_v34 = vrot.slane %v11747_v39, 2 }
 0x2ed   : > { %v13729_v30 = vrot.slane %v11752_v54, 2  ;;  %v1961_v17 = vrot.slane %v11758_v15, 2  ;;  %v14331_v42 = vrot.slane %v11659_v22, 6  ;;  %7662 = vmatmul.mubr.msk.f32.gmra.mrb[28].mxu1 %vm751_vm2, %v6035_v21  ;;  %v14332_v56 = vrot.slane %v14325_v59, 2 }
 0x2ee   : > { %v14333_v44 = vrot.slane %v14327_v58, 2  ;;  %v2315_v41 = vrot.slane %v11742_v38, 3  ;;  %v2316_v28 = vrot.slane %v11747_v39, 3  ;;  %v1956_v5 = vsel %vm1820_vm4, %v1954_v46, %v1955_v34 }
 0x2ef   : > { %v5330_v31 = vsel %vm5255_vm7, %v14331_v42, %v5329_v27  ;;  %v1958_v45 = vsel %vm1820_vm4, %v1955_v34, %v13729_v30  ;;  %v2161_v27 = vmax.f32 %v1800_v10, %v1956_v5  ;;  %v2323_v46 = vrot.slane %v14327_v58, 3 }
 0x2f0   : > { %v1965_v60 = vsel %vm1820_vm4, %v14333_v44, %v14332_v56  ;;  %7586 = vmatmul.mubr.msk.f32.gmra.mrb[60].mxu0 %vm751_vm2, %v5330_v31  ;;  %v14334_v14 = vmov %v14333_v44  ;;  %v2162_v3 = vmax.f32 %v1801_v47, %v1958_v45  ;;  %v2317_v42 = vsel %vm2181_vm5, %v2315_v41, %v2316_v28 }
 0x2f1   : > { %v1963_v20 = vsel %vm1820_vm4, %v1961_v17, %v14334_v14  ;;  %v2166_v57 = vmax.f32 %v1805_v33, %v1965_v60  ;;  %v2318_v56 = vrot.slane %v11752_v54, 3  ;;  %v2322_v31 = vrot.slane %v11758_v15, 3 }
 0x2f2   : > { %v2165_v21 = vmax.f32 %v1804_v35, %v1963_v20  ;;  %v2325_v44 = vrot.slane %v14325_v59, 3  ;;  %v2522_v23 = vmax.f32 %v2161_v27, %v2317_v42  ;;  %v2675_v34 = vrot.slane %v11742_v38, 4  ;;  %v14335_v27 = vld [vmem:[#allocation9_spill] sm:$0xff] }
 0x2f3   : > { %v2676_v30 = vrot.slane %v11747_v39, 4  ;;  %v13731_v33 = vrot.slane %v11752_v54, 4  ;;  %v2319_v10 = vsel %vm2181_vm5, %v2316_v28, %v2318_v56  ;;  %v2324_v47 = vsel %vm2181_vm5, %v2322_v31, %v2323_v46  ;;  %v14339_v31 = vld [vmem:[#allocation16_spill] sm:$0xff] }
 0x2f4   : > { %v2326_v35 = vsel %vm2181_vm5, %v2323_v46, %v2325_v44  ;;  %v2682_v17 = vrot.slane %v11758_v15, 4  ;;  %v2523_v60 = vmax.f32 %v2162_v3, %v2319_v10  ;;  %v2526_v41 = vmax.f32 %v2165_v21, %v2324_v47 }
 0x2f5   : > { %v2527_v5 = vmax.f32 %v2166_v57, %v2326_v35  ;;  %v2677_v38 = vsel %vm362_vm0, %v2675_v34, %v2676_v30  ;;  %v2679_v39 = vsel %vm362_vm0, %v2676_v30, %v13731_v33  ;;  %v2683_v45 = vrot.slane %v14327_v58, 4  ;;  %v14337_v57 = vld [vmem:[#allocation10_spill] sm:$0xff] }
 0x2f6   : > { %v2685_v28 = vrot.slane %v14325_v59, 4  ;;  %v11842_v14 = vmax.f32 %v2522_v23, %v2677_v38  ;;  %v11844_v20 = vmax.f32 %v2523_v60, %v2679_v39  ;;  %v14336_v15 = vmax.f32 %v14335_v27, %v10618_v26  ;;  %v14340_v30 = vld [vmem:[#allocation90_spill] sm:$0xff] }
 0x2f7   : > { %v14338_v21 = vmax.f32 %v14337_v57, %v10586_v55  ;;  %v14341_v58 = vmax.f32 %v14340_v30, %v10664_v63  ;;  %v2684_v23 = vsel %vm362_vm0, %v2682_v17, %v2683_v45  ;;  %v11891_v33 = vld [vmem:[#allocation2 + $0x2f8] sm:$0x3f] }
 0x2f8   : > { %v3178_v3 = vmax.f32 %v14336_v15, %v10859_v40  ;;  %v2686_v34 = vsel %vm362_vm0, %v2683_v45, %v2685_v28  ;;  %v5331_v10 = vrot.slane %v11842_v14, 6  ;;  %v11867_v47 = vmax.f32 %v2526_v41, %v2684_v23  ;;  %14342 = vst [vmem:[#allocation4_spill] sm:$0xff] %v11891_v33 }
 0x2f9   : > { %v3179_v42 = vmax.f32 %v14338_v21, %v10848_v32  ;;  %v11858_v46 = vmax.f32 %v14341_v58, %v14339_v31  ;;  %v11869_v55 = vmax.f32 %v2527_v5, %v2686_v34  ;;  %v13730_v35 = vrot.slane %v11844_v20, 6 }
 0x2fa   : > { %v3327_v60 = vrot.slane %v3178_v3, 1  ;;  %v3547_v39 = vrot.slane %v3178_v3, 2  ;;  %v3805_v30 = vrot.slane %v3178_v3, 3 }
 0x2fb   : > { %v3328_v17 = vrot.slane %v3179_v42, 1  ;;  %v3330_v38 = vrot.slane %v11858_v46, 1  ;;  %v5333_v41 = vsel %vm5255_vm7, %v5331_v10, %v13730_v35  ;;  %v3548_v5 = vrot.slane %v3179_v42, 2 }
 0x2fc   : > { %7588 = vmatprep.mubr.msk.f32.mxu0 %vm751_vm2, %v5333_v41  ;;  %v3550_v21 = vrot.slane %v11858_v46, 2  ;;  %v3806_v45 = vrot.slane %v3179_v42, 3  ;;  %v13735_v63 = vrot.slane %v11858_v46, 3  ;;  %v4065_v10 = vrot.slane %v3178_v3, 4 }
 0x2fd   : > { %v3329_v15 = vsel %vm1459_vm3, %v3327_v60, %v3328_v17  ;;  %v3331_v57 = vsel %vm1459_vm3, %v3328_v17, %v3330_v38  ;;  %v3549_v34 = vsel %vm1820_vm4, %v3547_v39, %v3548_v5  ;;  %v4066_v26 = vrot.slane %v3179_v42, 4 }
 0x2fe   : > { %v3469_v58 = vmax.f32 %v3178_v3, %v3329_v15  ;;  %v3470_v23 = vmax.f32 %v3179_v42, %v3331_v57  ;;  %v3551_v27 = vsel %vm1820_vm4, %v3548_v5, %v3550_v21  ;;  %v3807_v60 = vsel %vm2181_vm5, %v3805_v30, %v3806_v45  ;;  %v11897_v57 = vld [vmem:[#allocation2 + $0x318] sm:$0x3f] }
 0x2ff   : > { %v13734_v17 = vrot.slane %v11858_v46, 4  ;;  %v3809_v15 = vsel %vm2181_vm5, %v3806_v45, %v13735_v63  ;;  %v4067_v39 = vsel %vm362_vm0, %v4065_v10, %v4066_v26  ;;  %14343 = vst [vmem:[#allocation38_spill] sm:$0xff] %v11897_v57  ;;  %v8015_v5 = vld [vmem:[#allocation2 + $0x278] sm:$0x3f]  ;;  %v1070_v42 = vmax.f32 %v11676_v25, %v11891_v33 }
 0x300   : > { %v3689_v35 = vmax.f32 %v3469_v58, %v3549_v34  ;;  %v3690_v41 = vmax.f32 %v3470_v23, %v3551_v27  ;;  %v1058_v3 = vmax.f32 %v8015_v5, %v11367_v48  ;;  %v14344_v34 = vmax.f32 %v11503_v49, %v11676_v25 }
 0x301   : > { %v4069_v58 = vsel %vm362_vm0, %v4066_v26, %v13734_v17  ;;  %v1166_v48 = vmax.f32 %v1070_v42, %v11897_v57  ;;  %v11921_v26 = vld [vmem:[#allocation2 + $0x338] sm:$0x3f]  ;;  %v2941_v5 = vmax.f32 %v14234_v24, %v14261_v0  ;;  %v14350_v17 = vrot.slane %v11752_v54, 2 }
 0x302   : > { %v3969_v27 = vmax.f32 %v3689_v35, %v3807_v60  ;;  %v3970_v30 = vmax.f32 %v3690_v41, %v3809_v15  ;;  %v1154_v45 = vmax.f32 %v1058_v3, %v11503_v49  ;;  %v11912_v10 = vmax.f32 %v14344_v34, %v11891_v33  ;;  %v974_v15 = vld [vmem:[#allocation2 + $0x358] sm:$0x3f] }
 0x303   : > { %v1254_v35 = vmax.f32 %v11698_v12, %v11891_v33  ;;  %v3471_v3 = vmax.f32 %v11858_v46, %v3330_v38  ;;  %v1262_v34 = vmax.f32 %v1166_v48, %v11921_v26  ;;  %v14346_v12 = vld [vmem:[#allocation93_spill] sm:$0xff]  ;;  %v3021_v24 = vmax.f32 %v2941_v5, %v14285_v37 }
 0x304   : > { %v11917_v41 = vmax.f32 %v3969_v27, %v4067_v39  ;;  %v11919_v60 = vmax.f32 %v3970_v30, %v4069_v58  ;;  %v1250_v49 = vmax.f32 %v1154_v45, %v11676_v25  ;;  %v14347_v39 = vmax.f32 %v14346_v12, %v10859_v40 }
 0x305   : > { %v11929_v42 = vmax.f32 %v1254_v35, %v11897_v57  ;;  %v3691_v38 = vmax.f32 %v3471_v3, %v3550_v21  ;;  %v11941_v45 = vmax.f32 %v1262_v34, %v974_v15  ;;  %v3101_v23 = vmax.f32 %v3021_v24, %v10666_v13 }
 0x306   : > { %14345 = vst [vmem:[#allocation66_spill] sm:$0xff] %v11917_v41  ;;  %v11935_v27 = vmax.f32 %v14347_v39, %v11053_v7  ;;  %v6036_v30 = vrot.slane %v11917_v41, 4  ;;  %v13732_v58 = vrot.slane %v11919_v60, 4  ;;  %v1346_v25 = vmax.f32 %v1250_v49, %v11891_v33  ;;  %v14354_v33 = vld [vmem:[#allocation55_spill] sm:$0xff] }
 0x307   : > { %v13733_v48 = vrot.slane %v11929_v42, 1  ;;  %v13736_v35 = vrot.slane %v11929_v42, 2  ;;  %v13737_v12 = vrot.slane %v11929_v42, 3  ;;  %v13742_v39 = vrot.slane %v11929_v42, 4 }
 0x308   : > { %v6038_v40 = vsel %vm362_vm0, %v6036_v30, %v13732_v58  ;;  %v1598_v21 = vrot.slane %v1346_v25, 1  ;;  %v14348_v15 = vrot.slane %v14325_v59, 1  ;;  %v1959_v3 = vrot.slane %v1346_v25, 2 }
 0x309   : > { %7664 = vmatprep.mubr.msk.f32.mxu1 %vm751_vm2, %v6038_v40  ;;  %v14349_v49 = vrot.slane %v14325_v59, 2  ;;  %v2320_v58 = vrot.slane %v1346_v25, 3  ;;  %v2328_v24 = vsel %vm2181_vm5, %v2325_v44, %v13737_v12  ;;  %v2680_v40 = vrot.slane %v1346_v25, 4  ;;  %v14352_v12 = vld [vmem:[#allocation53_spill] sm:$0xff] }
 0x30a   : > { %v1606_v5 = vsel %vm1459_vm3, %v14348_v15, %v13733_v48  ;;  %v1599_v15 = vsel %vm1459_vm3, %v1596_v6, %v1598_v21  ;;  %v1803_v48 = vmax.f32 %v1346_v25, %v1598_v21  ;;  %v1960_v63 = vsel %vm1820_vm4, %v14350_v17, %v1959_v3 }
 0x30b   : > { %v1967_v34 = vsel %vm1820_vm4, %v14349_v49, %v13736_v35  ;;  %v1806_v30 = vmax.f32 %v14325_v59, %v1606_v5  ;;  %v2688_v5 = vsel %vm362_vm0, %v2685_v28, %v13742_v39  ;;  %v1802_v49 = vmax.f32 %v11752_v54, %v1599_v15  ;;  %v14356_v28 = vld [vmem:[#allocation94_spill] sm:$0xff] }
 0x30c   : > { %v2321_v44 = vsel %vm2181_vm5, %v2318_v56, %v2320_v58  ;;  %v14351_v6 = vrot.slane %v11752_v54, 4  ;;  %v2164_v21 = vmax.f32 %v1803_v48, %v1959_v3  ;;  %v3181_v17 = vmax.f32 %v3101_v23, %v14352_v12 }
 0x30d   : > { %v2167_v35 = vmax.f32 %v1806_v30, %v1967_v34  ;;  %v14355_v59 = vmax.f32 %v14354_v33, %v10848_v32  ;;  %v14357_v34 = vmax.f32 %v14356_v28, %v14339_v31  ;;  %v2163_v15 = vmax.f32 %v1802_v49, %v1960_v63 }
 0x30e   : > { %v2681_v25 = vsel %vm362_vm0, %v14351_v6, %v2680_v40  ;;  %v3332_v54 = vrot.slane %v11935_v27, 1  ;;  %v3552_v6 = vrot.slane %v11935_v27, 2  ;;  %v2525_v48 = vmax.f32 %v2164_v21, %v2320_v58 }
 0x30f   : > { %v3183_v41 = vmax.f32 %v14355_v59, %v14353_v2  ;;  %v11995_v30 = vmax.f32 %v14357_v34, %v11108_v50  ;;  %v2528_v56 = vmax.f32 %v2167_v35, %v2328_v24  ;;  %v3810_v3 = vrot.slane %v3181_v17, 3 }
 0x310   : > { %v4070_v23 = vrot.slane %v3181_v17, 4  ;;  %v2524_v51 = vmax.f32 %v2163_v15, %v2321_v44  ;;  %v12002_v59 = vmax.f32 %v2525_v48, %v2680_v40  ;;  %v14358_v31 = vrot.slane %v11858_v46, 3 }
 0x311   : > { %v3333_v39 = vrot.slane %v3183_v41, 1  ;;  %v11999_v8 = vmax.f32 %v2528_v56, %v2688_v5  ;;  %v3335_v32 = vrot.slane %v11995_v30, 1  ;;  %v3553_v33 = vrot.slane %v3183_v41, 2 }
 0x312   : > { %v3811_v63 = vsel %vm2181_vm5, %v14358_v31, %v3810_v3  ;;  %v14359_v35 = vrot.slane %v11858_v46, 4  ;;  %v12011_v49 = vmax.f32 %v2524_v51, %v2681_v25  ;;  %v3555_v28 = vrot.slane %v11995_v30, 2 }
 0x313   : > { %v3334_v58 = vsel %vm1459_vm3, %v3332_v54, %v3333_v39  ;;  %v3971_v44 = vmax.f32 %v3691_v38, %v3811_v63  ;;  %v3336_v5 = vsel %vm1459_vm3, %v3333_v39, %v3335_v32  ;;  %v3554_v40 = vsel %vm1820_vm4, %v3552_v6, %v3553_v33 }
 0x314   : > { %v4071_v24 = vsel %vm362_vm0, %v14359_v35, %v4070_v23  ;;  %v3472_v21 = vmax.f32 %v11935_v27, %v3334_v58  ;;  %v3473_v17 = vmax.f32 %v3183_v41, %v3336_v5  ;;  %v3812_v34 = vrot.slane %v11935_v27, 3  ;;  %v14362_v5 = vld [vmem:[#allocation18_spill] sm:$0xff] }
 0x315   : > { %v5334_v51 = vrot.slane %v12011_v49, 6  ;;  %v12023_v38 = vmax.f32 %v3971_v44, %v4071_v24  ;;  %v3556_v39 = vsel %vm1820_vm4, %v3553_v33, %v3555_v28  ;;  %v3813_v56 = vrot.slane %v3183_v41, 3 }
 0x316   : > { %v3692_v25 = vmax.f32 %v3472_v21, %v3554_v40  ;;  %v3815_v54 = vrot.slane %v11995_v30, 3  ;;  %v14360_v6 = vrot.slane %v11844_v20, 6  ;;  %v3693_v23 = vmax.f32 %v3473_v17, %v3556_v39 }
 0x317   : > { %v6039_v3 = vrot.slane %v12023_v38, 4  ;;  %v4072_v31 = vrot.slane %v11935_v27, 4  ;;  %v3814_v63 = vsel %vm2181_vm5, %v3812_v34, %v3813_v56  ;;  %v4073_v33 = vrot.slane %v3183_v41, 4 }
 0x318   : > { %v5335_v48 = vsel %vm5255_vm7, %v14360_v6, %v5334_v51  ;;  %v3816_v35 = vsel %vm2181_vm5, %v3813_v56, %v3815_v54  ;;  %v4075_v24 = vrot.slane %v11995_v30, 4  ;;  %v14361_v58 = vrot.slane %v11919_v60, 4  ;;  %v14363_v51 = vld [vmem:[#allocation64_spill] sm:$0xff] }
 0x319   : > { %7589 = vmatmul.mubr.msk.f32.gmra.mrb[62].mxu0 %vm751_vm2, %v5335_v48  ;;  %v3972_v21 = vmax.f32 %v3692_v25, %v3814_v63  ;;  %v3973_v17 = vmax.f32 %v3693_v23, %v3816_v35  ;;  %v2945_v27 = vmax.f32 %v14261_v0, %v14285_v37  ;;  %v4074_v40 = vsel %vm362_vm0, %v4072_v31, %v4073_v33  ;;  %v14367_v0 = vld [vmem:[#allocation40_spill] sm:$0xff]  ;;  %v14369_v31 = vld [vmem:[#allocation17_spill] sm:$0xff] }
 0x31a   : > { %v6040_v44 = vsel %vm362_vm0, %v14361_v58, %v6039_v3  ;;  %7593 = vmatprep.mubr.msk.f32.mxu0 %vm751_vm2, %v14362_v5  ;;  %v4076_v41 = vsel %vm362_vm0, %v4073_v33, %v4075_v24  ;;  %v3474_v34 = vmax.f32 %v11995_v30, %v3335_v32  ;;  %v14364_v39 = vmax.f32 %v14363_v51, %v11053_v7  ;;  %v14370_v32 = vld [vmem:[#allocation65_spill] sm:$0xff] }
 0x31b   : > { %7665 = vmatmul.mubr.msk.f32.gmra.mrb[30].mxu1 %vm751_vm2, %v6040_v44  ;;  %v12051_v6 = vmax.f32 %v3972_v21, %v4074_v40  ;;  %v12053_v25 = vmax.f32 %v3973_v17, %v4076_v41  ;;  %v3025_v48 = vmax.f32 %v2945_v27, %v10666_v13  ;;  %v14368_v3 = vmax.f32 %v14367_v0, %v14353_v2  ;;  %v14372_v2 = vld [vmem:[#allocation21_spill] sm:$0xff]  ;;  %v14373_v41 = vld [vmem:[#allocation79_spill] sm:$0xff] }
 0x31c   : > { %v3186_v56 = vmax.f32 %v14364_v39, %v11228_v29  ;;  %v3694_v30 = vmax.f32 %v3474_v34, %v3555_v28  ;;  %v14371_v7 = vmax.f32 %v14370_v32, %v11108_v50 }
 0x31d   : > { %14365 = vst [vmem:[#allocation43_spill] sm:$0xff] %v12051_v6  ;;  %14366 = vst [vmem:[#allocation13_spill] sm:$0xff] %v12053_v25  ;;  %v3187_v23 = vmax.f32 %v14368_v3, %v11185_v11  ;;  %7594 = vmatmul.mubr.msk.f32.vlgmr.msra.gmra.mrb[32].mxu0 %vm751_vm2, %v14369_v31  ;;  %v6041_v58 = vrot.slane %v12051_v6, 4  ;;  %v6042_v44 = vrot.slane %v12053_v25, 4  ;;  %v3105_v5 = vmax.f32 %v3025_v48, %v14352_v12  ;;  %v14375_v25 = vld [vmem:[#allocation28_spill] sm:$0xff] }
 0x31e   : > { %v12066_v63 = vmax.f32 %v14371_v7, %v11281_v52  ;;  %v3337_v35 = vrot.slane %v3186_v56, 1  ;;  %v3557_v33 = vrot.slane %v3186_v56, 2  ;;  %7596 = vmatprep.mubr.msk.f32.mxu0 %vm751_vm2, %v14372_v2  ;;  %v3819_v50 = vrot.slane %v3186_v56, 3 }
 0x31f   : > { %v3338_v21 = vrot.slane %v3187_v23, 1  ;;  %v3558_v17 = vrot.slane %v3187_v23, 2  ;;  %v6043_v40 = vsel %vm362_vm0, %v6041_v58, %v6042_v44  ;;  %v3185_v34 = vmax.f32 %v3105_v5, %v14373_v41  ;;  %v14374_v58 = vld [vmem:[#allocation19_spill] sm:$0xff] }
 0x320   : > { %v3340_v28 = vrot.slane %v12066_v63, 1  ;;  %v3560_v27 = vrot.slane %v12066_v63, 2  ;;  %v3820_v39 = vrot.slane %v3187_v23, 3  ;;  %7667 = vmatprep.mubr.msk.f32.mxu1 %vm751_vm2, %v6043_v40  ;;  %v4079_v46 = vrot.slane %v3186_v56, 4 }
 0x321   : > { %v3339_v51 = vsel %vm1459_vm3, %v3337_v35, %v3338_v21  ;;  %v3559_v3 = vsel %vm1820_vm4, %v3557_v33, %v3558_v17  ;;  %v3817_v32 = vrot.slane %v3185_v34, 3  ;;  %v4077_v7 = vrot.slane %v3185_v34, 4  ;;  %7597 = vmatmul.mubr.msk.f32.gmra.mrb[34].mxu0 %vm751_vm2, %v14374_v58  ;;  %v14385_v58 = vld [vmem:[#allocation39_spill] sm:$0xff] }
 0x322   : > { %v3341_v48 = vsel %vm1459_vm3, %v3338_v21, %v3340_v28  ;;  %v3475_v0 = vmax.f32 %v3186_v56, %v3339_v51  ;;  %v3561_v31 = vsel %vm1820_vm4, %v3558_v17, %v3560_v27  ;;  %v3821_v15 = vsel %vm2181_vm5, %v3819_v50, %v3820_v39  ;;  %7599 = vmatprep.mubr.msk.f32.mxu0 %vm751_vm2, %v14375_v25 }
 0x323   : > { %v3476_v2 = vmax.f32 %v3187_v23, %v3341_v48  ;;  %v3822_v35 = vrot.slane %v12066_v63, 3  ;;  %v4080_v40 = vrot.slane %v3187_v23, 4  ;;  %v3818_v33 = vsel %vm2181_vm5, %v3815_v54, %v3817_v32  ;;  %v14376_v54 = vld [vmem:[#allocation26_spill] sm:$0xff] }
 0x324   : > { %v3695_v5 = vmax.f32 %v3475_v0, %v3559_v3  ;;  %v4078_v21 = vsel %vm362_vm0, %v4075_v24, %v4077_v7  ;;  %v4082_v34 = vrot.slane %v12066_v63, 4  ;;  %v3974_v51 = vmax.f32 %v3694_v30, %v3818_v33  ;;  %v14379_v30 = vld [vmem:[#allocation52_spill] sm:$0xff] }
 0x325   : > { %v3696_v17 = vmax.f32 %v3476_v2, %v3561_v31  ;;  %v3823_v50 = vsel %vm2181_vm5, %v3820_v39, %v3822_v35  ;;  %v4081_v0 = vsel %vm362_vm0, %v4079_v46, %v4080_v40  ;;  %v2949_v23 = vmax.f32 %v14285_v37, %v10666_v13  ;;  %7600 = vmatmul.mubr.msk.f32.gmra.mrb[36].mxu0 %vm751_vm2, %v14376_v54  ;;  %v14381_v39 = vld [vmem:[#allocation11_spill] sm:$0xff]  ;;  %v14383_v37 = vld [vmem:[#allocation30_spill] sm:$0xff] }
 0x326   : > { %v3975_v48 = vmax.f32 %v3695_v5, %v3821_v15  ;;  %v4083_v56 = vsel %vm362_vm0, %v4080_v40, %v4082_v34  ;;  %v3477_v25 = vmax.f32 %v12066_v63, %v3340_v28  ;;  %v12099_v24 = vmax.f32 %v3974_v51, %v4078_v21  ;;  %7602 = vmatprep.mubr.msk.f32.mxu0 %vm751_vm2, %v14383_v37  ;;  %v14389_v54 = vld [vmem:[#allocation67_spill] sm:$0xff] }
 0x327   : > { %v3976_v3 = vmax.f32 %v3696_v17, %v3823_v50  ;;  %v14380_v15 = vmax.f32 %v14379_v30, %v11228_v29  ;;  %v14382_v32 = vmax.f32 %v14381_v39, %v11185_v11  ;;  %v3029_v28 = vmax.f32 %v2949_v23, %v14352_v12  ;;  %v14388_v23 = vld [vmem:[#allocation32_spill] sm:$0xff] }
 0x328   : > { %14377 = vst [vmem:[#allocation89_spill] sm:$0xff] %v12099_v24  ;;  %v12101_v31 = vmax.f32 %v3975_v48, %v4081_v0  ;;  %v3697_v2 = vmax.f32 %v3477_v25, %v3560_v27  ;;  %v14386_v5 = vmax.f32 %v14385_v58, %v11281_v52  ;;  %v6044_v29 = vrot.slane %v12099_v24, 4  ;;  %v14387_v27 = vld [vmem:[#allocation29_spill] sm:$0xff] }
 0x329   : > { %v3190_v46 = vmax.f32 %v14380_v15, %v11407_v1  ;;  %v3191_v7 = vmax.f32 %v14382_v32, %v11365_v62  ;;  %v12113_v63 = vmax.f32 %v3976_v3, %v4083_v56  ;;  %v3109_v51 = vmax.f32 %v3029_v28, %v14373_v41  ;;  %7603 = vmatmul.mubr.msk.f32.gmra.mrb[38].mxu0 %vm751_vm2, %v14387_v27  ;;  %v14390_v27 = vld [vmem:[#allocation31_spill] sm:$0xff] }
 0x32a   : > { %14378 = vst [vmem:[#allocation88_spill] sm:$0xff] %v12101_v31  ;;  %v12120_v40 = vmax.f32 %v14386_v5, %v11449_v4  ;;  %v6046_v33 = vrot.slane %v12101_v31, 4  ;;  %v6045_v52 = vsel %vm362_vm0, %v6042_v44, %v6044_v29  ;;  %7605 = vmatprep.mubr.msk.f32.mxu0 %vm751_vm2, %v14388_v23 }
 0x32b   : > { %14384 = vst [vmem:[#allocation3_spill] sm:$0xff] %v12113_v63  ;;  %v3342_v11 = vrot.slane %v3190_v46, 1  ;;  %v3343_v21 = vrot.slane %v3191_v7, 1  ;;  %v6047_v17 = vrot.slane %v12113_v63, 4  ;;  %v3562_v48 = vrot.slane %v3190_v46, 2  ;;  %7668 = vmatmul.mubr.msk.f32.gmra.mrb[0].mxu1 %vm751_vm2, %v6045_v52 }
 0x32c   : > { %v3345_v50 = vrot.slane %v12120_v40, 1  ;;  %v3563_v3 = vrot.slane %v3191_v7, 2  ;;  %v3565_v56 = vrot.slane %v12120_v40, 2  ;;  %v3189_v30 = vmax.f32 %v3109_v51, %v14389_v54 }
 0x32d   : > { %v3344_v0 = vsel %vm1459_vm3, %v3342_v11, %v3343_v21  ;;  %v6048_v25 = vsel %vm362_vm0, %v6046_v33, %v6047_v17  ;;  %v3826_v28 = vrot.slane %v3190_v46, 3  ;;  %v3827_v11 = vrot.slane %v3191_v7, 3  ;;  %7606 = vmatmul.mubr.msk.f32.gmra.mrb[40].mxu0 %vm751_vm2, %v14390_v27 }
 0x32e   : > { %v3346_v15 = vsel %vm1459_vm3, %v3343_v21, %v3345_v50  ;;  %v3478_v39 = vmax.f32 %v3190_v46, %v3344_v0  ;;  %7670 = vmatprep.mubr.msk.f32.mxu1 %vm751_vm2, %v6048_v25  ;;  %v3564_v32 = vsel %vm1820_vm4, %v3562_v48, %v3563_v3  ;;  %v3566_v37 = vsel %vm1820_vm4, %v3563_v3, %v3565_v56  ;;  %v14391_v0 = vld [vmem:[#allocation34_spill] sm:$0xff] }
 0x32f   : > { %v3479_v44 = vmax.f32 %v3191_v7, %v3346_v15  ;;  %v3824_v58 = vrot.slane %v3189_v30, 3  ;;  %v4084_v5 = vrot.slane %v3189_v30, 4  ;;  %v3829_v51 = vrot.slane %v12120_v40, 3  ;;  %7608 = vmatprep.mubr.msk.f32.mxu0 %vm751_vm2, %v14391_v0 }
 0x330   : > { %v3698_v29 = vmax.f32 %v3478_v39, %v3564_v32  ;;  %v4086_v21 = vrot.slane %v3190_v46, 4  ;;  %v4087_v52 = vrot.slane %v3191_v7, 4  ;;  %v3828_v23 = vsel %vm2181_vm5, %v3826_v28, %v3827_v11 }
 0x331   : > { %v3699_v33 = vmax.f32 %v3479_v44, %v3566_v37  ;;  %v3825_v48 = vsel %vm2181_vm5, %v3822_v35, %v3824_v58  ;;  %v4085_v3 = vsel %vm362_vm0, %v4082_v34, %v4084_v5  ;;  %v4089_v25 = vrot.slane %v12120_v40, 4  ;;  %v14392_v37 = vld [vmem:[#allocation33_spill] sm:$0xff] }
 0x332   : > { %v3977_v30 = vmax.f32 %v3697_v2, %v3825_v48  ;;  %v3830_v15 = vsel %vm2181_vm5, %v3827_v11, %v3829_v51  ;;  %v3978_v39 = vmax.f32 %v3698_v29, %v3828_v23  ;;  %v4088_v44 = vsel %vm362_vm0, %v4086_v21, %v4087_v52  ;;  %7609 = vmatmul.mubr.msk.f32.gmra.mrb[42].mxu0 %vm751_vm2, %v14392_v37  ;;  %v14395_v2 = vld [vmem:[#allocation58_spill] sm:$0xff]  ;;  %v14398_v11 = vld [vmem:[#allocation56_spill] sm:$0xff] }
 0x333   : > { %v3979_v32 = vmax.f32 %v3699_v33, %v3830_v15  ;;  %v4090_v46 = vsel %vm362_vm0, %v4087_v52, %v4089_v25  ;;  %v2953_v7 = vmax.f32 %v10666_v13, %v14352_v12  ;;  %v3480_v35 = vmax.f32 %v12120_v40, %v3345_v50  ;;  %v14397_v29 = vld [vmem:[#allocation82_spill] sm:$0xff]  ;;  %v14400_v13 = vld [vmem:[#allocation44_spill] sm:$0xff] }
 0x334   : > { %v12158_v34 = vmax.f32 %v3977_v30, %v4085_v3  ;;  %v12160_v28 = vmax.f32 %v3978_v39, %v4088_v44  ;;  %v14396_v58 = vmax.f32 %v14395_v2, %v11407_v1  ;;  %v14399_v27 = vmax.f32 %v14398_v11, %v11365_v62  ;;  %7611 = vmatprep.mubr.msk.f32.mxu0 %vm751_vm2, %v14400_v13  ;;  %v14402_v52 = vld [vmem:[#allocation80_spill] sm:$0xff] }
 0x335   : > { %v12172_v40 = vmax.f32 %v3979_v32, %v4090_v46  ;;  %v3033_v50 = vmax.f32 %v2953_v7, %v14373_v41  ;;  %v3700_v21 = vmax.f32 %v3480_v35, %v3565_v56  ;;  %v14403_v0 = vmax.f32 %v14402_v52, %v11449_v4  ;;  %v14404_v56 = vld [vmem:[#allocation35_spill] sm:$0xff] }
 0x336   : > { %14393 = vst [vmem:[#allocation70_spill] sm:$0xff] %v12158_v34  ;;  %14394 = vst [vmem:[#allocation69_spill] sm:$0xff] %v12160_v28  ;;  %v3194_v5 = vmax.f32 %v14396_v58, %v11563_v61  ;;  %v3195_v33 = vmax.f32 %v14399_v27, %v14397_v29  ;;  %v6049_v3 = vrot.slane %v12158_v34, 4  ;;  %v6051_v23 = vrot.slane %v12160_v28, 4  ;;  %7612 = vmatmul.mubr.msk.f32.gmra.mrb[44].mxu0 %vm751_vm2, %v14404_v56  ;;  %v14405_v58 = vld [vmem:[#allocation46_spill] sm:$0xff]  ;;  %v14406_v27 = vld [vmem:[#allocation60_spill] sm:$0xff] }
 0x337   : > { %14401 = vst [vmem:[#allocation62_spill] sm:$0xff] %v12172_v40  ;;  %v12179_v48 = vmax.f32 %v14403_v0, %v11600_v36  ;;  %v6052_v39 = vrot.slane %v12172_v40, 4  ;;  %v3113_v44 = vmax.f32 %v3033_v50, %v14389_v54  ;;  %7614 = vmatprep.mubr.msk.f32.mxu0 %vm751_vm2, %v14405_v58 }
 0x338   : > { %v3347_v30 = vrot.slane %v3194_v5, 1  ;;  %v3348_v15 = vrot.slane %v3195_v33, 1  ;;  %v3567_v46 = vrot.slane %v3194_v5, 2  ;;  %v6050_v7 = vsel %vm362_vm0, %v6047_v17, %v6049_v3 }
 0x339   : > { %v3350_v32 = vrot.slane %v12179_v48, 1  ;;  %v3568_v37 = vrot.slane %v3195_v33, 2  ;;  %v3570_v2 = vrot.slane %v12179_v48, 2  ;;  %7671 = vmatmul.mubr.msk.f32.gmra.mrb[2].mxu1 %vm751_vm2, %v6050_v7  ;;  %v6053_v11 = vsel %vm362_vm0, %v6051_v23, %v6052_v39  ;;  %v14407_v7 = vld [vmem:[#allocation45_spill] sm:$0xff] }
 0x33a   : > { %v3349_v35 = vsel %vm1459_vm3, %v3347_v30, %v3348_v15  ;;  %v3193_v13 = vmax.f32 %v3113_v44, %v14406_v27  ;;  %7673 = vmatprep.mubr.msk.f32.mxu1 %vm751_vm2, %v6053_v11  ;;  %v3833_v30 = vrot.slane %v3194_v5, 3  ;;  %v3834_v28 = vrot.slane %v3195_v33, 3  ;;  %7615 = vmatmul.mubr.msk.f32.gmra.mrb[46].mxu0 %vm751_vm2, %v14407_v7 }
 0x33b   : > { %v3351_v50 = vsel %vm1459_vm3, %v3348_v15, %v3350_v32  ;;  %v3481_v52 = vmax.f32 %v3194_v5, %v3349_v35  ;;  %v3569_v0 = vsel %vm1820_vm4, %v3567_v46, %v3568_v37  ;;  %v3571_v3 = vsel %vm1820_vm4, %v3568_v37, %v3570_v2 }
 0x33c   : > { %v3482_v17 = vmax.f32 %v3195_v33, %v3351_v50  ;;  %v3831_v56 = vrot.slane %v3193_v13, 3  ;;  %v4091_v40 = vrot.slane %v3193_v13, 4  ;;  %v3836_v44 = vrot.slane %v12179_v48, 3 }
 0x33d   : > { %v3701_v58 = vmax.f32 %v3481_v52, %v3569_v0  ;;  %v4093_v15 = vrot.slane %v3194_v5, 4  ;;  %v4094_v35 = vrot.slane %v3195_v33, 4  ;;  %v3835_v46 = vsel %vm2181_vm5, %v3833_v30, %v3834_v28 }
 0x33e   : > { %v3702_v23 = vmax.f32 %v3482_v17, %v3571_v3  ;;  %v3832_v11 = vsel %vm2181_vm5, %v3829_v51, %v3831_v56  ;;  %v4092_v50 = vsel %vm362_vm0, %v4089_v25, %v4091_v40  ;;  %v4096_v37 = vrot.slane %v12179_v48, 4 }
 0x33f   : > { %v3980_v34 = vmax.f32 %v3700_v21, %v3832_v11  ;;  %v3837_v13 = vsel %vm2181_vm5, %v3834_v28, %v3836_v44  ;;  %v3981_v52 = vmax.f32 %v3701_v58, %v3835_v46  ;;  %v4095_v0 = vsel %vm362_vm0, %v4093_v15, %v4094_v35  ;;  %v14410_v21 = vld [vmem:[#allocation41_spill] sm:$0xff] }
 0x340   : > { %v3982_v7 = vmax.f32 %v3702_v23, %v3837_v13  ;;  %v4097_v17 = vsel %vm362_vm0, %v4094_v35, %v4096_v37  ;;  %v2957_v5 = vmax.f32 %v14352_v12, %v14373_v41  ;;  %v3483_v51 = vmax.f32 %v12179_v48, %v3350_v32 }
 0x341   : > { %v12213_v33 = vmax.f32 %v3980_v34, %v4092_v50  ;;  %v12215_v25 = vmax.f32 %v3981_v52, %v4095_v0  ;;  %v14409_v40 = vmax.f32 %v11424_v43, %v11563_v61  ;;  %v14411_v3 = vmax.f32 %v14410_v21, %v14397_v29  ;;  %v14412_v34 = vld [vmem:[#allocation59_spill] sm:$0xff] }
 0x342   : > { %v12225_v56 = vmax.f32 %v3982_v7, %v4097_v17  ;;  %v3037_v12 = vmax.f32 %v2957_v5, %v14389_v54  ;;  %v3703_v58 = vmax.f32 %v3483_v51, %v3570_v2  ;;  %v14413_v48 = vmax.f32 %v14412_v34, %v11600_v36  ;;  %v14414_v5 = vld [vmem:[#allocation25_spill] sm:$0xff] }
 0x343   : > { %14408 = vst [vmem:[#allocation14_spill] sm:$0xff] %v12213_v33  ;;  %v3198_v28 = vmax.f32 %v14409_v40, %v11663_v9  ;;  %v3199_v30 = vmax.f32 %v14411_v3, %v11659_v22  ;;  %v6054_v23 = vrot.slane %v12213_v33, 4  ;;  %v6056_v43 = vrot.slane %v12215_v25, 4 }
 0x344   : > { %v12232_v32 = vmax.f32 %v14413_v48, %v11777_v18  ;;  %v6057_v11 = vrot.slane %v12225_v56, 4  ;;  %v3117_v50 = vmax.f32 %v3037_v12, %v14406_v27 }
 0x345   : > { %v3352_v15 = vrot.slane %v3198_v28, 1  ;;  %v3353_v35 = vrot.slane %v3199_v30, 1  ;;  %v3572_v13 = vrot.slane %v3198_v28, 2  ;;  %v6055_v2 = vsel %vm362_vm0, %v6052_v39, %v6054_v23 }
 0x346   : > { %v3355_v46 = vrot.slane %v12232_v32, 1  ;;  %v3573_v0 = vrot.slane %v3199_v30, 2  ;;  %v3575_v7 = vrot.slane %v12232_v32, 2  ;;  %7674 = vmatmul.mubr.msk.f32.gmra.mrb[4].mxu1 %vm751_vm2, %v6055_v2  ;;  %v6058_v17 = vsel %vm362_vm0, %v6056_v43, %v6057_v11 }
 0x347   : > { %v3354_v52 = vsel %vm1459_vm3, %v3352_v15, %v3353_v35  ;;  %v3197_v51 = vmax.f32 %v3117_v50, %v14414_v5  ;;  %7676 = vmatprep.mubr.msk.f32.mxu1 %vm751_vm2, %v6058_v17  ;;  %v3840_v34 = vrot.slane %v3198_v28, 3  ;;  %v3841_v33 = vrot.slane %v3199_v30, 3 }
 0x348   : > { %v3356_v40 = vsel %vm1459_vm3, %v3353_v35, %v3355_v46  ;;  %v3484_v21 = vmax.f32 %v3198_v28, %v3354_v52  ;;  %v3574_v12 = vsel %vm1820_vm4, %v3572_v13, %v3573_v0  ;;  %v3576_v39 = vsel %vm1820_vm4, %v3573_v0, %v3575_v7 }
 0x349   : > { %v3485_v3 = vmax.f32 %v3199_v30, %v3356_v40  ;;  %v3838_v48 = vrot.slane %v3197_v51, 3  ;;  %v4098_v23 = vrot.slane %v3197_v51, 4  ;;  %v3843_v43 = vrot.slane %v12232_v32, 3 }
 0x34a   : > { %v3704_v15 = vmax.f32 %v3484_v21, %v3574_v12  ;;  %v4100_v63 = vrot.slane %v3198_v28, 4  ;;  %v4101_v50 = vrot.slane %v3199_v30, 4  ;;  %v3842_v17 = vsel %vm2181_vm5, %v3840_v34, %v3841_v33  ;;  %v14415_v12 = vld [vmem:[#allocation37_spill] sm:$0xff] }
 0x34b   : > { %v3705_v2 = vmax.f32 %v3485_v3, %v3576_v39  ;;  %v3839_v35 = vsel %vm2181_vm5, %v3836_v44, %v3838_v48  ;;  %v4099_v52 = vsel %vm362_vm0, %v4096_v37, %v4098_v23  ;;  %v4103_v13 = vrot.slane %v12232_v32, 4  ;;  %v14417_v39 = vld [vmem:[#allocation85_spill] sm:$0xff] }
 0x34c   : > { %v3983_v40 = vmax.f32 %v3703_v58, %v3839_v35  ;;  %v3844_v0 = vsel %vm2181_vm5, %v3841_v33, %v3843_v43  ;;  %v3984_v31 = vmax.f32 %v3704_v15, %v3842_v17  ;;  %v4102_v51 = vsel %vm362_vm0, %v4100_v63, %v4101_v50 }
 0x34d   : > { %v3985_v21 = vmax.f32 %v3705_v2, %v3844_v0  ;;  %v4104_v3 = vsel %vm362_vm0, %v4101_v50, %v4103_v13  ;;  %v2961_v28 = vmax.f32 %v14373_v41, %v14389_v54  ;;  %v3486_v44 = vmax.f32 %v12232_v32, %v3355_v46 }
 0x34e   : > { %v12260_v30 = vmax.f32 %v3983_v40, %v4099_v52  ;;  %v12262_v37 = vmax.f32 %v3984_v31, %v4102_v51  ;;  %v14416_v58 = vmax.f32 %v14415_v12, %v11663_v9  ;;  %v14418_v63 = vmax.f32 %v14417_v39, %v11659_v22 }
 0x34f   : > { %v12272_v48 = vmax.f32 %v3985_v21, %v4104_v3  ;;  %v3041_v41 = vmax.f32 %v2961_v28, %v14406_v27  ;;  %v3706_v23 = vmax.f32 %v3486_v44, %v3575_v7  ;;  %v14419_v31 = vmax.f32 %v11615_v53, %v11777_v18 }
 0x350   : > { %v3202_v33 = vmax.f32 %v14416_v58, %v11842_v14  ;;  %v3203_v34 = vmax.f32 %v14418_v63, %v11844_v20  ;;  %v6059_v46 = vrot.slane %v12260_v30, 4  ;;  %v6061_v15 = vrot.slane %v12262_v37, 4 }
 0x351   : > { %v12279_v32 = vmax.f32 %v14419_v31, %v12011_v49  ;;  %v6062_v35 = vrot.slane %v12272_v48, 4  ;;  %v3121_v52 = vmax.f32 %v3041_v41, %v14414_v5 }
 0x352   : > { %v3357_v2 = vrot.slane %v3202_v33, 1  ;;  %v3358_v50 = vrot.slane %v3203_v34, 1  ;;  %v3577_v40 = vrot.slane %v3202_v33, 2  ;;  %v6060_v7 = vsel %vm362_vm0, %v6057_v11, %v6059_v46 }
 0x353   : > { %v3360_v17 = vrot.slane %v12279_v32, 1  ;;  %v3578_v53 = vrot.slane %v3203_v34, 2  ;;  %v3580_v51 = vrot.slane %v12279_v32, 2  ;;  %7677 = vmatmul.mubr.msk.f32.gmra.mrb[6].mxu1 %vm751_vm2, %v6060_v7  ;;  %v6063_v21 = vsel %vm362_vm0, %v6061_v15, %v6062_v35 }
 0x354   : > { %v3359_v0 = vsel %vm1459_vm3, %v3357_v2, %v3358_v50  ;;  %v3201_v3 = vmax.f32 %v3121_v52, %v11767_v16  ;;  %7679 = vmatprep.mubr.msk.f32.mxu1 %vm751_vm2, %v6063_v21  ;;  %v3847_v39 = vrot.slane %v3202_v33, 3  ;;  %v3848_v46 = vrot.slane %v3203_v34, 3 }
 0x355   : > { %v3361_v28 = vsel %vm1459_vm3, %v3358_v50, %v3360_v17  ;;  %v3487_v44 = vmax.f32 %v3202_v33, %v3359_v0  ;;  %v3579_v58 = vsel %vm1820_vm4, %v3577_v40, %v3578_v53  ;;  %v3581_v11 = vsel %vm1820_vm4, %v3578_v53, %v3580_v51 }
 0x356   : > { %v3488_v12 = vmax.f32 %v3203_v34, %v3361_v28  ;;  %v3845_v63 = vrot.slane %v3201_v3, 3  ;;  %v4105_v41 = vrot.slane %v3201_v3, 4  ;;  %v3850_v15 = vrot.slane %v12279_v32, 3 }
 0x357   : > { %v3707_v31 = vmax.f32 %v3487_v44, %v3579_v58  ;;  %v4107_v7 = vrot.slane %v3202_v33, 4  ;;  %v4108_v52 = vrot.slane %v3203_v34, 4  ;;  %v3849_v21 = vsel %vm2181_vm5, %v3847_v39, %v3848_v46 }
 0x358   : > { %v3708_v2 = vmax.f32 %v3488_v12, %v3581_v11  ;;  %v3846_v50 = vsel %vm2181_vm5, %v3843_v43, %v3845_v63  ;;  %v4106_v0 = vsel %vm362_vm0, %v4103_v13, %v4105_v41  ;;  %v4110_v40 = vrot.slane %v12279_v32, 4 }
 0x359   : > { %v3986_v28 = vmax.f32 %v3706_v23, %v3846_v50  ;;  %v3851_v53 = vsel %vm2181_vm5, %v3848_v46, %v3850_v15  ;;  %v3987_v24 = vmax.f32 %v3707_v31, %v3849_v21  ;;  %v4109_v3 = vsel %vm362_vm0, %v4107_v7, %v4108_v52 }
 0x35a   : > { %v3988_v44 = vmax.f32 %v3708_v2, %v3851_v53  ;;  %v4111_v12 = vsel %vm362_vm0, %v4108_v52, %v4110_v40  ;;  %v2965_v33 = vmax.f32 %v14389_v54, %v14406_v27  ;;  %v3489_v43 = vmax.f32 %v12279_v32, %v3360_v17 }
 0x35b   : > { %v12307_v34 = vmax.f32 %v3986_v28, %v4106_v0  ;;  %v12309_v13 = vmax.f32 %v3987_v24, %v4109_v3  ;;  %v14420_v23 = vmax.f32 %v11407_v1, %v11563_v61  ;;  %v14421_v11 = vmax.f32 %v11365_v62, %v14397_v29 }
 0x35c   : > { %v12319_v63 = vmax.f32 %v3988_v44, %v4111_v12  ;;  %v3045_v54 = vmax.f32 %v2965_v33, %v14414_v5  ;;  %v3709_v41 = vmax.f32 %v3489_v43, %v3580_v51  ;;  %v14422_v24 = vmax.f32 %v11449_v4, %v11600_v36 }
 0x35d   : > { %v3046_v58 = vmax.f32 %v14420_v23, %v11663_v9  ;;  %v3047_v39 = vmax.f32 %v14421_v11, %v11659_v22  ;;  %v6064_v17 = vrot.slane %v12307_v34, 4  ;;  %v6066_v1 = vrot.slane %v12309_v13, 4 }
 0x35e   : > { %v3048_v32 = vmax.f32 %v14422_v24, %v11777_v18  ;;  %v6067_v62 = vrot.slane %v12319_v63, 4  ;;  %v3125_v2 = vmax.f32 %v3045_v54, %v11767_v16  ;;  %v14423_v51 = vrot.slane %v11929_v42, 1 }
 0x35f   : > { %v3126_v31 = vmax.f32 %v3046_v58, %v11842_v14  ;;  %v3127_v46 = vmax.f32 %v3047_v39, %v11844_v20  ;;  %v6065_v4 = vsel %vm362_vm0, %v6062_v35, %v6064_v17  ;;  %v2969_v21 = vmax.f32 %v14406_v27, %v14414_v5 }
 0x360   : > { %v3128_v7 = vmax.f32 %v3048_v32, %v12011_v49  ;;  %v1807_v52 = vmax.f32 %v11929_v42, %v14423_v51  ;;  %7680 = vmatmul.mubr.msk.f32.gmra.mrb[8].mxu1 %vm751_vm2, %v6065_v4  ;;  %v6068_v28 = vsel %vm362_vm0, %v6066_v1, %v6067_v62  ;;  %v3205_v53 = vmax.f32 %v3125_v2, %v12002_v59 }
 0x361   : > { %v3206_v50 = vmax.f32 %v3126_v31, %v11867_v47  ;;  %v3207_v0 = vmax.f32 %v3127_v46, %v11869_v55  ;;  %v14424_v44 = vrot.slane %v11929_v42, 2  ;;  %7682 = vmatprep.mubr.msk.f32.mxu1 %vm751_vm2, %v6068_v28 }
 0x362   : > { %v12345_v3 = vmax.f32 %v3128_v7, %v11999_v8  ;;  %v3852_v58 = vrot.slane %v3205_v53, 3  ;;  %v4112_v27 = vrot.slane %v3205_v53, 4 }
 0x363   : > { %v2168_v12 = vmax.f32 %v1807_v52, %v14424_v44  ;;  %v3362_v35 = vrot.slane %v3206_v50, 1  ;;  %v3363_v33 = vrot.slane %v3207_v0, 1  ;;  %v3582_v43 = vrot.slane %v3206_v50, 2 }
 0x364   : > { %v3583_v23 = vrot.slane %v3207_v0, 2  ;;  %v3365_v11 = vrot.slane %v12345_v3, 1  ;;  %v3585_v39 = vrot.slane %v12345_v3, 2  ;;  %v3854_v32 = vrot.slane %v3206_v50, 3 }
 0x365   : > { %v3364_v54 = vsel %vm1459_vm3, %v3362_v35, %v3363_v33  ;;  %v3855_v17 = vrot.slane %v3207_v0, 3  ;;  %v3853_v1 = vsel %vm2181_vm5, %v3850_v15, %v3852_v58  ;;  %v4113_v31 = vsel %vm362_vm0, %v4110_v40, %v4112_v27 }
 0x366   : > { %v3584_v24 = vsel %vm1820_vm4, %v3582_v43, %v3583_v23  ;;  %v3366_v46 = vsel %vm1459_vm3, %v3363_v33, %v3365_v11  ;;  %v3490_v2 = vmax.f32 %v3206_v50, %v3364_v54  ;;  %v3989_v7 = vmax.f32 %v3709_v41, %v3853_v1 }
 0x367   : > { %v3491_v51 = vmax.f32 %v3207_v0, %v3366_v46  ;;  %v3586_v52 = vsel %vm1820_vm4, %v3583_v23, %v3585_v39  ;;  %v3856_v4 = vsel %vm2181_vm5, %v3854_v32, %v3855_v17  ;;  %v3857_v53 = vrot.slane %v12345_v3, 3  ;;  %v14427_v46 = vld [vmem:[#allocation87_spill] sm:$0xff] }
 0x368   : > { %v3710_v28 = vmax.f32 %v3490_v2, %v3584_v24  ;;  %v4114_v44 = vrot.slane %v3206_v50, 4  ;;  %v4115_v35 = vrot.slane %v3207_v0, 4  ;;  %v12360_v43 = vmax.f32 %v3989_v7, %v4113_v31  ;;  %v8016_v31 = vld [vmem:[#allocation2 + $0x300] sm:$0xff] }
 0x369   : > { %v3711_v6 = vmax.f32 %v3491_v51, %v3586_v52  ;;  %v4117_v15 = vrot.slane %v12345_v3, 4  ;;  %v14425_v40 = vrot.slane %v11929_v42, 3  ;;  %v3858_v41 = vsel %vm2181_vm5, %v3855_v17, %v3857_v53  ;;  %v14428_v51 = vld [vmem:[#allocation75_spill] sm:$0xff] }
 0x36a   : > { %v3990_v58 = vmax.f32 %v3710_v28, %v3856_v4  ;;  %v4116_v23 = vsel %vm362_vm0, %v4114_v44, %v4115_v35  ;;  %v3049_v27 = vmax.f32 %v2969_v21, %v11767_v16  ;;  %v6069_v54 = vrot.slane %v12360_v43, 4 }
 0x36b   : > { %v2529_v33 = vmax.f32 %v2168_v12, %v14425_v40  ;;  %v3991_v24 = vmax.f32 %v3711_v6, %v3858_v41  ;;  %v4118_v50 = vsel %vm362_vm0, %v4115_v35, %v4117_v15  ;;  %v14426_v0 = vrot.slane %v11929_v42, 4  ;;  %v14429_v35 = vld [vmem:[#allocation73_spill] sm:$0xff] }
 0x36c   : > { %v12374_v1 = vmax.f32 %v3990_v58, %v4116_v23  ;;  %v3129_v12 = vmax.f32 %v3049_v27, %v12002_v59  ;;  %v3492_v17 = vmax.f32 %v12345_v3, %v3365_v11  ;;  %v1255_v2 = vmax.f32 %v14427_v46, %v8016_v31  ;;  %v8017_v3 = vld [vmem:[#allocation2 + $0x320] sm:$0xff] }
 0x36d   : > { %v12372_v32 = vmax.f32 %v2529_v33, %v14426_v0  ;;  %v6070_v21 = vsel %vm362_vm0, %v6067_v62, %v6069_v54  ;;  %v12380_v7 = vmax.f32 %v3991_v24, %v4118_v50  ;;  %v1258_v6 = vmax.f32 %v11912_v10, %v11897_v57  ;;  %v14430_v23 = vld [vmem:[#allocation51_spill] sm:$0xff]  ;;  %v14431_v50 = vld [vmem:[#allocation20_spill] sm:$0xff] }
 0x36e   : > { %v1608_v42 = vrot.slane %v14428_v51, 1  ;;  %7683 = vmatmul.mubr.msk.f32.gmra.mrb[10].mxu1 %vm751_vm2, %v6070_v21  ;;  %v6071_v52 = vrot.slane %v12374_v1, 4  ;;  %v3712_v28 = vmax.f32 %v3492_v17, %v3585_v39  ;;  %v12388_v11 = vmax.f32 %v1255_v2, %v8017_v3 }
 0x36f   : > { %v3209_v4 = vmax.f32 %v3129_v12, %v12372_v32  ;;  %v6072_v44 = vrot.slane %v12380_v7, 4  ;;  %v12392_v62 = vmax.f32 %v1258_v6, %v11921_v26  ;;  %v1610_v40 = vrot.slane %v14429_v35, 1 }
 0x370   : > { %v1614_v10 = vrot.slane %v11760_v19, 1  ;;  %v1607_v58 = vrot.slane %v12388_v11, 1  ;;  %v1615_v27 = vrot.slane %v14430_v23, 1  ;;  %v1617_v0 = vrot.slane %v14431_v50, 1 }
 0x371   : > { %v3859_v33 = vrot.slane %v3209_v4, 3  ;;  %v4119_v41 = vrot.slane %v3209_v4, 4  ;;  %v6073_v39 = vsel %vm362_vm0, %v6071_v52, %v6072_v44  ;;  %v1611_v54 = vsel %vm1459_vm3, %v1608_v42, %v1610_v40 }
 0x372   : > { %v13766_v24 = vrot.slane %v12392_v62, 1  ;;  %7685 = vmatprep.mubr.msk.f32.mxu1 %vm751_vm2, %v6073_v39  ;;  %v1609_v17 = vsel %vm1459_vm3, %v1607_v58, %v1608_v42  ;;  %v1616_v31 = vsel %vm1459_vm3, %v1614_v10, %v1615_v27  ;;  %v1618_v21 = vsel %vm1459_vm3, %v1615_v27, %v1617_v0 }
 0x373   : > { %v3860_v26 = vsel %vm2181_vm5, %v3857_v53, %v3859_v33  ;;  %v4120_v12 = vsel %vm362_vm0, %v4117_v15, %v4119_v41  ;;  %v13765_v6 = vrot.slane %v11941_v45, 1  ;;  %v1808_v52 = vmax.f32 %v12388_v11, %v1609_v17 }
 0x374   : > { %v3992_v46 = vmax.f32 %v3712_v28, %v3860_v26  ;;  %v1613_v2 = vsel %vm1459_vm3, %v1610_v40, %v13766_v24  ;;  %v1809_v4 = vmax.f32 %v14428_v51, %v1611_v54  ;;  %v1812_v15 = vmax.f32 %v11760_v19, %v1616_v31 }
 0x375   : > { %v1810_v53 = vmax.f32 %v14429_v35, %v1613_v2  ;;  %v1620_v28 = vsel %vm1459_vm3, %v1617_v0, %v13765_v6  ;;  %v1813_v3 = vmax.f32 %v14430_v23, %v1618_v21  ;;  %v1968_v40 = vrot.slane %v12388_v11, 2 }
 0x376   : > { %v12416_v42 = vmax.f32 %v3992_v46, %v4120_v12  ;;  %v1814_v10 = vmax.f32 %v14431_v50, %v1620_v28  ;;  %v1969_v33 = vrot.slane %v14428_v51, 2  ;;  %v1971_v41 = vrot.slane %v14429_v35, 2 }
 0x377   : > { %v13768_v58 = vrot.slane %v12392_v62, 2  ;;  %v1975_v39 = vrot.slane %v11760_v19, 2  ;;  %v1976_v54 = vrot.slane %v14430_v23, 2  ;;  %v1978_v0 = vrot.slane %v14431_v50, 2 }
 0x378   : > { %v6074_v27 = vrot.slane %v12416_v42, 4  ;;  %v1970_v26 = vsel %vm1820_vm4, %v1968_v40, %v1969_v33  ;;  %v1972_v12 = vsel %vm1820_vm4, %v1969_v33, %v1971_v41  ;;  %v13769_v31 = vrot.slane %v11941_v45, 2 }
 0x379   : > { %v1974_v17 = vsel %vm1820_vm4, %v1971_v41, %v13768_v58  ;;  %v1977_v2 = vsel %vm1820_vm4, %v1975_v39, %v1976_v54  ;;  %v1979_v21 = vsel %vm1820_vm4, %v1976_v54, %v1978_v0  ;;  %v2169_v28 = vmax.f32 %v1808_v52, %v1970_v26 }
 0x37a   : > { %v6075_v46 = vsel %vm362_vm0, %v6072_v44, %v6074_v27  ;;  %v1981_v40 = vsel %vm1820_vm4, %v1978_v0, %v13769_v31  ;;  %v2170_v33 = vmax.f32 %v1809_v4, %v1972_v12  ;;  %v2171_v6 = vmax.f32 %v1810_v53, %v1974_v17 }
 0x37b   : > { %7686 = vmatmul.mubr.msk.f32.gmra.mrb[12].mxu1 %vm751_vm2, %v6075_v46  ;;  %v2173_v24 = vmax.f32 %v1812_v15, %v1977_v2  ;;  %v2174_v57 = vmax.f32 %v1813_v3, %v1979_v21  ;;  %v2175_v41 = vmax.f32 %v1814_v10, %v1981_v40  ;;  %v2329_v58 = vrot.slane %v12388_v11, 3 }
 0x37c   : > { %v2330_v44 = vrot.slane %v14428_v51, 3  ;;  %v2332_v27 = vrot.slane %v14429_v35, 3  ;;  %v2334_v39 = vrot.slane %v12392_v62, 3  ;;  %v2336_v52 = vrot.slane %v11760_v19, 3 }
 0x37d   : > { %v2337_v54 = vrot.slane %v14430_v23, 3  ;;  %v2339_v4 = vrot.slane %v14431_v50, 3  ;;  %v2341_v53 = vrot.slane %v11941_v45, 3  ;;  %v2689_v15 = vrot.slane %v12388_v11, 4 }
 0x37e   : > { %v2331_v26 = vsel %vm2181_vm5, %v2329_v58, %v2330_v44  ;;  %v2333_v3 = vsel %vm2181_vm5, %v2330_v44, %v2332_v27  ;;  %v2335_v10 = vsel %vm2181_vm5, %v2332_v27, %v2334_v39  ;;  %v2690_v44 = vrot.slane %v14428_v51, 4 }
 0x37f   : > { %v2338_v0 = vsel %vm2181_vm5, %v2336_v52, %v2337_v54  ;;  %v2530_v12 = vmax.f32 %v2169_v28, %v2331_v26  ;;  %v2340_v17 = vsel %vm2181_vm5, %v2337_v54, %v2339_v4  ;;  %v2342_v58 = vsel %vm2181_vm5, %v2339_v4, %v2341_v53 }
 0x380   : > { %v2531_v46 = vmax.f32 %v2170_v33, %v2333_v3  ;;  %v2532_v2 = vmax.f32 %v2171_v6, %v2335_v10  ;;  %v2534_v21 = vmax.f32 %v2173_v24, %v2338_v0  ;;  %v2535_v40 = vmax.f32 %v2174_v57, %v2340_v17 }
 0x381   : > { %v2536_v11 = vmax.f32 %v2175_v41, %v2342_v58  ;;  %v2692_v31 = vrot.slane %v14429_v35, 4  ;;  %v2694_v27 = vrot.slane %v12392_v62, 4  ;;  %v2696_v52 = vrot.slane %v11760_v19, 4 }
 0x382   : > { %v2697_v28 = vrot.slane %v14430_v23, 4  ;;  %v2691_v54 = vsel %vm362_vm0, %v2689_v15, %v2690_v44  ;;  %v2699_v26 = vrot.slane %v14431_v50, 4  ;;  %v2701_v33 = vrot.slane %v11941_v45, 4 }
 0x383   : > { %v2970_v57 = vmax.f32 %v11563_v61, %v11663_v9  ;;  %v2693_v24 = vsel %vm362_vm0, %v2690_v44, %v2692_v31  ;;  %v2695_v51 = vsel %vm362_vm0, %v2692_v31, %v2694_v27  ;;  %v2890_v19 = vmax.f32 %v2530_v12, %v2691_v54 }
 0x384   : > { %v2698_v35 = vsel %vm362_vm0, %v2696_v52, %v2697_v28  ;;  %v2700_v23 = vsel %vm362_vm0, %v2697_v28, %v2699_v26  ;;  %v2702_v50 = vsel %vm362_vm0, %v2699_v26, %v2701_v33  ;;  %v2891_v6 = vmax.f32 %v2531_v46, %v2693_v24  ;;  %v14454_v26 = vld [vmem:[#allocation23_spill] sm:$0xff] }
 0x385   : > { %v2892_v41 = vmax.f32 %v2532_v2, %v2695_v51  ;;  %v12482_v4 = vmax.f32 %v2534_v21, %v2698_v35  ;;  %v12484_v61 = vmax.f32 %v2535_v40, %v2700_v23  ;;  %v12486_v15 = vmax.f32 %v2536_v11, %v2702_v50 }
 0x386   : > { %v2971_v31 = vmax.f32 %v14397_v29, %v11659_v22  ;;  %v2972_v3 = vmax.f32 %v11600_v36, %v11777_v18  ;;  %v3050_v10 = vmax.f32 %v2970_v57, %v11842_v14  ;;  %v14433_v0 = vmax.f32 %v11663_v9, %v11842_v14 }
 0x387   : > { %14432 = vst [vmem:[#allocation72_spill] sm:$0xff] %v12486_v15  ;;  %v14434_v17 = vmax.f32 %v11659_v22, %v11844_v20  ;;  %v14435_v29 = vmax.f32 %v11777_v18, %v12011_v49  ;;  %v14436_v36 = vmax.f32 %v11842_v14, %v11867_v47  ;;  %v14437_v9 = vmax.f32 %v11844_v20, %v11869_v55 }
 0x388   : > { %v3054_v12 = vmax.f32 %v14433_v0, %v11867_v47  ;;  %v3051_v46 = vmax.f32 %v2971_v31, %v11844_v20  ;;  %v3052_v22 = vmax.f32 %v2972_v3, %v12011_v49  ;;  %v14438_v11 = vmax.f32 %v12011_v49, %v11999_v8 }
 0x389   : > { %v3055_v58 = vmax.f32 %v14434_v17, %v11869_v55  ;;  %v3056_v2 = vmax.f32 %v14435_v29, %v11999_v8  ;;  %v12509_v21 = vmax.f32 %v14436_v36, %v2890_v19  ;;  %v12514_v40 = vmax.f32 %v14437_v9, %v2891_v6 }
 0x38a   : > { %v12520_v44 = vmax.f32 %v14438_v11, %v2892_v41  ;;  %v3130_v18 = vmax.f32 %v3050_v10, %v11867_v47  ;;  %v3134_v52 = vmax.f32 %v3054_v12, %v2890_v19  ;;  %v3131_v28 = vmax.f32 %v3051_v46, %v11869_v55 }
 0x38b   : > { %v3135_v14 = vmax.f32 %v3055_v58, %v2891_v6  ;;  %v3136_v54 = vmax.f32 %v3056_v2, %v2892_v41  ;;  %v3132_v20 = vmax.f32 %v3052_v22, %v11999_v8 }
 0x38c   : > { %14439 = vst [vmem:[#allocation74_spill] sm:$0xff] %v12520_v44  ;;  %v3210_v24 = vmax.f32 %v3130_v18, %v2890_v19  ;;  %v3211_v51 = vmax.f32 %v3131_v28, %v2891_v6  ;;  %v3214_v47 = vmax.f32 %v3134_v52, %v12482_v4 }
 0x38d   : > { %v3215_v35 = vmax.f32 %v3135_v14, %v12484_v61  ;;  %v12534_v55 = vmax.f32 %v3136_v54, %v12486_v15  ;;  %v12536_v23 = vmax.f32 %v3132_v20, %v2892_v41 }
 0x38e   : > { %v3367_v50 = vrot.slane %v3210_v24, 1  ;;  %v3587_v31 = vrot.slane %v3210_v24, 2  ;;  %v3861_v8 = vrot.slane %v3210_v24, 3  ;;  %v3368_v3 = vrot.slane %v3211_v51, 1 }
 0x38f   : > { %v3372_v10 = vrot.slane %v3214_v47, 1  ;;  %v3373_v0 = vrot.slane %v3215_v35, 1  ;;  %v3375_v12 = vrot.slane %v12534_v55, 1  ;;  %v3370_v19 = vrot.slane %v12536_v23, 1 }
 0x390   : > { %v3588_v6 = vrot.slane %v3211_v51, 2  ;;  %v3590_v17 = vrot.slane %v12536_v23, 2  ;;  %v3592_v58 = vrot.slane %v3214_v47, 2  ;;  %v3369_v46 = vsel %vm1459_vm3, %v3367_v50, %v3368_v3 }
 0x391   : > { %v3374_v29 = vsel %vm1459_vm3, %v3372_v10, %v3373_v0  ;;  %v3376_v41 = vsel %vm1459_vm3, %v3373_v0, %v3375_v12  ;;  %v3593_v2 = vrot.slane %v3215_v35, 2  ;;  %v3371_v36 = vsel %vm1459_vm3, %v3368_v3, %v3370_v19 }
 0x392   : > { %v3493_v9 = vmax.f32 %v3210_v24, %v3369_v46  ;;  %v3496_v22 = vmax.f32 %v3214_v47, %v3374_v29  ;;  %v3497_v11 = vmax.f32 %v3215_v35, %v3376_v41  ;;  %v3494_v18 = vmax.f32 %v3211_v51, %v3371_v36 }
 0x393   : > { %v3589_v52 = vsel %vm1820_vm4, %v3587_v31, %v3588_v6  ;;  %v3591_v28 = vsel %vm1820_vm4, %v3588_v6, %v3590_v17  ;;  %v3594_v14 = vsel %vm1820_vm4, %v3592_v58, %v3593_v2  ;;  %v3595_v54 = vrot.slane %v12534_v55, 2 }
 0x394   : > { %v3713_v20 = vmax.f32 %v3493_v9, %v3589_v52  ;;  %v3716_v50 = vmax.f32 %v3496_v22, %v3594_v14  ;;  %v3862_v10 = vrot.slane %v3211_v51, 3  ;;  %v3714_v0 = vmax.f32 %v3494_v18, %v3591_v28 }
 0x395   : > { %v3864_v3 = vrot.slane %v12536_v23, 3  ;;  %v3868_v46 = vrot.slane %v3214_v47, 3  ;;  %v3869_v29 = vrot.slane %v3215_v35, 3  ;;  %v3596_v31 = vsel %vm1820_vm4, %v3593_v2, %v3595_v54 }
 0x396   : > { %v3863_v41 = vsel %vm2181_vm5, %v3861_v8, %v3862_v10  ;;  %v13772_v6 = vrot.slane %v12534_v55, 3  ;;  %v4121_v36 = vrot.slane %v3210_v24, 4  ;;  %v3717_v58 = vmax.f32 %v3497_v11, %v3596_v31 }
 0x397   : > { %v3865_v9 = vsel %vm2181_vm5, %v3862_v10, %v3864_v3  ;;  %v3870_v22 = vsel %vm2181_vm5, %v3868_v46, %v3869_v29  ;;  %v3993_v18 = vmax.f32 %v3713_v20, %v3863_v41  ;;  %v4122_v2 = vrot.slane %v3211_v51, 4 }
 0x398   : > { %v3872_v52 = vsel %vm2181_vm5, %v3869_v29, %v13772_v6  ;;  %v3994_v28 = vmax.f32 %v3714_v0, %v3865_v9  ;;  %v3996_v14 = vmax.f32 %v3716_v50, %v3870_v22  ;;  %v13773_v8 = vrot.slane %v12536_v23, 4 }
 0x399   : > { %v3997_v49 = vmax.f32 %v3717_v58, %v3872_v52  ;;  %v4128_v57 = vrot.slane %v3214_v47, 4  ;;  %v4129_v24 = vrot.slane %v3215_v35, 4  ;;  %v4123_v11 = vsel %vm362_vm0, %v4121_v36, %v4122_v2 }
 0x39a   : > { %v13771_v31 = vrot.slane %v12534_v55, 4  ;;  %v4301_v10 = vmax.f32 %v12215_v25, %v12262_v37  ;;  %v4302_v20 = vmax.f32 %v12225_v56, %v12272_v48  ;;  %v4125_v50 = vsel %vm362_vm0, %v4122_v2, %v13773_v8 }
 0x39b   : > { %v4130_v51 = vsel %vm362_vm0, %v4128_v57, %v4129_v24  ;;  %v4253_v0 = vmax.f32 %v3993_v18, %v4123_v11  ;;  %v4304_v47 = vmax.f32 %v12262_v37, %v12309_v13  ;;  %v12584_v46 = vmax.f32 %v3994_v28, %v4125_v50 }
 0x39c   : > { %v4132_v35 = vsel %vm362_vm0, %v4129_v24, %v13771_v31  ;;  %v12586_v29 = vmax.f32 %v3996_v14, %v4130_v51  ;;  %v4305_v41 = vmax.f32 %v12272_v48, %v12319_v63  ;;  %v4307_v57 = vmax.f32 %v12309_v13, %v12374_v1  ;;  %v14460_v31 = vld [vmem:[#allocation91_spill] sm:$0xff] }
 0x39d   : > { %v12590_v36 = vmax.f32 %v3997_v49, %v4132_v35  ;;  %v4308_v58 = vmax.f32 %v12319_v63, %v12380_v7  ;;  %v4349_v9 = vmax.f32 %v4301_v10, %v12309_v13  ;;  %v4350_v22 = vmax.f32 %v4302_v20, %v12319_v63 }
 0x39e   : > { %14440 = vst [vmem:[#allocation9_spill] sm:$0xff] %v12586_v29  ;;  %v4352_v18 = vmax.f32 %v4304_v47, %v12374_v1  ;;  %v4353_v52 = vmax.f32 %v4305_v41, %v12380_v7  ;;  %v6076_v28 = vrot.slane %v4253_v0, 4  ;;  %v12600_v14 = vmax.f32 %v4307_v57, %v4253_v0  ;;  %v14453_v47 = vld [vmem:[#allocation42_spill] sm:$0xff] }
 0x39f   : > { %14441 = vst [vmem:[#allocation10_spill] sm:$0xff] %v12590_v36  ;;  %v12603_v49 = vmax.f32 %v4308_v58, %v12584_v46  ;;  %v4397_v2 = vmax.f32 %v4349_v9, %v12374_v1  ;;  %v13770_v24 = vrot.slane %v12584_v46, 4  ;;  %v4398_v11 = vmax.f32 %v4350_v22, %v12380_v7 }
 0x3a0   : > { %14442 = vst [vmem:[#allocation16_spill] sm:$0xff] %v12600_v14  ;;  %v4400_v50 = vmax.f32 %v4352_v18, %v4253_v0  ;;  %v4401_v10 = vmax.f32 %v4353_v52, %v12584_v46  ;;  %v14444_v20 = vrot.slane %v12392_v62, 1  ;;  %v14445_v18 = vrot.slane %v11941_v45, 1 }
 0x3a1   : > { %14443 = vst [vmem:[#allocation90_spill] sm:$0xff] %v12603_v49  ;;  %v12616_v41 = vmax.f32 %v4397_v2, %v4253_v0  ;;  %v6078_v57 = vsel %vm362_vm0, %v6076_v28, %v13770_v24  ;;  %v12622_v58 = vmax.f32 %v4398_v11, %v12584_v46  ;;  %v14446_v52 = vrot.slane %v12392_v62, 2 }
 0x3a2   : > { %v1811_v51 = vmax.f32 %v12392_v62, %v14444_v20  ;;  %v12625_v9 = vmax.f32 %v4400_v50, %v12586_v29  ;;  %v12628_v22 = vmax.f32 %v4401_v10, %v12590_v36  ;;  %7688 = vmatprep.mubr.msk.f32.mxu1 %vm751_vm2, %v6078_v57  ;;  %v1815_v0 = vmax.f32 %v11941_v45, %v14445_v18 }
 0x3a3   : > { %v2973_v28 = vmax.f32 %v14414_v5, %v11767_v16  ;;  %v2977_v11 = vmax.f32 %v11767_v16, %v12002_v59  ;;  %v2981_v50 = vmax.f32 %v12002_v59, %v12372_v32  ;;  %v14447_v10 = vrot.slane %v11941_v45, 2  ;;  %v14457_v45 = vld [vmem:[#allocation57_spill] sm:$0xff] }
 0x3a4   : > { %v2172_v2 = vmax.f32 %v1811_v51, %v14446_v52  ;;  %v3495_v57 = vmax.f32 %v12536_v23, %v3370_v19  ;;  %v3498_v51 = vmax.f32 %v12534_v55, %v3375_v12  ;;  %v4303_v5 = vmax.f32 %v12260_v30, %v12307_v34 }
 0x3a5   : > { %v2176_v20 = vmax.f32 %v1815_v0, %v14447_v10  ;;  %v3053_v18 = vmax.f32 %v2973_v28, %v12002_v59  ;;  %v3057_v52 = vmax.f32 %v2977_v11, %v12372_v32  ;;  %v4306_v0 = vmax.f32 %v12307_v34, %v12360_v43  ;;  %v14450_v11 = vld [vmem:[#allocation7_spill] sm:$0xff] }
 0x3a6   : > { %v2533_v16 = vmax.f32 %v2172_v2, %v2334_v39  ;;  %v3715_v10 = vmax.f32 %v3495_v57, %v3590_v17  ;;  %v3718_v12 = vmax.f32 %v3498_v51, %v3595_v54  ;;  %v4309_v35 = vmax.f32 %v12360_v43, %v12416_v42  ;;  %v14449_v17 = vld [vmem:[#allocation15_spill] sm:$0xff]  ;;  %v14451_v54 = vld [vmem:[#allocation24_spill] sm:$0xff]  ;;  %v14452_v57 = vld [vmem:[#allocation54_spill] sm:$0xff] }
 0x3a7   : > { %v2537_v19 = vmax.f32 %v2176_v20, %v2341_v53  ;;  %v3133_v39 = vmax.f32 %v3053_v18, %v12372_v32  ;;  %v4351_v2 = vmax.f32 %v4303_v5, %v12360_v43  ;;  %v4354_v28 = vmax.f32 %v4306_v0, %v12416_v42  ;;  %v14456_v18 = vld [vmem:[#allocation49_spill] sm:$0xff] }
 0x3a8   : > { %v2893_v59 = vmax.f32 %v2533_v16, %v2694_v27  ;;  %v4358_v20 = vmax.f32 %v14450_v11, %v14449_v17  ;;  %v4359_v51 = vmax.f32 %v14452_v57, %v14451_v54  ;;  %v4360_v62 = vmax.f32 %v14454_v26, %v14453_v47  ;;  %v14459_v11 = vld [vmem:[#allocation61_spill] sm:$0xff] }
 0x3a9   : > { %v12673_v53 = vmax.f32 %v2537_v19, %v2701_v33  ;;  %v4399_v5 = vmax.f32 %v4351_v2, %v12416_v42  ;;  %v14458_v19 = vld [vmem:[#allocation8_spill] sm:$0xff]  ;;  %v14461_v57 = vmax.f32 %v14459_v11, %v14460_v31  ;;  %v14462_v11 = vrot.slane %v12536_v23, 4 }
 0x3aa   : > { %v12681_v27 = vmax.f32 %v2981_v50, %v2893_v59  ;;  %v3137_v32 = vmax.f32 %v3057_v52, %v2893_v59  ;;  %v3213_v16 = vmax.f32 %v3133_v39, %v2893_v59  ;;  %v4406_v0 = vmax.f32 %v4358_v20, %v14456_v18 }
 0x3ab   : > { %14448 = vst [vmem:[#allocation93_spill] sm:$0xff] %v12673_v53  ;;  %v4407_v33 = vmax.f32 %v4359_v51, %v14457_v45  ;;  %v12687_v24 = vmax.f32 %v4360_v62, %v14458_v19  ;;  %v4313_v6 = vmax.f32 %v14461_v57, %v14449_v17  ;;  %v14463_v29 = vrot.slane %v12534_v55, 3 }
 0x3ac   : > { %14455 = vst [vmem:[#allocation53_spill] sm:$0xff] %v12681_v27  ;;  %v3217_v50 = vmax.f32 %v3137_v32, %v12673_v53  ;;  %v3866_v52 = vrot.slane %v3213_v16, 3  ;;  %v4126_v59 = vrot.slane %v3213_v16, 4  ;;  %v4502_v39 = vrot.slane %v4406_v0, 1 }
 0x3ad   : > { %v4503_v2 = vrot.slane %v4407_v33, 1  ;;  %v4505_v20 = vrot.slane %v12687_v24, 1  ;;  %v4678_v51 = vrot.slane %v4406_v0, 2  ;;  %v4679_v49 = vrot.slane %v4407_v33, 2 }
 0x3ae   : > { %v3867_v62 = vsel %vm2181_vm5, %v3864_v3, %v3866_v52  ;;  %v3873_v8 = vrot.slane %v3217_v50, 3  ;;  %v4127_v57 = vsel %vm362_vm0, %v14462_v11, %v4126_v59  ;;  %v4133_v36 = vrot.slane %v3217_v50, 4 }
 0x3af   : > { %v3995_v26 = vmax.f32 %v3715_v10, %v3867_v62  ;;  %v4504_v32 = vsel %vm1459_vm3, %v4502_v39, %v4503_v2  ;;  %v4506_v16 = vsel %vm1459_vm3, %v4503_v2, %v4505_v20  ;;  %v14464_v15 = vrot.slane %v12534_v55, 4 }
 0x3b0   : > { %v3874_v14 = vsel %vm2181_vm5, %v14463_v29, %v3873_v8  ;;  %v4630_v52 = vmax.f32 %v4406_v0, %v4504_v32  ;;  %v4631_v44 = vmax.f32 %v4407_v33, %v4506_v16  ;;  %v4680_v50 = vsel %vm1820_vm4, %v4678_v51, %v4679_v49 }
 0x3b1   : > { %v4134_v3 = vsel %vm362_vm0, %v14464_v15, %v4133_v36  ;;  %v3998_v23 = vmax.f32 %v3718_v12, %v3874_v14  ;;  %v4255_v53 = vmax.f32 %v3995_v26, %v4127_v57  ;;  %v4681_v10 = vrot.slane %v12687_v24, 2 }
 0x3b2   : > { %v4806_v59 = vmax.f32 %v4630_v52, %v4680_v50  ;;  %v4854_v39 = vrot.slane %v4406_v0, 3  ;;  %v4855_v2 = vrot.slane %v4407_v33, 3  ;;  %v4857_v62 = vrot.slane %v12687_v24, 3  ;;  %v14468_v52 = vld [vmem:[#allocation36_spill] sm:$0xff] }
 0x3b3   : > { %v12714_v11 = vmax.f32 %v3998_v23, %v4134_v3  ;;  %v12716_v8 = vmax.f32 %v4309_v35, %v4255_v53  ;;  %v4402_v55 = vmax.f32 %v4354_v28, %v4255_v53  ;;  %v12718_v29 = vmax.f32 %v4399_v5, %v4255_v53  ;;  %v14469_v23 = vld [vmem:[#allocation92_spill] sm:$0xff] }
 0x3b4   : > { %v6079_v15 = vrot.slane %v4255_v53, 4  ;;  %v4682_v36 = vsel %vm1820_vm4, %v4679_v49, %v4681_v10  ;;  %v4856_v14 = vsel %vm2181_vm5, %v4854_v39, %v4855_v2  ;;  %v4858_v12 = vsel %vm2181_vm5, %v4855_v2, %v4857_v62 }
 0x3b5   : > { %14465 = vst [vmem:[#allocation76_spill] sm:$0xff] %v12714_v11  ;;  %14466 = vst [vmem:[#allocation55_spill] sm:$0xff] %v12716_v8  ;;  %v12726_v51 = vmax.f32 %v4402_v55, %v12714_v11  ;;  %v4807_v57 = vmax.f32 %v4631_v44, %v4682_v36  ;;  %v4982_v32 = vmax.f32 %v4806_v59, %v4856_v14  ;;  %v14467_v35 = vrot.slane %v12584_v46, 4  ;;  %v14471_v44 = vld [vmem:[#allocation12_spill] sm:$0xff]  ;;  %v14472_v59 = vld [vmem:[#allocation47_spill] sm:$0xff] }
 0x3b6   : > { %v5030_v5 = vrot.slane %v4406_v0, 4  ;;  %v5031_v53 = vrot.slane %v4407_v33, 4  ;;  %v5033_v49 = vrot.slane %v12687_v24, 4  ;;  %v4632_v3 = vmax.f32 %v12687_v24, %v4505_v20 }
 0x3b7   : > { %v6080_v28 = vsel %vm362_vm0, %v14467_v35, %v6079_v15  ;;  %v4983_v16 = vmax.f32 %v4807_v57, %v4858_v12  ;;  %v14470_v50 = vmax.f32 %v14468_v52, %v14469_v23  ;;  %v14473_v46 = vmax.f32 %v14471_v44, %v14472_v59  ;;  %v14474_v57 = vld [vmem:[#allocation27_spill] sm:$0xff] }
 0x3b8   : > { %7689 = vmatmul.mubr.msk.f32.gmra.mrb[14].mxu1 %vm751_vm2, %v6080_v28  ;;  %v5032_v0 = vsel %vm362_vm0, %v5030_v5, %v5031_v53  ;;  %v5034_v33 = vsel %vm362_vm0, %v5031_v53, %v5033_v49  ;;  %v4361_v55 = vmax.f32 %v4313_v6, %v14456_v18  ;;  %v4268_v15 = vmax.f32 %v14460_v31, %v14449_v17 }
 0x3b9   : > { %v4314_v39 = vmax.f32 %v14470_v50, %v14451_v54  ;;  %v4315_v2 = vmax.f32 %v14473_v46, %v14453_v47  ;;  %v5158_v24 = vmax.f32 %v4982_v32, %v5032_v0  ;;  %v5159_v20 = vmax.f32 %v4983_v16, %v5034_v33  ;;  %v14475_v50 = vld [vmem:[#allocation5_spill] sm:$0xff] }
 0x3ba   : > { %v4808_v36 = vmax.f32 %v4632_v3, %v4681_v10  ;;  %v4409_v35 = vmax.f32 %v4361_v55, %v14474_v57  ;;  %v4269_v28 = vmax.f32 %v14469_v23, %v14451_v54  ;;  %v4270_v5 = vmax.f32 %v14472_v59, %v14453_v47  ;;  %v14476_v32 = vld [vmem:[#allocation81_spill] sm:$0xff] }
 0x3bb   : > { %v4362_v14 = vmax.f32 %v4314_v39, %v14457_v45  ;;  %v4363_v12 = vmax.f32 %v4315_v2, %v14458_v19  ;;  %v6454_v53 = vrot.slane %v5158_v24, 2  ;;  %v6455_v6 = vrot.slane %v5159_v20, 2 }
 0x3bc   : > { %v4984_v52 = vmax.f32 %v4808_v36, %v4857_v62  ;;  %v4507_v10 = vrot.slane %v4409_v35, 1  ;;  %v4683_v3 = vrot.slane %v4409_v35, 2  ;;  %v4859_v39 = vrot.slane %v4409_v35, 3 }
 0x3bd   : > { %v4410_v31 = vmax.f32 %v4362_v14, %v14475_v50  ;;  %v4411_v16 = vmax.f32 %v4363_v12, %v14476_v32  ;;  %v6456_v44 = vsel %vm1820_vm4, %v6454_v53, %v6455_v6  ;;  %v5035_v36 = vrot.slane %v4409_v35, 4 }
 0x3be   : > { %v5160_v46 = vmax.f32 %v4984_v52, %v5033_v49  ;;  %7693 = vmatprep.mubr.msk.f32.mxu1 %vm751_vm2, %v6456_v44 }
 0x3bf   : > { %v4508_v2 = vrot.slane %v4410_v31, 1  ;;  %v4684_v0 = vrot.slane %v4410_v31, 2  ;;  %v4510_v23 = vrot.slane %v4411_v16, 1  ;;  %v4686_v33 = vrot.slane %v4411_v16, 2 }
 0x3c0   : > { %v4860_v59 = vrot.slane %v4410_v31, 3  ;;  %v4862_v55 = vrot.slane %v4411_v16, 3  ;;  %v6457_v24 = vrot.slane %v5160_v46, 2  ;;  %v5036_v11 = vrot.slane %v4410_v31, 4 }
 0x3c1   : > { %v4509_v62 = vsel %vm1459_vm3, %v4507_v10, %v4508_v2  ;;  %v4685_v20 = vsel %vm1820_vm4, %v4683_v3, %v4684_v0  ;;  %v4511_v14 = vsel %vm1459_vm3, %v4508_v2, %v4510_v23  ;;  %v4687_v53 = vsel %vm1820_vm4, %v4684_v0, %v4686_v33 }
 0x3c2   : > { %v4633_v12 = vmax.f32 %v4409_v35, %v4509_v62  ;;  %v4861_v49 = vsel %vm2181_vm5, %v4859_v39, %v4860_v59  ;;  %v6458_v52 = vsel %vm1820_vm4, %v6455_v6, %v6457_v24  ;;  %v4634_v44 = vmax.f32 %v4410_v31, %v4511_v14 }
 0x3c3   : > { %v4863_v26 = vsel %vm2181_vm5, %v4860_v59, %v4862_v55  ;;  %7694 = vmatmul.mubr.msk.f32.vlgmr.msra.gmra.mrb[16].mxu1 %vm751_vm2, %v6458_v52  ;;  %v5038_v10 = vrot.slane %v4411_v16, 4  ;;  %v4635_v8 = vmax.f32 %v4411_v16, %v4510_v23  ;;  %v4316_v3 = vmax.f32 %v4268_v15, %v14456_v18 }
 0x3c4   : > { %v4809_v46 = vmax.f32 %v4633_v12, %v4685_v20  ;;  %v4810_v27 = vmax.f32 %v4634_v44, %v4687_v53  ;;  %v5037_v35 = vsel %vm362_vm0, %v5035_v36, %v5036_v11  ;;  %v4317_v2 = vmax.f32 %v4269_v28, %v14457_v45  ;;  %v14477_v36 = vld [vmem:[#allocation68_spill] sm:$0xff] }
 0x3c5   : > { %v4318_v39 = vmax.f32 %v4270_v5, %v14458_v19  ;;  %v5039_v6 = vsel %vm362_vm0, %v5036_v11, %v5038_v10  ;;  %v4811_v24 = vmax.f32 %v4635_v8, %v4686_v33  ;;  %v4364_v31 = vmax.f32 %v4316_v3, %v14474_v57  ;;  %v14478_v11 = vld [vmem:[#allocation86_spill] sm:$0xff] }
 0x3c6   : > { %v4985_v0 = vmax.f32 %v4809_v46, %v4861_v49  ;;  %v4986_v59 = vmax.f32 %v4810_v27, %v4863_v26  ;;  %v4365_v62 = vmax.f32 %v4317_v2, %v14475_v50  ;;  %v4271_v15 = vmax.f32 %v14449_v17, %v14456_v18  ;;  %v14479_v33 = vld [vmem:[#allocation78_spill] sm:$0xff] }
 0x3c7   : > { %v4366_v16 = vmax.f32 %v4318_v39, %v14476_v32  ;;  %v4987_v20 = vmax.f32 %v4811_v24, %v4862_v55  ;;  %v4412_v28 = vmax.f32 %v4364_v31, %v14477_v36  ;;  %v4272_v5 = vmax.f32 %v14451_v54, %v14457_v45 }
 0x3c8   : > { %v5161_v23 = vmax.f32 %v4985_v0, %v5037_v35  ;;  %v5162_v14 = vmax.f32 %v4986_v59, %v5039_v6  ;;  %v4413_v8 = vmax.f32 %v4365_v62, %v14478_v11  ;;  %v4273_v27 = vmax.f32 %v14453_v47, %v14458_v19 }
 0x3c9   : > { %v4414_v12 = vmax.f32 %v4366_v16, %v14479_v33  ;;  %v5163_v53 = vmax.f32 %v4987_v20, %v5038_v10  ;;  %v4512_v49 = vrot.slane %v4412_v28, 1  ;;  %v4688_v52 = vrot.slane %v4412_v28, 2 }
 0x3ca   : > { %v6459_v26 = vrot.slane %v5161_v23, 2  ;;  %v6460_v17 = vrot.slane %v5162_v14, 2  ;;  %v4513_v44 = vrot.slane %v4413_v8, 1  ;;  %v4689_v46 = vrot.slane %v4413_v8, 2 }
 0x3cb   : > { %v4515_v55 = vrot.slane %v4414_v12, 1  ;;  %v6462_v3 = vrot.slane %v5163_v53, 2  ;;  %v4691_v35 = vrot.slane %v4414_v12, 2  ;;  %v4864_v2 = vrot.slane %v4412_v28, 3 }
 0x3cc   : > { %v4865_v54 = vrot.slane %v4413_v8, 3  ;;  %v6461_v39 = vsel %vm1820_vm4, %v6459_v26, %v6460_v17  ;;  %v4514_v0 = vsel %vm1459_vm3, %v4512_v49, %v4513_v44  ;;  %v4690_v47 = vsel %vm1820_vm4, %v4688_v52, %v4689_v46 }
 0x3cd   : > { %v4516_v6 = vsel %vm1459_vm3, %v4513_v44, %v4515_v55  ;;  %7696 = vmatprep.mubr.msk.f32.mxu1 %vm751_vm2, %v6461_v39  ;;  %v6463_v10 = vsel %vm1820_vm4, %v6460_v17, %v6462_v3  ;;  %v4636_v24 = vmax.f32 %v4412_v28, %v4514_v0  ;;  %v4692_v59 = vsel %vm1820_vm4, %v4689_v46, %v4691_v35 }
 0x3ce   : > { %v4637_v31 = vmax.f32 %v4413_v8, %v4516_v6  ;;  %7697 = vmatmul.mubr.msk.f32.gmra.mrb[18].mxu1 %vm751_vm2, %v6463_v10  ;;  %v4866_v62 = vsel %vm2181_vm5, %v4864_v2, %v4865_v54  ;;  %v4867_v16 = vrot.slane %v4414_v12, 3  ;;  %v5040_v23 = vrot.slane %v4412_v28, 4  ;;  %v14480_v10 = vld [vmem:[#allocation77_spill] sm:$0xff] }
 0x3cf   : > { %v5041_v20 = vrot.slane %v4413_v8, 4  ;;  %v4812_v14 = vmax.f32 %v4636_v24, %v4690_v47  ;;  %v5043_v53 = vrot.slane %v4414_v12, 4  ;;  %v4638_v49 = vmax.f32 %v4414_v12, %v4515_v55 }
 0x3d0   : > { %v4813_v26 = vmax.f32 %v4637_v31, %v4692_v59  ;;  %v4868_v52 = vsel %vm2181_vm5, %v4865_v54, %v4867_v16  ;;  %v4319_v17 = vmax.f32 %v4271_v15, %v14474_v57  ;;  %v4320_v3 = vmax.f32 %v4272_v5, %v14475_v50 }
 0x3d1   : > { %v5042_v44 = vsel %vm362_vm0, %v5040_v23, %v5041_v20  ;;  %v4988_v46 = vmax.f32 %v4812_v14, %v4866_v62  ;;  %v5044_v0 = vsel %vm362_vm0, %v5041_v20, %v5043_v53  ;;  %v4814_v2 = vmax.f32 %v4638_v49, %v4691_v35  ;;  %v14481_v35 = vld [vmem:[#allocation50_spill] sm:$0xff]  ;;  %v14482_v20 = vld [vmem:[#allocation83_spill] sm:$0xff] }
 0x3d2   : > { %v4989_v39 = vmax.f32 %v4813_v26, %v4868_v52  ;;  %v4321_v28 = vmax.f32 %v4273_v27, %v14476_v32  ;;  %v4367_v8 = vmax.f32 %v4319_v17, %v14477_v36  ;;  %v4368_v6 = vmax.f32 %v4320_v3, %v14478_v11 }
 0x3d3   : > { %v4274_v12 = vmax.f32 %v14456_v18, %v14474_v57  ;;  %v5164_v55 = vmax.f32 %v4988_v46, %v5042_v44  ;;  %v4990_v47 = vmax.f32 %v4814_v2, %v4867_v16  ;;  %v4275_v15 = vmax.f32 %v14457_v45, %v14475_v50 }
 0x3d4   : > { %v5165_v54 = vmax.f32 %v4989_v39, %v5044_v0  ;;  %v4369_v5 = vmax.f32 %v4321_v28, %v14479_v33  ;;  %v4415_v24 = vmax.f32 %v4367_v8, %v14480_v10  ;;  %v4416_v31 = vmax.f32 %v4368_v6, %v14481_v35 }
 0x3d5   : > { %v4276_v27 = vmax.f32 %v14458_v19, %v14476_v32  ;;  %v6464_v59 = vrot.slane %v5164_v55, 2  ;;  %v5166_v23 = vmax.f32 %v4990_v47, %v5043_v53  ;;  %v4322_v18 = vmax.f32 %v4274_v12, %v14477_v36 }
 0x3d6   : > { %v6465_v62 = vrot.slane %v5165_v54, 2  ;;  %v4417_v14 = vmax.f32 %v4369_v5, %v14482_v20  ;;  %v4517_v16 = vrot.slane %v4415_v24, 1  ;;  %v4518_v26 = vrot.slane %v4416_v31, 1 }
 0x3d7   : > { %v4693_v49 = vrot.slane %v4415_v24, 2  ;;  %v6467_v52 = vrot.slane %v5166_v23, 2  ;;  %v4694_v44 = vrot.slane %v4416_v31, 2  ;;  %v4869_v17 = vrot.slane %v4415_v24, 3 }
 0x3d8   : > { %v6466_v45 = vsel %vm1820_vm4, %v6464_v59, %v6465_v62  ;;  %v4519_v3 = vsel %vm1459_vm3, %v4517_v16, %v4518_v26  ;;  %v4520_v19 = vrot.slane %v4417_v14, 1  ;;  %v4696_v46 = vrot.slane %v4417_v14, 2 }
 0x3d9   : > { %7699 = vmatprep.mubr.msk.f32.mxu1 %vm751_vm2, %v6466_v45  ;;  %v4870_v39 = vrot.slane %v4416_v31, 3  ;;  %v6468_v53 = vsel %vm1820_vm4, %v6465_v62, %v6467_v52  ;;  %v4639_v0 = vmax.f32 %v4415_v24, %v4519_v3  ;;  %v4695_v2 = vsel %vm1820_vm4, %v4693_v49, %v4694_v44 }
 0x3da   : > { %v4872_v28 = vrot.slane %v4417_v14, 3  ;;  %7700 = vmatmul.mubr.msk.f32.gmra.mrb[20].mxu1 %vm751_vm2, %v6468_v53  ;;  %v4521_v8 = vsel %vm1459_vm3, %v4518_v26, %v4520_v19  ;;  %v4697_v6 = vsel %vm1820_vm4, %v4694_v44, %v4696_v46  ;;  %v5045_v55 = vrot.slane %v4415_v24, 4 }
 0x3db   : > { %v4871_v12 = vsel %vm2181_vm5, %v4869_v17, %v4870_v39  ;;  %v4640_v54 = vmax.f32 %v4416_v31, %v4521_v8  ;;  %v4815_v47 = vmax.f32 %v4639_v0, %v4695_v2  ;;  %v5046_v59 = vrot.slane %v4416_v31, 4  ;;  %v14484_v0 = vld [vmem:[#allocation6_spill] sm:$0xff]  ;;  %v14485_v8 = vld [vmem:[#allocation63_spill] sm:$0xff] }
 0x3dc   : > { %v4873_v5 = vsel %vm2181_vm5, %v4870_v39, %v4872_v28  ;;  %v5048_v23 = vrot.slane %v4417_v14, 4  ;;  %v4641_v62 = vmax.f32 %v4417_v14, %v4520_v19  ;;  %v4323_v16 = vmax.f32 %v4275_v15, %v14478_v11  ;;  %v14483_v14 = vld [vmem:[#allocation84_spill] sm:$0xff] }
 0x3dd   : > { %v4324_v49 = vmax.f32 %v4276_v27, %v14479_v33  ;;  %v4816_v45 = vmax.f32 %v4640_v54, %v4697_v6  ;;  %v4991_v52 = vmax.f32 %v4815_v47, %v4871_v12  ;;  %v5047_v26 = vsel %vm362_vm0, %v5045_v55, %v5046_v59 }
 0x3de   : > { %v4370_v44 = vmax.f32 %v4322_v18, %v14480_v10  ;;  %v5049_v17 = vsel %vm362_vm0, %v5046_v59, %v5048_v23  ;;  %v4817_v24 = vmax.f32 %v4641_v62, %v4696_v46  ;;  %v4371_v3 = vmax.f32 %v4323_v16, %v14481_v35 }
 0x3df   : > { %v4372_v39 = vmax.f32 %v4324_v49, %v14482_v20  ;;  %v4992_v31 = vmax.f32 %v4816_v45, %v4873_v5  ;;  %v5167_v53 = vmax.f32 %v4991_v52, %v5047_v26  ;;  %v4277_v15 = vmax.f32 %v14474_v57, %v14477_v36 }
 0x3e0   : > { %v4418_v19 = vmax.f32 %v4370_v44, %v14483_v14  ;;  %v4993_v27 = vmax.f32 %v4817_v24, %v4872_v28  ;;  %v4419_v2 = vmax.f32 %v4371_v3, %v14484_v0  ;;  %v4278_v18 = vmax.f32 %v14475_v50, %v14478_v11 }
 0x3e1   : > { %v4420_v6 = vmax.f32 %v4372_v39, %v14485_v8  ;;  %v5168_v46 = vmax.f32 %v4992_v31, %v5049_v17  ;;  %v6469_v12 = vrot.slane %v5167_v53, 2 }
 0x3e2   : > { %v4522_v55 = vrot.slane %v4418_v19, 1  ;;  %v4698_v54 = vrot.slane %v4418_v19, 2  ;;  %v5169_v47 = vmax.f32 %v4993_v27, %v5048_v23  ;;  %v4523_v5 = vrot.slane %v4419_v2, 1 }
 0x3e3   : > { %v4525_v59 = vrot.slane %v4420_v6, 1  ;;  %v4699_v62 = vrot.slane %v4419_v2, 2  ;;  %v6470_v16 = vrot.slane %v5168_v46, 2  ;;  %v4701_v49 = vrot.slane %v4420_v6, 2 }
 0x3e4   : > { %v4874_v45 = vrot.slane %v4418_v19, 3  ;;  %v4875_v57 = vrot.slane %v4419_v2, 3  ;;  %v6472_v28 = vrot.slane %v5169_v47, 2  ;;  %v4524_v52 = vsel %vm1459_vm3, %v4522_v55, %v4523_v5 }
 0x3e5   : > { %v4526_v26 = vsel %vm1459_vm3, %v4523_v5, %v4525_v59  ;;  %v4700_v44 = vsel %vm1820_vm4, %v4698_v54, %v4699_v62  ;;  %v6471_v50 = vsel %vm1820_vm4, %v6469_v12, %v6470_v16  ;;  %v4642_v17 = vmax.f32 %v4418_v19, %v4524_v52 }
 0x3e6   : > { %v4643_v24 = vmax.f32 %v4419_v2, %v4526_v26  ;;  %v4702_v23 = vsel %vm1820_vm4, %v4699_v62, %v4701_v49  ;;  %7702 = vmatprep.mubr.msk.f32.mxu1 %vm751_vm2, %v6471_v50  ;;  %v6473_v3 = vsel %vm1820_vm4, %v6470_v16, %v6472_v28  ;;  %v4876_v39 = vsel %vm2181_vm5, %v4874_v45, %v4875_v57 }
 0x3e7   : > { %v4877_v31 = vrot.slane %v4420_v6, 3  ;;  %v5050_v53 = vrot.slane %v4418_v19, 4  ;;  %7703 = vmatmul.mubr.msk.f32.gmra.mrb[22].mxu1 %vm751_vm2, %v6473_v3  ;;  %v4818_v27 = vmax.f32 %v4642_v17, %v4700_v44  ;;  %v5051_v55 = vrot.slane %v4419_v2, 4 }
 0x3e8   : > { %v4819_v46 = vmax.f32 %v4643_v24, %v4702_v23  ;;  %v5053_v54 = vrot.slane %v4420_v6, 4  ;;  %v4644_v47 = vmax.f32 %v4420_v6, %v4525_v59  ;;  %v4279_v5 = vmax.f32 %v14476_v32, %v14479_v33 }
 0x3e9   : > { %v4878_v12 = vsel %vm2181_vm5, %v4875_v57, %v4877_v31  ;;  %v4325_v62 = vmax.f32 %v4277_v15, %v14480_v10  ;;  %v4994_v52 = vmax.f32 %v4818_v27, %v4876_v39  ;;  %v5052_v45 = vsel %vm362_vm0, %v5050_v53, %v5051_v55 }
 0x3ea   : > { %v4995_v16 = vmax.f32 %v4819_v46, %v4878_v12  ;;  %v5054_v19 = vsel %vm362_vm0, %v5051_v55, %v5053_v54  ;;  %v4820_v28 = vmax.f32 %v4644_v47, %v4701_v49  ;;  %v4326_v26 = vmax.f32 %v4278_v18, %v14481_v35  ;;  %v14486_v49 = vld [vmem:[#allocation66_spill] sm:$0xff] }
 0x3eb   : > { %v4327_v2 = vmax.f32 %v4279_v5, %v14482_v20  ;;  %v4373_v44 = vmax.f32 %v4325_v62, %v14483_v14  ;;  %v5170_v57 = vmax.f32 %v4994_v52, %v5052_v45  ;;  %v4280_v32 = vmax.f32 %v14477_v36, %v14480_v10 }
 0x3ec   : > { %v5171_v6 = vmax.f32 %v4995_v16, %v5054_v19  ;;  %v4281_v15 = vmax.f32 %v14478_v11, %v14481_v35  ;;  %v4996_v59 = vmax.f32 %v4820_v28, %v4877_v31  ;;  %v4374_v50 = vmax.f32 %v4326_v26, %v14484_v0 }
 0x3ed   : > { %v4375_v17 = vmax.f32 %v4327_v2, %v14485_v8  ;;  %v4421_v24 = vmax.f32 %v4373_v44, %v14486_v49  ;;  %v6474_v18 = vrot.slane %v5170_v57, 2  ;;  %v4282_v3 = vmax.f32 %v14479_v33, %v14482_v20 }
 0x3ee   : > { %v6475_v23 = vrot.slane %v5171_v6, 2  ;;  %v4328_v39 = vmax.f32 %v4280_v32, %v14483_v14  ;;  %v5172_v53 = vmax.f32 %v4996_v59, %v5053_v54  ;;  %v4422_v36 = vmax.f32 %v4374_v50, %v11919_v60 }
 0x3ef   : > { %v4423_v27 = vmax.f32 %v4375_v17, %v12023_v38  ;;  %v4527_v11 = vrot.slane %v4421_v24, 1  ;;  %v4703_v46 = vrot.slane %v4421_v24, 2  ;;  %v4879_v55 = vrot.slane %v4421_v24, 3 }
 0x3f0   : > { %v6476_v31 = vsel %vm1820_vm4, %v6474_v18, %v6475_v23  ;;  %v5055_v12 = vrot.slane %v4421_v24, 4  ;;  %v6477_v47 = vrot.slane %v5172_v53, 2  ;;  %v4528_v5 = vrot.slane %v4422_v36, 1 }
 0x3f1   : > { %7705 = vmatprep.mubr.msk.f32.mxu1 %vm751_vm2, %v6476_v31  ;;  %v4530_v62 = vrot.slane %v4423_v27, 1  ;;  %v4704_v52 = vrot.slane %v4422_v36, 2  ;;  %v4706_v33 = vrot.slane %v4423_v27, 2  ;;  %v4880_v16 = vrot.slane %v4422_v36, 3 }
 0x3f2   : > { %v4882_v45 = vrot.slane %v4423_v27, 3  ;;  %v5056_v54 = vrot.slane %v4422_v36, 4  ;;  %v6478_v19 = vsel %vm1820_vm4, %v6475_v23, %v6477_v47  ;;  %v4529_v28 = vsel %vm1459_vm3, %v4527_v11, %v4528_v5 }
 0x3f3   : > { %v4531_v26 = vsel %vm1459_vm3, %v4528_v5, %v4530_v62  ;;  %v4705_v2 = vsel %vm1820_vm4, %v4703_v46, %v4704_v52  ;;  %7706 = vmatmul.mubr.msk.f32.gmra.mrb[24].mxu1 %vm751_vm2, %v6478_v19  ;;  %v4645_v44 = vmax.f32 %v4421_v24, %v4529_v28  ;;  %v4707_v6 = vsel %vm1820_vm4, %v4704_v52, %v4706_v33  ;;  %v14487_v52 = vld [vmem:[#allocation43_spill] sm:$0xff] }
 0x3f4   : > { %v4646_v57 = vmax.f32 %v4422_v36, %v4531_v26  ;;  %v4881_v32 = vsel %vm2181_vm5, %v4879_v55, %v4880_v16  ;;  %v4883_v59 = vsel %vm2181_vm5, %v4880_v16, %v4882_v45  ;;  %v5057_v50 = vsel %vm362_vm0, %v5055_v12, %v5056_v54 }
 0x3f5   : > { %v5058_v17 = vrot.slane %v4423_v27, 4  ;;  %v4647_v18 = vmax.f32 %v4423_v27, %v4530_v62  ;;  %v4821_v23 = vmax.f32 %v4645_v44, %v4705_v2  ;;  %v4329_v11 = vmax.f32 %v4281_v15, %v14484_v0 }
 0x3f6   : > { %v4822_v53 = vmax.f32 %v4646_v57, %v4707_v6  ;;  %v4330_v31 = vmax.f32 %v4282_v3, %v14485_v8  ;;  %v4376_v36 = vmax.f32 %v4328_v39, %v14486_v49  ;;  %v4283_v55 = vmax.f32 %v14480_v10, %v14483_v14  ;;  %v14489_v10 = vld [vmem:[#allocation89_spill] sm:$0xff] }
 0x3f7   : > { %v5059_v46 = vsel %vm362_vm0, %v5056_v54, %v5058_v17  ;;  %v4823_v24 = vmax.f32 %v4647_v18, %v4706_v33  ;;  %v4997_v47 = vmax.f32 %v4821_v23, %v4881_v32  ;;  %v4377_v12 = vmax.f32 %v4329_v11, %v11919_v60  ;;  %v14488_v54 = vld [vmem:[#allocation13_spill] sm:$0xff] }
 0x3f8   : > { %v4998_v5 = vmax.f32 %v4822_v53, %v4883_v59  ;;  %v4378_v27 = vmax.f32 %v4330_v31, %v12023_v38  ;;  %v4424_v16 = vmax.f32 %v4376_v36, %v14487_v52  ;;  %v4284_v15 = vmax.f32 %v14481_v35, %v14484_v0 }
 0x3f9   : > { %v4999_v62 = vmax.f32 %v4823_v24, %v4882_v45  ;;  %v4285_v3 = vmax.f32 %v14482_v20, %v14485_v8  ;;  %v5173_v33 = vmax.f32 %v4997_v47, %v5057_v50  ;;  %v4425_v19 = vmax.f32 %v4377_v12, %v14488_v54 }
 0x3fa   : > { %v5174_v39 = vmax.f32 %v4998_v5, %v5059_v46  ;;  %v4426_v28 = vmax.f32 %v4378_v27, %v14489_v10  ;;  %v4532_v2 = vrot.slane %v4424_v16, 1  ;;  %v4708_v44 = vrot.slane %v4424_v16, 2 }
 0x3fb   : > { %v5175_v26 = vmax.f32 %v4999_v62, %v5058_v17  ;;  %v4884_v57 = vrot.slane %v4424_v16, 3  ;;  %v6479_v6 = vrot.slane %v5173_v33, 2  ;;  %v4533_v32 = vrot.slane %v4425_v19, 1 }
 0x3fc   : > { %v6480_v45 = vrot.slane %v5174_v39, 2  ;;  %v4535_v59 = vrot.slane %v4426_v28, 1  ;;  %v4709_v23 = vrot.slane %v4425_v19, 2  ;;  %v4711_v35 = vrot.slane %v4426_v28, 2 }
 0x3fd   : > { %v6482_v18 = vrot.slane %v5175_v26, 2  ;;  %v4885_v53 = vrot.slane %v4425_v19, 3  ;;  %v4534_v50 = vsel %vm1459_vm3, %v4532_v2, %v4533_v32  ;;  %v4887_v31 = vrot.slane %v4426_v28, 3 }
 0x3fe   : > { %v6481_v20 = vsel %vm1820_vm4, %v6479_v6, %v6480_v45  ;;  %v4536_v11 = vsel %vm1459_vm3, %v4533_v32, %v4535_v59  ;;  %v4648_v46 = vmax.f32 %v4424_v16, %v4534_v50  ;;  %v4710_v36 = vsel %vm1820_vm4, %v4708_v44, %v4709_v23  ;;  %v14490_v50 = vld [vmem:[#allocation88_spill] sm:$0xff] }
 0x3ff   : > { %7708 = vmatprep.mubr.msk.f32.mxu1 %vm751_vm2, %v6481_v20  ;;  %v6483_v17 = vsel %vm1820_vm4, %v6480_v45, %v6482_v18  ;;  %v4649_v24 = vmax.f32 %v4425_v19, %v4536_v11  ;;  %v4712_v47 = vsel %vm1820_vm4, %v4709_v23, %v4711_v35  ;;  %v4886_v5 = vsel %vm2181_vm5, %v4884_v57, %v4885_v53 }
 0x400   : > { %7709 = vmatmul.mubr.msk.f32.gmra.mrb[26].mxu1 %vm751_vm2, %v6483_v17  ;;  %v4888_v12 = vsel %vm2181_vm5, %v4885_v53, %v4887_v31  ;;  %v5060_v27 = vrot.slane %v4424_v16, 4  ;;  %v4824_v62 = vmax.f32 %v4648_v46, %v4710_v36  ;;  %v5061_v39 = vrot.slane %v4425_v19, 4  ;;  %v14491_v17 = vld [vmem:[#allocation3_spill] sm:$0xff] }
 0x401   : > { %v4825_v33 = vmax.f32 %v4649_v24, %v4712_v47  ;;  %v5063_v26 = vrot.slane %v4426_v28, 4  ;;  %v4650_v2 = vmax.f32 %v4426_v28, %v4535_v59  ;;  %v4331_v6 = vmax.f32 %v4283_v55, %v14486_v49 }
 0x402   : > { %v4332_v45 = vmax.f32 %v4284_v15, %v11919_v60  ;;  %v4333_v44 = vmax.f32 %v4285_v3, %v12023_v38  ;;  %v5000_v32 = vmax.f32 %v4824_v62, %v4886_v5  ;;  %v5062_v23 = vsel %vm362_vm0, %v5060_v27, %v5061_v39 }
 0x403   : > { %v5001_v18 = vmax.f32 %v4825_v33, %v4888_v12  ;;  %v5064_v57 = vsel %vm362_vm0, %v5061_v39, %v5063_v26  ;;  %v4826_v20 = vmax.f32 %v4650_v2, %v4711_v35  ;;  %v4379_v16 = vmax.f32 %v4331_v6, %v14487_v52  ;;  %v14492_v35 = vld [vmem:[#allocation70_spill] sm:$0xff] }
 0x404   : > { %v4380_v53 = vmax.f32 %v4332_v45, %v14488_v54  ;;  %v4381_v19 = vmax.f32 %v4333_v44, %v14489_v10  ;;  %v5176_v28 = vmax.f32 %v5000_v32, %v5062_v23  ;;  %v4286_v55 = vmax.f32 %v14483_v14, %v14486_v49 }
 0x405   : > { %v5177_v59 = vmax.f32 %v5001_v18, %v5064_v57  ;;  %v4287_v15 = vmax.f32 %v14484_v0, %v11919_v60  ;;  %v5002_v3 = vmax.f32 %v4826_v20, %v4887_v31  ;;  %v4427_v11 = vmax.f32 %v4379_v16, %v14490_v50 }
 0x406   : > { %v4428_v46 = vmax.f32 %v4380_v53, %v14491_v17  ;;  %v4429_v24 = vmax.f32 %v4381_v19, %v14492_v35  ;;  %v6484_v36 = vrot.slane %v5176_v28, 2  ;;  %v4288_v5 = vmax.f32 %v14485_v8, %v12023_v38 }
 0x407   : > { %v6485_v47 = vrot.slane %v5177_v59, 2  ;;  %v4334_v12 = vmax.f32 %v4286_v55, %v14487_v52  ;;  %v5178_v27 = vmax.f32 %v5002_v3, %v5063_v26  ;;  %v4537_v62 = vrot.slane %v4427_v11, 1 }
 0x408   : > { %v4538_v14 = vrot.slane %v4428_v46, 1  ;;  %v4540_v33 = vrot.slane %v4429_v24, 1  ;;  %v4713_v31 = vrot.slane %v4427_v11, 2  ;;  %v4714_v39 = vrot.slane %v4428_v46, 2 }
 0x409   : > { %v6486_v0 = vsel %vm1820_vm4, %v6484_v36, %v6485_v47  ;;  %v4716_v2 = vrot.slane %v4429_v24, 2  ;;  %v6487_v6 = vrot.slane %v5178_v27, 2  ;;  %v4889_v32 = vrot.slane %v4427_v11, 3 }
 0x40a   : > { %7711 = vmatprep.mubr.msk.f32.mxu1 %vm751_vm2, %v6486_v0  ;;  %v4539_v45 = vsel %vm1459_vm3, %v4537_v62, %v4538_v14  ;;  %v4541_v44 = vsel %vm1459_vm3, %v4538_v14, %v4540_v33  ;;  %v4715_v26 = vsel %vm1820_vm4, %v4713_v31, %v4714_v39  ;;  %v4890_v20 = vrot.slane %v4428_v46, 3  ;;  %v12930_v14 = vpop.f32.mrb[48].mxu0 }
 0x40b   : > { %v4651_v8 = vmax.f32 %v4427_v11, %v4539_v45  ;;  %v4652_v18 = vmax.f32 %v4428_v46, %v4541_v44  ;;  %v4717_v23 = vsel %vm1820_vm4, %v4714_v39, %v4716_v2  ;;  %v6488_v57 = vsel %vm1820_vm4, %v6485_v47, %v6487_v6  ;;  %14493 = vst [vmem:[#allocation94_spill] sm:$0xff] %v12930_v14  ;;  %v12934_v39 = vpop.f32.mrb[49].mxu0 }
 0x40c   : > { %v4892_v16 = vrot.slane %v4429_v24, 3  ;;  %v5065_v53 = vrot.slane %v4427_v11, 4  ;;  %7712 = vmatmul.mubr.msk.f32.gmra.mrb[28].mxu1 %vm751_vm2, %v6488_v57  ;;  %v5066_v59 = vrot.slane %v4428_v46, 4  ;;  %v5068_v55 = vrot.slane %v4429_v24, 4  ;;  %14494 = vst [vmem:[#allocation18_spill] sm:$0xff] %v12934_v39 }
 0x40d   : > { %v4827_v19 = vmax.f32 %v4651_v8, %v4715_v26  ;;  %v4828_v28 = vmax.f32 %v4652_v18, %v4717_v23  ;;  %v4891_v3 = vsel %vm2181_vm5, %v4889_v32, %v4890_v20  ;;  %v4653_v27 = vmax.f32 %v4429_v24, %v4540_v33  ;;  %v12939_v24 = vpop.f32.mrb[50].mxu0 }
 0x40e   : > { %v4893_v36 = vsel %vm2181_vm5, %v4890_v20, %v4892_v16  ;;  %v4335_v62 = vmax.f32 %v4287_v15, %v14488_v54  ;;  %v5067_v31 = vsel %vm362_vm0, %v5065_v53, %v5066_v59  ;;  %v5069_v11 = vsel %vm362_vm0, %v5066_v59, %v5068_v55  ;;  %14495 = vst [vmem:[#allocation64_spill] sm:$0xff] %v12939_v24  ;;  %v12945_v18 = vpop.f32.mrb[51].mxu0 }
 0x40f   : > { %v5003_v0 = vmax.f32 %v4827_v19, %v4891_v3  ;;  %v5004_v47 = vmax.f32 %v4828_v28, %v4893_v36  ;;  %v4829_v6 = vmax.f32 %v4653_v27, %v4716_v2  ;;  %v4336_v46 = vmax.f32 %v4288_v5, %v14489_v10  ;;  %14496 = vst [vmem:[#allocation40_spill] sm:$0xff] %v12945_v18  ;;  %v14497_v5 = vld [vmem:[#allocation69_spill] sm:$0xff]  ;;  %v12950_v20 = vpop.f32.mrb[52].mxu0  ;;  %v14501_v3 = vld [vmem:[#allocation14_spill] sm:$0xff] }
 0x410   : > { %v4382_v45 = vmax.f32 %v4334_v12, %v14490_v50  ;;  %v4383_v44 = vmax.f32 %v4335_v62, %v14491_v17  ;;  %v4289_v32 = vmax.f32 %v14486_v49, %v14487_v52  ;;  %v4290_v8 = vmax.f32 %v11919_v60, %v14488_v54  ;;  %v14498_v12 = vld [vmem:[#allocation62_spill] sm:$0xff]  ;;  %14499 = vst [vmem:[#allocation17_spill] sm:$0xff] %v12950_v20  ;;  %v12955_v59 = vpop.f32.mrb[53].mxu0 }
 0x411   : > { %v5179_v15 = vmax.f32 %v5003_v0, %v5067_v31  ;;  %v5180_v33 = vmax.f32 %v5004_v47, %v5069_v11  ;;  %v5005_v26 = vmax.f32 %v4829_v6, %v4892_v16  ;;  %v4384_v2 = vmax.f32 %v4336_v46, %v14492_v35  ;;  %14500 = vst [vmem:[#allocation65_spill] sm:$0xff] %v12955_v59  ;;  %v12958_v62 = vpop.f32.mrb[54].mxu0 }
 0x412   : > { %v4430_v23 = vmax.f32 %v4382_v45, %v14497_v5  ;;  %v4431_v57 = vmax.f32 %v4383_v44, %v14498_v12  ;;  %v4291_v28 = vmax.f32 %v12023_v38, %v14489_v10  ;;  %v4337_v49 = vmax.f32 %v4289_v32, %v14490_v50  ;;  %14502 = vst [vmem:[#allocation21_spill] sm:$0xff] %v12958_v62  ;;  %v12961_v6 = vpop.f32.mrb[55].mxu0 }
 0x413   : > { %v6489_v53 = vrot.slane %v5179_v15, 2  ;;  %v6490_v19 = vrot.slane %v5180_v33, 2  ;;  %v5181_v60 = vmax.f32 %v5005_v26, %v5068_v55  ;;  %v4432_v16 = vmax.f32 %v4384_v2, %v14501_v3  ;;  %14503 = vst [vmem:[#allocation79_spill] sm:$0xff] %v12961_v6  ;;  %v12965_v44 = vpop.f32.mrb[56].mxu0 }
 0x414   : > { %v4542_v36 = vrot.slane %v4430_v23, 1  ;;  %v4543_v27 = vrot.slane %v4431_v57, 1  ;;  %v4718_v47 = vrot.slane %v4430_v23, 2  ;;  %v4719_v31 = vrot.slane %v4431_v57, 2  ;;  %14504 = vst [vmem:[#allocation19_spill] sm:$0xff] %v12965_v44  ;;  %v12968_v2 = vpop.f32.mrb[57].mxu0 }
 0x415   : > { %v6491_v0 = vsel %vm1820_vm4, %v6489_v53, %v6490_v19  ;;  %v4894_v11 = vrot.slane %v4430_v23, 3  ;;  %v6492_v38 = vrot.slane %v5181_v60, 2  ;;  %v4545_v45 = vrot.slane %v4432_v16, 1  ;;  %14505 = vst [vmem:[#allocation28_spill] sm:$0xff] %v12968_v2  ;;  %v12973_v62 = vpop.f32.mrb[58].mxu0 }
 0x416   : > { %7714 = vmatprep.mubr.msk.f32.mxu1 %vm751_vm2, %v6491_v0  ;;  %v4544_v46 = vsel %vm1459_vm3, %v4542_v36, %v4543_v27  ;;  %v4721_v55 = vrot.slane %v4432_v16, 2  ;;  %v4720_v33 = vsel %vm1820_vm4, %v4718_v47, %v4719_v31  ;;  %v4895_v32 = vrot.slane %v4431_v57, 3  ;;  %14506 = vst [vmem:[#allocation26_spill] sm:$0xff] %v12973_v62  ;;  %v12978_v59 = vpop.f32.mrb[59].mxu0 }
 0x417   : > { %v4654_v15 = vmax.f32 %v4430_v23, %v4544_v46  ;;  %v4897_v26 = vrot.slane %v4432_v16, 3  ;;  %v6493_v53 = vsel %vm1820_vm4, %v6490_v19, %v6492_v38  ;;  %v4546_v6 = vsel %vm1459_vm3, %v4543_v27, %v4545_v45  ;;  %14507 = vst [vmem:[#allocation52_spill] sm:$0xff] %v12978_v59  ;;  %v12981_v38 = vpop.f32.mrb[60].mxu0 }
 0x418   : > { %v4722_v0 = vsel %vm1820_vm4, %v4719_v31, %v4721_v55  ;;  %v5070_v60 = vrot.slane %v4430_v23, 4  ;;  %7715 = vmatmul.mubr.msk.f32.gmra.mrb[30].mxu1 %vm751_vm2, %v6493_v53  ;;  %v4655_v36 = vmax.f32 %v4431_v57, %v4546_v6  ;;  %v4896_v46 = vsel %vm2181_vm5, %v4894_v11, %v4895_v32  ;;  %14508 = vst [vmem:[#allocation11_spill] sm:$0xff] %v12981_v38 }
 0x419   : > { %v4830_v44 = vmax.f32 %v4654_v15, %v4720_v33  ;;  %v4898_v47 = vsel %vm2181_vm5, %v4895_v32, %v4897_v26  ;;  %v5071_v2 = vrot.slane %v4431_v57, 4  ;;  %v5073_v20 = vrot.slane %v4432_v16, 4  ;;  %v12985_v15 = vpop.f32.mrb[61].mxu0 }
 0x41a   : > { %v4656_v19 = vmax.f32 %v4432_v16, %v4545_v45  ;;  %v4338_v27 = vmax.f32 %v4290_v8, %v14491_v17  ;;  %v4831_v23 = vmax.f32 %v4655_v36, %v4722_v0  ;;  %v4339_v62 = vmax.f32 %v4291_v28, %v14492_v35  ;;  %14509 = vst [vmem:[#allocation30_spill] sm:$0xff] %v12985_v15  ;;  %v12990_v16 = vpop.f32.mrb[62].mxu0 }
 0x41b   : > { %v5006_v31 = vmax.f32 %v4830_v44, %v4896_v46  ;;  %v4385_v6 = vmax.f32 %v4337_v49, %v14497_v5  ;;  %v5072_v11 = vsel %vm362_vm0, %v5070_v60, %v5071_v2  ;;  %v5074_v33 = vsel %vm362_vm0, %v5071_v2, %v5073_v20  ;;  %14510 = vst [vmem:[#allocation39_spill] sm:$0xff] %v12990_v16  ;;  %v12994_v28 = vpop.f32.mrb[63].mxu0 }
 0x41c   : > { %v4832_v32 = vmax.f32 %v4656_v19, %v4721_v55  ;;  %v4386_v57 = vmax.f32 %v4338_v27, %v14498_v12  ;;  %v5007_v8 = vmax.f32 %v4831_v23, %v4898_v47  ;;  %v4387_v53 = vmax.f32 %v4339_v62, %v14501_v3  ;;  %14511 = vst [vmem:[#allocation29_spill] sm:$0xff] %v12994_v28  ;;  %v13001_v2 = vpop.f32.mrb[32].mxu0 }
 0x41d   : > { %v5182_v45 = vmax.f32 %v5006_v31, %v5072_v11  ;;  %v4433_v44 = vmax.f32 %v4385_v6, %v12215_v25  ;;  %v4292_v60 = vmax.f32 %v14487_v52, %v14490_v50  ;;  %v4293_v55 = vmax.f32 %v14488_v54, %v14491_v17  ;;  %v13006_v19 = vpop.f32.mrb[33].mxu0 }
 0x41e   : > { %v5008_v49 = vmax.f32 %v4832_v32, %v4897_v26  ;;  %v4434_v0 = vmax.f32 %v4386_v57, %v12225_v56  ;;  %v5183_v36 = vmax.f32 %v5007_v8, %v5074_v33  ;;  %v13004_v47 = vmax.f32 %v4387_v53, %v12260_v30  ;;  %v13008_v6 = vpop.f32.mrb[34].mxu0 }
 0x41f   : > { %v6494_v46 = vrot.slane %v5182_v45, 2  ;;  %v4547_v62 = vrot.slane %v4433_v44, 1  ;;  %v4723_v23 = vrot.slane %v4433_v44, 2  ;;  %v4899_v32 = vrot.slane %v4433_v44, 3  ;;  %v13012_v33 = vpop.f32.mrb[35].mxu0 }
 0x420   : > { %v5184_v27 = vmax.f32 %v5008_v49, %v5073_v20  ;;  %v4548_v26 = vrot.slane %v4434_v0, 1  ;;  %v4724_v31 = vrot.slane %v4434_v0, 2  ;;  %v6495_v52 = vrot.slane %v5183_v36, 2  ;;  %v13016_v20 = vpop.f32.mrb[36].mxu0 }
 0x421   : > { %v4550_v11 = vrot.slane %v13004_v47, 1  ;;  %v4726_v54 = vrot.slane %v13004_v47, 2  ;;  %v4900_v53 = vrot.slane %v4434_v0, 3  ;;  %v13021_v15 = vpop.f32.mrb[37].mxu0 }
 0x422   : > { %v6497_v57 = vrot.slane %v5184_v27, 2  ;;  %v4549_v8 = vsel %vm1459_vm3, %v4547_v62, %v4548_v26  ;;  %v4725_v45 = vsel %vm1820_vm4, %v4723_v23, %v4724_v31  ;;  %v6496_v49 = vsel %vm1820_vm4, %v6494_v46, %v6495_v52  ;;  %v13027_v59 = vpop.f32.mrb[38].mxu0 }
 0x423   : > { %v4551_v28 = vsel %vm1459_vm3, %v4548_v26, %v4550_v11  ;;  %v4657_v36 = vmax.f32 %v4433_v44, %v4549_v8  ;;  %v4727_v16 = vsel %vm1820_vm4, %v4724_v31, %v4726_v54  ;;  %7717 = vmatprep.mubr.msk.f32.mxu1 %vm751_vm2, %v6496_v49  ;;  %v4901_v62 = vsel %vm2181_vm5, %v4899_v32, %v4900_v53  ;;  %v13031_v18 = vpop.f32.mrb[39].mxu0 }
 0x424   : > { %v6498_v27 = vsel %vm1820_vm4, %v6495_v52, %v6497_v57  ;;  %v4658_v38 = vmax.f32 %v4434_v0, %v4551_v28  ;;  %v4902_v23 = vrot.slane %v13004_v47, 3  ;;  %v5075_v26 = vrot.slane %v4433_v44, 4  ;;  %v13037_v32 = vpop.f32.mrb[40].mxu0 }
 0x425   : > { %7718 = vmatmul.mubr.msk.f32.gmra.mrb[0].mxu1 %vm751_vm2, %v6498_v27  ;;  %v4833_v46 = vmax.f32 %v4657_v36, %v4725_v45  ;;  %v5076_v8 = vrot.slane %v4434_v0, 4  ;;  %v5078_v31 = vrot.slane %v13004_v47, 4  ;;  %v4659_v28 = vmax.f32 %v13004_v47, %v4550_v11  ;;  %v13042_v45 = vpop.f32.mrb[41].mxu0 }
 0x426   : > { %v4834_v24 = vmax.f32 %v4658_v38, %v4727_v16  ;;  %v4903_v49 = vsel %vm2181_vm5, %v4900_v53, %v4902_v23  ;;  %v4294_v52 = vmax.f32 %v14489_v10, %v14492_v35  ;;  %v4340_v0 = vmax.f32 %v4292_v60, %v14497_v5  ;;  %14512 = vst [vmem:[#allocation32_spill] sm:$0xff] %v13042_v45  ;;  %v13046_v11 = vpop.f32.mrb[42].mxu0 }
 0x427   : > { %v5009_v57 = vmax.f32 %v4833_v46, %v4901_v62  ;;  %v5077_v27 = vsel %vm362_vm0, %v5075_v26, %v5076_v8  ;;  %v5079_v44 = vsel %vm362_vm0, %v5076_v8, %v5078_v31  ;;  %v4835_v38 = vmax.f32 %v4659_v28, %v4726_v54  ;;  %14513 = vst [vmem:[#allocation67_spill] sm:$0xff] %v13046_v11  ;;  %v13053_v60 = vpop.f32.mrb[43].mxu0 }
 0x428   : > { %v5010_v36 = vmax.f32 %v4834_v24, %v4903_v49  ;;  %v4341_v16 = vmax.f32 %v4293_v55, %v14498_v12  ;;  %v4342_v47 = vmax.f32 %v4294_v52, %v14501_v3  ;;  %v4388_v53 = vmax.f32 %v4340_v0, %v12215_v25  ;;  %14514 = vst [vmem:[#allocation31_spill] sm:$0xff] %v13053_v60  ;;  %v13057_v8 = vpop.f32.mrb[44].mxu0 }
 0x429   : > { %v5185_v10 = vmax.f32 %v5009_v57, %v5077_v27  ;;  %v4295_v62 = vmax.f32 %v14490_v50, %v14497_v5  ;;  %v4296_v46 = vmax.f32 %v14491_v17, %v14498_v12  ;;  %v5011_v24 = vmax.f32 %v4835_v38, %v4902_v23  ;;  %14515 = vst [vmem:[#allocation34_spill] sm:$0xff] %v13057_v8  ;;  %v13063_v57 = vpop.f32.mrb[45].mxu0 }
 0x42a   : > { %v5186_v26 = vmax.f32 %v5010_v36, %v5079_v44  ;;  %v4389_v54 = vmax.f32 %v4341_v16, %v12225_v56  ;;  %v4390_v55 = vmax.f32 %v4342_v47, %v12260_v30  ;;  %v4436_v28 = vmax.f32 %v4388_v53, %v12262_v37  ;;  %14516 = vst [vmem:[#allocation33_spill] sm:$0xff] %v13063_v57  ;;  %v13067_v0 = vpop.f32.mrb[46].mxu0 }
 0x42b   : > { %v6499_v49 = vrot.slane %v5185_v10, 2  ;;  %v4297_v52 = vmax.f32 %v14492_v35, %v14501_v3  ;;  %v4343_v50 = vmax.f32 %v4295_v62, %v12215_v25  ;;  %v5187_v27 = vmax.f32 %v5011_v24, %v5078_v31  ;;  %14517 = vst [vmem:[#allocation58_spill] sm:$0xff] %v13067_v0  ;;  %v13069_v10 = vpop.f32.mrb[47].mxu0 }
 0x42c   : > { %v6500_v17 = vrot.slane %v5186_v26, 2  ;;  %v4437_v23 = vmax.f32 %v4389_v54, %v12272_v48  ;;  %v4438_v44 = vmax.f32 %v4390_v55, %v12307_v34  ;;  %v4552_v36 = vrot.slane %v4436_v28, 1  ;;  %14518 = vst [vmem:[#allocation82_spill] sm:$0xff] %v13069_v10 }
 0x42d   : > { %v4728_v38 = vrot.slane %v4436_v28, 2  ;;  %v4904_v16 = vrot.slane %v4436_v28, 3  ;;  %v5080_v47 = vrot.slane %v4436_v28, 4  ;;  %v6502_v53 = vrot.slane %v5187_v27, 2 }
 0x42e   : > { %v6501_v35 = vsel %vm1820_vm4, %v6499_v49, %v6500_v17  ;;  %v4553_v62 = vrot.slane %v4437_v23, 1  ;;  %v4555_v39 = vrot.slane %v4438_v44, 1  ;;  %v4729_v31 = vrot.slane %v4437_v23, 2 }
 0x42f   : > { %7720 = vmatprep.mubr.msk.f32.mxu1 %vm751_vm2, %v6501_v35  ;;  %v4731_v26 = vrot.slane %v4438_v44, 2  ;;  %v4905_v24 = vrot.slane %v4437_v23, 3  ;;  %v4907_v54 = vrot.slane %v4438_v44, 3  ;;  %v6503_v55 = vsel %vm1820_vm4, %v6500_v17, %v6502_v53 }
 0x430   : > { %v4554_v14 = vsel %vm1459_vm3, %v4552_v36, %v4553_v62  ;;  %v4556_v0 = vsel %vm1459_vm3, %v4553_v62, %v4555_v39  ;;  %v5081_v57 = vrot.slane %v4437_v23, 4  ;;  %7721 = vmatmul.mubr.msk.f32.gmra.mrb[2].mxu1 %vm751_vm2, %v6503_v55  ;;  %v4730_v27 = vsel %vm1820_vm4, %v4728_v38, %v4729_v31 }
 0x431   : > { %v4660_v10 = vmax.f32 %v4436_v28, %v4554_v14  ;;  %v4661_v49 = vmax.f32 %v4437_v23, %v4556_v0  ;;  %v4732_v8 = vsel %vm1820_vm4, %v4729_v31, %v4731_v26  ;;  %v4906_v35 = vsel %vm2181_vm5, %v4904_v16, %v4905_v24 }
 0x432   : > { %v4908_v60 = vsel %vm2181_vm5, %v4905_v24, %v4907_v54  ;;  %v5082_v11 = vsel %vm362_vm0, %v5080_v47, %v5081_v57  ;;  %v5083_v17 = vrot.slane %v4438_v44, 4  ;;  %v4662_v45 = vmax.f32 %v4438_v44, %v4555_v39 }
 0x433   : > { %v4836_v53 = vmax.f32 %v4660_v10, %v4730_v27  ;;  %v4837_v36 = vmax.f32 %v4661_v49, %v4732_v8  ;;  %v4344_v62 = vmax.f32 %v4296_v46, %v12225_v56  ;;  %v4345_v14 = vmax.f32 %v4297_v52, %v12260_v30 }
 0x434   : > { %v5084_v55 = vsel %vm362_vm0, %v5081_v57, %v5083_v17  ;;  %v4391_v28 = vmax.f32 %v4343_v50, %v12262_v37  ;;  %v4298_v23 = vmax.f32 %v14497_v5, %v12215_v25  ;;  %v4838_v16 = vmax.f32 %v4662_v45, %v4731_v26 }
 0x435   : > { %v5012_v0 = vmax.f32 %v4836_v53, %v4906_v35  ;;  %v5013_v38 = vmax.f32 %v4837_v36, %v4908_v60  ;;  %v4392_v47 = vmax.f32 %v4344_v62, %v12272_v48  ;;  %v4393_v10 = vmax.f32 %v4345_v14, %v12307_v34 }
 0x436   : > { %v4439_v39 = vmax.f32 %v4391_v28, %v12309_v13  ;;  %v4299_v46 = vmax.f32 %v14498_v12, %v12225_v56  ;;  %v4300_v8 = vmax.f32 %v14501_v3, %v12260_v30  ;;  %v5014_v57 = vmax.f32 %v4838_v16, %v4907_v54 }
 0x437   : > { %v5188_v52 = vmax.f32 %v5012_v0, %v5082_v11  ;;  %v5189_v50 = vmax.f32 %v5013_v38, %v5084_v55  ;;  %v4440_v25 = vmax.f32 %v4392_v47, %v12319_v63  ;;  %v4441_v5 = vmax.f32 %v4393_v10, %v12360_v43 }
 0x438   : > { %v4557_v45 = vrot.slane %v4439_v39, 1  ;;  %v4733_v60 = vrot.slane %v4439_v39, 2  ;;  %v4909_v44 = vrot.slane %v4439_v39, 3  ;;  %v5190_v24 = vmax.f32 %v5014_v57, %v5083_v17 }
 0x439   : > { %v6504_v31 = vrot.slane %v5188_v52, 2  ;;  %v6505_v26 = vrot.slane %v5189_v50, 2  ;;  %v4558_v49 = vrot.slane %v4440_v25, 1  ;;  %v4560_v27 = vrot.slane %v4441_v5, 1 }
 0x43a   : > { %v4734_v35 = vrot.slane %v4440_v25, 2  ;;  %v4736_v56 = vrot.slane %v4441_v5, 2  ;;  %v4910_v12 = vrot.slane %v4440_v25, 3  ;;  %v6507_v3 = vrot.slane %v5190_v24, 2 }
 0x43b   : > { %v6506_v30 = vsel %vm1820_vm4, %v6504_v31, %v6505_v26  ;;  %v4559_v11 = vsel %vm1459_vm3, %v4557_v45, %v4558_v49  ;;  %v4912_v54 = vrot.slane %v4441_v5, 3  ;;  %v4561_v53 = vsel %vm1459_vm3, %v4558_v49, %v4560_v27 }
 0x43c   : > { %7723 = vmatprep.mubr.msk.f32.mxu1 %vm751_vm2, %v6506_v30  ;;  %v4663_v36 = vmax.f32 %v4439_v39, %v4559_v11  ;;  %v4735_v62 = vsel %vm1820_vm4, %v4733_v60, %v4734_v35  ;;  %v4737_v17 = vsel %vm1820_vm4, %v4734_v35, %v4736_v56  ;;  %v6508_v55 = vsel %vm1820_vm4, %v6505_v26, %v6507_v3 }
 0x43d   : > { %v4664_v14 = vmax.f32 %v4440_v25, %v4561_v53  ;;  %v4911_v28 = vsel %vm2181_vm5, %v4909_v44, %v4910_v12  ;;  %v4913_v0 = vsel %vm2181_vm5, %v4910_v12, %v4912_v54  ;;  %7724 = vmatmul.mubr.msk.f32.gmra.mrb[4].mxu1 %vm751_vm2, %v6508_v55  ;;  %v5085_v16 = vrot.slane %v4439_v39, 4 }
 0x43e   : > { %v4839_v38 = vmax.f32 %v4663_v36, %v4735_v62  ;;  %v5086_v47 = vrot.slane %v4440_v25, 4  ;;  %v5088_v10 = vrot.slane %v4441_v5, 4  ;;  %v4665_v50 = vmax.f32 %v4441_v5, %v4560_v27 }
 0x43f   : > { %v4840_v52 = vmax.f32 %v4664_v14, %v4737_v17  ;;  %v4346_v57 = vmax.f32 %v4298_v23, %v12262_v37  ;;  %v4347_v45 = vmax.f32 %v4299_v46, %v12272_v48  ;;  %v4348_v44 = vmax.f32 %v4300_v8, %v12307_v34 }
 0x440   : > { %v5015_v60 = vmax.f32 %v4839_v38, %v4911_v28  ;;  %v5087_v31 = vsel %vm362_vm0, %v5085_v16, %v5086_v47  ;;  %v5089_v26 = vsel %vm362_vm0, %v5086_v47, %v5088_v10  ;;  %v4841_v49 = vmax.f32 %v4665_v50, %v4736_v56 }
 0x441   : > { %v5016_v24 = vmax.f32 %v4840_v52, %v4913_v0  ;;  %v4394_v35 = vmax.f32 %v4346_v57, %v12309_v13  ;;  %v4395_v39 = vmax.f32 %v4347_v45, %v12319_v63  ;;  %v4396_v5 = vmax.f32 %v4348_v44, %v12360_v43 }
 0x442   : > { %v5191_v25 = vmax.f32 %v5015_v60, %v5087_v31  ;;  %v4567_v37 = vrot.slane %v12616_v41, 1  ;;  %v4568_v48 = vrot.slane %v12622_v58, 1  ;;  %v5017_v46 = vmax.f32 %v4841_v49, %v4912_v54 }
 0x443   : > { %v5192_v23 = vmax.f32 %v5016_v24, %v5089_v26  ;;  %v4442_v27 = vmax.f32 %v4394_v35, %v12374_v1  ;;  %v4443_v12 = vmax.f32 %v4395_v39, %v12380_v7  ;;  %v4444_v8 = vmax.f32 %v4396_v5, %v12416_v42 }
 0x444   : > { %v6509_v34 = vrot.slane %v5191_v25, 2  ;;  %v4569_v13 = vsel %vm1459_vm3, %v4567_v37, %v4568_v48  ;;  %v4570_v63 = vrot.slane %v12718_v29, 1  ;;  %v5193_v30 = vmax.f32 %v5017_v46, %v5088_v10 }
 0x445   : > { %v6510_v56 = vrot.slane %v5192_v23, 2  ;;  %v4562_v43 = vrot.slane %v4442_v27, 1  ;;  %v4563_v3 = vrot.slane %v4443_v12, 1  ;;  %v4565_v11 = vrot.slane %v4444_v8, 1 }
 0x446   : > { %v4738_v53 = vrot.slane %v4442_v27, 2  ;;  %v4739_v36 = vrot.slane %v4443_v12, 2  ;;  %v4741_v62 = vrot.slane %v4444_v8, 2  ;;  %v6512_v1 = vrot.slane %v5193_v30, 2 }
 0x447   : > { %v6511_v54 = vsel %vm1820_vm4, %v6509_v34, %v6510_v56  ;;  %v4564_v7 = vsel %vm1459_vm3, %v4562_v43, %v4563_v3  ;;  %v4914_v17 = vrot.slane %v4442_v27, 3  ;;  %v4566_v42 = vsel %vm1459_vm3, %v4563_v3, %v4565_v11 }
 0x448   : > { %7726 = vmatprep.mubr.msk.f32.mxu1 %vm751_vm2, %v6511_v54  ;;  %v4666_v55 = vmax.f32 %v4442_v27, %v4564_v7  ;;  %v4740_v14 = vsel %vm1820_vm4, %v4738_v53, %v4739_v36  ;;  %v4742_v28 = vsel %vm1820_vm4, %v4739_v36, %v4741_v62  ;;  %v6513_v0 = vsel %vm1820_vm4, %v6510_v56, %v6512_v1 }
 0x449   : > { %v4667_v38 = vmax.f32 %v4443_v12, %v4566_v42  ;;  %v4915_v16 = vrot.slane %v4443_v12, 3  ;;  %v4917_v47 = vrot.slane %v4444_v8, 3  ;;  %7727 = vmatmul.mubr.msk.f32.gmra.mrb[6].mxu1 %vm751_vm2, %v6513_v0  ;;  %v5090_v52 = vrot.slane %v4442_v27, 4 }
 0x44a   : > { %v4842_v10 = vmax.f32 %v4666_v55, %v4740_v14  ;;  %v5091_v50 = vrot.slane %v4443_v12, 4  ;;  %v5093_v57 = vrot.slane %v4444_v8, 4  ;;  %v4668_v26 = vmax.f32 %v4444_v8, %v4565_v11 }
 0x44b   : > { %v4843_v45 = vmax.f32 %v4667_v38, %v4742_v28  ;;  %v4916_v60 = vsel %vm2181_vm5, %v4914_v17, %v4915_v16  ;;  %v4918_v31 = vsel %vm2181_vm5, %v4915_v16, %v4917_v47  ;;  %v4571_v35 = vsel %vm1459_vm3, %v4568_v48, %v4570_v63 }
 0x44c   : > { %v5018_v44 = vmax.f32 %v4842_v10, %v4916_v60  ;;  %v5092_v24 = vsel %vm362_vm0, %v5090_v52, %v5091_v50  ;;  %v5094_v49 = vsel %vm362_vm0, %v5091_v50, %v5093_v57  ;;  %v4844_v25 = vmax.f32 %v4668_v26, %v4741_v62 }
 0x44d   : > { %v5019_v39 = vmax.f32 %v4843_v45, %v4918_v31  ;;  %v4669_v5 = vmax.f32 %v12616_v41, %v4569_v13  ;;  %v4670_v37 = vmax.f32 %v12622_v58, %v4571_v35  ;;  %v4743_v46 = vrot.slane %v12616_v41, 2 }
 0x44e   : > { %v5194_v23 = vmax.f32 %v5018_v44, %v5092_v24  ;;  %v4744_v27 = vrot.slane %v12622_v58, 2  ;;  %v4746_v12 = vrot.slane %v12718_v29, 2  ;;  %v5020_v8 = vmax.f32 %v4844_v25, %v4917_v47 }
 0x44f   : > { %v5195_v34 = vmax.f32 %v5019_v39, %v5094_v49  ;;  %v4919_v56 = vrot.slane %v12616_v41, 3  ;;  %v4920_v30 = vrot.slane %v12622_v58, 3  ;;  %v4922_v3 = vrot.slane %v12718_v29, 3 }
 0x450   : > { %v6514_v48 = vrot.slane %v5194_v23, 2  ;;  %v4745_v43 = vsel %vm1820_vm4, %v4743_v46, %v4744_v27  ;;  %v4747_v13 = vsel %vm1820_vm4, %v4744_v27, %v4746_v12  ;;  %v5196_v53 = vmax.f32 %v5020_v8, %v5093_v57 }
 0x451   : > { %v6515_v11 = vrot.slane %v5195_v34, 2  ;;  %v4845_v36 = vmax.f32 %v4669_v5, %v4745_v43  ;;  %v4846_v62 = vmax.f32 %v4670_v37, %v4747_v13  ;;  %v4921_v54 = vsel %vm2181_vm5, %v4919_v56, %v4920_v30 }
 0x452   : > { %v4923_v1 = vsel %vm2181_vm5, %v4920_v30, %v4922_v3  ;;  %v5095_v7 = vrot.slane %v12616_v41, 4  ;;  %v5096_v17 = vrot.slane %v12622_v58, 4  ;;  %v6517_v55 = vrot.slane %v5196_v53, 2 }
 0x453   : > { %v6516_v42 = vsel %vm1820_vm4, %v6514_v48, %v6515_v11  ;;  %v5021_v14 = vmax.f32 %v4845_v36, %v4921_v54  ;;  %v5022_v28 = vmax.f32 %v4846_v62, %v4923_v1  ;;  %v5098_v38 = vrot.slane %v12718_v29, 4  ;;  %v8018_v36 = vld [vmem:[#allocation2 + $0x338] sm:$0x3f]  ;;  %v14519_v62 = vld [vmem:[#allocation4_spill] sm:$0xff] }
 0x454   : > { %7729 = vmatprep.mubr.msk.f32.mxu1 %vm751_vm2, %v6516_v42  ;;  %v5097_v0 = vsel %vm362_vm0, %v5095_v7, %v5096_v17  ;;  %v4671_v16 = vmax.f32 %v12718_v29, %v4570_v63  ;;  %v4572_v47 = vrot.slane %v12625_v9, 1  ;;  %v6518_v41 = vsel %vm1820_vm4, %v6515_v11, %v6517_v55  ;;  %v14520_v54 = vld [vmem:[#allocation38_spill] sm:$0xff] }
 0x455   : > { %v5197_v58 = vmax.f32 %v5021_v14, %v5097_v0  ;;  %v4573_v10 = vrot.slane %v12628_v22, 1  ;;  %v4575_v52 = vrot.slane %v12726_v51, 1  ;;  %7730 = vmatmul.mubr.msk.f32.gmra.mrb[8].mxu1 %vm751_vm2, %v6518_v41  ;;  %v5099_v50 = vsel %vm362_vm0, %v5096_v17, %v5098_v38  ;;  %v978_v55 = vld [vmem:[#allocation2 + $0x378] sm:$0x3f]  ;;  %v14522_v14 = vld [vmem:[#allocation71_spill] sm:$0xff] }
 0x456   : > { %v4847_v57 = vmax.f32 %v4671_v16, %v4746_v12  ;;  %v4748_v45 = vrot.slane %v12625_v9, 2  ;;  %v4749_v60 = vrot.slane %v12628_v22, 2  ;;  %v5198_v31 = vmax.f32 %v5022_v28, %v5099_v50  ;;  %v8019_v16 = vld [vmem:[#allocation2 + $0x358] sm:$0x3f] }
 0x457   : > { %v6519_v29 = vrot.slane %v5197_v58, 2  ;;  %v4574_v63 = vsel %vm1459_vm3, %v4572_v47, %v4573_v10  ;;  %v4576_v26 = vsel %vm1459_vm3, %v4573_v10, %v4575_v52  ;;  %v4751_v25 = vrot.slane %v12726_v51, 2 }
 0x458   : > { %v5023_v44 = vmax.f32 %v4847_v57, %v4922_v3  ;;  %v4672_v24 = vmax.f32 %v12625_v9, %v4574_v63  ;;  %v4673_v49 = vmax.f32 %v12628_v22, %v4576_v26  ;;  %v4750_v35 = vsel %vm1820_vm4, %v4748_v45, %v4749_v60 }
 0x459   : > { %v6520_v39 = vrot.slane %v5198_v31, 2  ;;  %v4924_v5 = vrot.slane %v12625_v9, 3  ;;  %v4925_v37 = vrot.slane %v12628_v22, 3  ;;  %v4927_v27 = vrot.slane %v12726_v51, 3 }
 0x45a   : > { %v5199_v23 = vmax.f32 %v5023_v44, %v5098_v38  ;;  %v4848_v46 = vmax.f32 %v4672_v24, %v4750_v35  ;;  %v5100_v12 = vrot.slane %v12625_v9, 4  ;;  %v4752_v8 = vsel %vm1820_vm4, %v4749_v60, %v4751_v25 }
 0x45b   : > { %v6521_v34 = vsel %vm1820_vm4, %v6519_v29, %v6520_v39  ;;  %v4926_v56 = vsel %vm2181_vm5, %v4924_v5, %v4925_v37  ;;  %v5101_v30 = vrot.slane %v12628_v22, 4  ;;  %v4849_v43 = vmax.f32 %v4673_v49, %v4752_v8 }
 0x45c   : > { %7732 = vmatprep.mubr.msk.f32.mxu1 %vm751_vm2, %v6521_v34  ;;  %v6522_v48 = vrot.slane %v5199_v23, 2  ;;  %v4928_v13 = vsel %vm2181_vm5, %v4925_v37, %v4927_v27  ;;  %v5024_v3 = vmax.f32 %v4848_v46, %v4926_v56  ;;  %v5103_v53 = vrot.slane %v12726_v51, 4 }
 0x45d   : > { %v5102_v11 = vsel %vm362_vm0, %v5100_v12, %v5101_v30  ;;  %v4674_v9 = vmax.f32 %v12726_v51, %v4575_v52  ;;  %v14521_v1 = vmax.f32 %v14519_v62, %v14520_v54  ;;  %v5025_v17 = vmax.f32 %v4849_v43, %v4928_v13  ;;  %v14523_v51 = vld [vmem:[#allocation48_spill] sm:$0xff]  ;;  %v14524_v52 = vld [vmem:[#allocation22_spill] sm:$0xff] }
 0x45e   : > { %v6523_v22 = vsel %vm1820_vm4, %v6520_v39, %v6522_v48  ;;  %v5200_v42 = vmax.f32 %v5024_v3, %v5102_v11  ;;  %v1621_v28 = vrot.slane %v14522_v14, 1  ;;  %v5104_v0 = vsel %vm362_vm0, %v5101_v30, %v5103_v53 }
 0x45f   : > { %v1170_v7 = vmax.f32 %v14521_v1, %v8018_v36  ;;  %7733 = vmatmul.mubr.msk.f32.gmra.mrb[10].mxu1 %vm751_vm2, %v6523_v22  ;;  %v4850_v38 = vmax.f32 %v4674_v9, %v4751_v25  ;;  %v1622_v41 = vrot.slane %v14523_v51, 1  ;;  %v5201_v58 = vmax.f32 %v5025_v17, %v5104_v0 }
 0x460   : > { %v6524_v10 = vrot.slane %v5200_v42, 2  ;;  %v1624_v50 = vrot.slane %v14524_v52, 1  ;;  %v1982_v57 = vrot.slane %v14522_v14, 2  ;;  %v1983_v29 = vrot.slane %v14523_v51, 2 }
 0x461   : > { %v1266_v47 = vmax.f32 %v1170_v7, %v8019_v16  ;;  %v5026_v45 = vmax.f32 %v4850_v38, %v4927_v27  ;;  %v1623_v31 = vsel %vm1459_vm3, %v1621_v28, %v1622_v41  ;;  %v6525_v63 = vrot.slane %v5201_v58, 2 }
 0x462   : > { %v1625_v26 = vsel %vm1459_vm3, %v1622_v41, %v1624_v50  ;;  %v1816_v44 = vmax.f32 %v14522_v14, %v1623_v31  ;;  %v1985_v24 = vrot.slane %v14524_v52, 2  ;;  %v1984_v25 = vsel %vm1820_vm4, %v1982_v57, %v1983_v29  ;;  %v14527_v31 = vld [vmem:[#allocation53_spill] sm:$0xff] }
 0x463   : > { %v1362_v60 = vmax.f32 %v1266_v47, %v978_v55  ;;  %v5202_v49 = vmax.f32 %v5026_v45, %v5103_v53  ;;  %v1817_v39 = vmax.f32 %v14523_v51, %v1625_v26  ;;  %v6526_v5 = vsel %vm1820_vm4, %v6524_v10, %v6525_v63 }
 0x464   : > { %v1986_v37 = vsel %vm1820_vm4, %v1983_v29, %v1985_v24  ;;  %v2177_v46 = vmax.f32 %v1816_v44, %v1984_v25  ;;  %7735 = vmatprep.mubr.msk.f32.mxu1 %vm751_vm2, %v6526_v5  ;;  %v2343_v48 = vrot.slane %v14522_v14, 3  ;;  %v2344_v43 = vrot.slane %v14523_v51, 3  ;;  %v14528_v29 = vld [vmem:[#allocation93_spill] sm:$0xff]  ;;  %v14530_v44 = vld [vmem:[#allocation74_spill] sm:$0xff] }
 0x465   : > { %v1626_v35 = vrot.slane %v1362_v60, 1  ;;  %v1987_v23 = vrot.slane %v1362_v60, 2  ;;  %v6527_v27 = vrot.slane %v5202_v49, 2  ;;  %v2178_v8 = vmax.f32 %v1817_v39, %v1986_v37 }
 0x466   : > { %v2346_v11 = vrot.slane %v14524_v52, 3  ;;  %v2348_v53 = vrot.slane %v1362_v60, 3  ;;  %v2345_v36 = vsel %vm2181_vm5, %v2343_v48, %v2344_v43  ;;  %v2703_v62 = vrot.slane %v14522_v14, 4 }
 0x467   : > { %v1627_v12 = vsel %vm1459_vm3, %v1624_v50, %v1626_v35  ;;  %v1819_v34 = vmax.f32 %v1362_v60, %v1626_v35  ;;  %v1988_v30 = vsel %vm1820_vm4, %v1985_v24, %v1987_v23  ;;  %v6528_v13 = vsel %vm1820_vm4, %v6525_v63, %v6527_v27  ;;  %v14531_v24 = vld [vmem:[#allocation72_spill] sm:$0xff] }
 0x468   : > { %v1818_v56 = vmax.f32 %v14524_v52, %v1627_v12  ;;  %7736 = vmatmul.mubr.msk.f32.gmra.mrb[12].mxu1 %vm751_vm2, %v6528_v13  ;;  %v2704_v54 = vrot.slane %v14523_v51, 4  ;;  %v2347_v1 = vsel %vm2181_vm5, %v2344_v43, %v2346_v11  ;;  %v2349_v7 = vsel %vm2181_vm5, %v2346_v11, %v2348_v53 }
 0x469   : > { %v2180_v3 = vmax.f32 %v1819_v34, %v1987_v23  ;;  %v2538_v22 = vmax.f32 %v2177_v46, %v2345_v36  ;;  %v2539_v42 = vmax.f32 %v2178_v8, %v2347_v1  ;;  %v2706_v0 = vrot.slane %v14524_v52, 4 }
 0x46a   : > { %v2179_v9 = vmax.f32 %v1818_v56, %v1988_v30  ;;  %v2705_v28 = vsel %vm362_vm0, %v2703_v62, %v2704_v54  ;;  %v2708_v38 = vrot.slane %v1362_v60, 4  ;;  %v14525_v58 = vmax.f32 %v12509_v21, %v12482_v4 }
 0x46b   : > { %v2541_v17 = vmax.f32 %v2180_v3, %v2348_v53  ;;  %v2898_v16 = vmax.f32 %v2538_v22, %v2705_v28  ;;  %v2707_v47 = vsel %vm362_vm0, %v2704_v54, %v2706_v0  ;;  %v14526_v57 = vmax.f32 %v12514_v40, %v12484_v61 }
 0x46c   : > { %v2540_v55 = vmax.f32 %v2179_v9, %v2349_v7  ;;  %v2709_v14 = vsel %vm362_vm0, %v2706_v0, %v2708_v38  ;;  %v2899_v41 = vmax.f32 %v2539_v42, %v2707_v47  ;;  %v14529_v52 = vmax.f32 %v14527_v31, %v14528_v29 }
 0x46d   : > { %v2901_v51 = vmax.f32 %v2541_v17, %v2708_v38  ;;  %v3218_v10 = vmax.f32 %v14525_v58, %v2898_v16  ;;  %v14532_v49 = vmax.f32 %v14530_v44, %v14531_v24  ;;  %v14533_v38 = vld [vmem:[#allocation16_spill] sm:$0xff]  ;;  %v14534_v16 = vld [vmem:[#allocation9_spill] sm:$0xff] }
 0x46e   : > { %v2900_v50 = vmax.f32 %v2540_v55, %v2709_v14  ;;  %v3219_v45 = vmax.f32 %v14526_v57, %v2899_v41  ;;  %v14535_v47 = vmax.f32 %v14533_v38, %v14534_v16  ;;  %v14536_v41 = vld [vmem:[#allocation55_spill] sm:$0xff]  ;;  %v14540_v57 = vld [vmem:[#allocation10_spill] sm:$0xff] }
 0x46f   : > { %v3221_v60 = vmax.f32 %v14529_v52, %v2901_v51  ;;  %v3377_v63 = vrot.slane %v3218_v10, 1  ;;  %v3597_v26 = vrot.slane %v3218_v10, 2  ;;  %v3875_v39 = vrot.slane %v3218_v10, 3  ;;  %v14537_v51 = vld [vmem:[#allocation76_spill] sm:$0xff] }
 0x470   : > { %v3220_v35 = vmax.f32 %v14532_v49, %v2900_v50  ;;  %v4135_v25 = vrot.slane %v3218_v10, 4  ;;  %v3378_v5 = vrot.slane %v3219_v45, 1  ;;  %v3598_v4 = vrot.slane %v3219_v45, 2  ;;  %v14539_v50 = vld [vmem:[#allocation90_spill] sm:$0xff] }
 0x471   : > { %v3876_v21 = vrot.slane %v3219_v45, 3  ;;  %v3880_v37 = vrot.slane %v3221_v60, 3  ;;  %v4136_v40 = vrot.slane %v3219_v45, 4  ;;  %v4140_v54 = vrot.slane %v3221_v60, 4 }
 0x472   : > { %v3380_v23 = vrot.slane %v3220_v35, 1  ;;  %v3600_v46 = vrot.slane %v3220_v35, 2  ;;  %v3878_v61 = vrot.slane %v3220_v35, 3  ;;  %v3379_v27 = vsel %vm1459_vm3, %v3377_v63, %v3378_v5 }
 0x473   : > { %v3599_v12 = vsel %vm1820_vm4, %v3597_v26, %v3598_v4  ;;  %v3877_v34 = vsel %vm2181_vm5, %v3875_v39, %v3876_v21  ;;  %v4138_v8 = vrot.slane %v3220_v35, 4  ;;  %v3499_v30 = vmax.f32 %v3218_v10, %v3379_v27 }
 0x474   : > { %v3381_v56 = vsel %vm1459_vm3, %v3378_v5, %v3380_v23  ;;  %v3501_v48 = vmax.f32 %v3220_v35, %v3380_v23  ;;  %v3601_v43 = vsel %vm1820_vm4, %v3598_v4, %v3600_v46  ;;  %v3879_v3 = vsel %vm2181_vm5, %v3876_v21, %v3878_v61 }
 0x475   : > { %v3500_v13 = vmax.f32 %v3219_v45, %v3381_v56  ;;  %v3881_v11 = vsel %vm2181_vm5, %v3878_v61, %v3880_v37  ;;  %v4137_v53 = vsel %vm362_vm0, %v4135_v25, %v4136_v40  ;;  %v3719_v9 = vmax.f32 %v3499_v30, %v3599_v12 }
 0x476   : > { %v3721_v36 = vmax.f32 %v3501_v48, %v3600_v46  ;;  %v4139_v62 = vsel %vm362_vm0, %v4136_v40, %v4138_v8  ;;  %v4141_v17 = vsel %vm362_vm0, %v4138_v8, %v4140_v54  ;;  %v14538_v58 = vmax.f32 %v14536_v41, %v14537_v51 }
 0x477   : > { %v3720_v1 = vmax.f32 %v3500_v13, %v3601_v43  ;;  %v3999_v7 = vmax.f32 %v3719_v9, %v3877_v34  ;;  %v14541_v45 = vmax.f32 %v14539_v50, %v14540_v57 }
 0x478   : > { %v4001_v22 = vmax.f32 %v3721_v36, %v3881_v11 }
 0x479   : > { %v4000_v42 = vmax.f32 %v3720_v1, %v3879_v3  ;;  %v4259_v55 = vmax.f32 %v3999_v7, %v4137_v53 }
 0x47a   : > { %v4261_v28 = vmax.f32 %v4001_v22, %v4141_v17  ;;  %v13268_v17 = vld [vmem:[%s13412_s4] ss:$0 sm:$0xff] }
 0x47b   : > { %v4260_v0 = vmax.f32 %v4000_v42, %v4139_v62  ;;  %v4451_v14 = vmax.f32 %v14535_v47, %v4259_v55 }
 0x47c   : > { %v4453_v10 = vmax.f32 %v14538_v58, %v4261_v28 }
 0x47d   : > { %v4452_v31 = vmax.f32 %v14541_v45, %v4260_v0  ;;  %v4577_v29 = vrot.slane %v4451_v14, 1  ;;  %v4753_v60 = vrot.slane %v4451_v14, 2  ;;  %v4929_v24 = vrot.slane %v4451_v14, 3 }
 0x47e   : > { %v4580_v52 = vrot.slane %v4453_v10, 1  ;;  %v4756_v63 = vrot.slane %v4453_v10, 2  ;;  %v4932_v35 = vrot.slane %v4453_v10, 3  ;;  %v5105_v39 = vrot.slane %v4451_v14, 4 }
 0x47f   : > { %v4578_v26 = vrot.slane %v4452_v31, 1  ;;  %v4754_v44 = vrot.slane %v4452_v31, 2  ;;  %v4930_v49 = vrot.slane %v4452_v31, 3  ;;  %v5106_v25 = vrot.slane %v4452_v31, 4 }
 0x480   : > { %v5108_v5 = vrot.slane %v4453_v10, 4  ;;  %v4677_v8 = vmax.f32 %v4453_v10, %v4580_v52 }
 0x481   : > { %v4579_v4 = vsel %vm1459_vm3, %v4577_v29, %v4578_v26  ;;  %v4581_v21 = vsel %vm1459_vm3, %v4578_v26, %v4580_v52  ;;  %v4755_v37 = vsel %vm1820_vm4, %v4753_v60, %v4754_v44  ;;  %v4757_v23 = vsel %vm1820_vm4, %v4754_v44, %v4756_v63 }
 0x482   : > { %v4675_v46 = vmax.f32 %v4451_v14, %v4579_v4  ;;  %v4676_v61 = vmax.f32 %v4452_v31, %v4581_v21  ;;  %v4931_v40 = vsel %vm2181_vm5, %v4929_v24, %v4930_v49  ;;  %v4933_v27 = vsel %vm2181_vm5, %v4930_v49, %v4932_v35 }
 0x483   : > { %v5107_v12 = vsel %vm362_vm0, %v5105_v39, %v5106_v25  ;;  %v5109_v34 = vsel %vm362_vm0, %v5106_v25, %v5108_v5  ;;  %v4853_v48 = vmax.f32 %v4677_v8, %v4756_v63 }
 0x484   : > { %v4851_v56 = vmax.f32 %v4675_v46, %v4755_v37  ;;  %v4852_v30 = vmax.f32 %v4676_v61, %v4757_v23 }
 0x485   : > { %v5029_v3 = vmax.f32 %v4853_v48, %v4932_v35 }
 0x486   : > { %v5027_v43 = vmax.f32 %v4851_v56, %v4931_v40  ;;  %v5028_v13 = vmax.f32 %v4852_v30, %v4933_v27 }
 0x487   : > { %v5205_v9 = vmax.f32 %v5029_v3, %v5108_v5 }
 0x488   : > { %v5203_v11 = vmax.f32 %v5027_v43, %v5107_v12  ;;  %v5204_v53 = vmax.f32 %v5028_v13, %v5109_v34 }
 0x489   : > { %v6532_v54 = vrot.slane %v5205_v9, 2 }
 0x48a   : > { %v6529_v36 = vrot.slane %v5203_v11, 2  ;;  %v6530_v62 = vrot.slane %v5204_v53, 2 }
 0x48c   : > { %v6531_v1 = vsel %vm1820_vm4, %v6529_v36, %v6530_v62  ;;  %v6533_v7 = vsel %vm1820_vm4, %v6530_v62, %v6532_v54  ;;  %v14542_v54 = vld [vmem:[#allocation32_spill] sm:$0xff] }
 0x48d   : > { %7738 = vmatprep.mubr.msk.f32.mxu1 %vm751_vm2, %v6531_v1 }
 0x48e   : > { %7739 = vmatmul.mubr.msk.f32.gmra.mrb[14].mxu1 %vm751_vm2, %v6533_v7 }
 0x496   : > { %v7695_v22 = vpop.f32.mrb[16].mxu1 }
 0x497   : > { %v7743_v42 = vadd.f32 %v7695_v22, %v13001_v2  ;;  %v6668_v55 = vpop.f32.mrb[17].mxu1 }
 0x498   : > { %v7744_v28 = vadd.f32 %v6668_v55, %v13006_v19 }
 0x499   : > { %v6867_v0 = vadd.f32 %v7743_v42, %v13268_v17 }
 0x49a   : > { %v6866_v38 = vadd.f32 %v7744_v28, %v13268_v17 }
 0x49b   : > { %v6899_v16 = vmul.f32 0.5, %v6867_v0 }
 0x49c   : > { %v6898_v47 = vmul.f32 0.5, %v6866_v38 }
 0x49d   : > { %7912 = vtanh.f32 %v6899_v16 }
 0x49e   : > { %7914 = vtanh.f32 %v6898_v47 }
 0x4a1   : > { %v7698_v14 = vpop.f32.mrb[18].mxu1 }
 0x4a2   : > { %v7745_v41 = vadd.f32 %v7698_v14, %v13008_v6  ;;  %v6678_v51 = vpop.f32.mrb[19].mxu1 }
 0x4a3   : > { %v7746_v58 = vadd.f32 %v6678_v51, %v13012_v33 }
 0x4a4   : > { %v6869_v2 = vadd.f32 %v7745_v41, %v13268_v17 }
 0x4a5   : > { %v6868_v10 = vadd.f32 %v7746_v58, %v13268_v17  ;;  %v14543_v58 = vld [vmem:[#allocation67_spill] sm:$0xff] }
 0x4a6   : > { %v6901_v19 = vmul.f32 0.5, %v6869_v2 }
 0x4a7   : > { %v7913_v50 = vpop.eup %7912  ;;  %v6900_v57 = vmul.f32 0.5, %v6868_v10 }
 0x4a8   : > { %v7915_v45 = vpop.eup %7914  ;;  %v6963_v31 = vadd.f32 1.0, %v7913_v50  ;;  %7916 = vtanh.f32 %v6901_v19  ;;  %v14544_v19 = vld [vmem:[#allocation31_spill] sm:$0xff] }
 0x4a9   : > { %v6962_v29 = vadd.f32 1.0, %v7915_v45  ;;  %7918 = vtanh.f32 %v6900_v57 }
 0x4aa   : > { %v6995_v52 = vmul.f32 0.5, %v6963_v31 }
 0x4ab   : > { %v6994_v6 = vmul.f32 0.5, %v6962_v29 }
 0x4ac   : > { %v7027_v33 = vmul.f32 %v6995_v52, %v6867_v0 }
 0x4ad   : > { %v7026_v60 = vmul.f32 %v6994_v6, %v6866_v38  ;;  %v7701_v63 = vpop.f32.mrb[20].mxu1 }
 0x4ae   : > { %7060 = vst.msk [vmem:[%s13283_s26 + $0x8] sm:$0xff] %vm7058_vm8, %v7027_v33  ;;  %v7747_v26 = vadd.f32 %v7701_v63, %v13016_v20  ;;  %v6688_v44 = vpop.f32.mrb[21].mxu1 }
 0x4af   : > { %7059 = vst.msk [vmem:[%s13283_s26] sm:$0xff] %vm7058_vm8, %v7026_v60  ;;  %v7748_v24 = vadd.f32 %v6688_v44, %v13021_v15 }
 0x4b0   : > { %v6871_v49 = vadd.f32 %v7747_v26, %v13268_v17 }
 0x4b1   : > { %v6870_v35 = vadd.f32 %v7748_v24, %v13268_v17 }
 0x4b2   : > { %v7917_v39 = vpop.eup %7916  ;;  %v6903_v25 = vmul.f32 0.5, %v6871_v49 }
 0x4b3   : > { %v7919_v5 = vpop.eup %7918  ;;  %v6965_v4 = vadd.f32 1.0, %v7917_v39  ;;  %v6902_v21 = vmul.f32 0.5, %v6870_v35 }
 0x4b4   : > { %v6964_v37 = vadd.f32 1.0, %v7919_v5  ;;  %7920 = vtanh.f32 %v6903_v25  ;;  %v14546_v5 = vld [vmem:[#allocation33_spill] sm:$0xff] }
 0x4b5   : > { %v6997_v23 = vmul.f32 0.5, %v6965_v4  ;;  %7922 = vtanh.f32 %v6902_v21 }
 0x4b6   : > { %v6996_v20 = vmul.f32 0.5, %v6964_v37 }
 0x4b7   : > { %v7029_v46 = vmul.f32 %v6997_v23, %v6869_v2 }
 0x4b8   : > { %v7028_v61 = vmul.f32 %v6996_v20, %v6868_v10 }
 0x4b9   : > { %7062 = vst.msk [vmem:[%s13283_s26 + $0x18] sm:$0xff] %vm7058_vm8, %v7029_v46 }
 0x4ba   : > { %7061 = vst.msk [vmem:[%s13283_s26 + $0x10] sm:$0xff] %vm7058_vm8, %v7028_v61  ;;  %v7704_v15 = vpop.f32.mrb[22].mxu1 }
 0x4bb   : > { %v7749_v40 = vadd.f32 %v7704_v15, %v13027_v59  ;;  %v6698_v27 = vpop.f32.mrb[23].mxu1 }
 0x4bc   : > { %v7750_v12 = vadd.f32 %v6698_v27, %v13031_v18 }
 0x4bd   : > { %v6873_v34 = vadd.f32 %v7749_v40, %v13268_v17 }
 0x4be   : > { %v7921_v8 = vpop.eup %7920  ;;  %v6872_v56 = vadd.f32 %v7750_v12, %v13268_v17 }
 0x4bf   : > { %v7923_v30 = vpop.eup %7922  ;;  %v6967_v48 = vadd.f32 1.0, %v7921_v8  ;;  %v6905_v43 = vmul.f32 0.5, %v6873_v34 }
 0x4c0   : > { %v6966_v13 = vadd.f32 1.0, %v7923_v30  ;;  %v6904_v3 = vmul.f32 0.5, %v6872_v56  ;;  %v14547_v30 = vld [vmem:[#allocation58_spill] sm:$0xff] }
 0x4c1   : > { %v6999_v11 = vmul.f32 0.5, %v6967_v48  ;;  %7924 = vtanh.f32 %v6905_v43 }
 0x4c2   : > { %v6998_v53 = vmul.f32 0.5, %v6966_v13  ;;  %7926 = vtanh.f32 %v6904_v3  ;;  %v14548_v13 = vld [vmem:[#allocation82_spill] sm:$0xff] }
 0x4c3   : > { %v7031_v59 = vmul.f32 %v6999_v11, %v6871_v49 }
 0x4c4   : > { %v7030_v9 = vmul.f32 %v6998_v53, %v6870_v35  ;;  %v14545_v35 = vld [vmem:[#allocation34_spill] sm:$0xff] }
 0x4c5   : > { %7064 = vst.msk [vmem:[%s13283_s26 + $0x28] sm:$0xff] %vm7058_vm8, %v7031_v59 }
 0x4c6   : > { %7063 = vst.msk [vmem:[%s13283_s26 + $0x20] sm:$0xff] %vm7058_vm8, %v7030_v9  ;;  %v7707_v18 = vpop.f32.mrb[24].mxu1 }
 0x4c7   : > { %v7751_v36 = vadd.f32 %v7707_v18, %v13037_v32  ;;  %v6708_v62 = vpop.f32.mrb[25].mxu1 }
 0x4c8   : > { %v7752_v1 = vadd.f32 %v6708_v62, %v14542_v54 }
 0x4c9   : > { %v6875_v7 = vadd.f32 %v7751_v36, %v13268_v17 }
 0x4ca   : > { %v6874_v22 = vadd.f32 %v7752_v1, %v13268_v17 }
 0x4cb   : > { %v7925_v42 = vpop.eup %7924  ;;  %v6907_v55 = vmul.f32 0.5, %v6875_v7 }
 0x4cc   : > { %v7927_v28 = vpop.eup %7926  ;;  %v6969_v0 = vadd.f32 1.0, %v7925_v42  ;;  %v6906_v38 = vmul.f32 0.5, %v6874_v22 }
 0x4cd   : > { %v6968_v16 = vadd.f32 1.0, %v7927_v28  ;;  %7928 = vtanh.f32 %v6907_v55  ;;  %v14549_v28 = vld [vmem:[#allocation94_spill] sm:$0xff] }
 0x4ce   : > { %v7001_v47 = vmul.f32 0.5, %v6969_v0  ;;  %7930 = vtanh.f32 %v6906_v38 }
 0x4cf   : > { %v7000_v14 = vmul.f32 0.5, %v6968_v16  ;;  %v14550_v16 = vld [vmem:[#allocation18_spill] sm:$0xff] }
 0x4d0   : > { %v7033_v32 = vmul.f32 %v7001_v47, %v6873_v34 }
 0x4d1   : > { %v7032_v41 = vmul.f32 %v7000_v14, %v6872_v56 }
 0x4d2   : > { %7066 = vst.msk [vmem:[%s13283_s26 + $0x38] sm:$0xff] %vm7058_vm8, %v7033_v32 }
 0x4d3   : > { %v7710_v51 = vpop.f32.mrb[26].mxu1  ;;  %7065 = vst.msk [vmem:[%s13283_s26 + $0x30] sm:$0xff] %vm7058_vm8, %v7032_v41 }
 0x4d4   : > { %v7753_v2 = vadd.f32 %v7710_v51, %v14543_v58  ;;  %v6718_v10 = vpop.f32.mrb[27].mxu1 }
 0x4d5   : > { %v7754_v50 = vadd.f32 %v6718_v10, %v14544_v19 }
 0x4d6   : > { %v6877_v57 = vadd.f32 %v7753_v2, %v13268_v17 }
 0x4d7   : > { %v6876_v45 = vadd.f32 %v7754_v50, %v13268_v17  ;;  %v7929_v31 = vpop.eup %7928 }
 0x4d8   : > { %v6909_v29 = vmul.f32 0.5, %v6877_v57  ;;  %v7931_v52 = vpop.eup %7930  ;;  %v6971_v6 = vadd.f32 1.0, %v7929_v31 }
 0x4d9   : > { %v6908_v33 = vmul.f32 0.5, %v6876_v45  ;;  %v6970_v60 = vadd.f32 1.0, %v7931_v52  ;;  %v14551_v52 = vld [vmem:[#allocation64_spill] sm:$0xff] }
 0x4da   : > { %7932 = vtanh.f32 %v6909_v29  ;;  %v7003_v63 = vmul.f32 0.5, %v6971_v6 }
 0x4db   : > { %7934 = vtanh.f32 %v6908_v33  ;;  %v7002_v26 = vmul.f32 0.5, %v6970_v60  ;;  %v14552_v60 = vld [vmem:[#allocation40_spill] sm:$0xff] }
 0x4dc   : > { %v7035_v44 = vmul.f32 %v7003_v63, %v6875_v7 }
 0x4dd   : > { %v7034_v24 = vmul.f32 %v7002_v26, %v6874_v22 }
 0x4de   : > { %7068 = vst.msk [vmem:[%s13283_s26 + $0x48] sm:$0xff] %vm7058_vm8, %v7035_v44 }
 0x4df   : > { %7067 = vst.msk [vmem:[%s13283_s26 + $0x40] sm:$0xff] %vm7058_vm8, %v7034_v24  ;;  %v7713_v49 = vpop.f32.mrb[28].mxu1 }
 0x4e0   : > { %v7755_v39 = vadd.f32 %v7713_v49, %v14545_v35  ;;  %v6728_v25 = vpop.f32.mrb[29].mxu1 }
 0x4e1   : > { %v7756_v4 = vadd.f32 %v6728_v25, %v14546_v5 }
 0x4e2   : > { %v6879_v21 = vadd.f32 %v7755_v39, %v13268_v17 }
 0x4e3   : > { %v6878_v23 = vadd.f32 %v7756_v4, %v13268_v17 }
 0x4e4   : > { %v7933_v37 = vpop.eup %7932  ;;  %v6911_v61 = vmul.f32 0.5, %v6879_v21 }
 0x4e5   : > { %v7935_v20 = vpop.eup %7934  ;;  %v6973_v46 = vadd.f32 1.0, %v7933_v37  ;;  %v6910_v40 = vmul.f32 0.5, %v6878_v23 }
 0x4e6   : > { %v6972_v15 = vadd.f32 1.0, %v7935_v20  ;;  %7936 = vtanh.f32 %v6911_v61 }
 0x4e7   : > { %v7005_v27 = vmul.f32 0.5, %v6973_v46  ;;  %7938 = vtanh.f32 %v6910_v40  ;;  %v14553_v46 = vld [vmem:[#allocation17_spill] sm:$0xff] }
 0x4e8   : > { %v7004_v12 = vmul.f32 0.5, %v6972_v15  ;;  %v14554_v40 = vld [vmem:[#allocation65_spill] sm:$0xff] }
 0x4e9   : > { %v7037_v34 = vmul.f32 %v7005_v27, %v6877_v57 }
 0x4ea   : > { %v7036_v8 = vmul.f32 %v7004_v12, %v6876_v45 }
 0x4eb   : > { %7070 = vst.msk [vmem:[%s13283_s26 + $0x58] sm:$0xff] %vm7058_vm8, %v7037_v34  ;;  %v7716_v56 = vpop.f32.mrb[30].mxu1 }
 0x4ec   : > { %7069 = vst.msk [vmem:[%s13283_s26 + $0x50] sm:$0xff] %vm7058_vm8, %v7036_v8  ;;  %v7757_v48 = vadd.f32 %v7716_v56, %v14547_v30  ;;  %v6738_v43 = vpop.f32.mrb[31].mxu1 }
 0x4ed   : > { %v7758_v3 = vadd.f32 %v6738_v43, %v14548_v13 }
 0x4ee   : > { %v6881_v11 = vadd.f32 %v7757_v48, %v13268_v17 }
 0x4ef   : > { %v6880_v53 = vadd.f32 %v7758_v3, %v13268_v17 }
 0x4f0   : > { %v7937_v59 = vpop.eup %7936  ;;  %v6913_v9 = vmul.f32 0.5, %v6881_v11 }
 0x4f1   : > { %v7939_v18 = vpop.eup %7938  ;;  %v6975_v36 = vadd.f32 1.0, %v7937_v59  ;;  %v6912_v62 = vmul.f32 0.5, %v6880_v53 }
 0x4f2   : > { %v6974_v54 = vadd.f32 1.0, %v7939_v18  ;;  %7940 = vtanh.f32 %v6913_v9  ;;  %v14555_v18 = vld [vmem:[#allocation21_spill] sm:$0xff] }
 0x4f3   : > { %v7007_v1 = vmul.f32 0.5, %v6975_v36  ;;  %7942 = vtanh.f32 %v6912_v62 }
 0x4f4   : > { %v7006_v7 = vmul.f32 0.5, %v6974_v54  ;;  %v14556_v54 = vld [vmem:[#allocation79_spill] sm:$0xff] }
 0x4f5   : > { %v7039_v22 = vmul.f32 %v7007_v1, %v6879_v21 }
 0x4f6   : > { %v7038_v42 = vmul.f32 %v7006_v7, %v6878_v23 }
 0x4f7   : > { %7072 = vst.msk [vmem:[%s13283_s26 + $0x68] sm:$0xff] %vm7058_vm8, %v7039_v22 }
 0x4f8   : > { %v7719_v55 = vpop.f32.mrb[0].mxu1  ;;  %7071 = vst.msk [vmem:[%s13283_s26 + $0x60] sm:$0xff] %vm7058_vm8, %v7038_v42 }
 0x4f9   : > { %v7759_v0 = vadd.f32 %v7719_v55, %v14549_v28  ;;  %v6748_v38 = vpop.f32.mrb[1].mxu1 }
 0x4fa   : > { %v7760_v47 = vadd.f32 %v6748_v38, %v14550_v16 }
 0x4fb   : > { %v6883_v14 = vadd.f32 %v7759_v0, %v13268_v17 }
 0x4fc   : > { %v6882_v32 = vadd.f32 %v7760_v47, %v13268_v17  ;;  %v7941_v41 = vpop.eup %7940 }
 0x4fd   : > { %v6915_v51 = vmul.f32 0.5, %v6883_v14  ;;  %v7943_v58 = vpop.eup %7942  ;;  %v6977_v2 = vadd.f32 1.0, %v7941_v41 }
 0x4fe   : > { %v6914_v10 = vmul.f32 0.5, %v6882_v32  ;;  %v6976_v19 = vadd.f32 1.0, %v7943_v58  ;;  %v14557_v58 = vld [vmem:[#allocation19_spill] sm:$0xff] }
 0x4ff   : > { %7944 = vtanh.f32 %v6915_v51  ;;  %v7009_v50 = vmul.f32 0.5, %v6977_v2 }
 0x500   : > { %7946 = vtanh.f32 %v6914_v10  ;;  %v7008_v57 = vmul.f32 0.5, %v6976_v19  ;;  %v14558_v19 = vld [vmem:[#allocation28_spill] sm:$0xff] }
 0x501   : > { %v7041_v45 = vmul.f32 %v7009_v50, %v6881_v11 }
 0x502   : > { %v7040_v31 = vmul.f32 %v7008_v57, %v6880_v53 }
 0x503   : > { %7074 = vst.msk [vmem:[%s13283_s26 + $0x78] sm:$0xff] %vm7058_vm8, %v7041_v45  ;;  %v7722_v29 = vpop.f32.mrb[2].mxu1 }
 0x504   : > { %7073 = vst.msk [vmem:[%s13283_s26 + $0x70] sm:$0xff] %vm7058_vm8, %v7040_v31  ;;  %v7761_v6 = vadd.f32 %v7722_v29, %v14551_v52  ;;  %v6758_v33 = vpop.f32.mrb[3].mxu1 }
 0x505   : > { %v7762_v63 = vadd.f32 %v6758_v33, %v14552_v60 }
 0x506   : > { %v6885_v26 = vadd.f32 %v7761_v6, %v13268_v17 }
 0x507   : > { %v6884_v44 = vadd.f32 %v7762_v63, %v13268_v17 }
 0x508   : > { %v6917_v49 = vmul.f32 0.5, %v6885_v26 }
 0x509   : > { %v7945_v24 = vpop.eup %7944  ;;  %v6916_v25 = vmul.f32 0.5, %v6884_v44 }
 0x50a   : > { %v7947_v35 = vpop.eup %7946  ;;  %v6979_v39 = vadd.f32 1.0, %v7945_v24  ;;  %7948 = vtanh.f32 %v6917_v49  ;;  %v14559_v49 = vld [vmem:[#allocation26_spill] sm:$0xff] }
 0x50b   : > { %v6978_v5 = vadd.f32 1.0, %v7947_v35  ;;  %7950 = vtanh.f32 %v6916_v25 }
 0x50c   : > { %v7011_v4 = vmul.f32 0.5, %v6979_v39 }
 0x50d   : > { %v7010_v21 = vmul.f32 0.5, %v6978_v5  ;;  %v14560_v5 = vld [vmem:[#allocation52_spill] sm:$0xff] }
 0x50e   : > { %v7043_v37 = vmul.f32 %v7011_v4, %v6883_v14 }
 0x50f   : > { %v7042_v23 = vmul.f32 %v7010_v21, %v6882_v32 }
 0x510   : > { %7076 = vst.msk [vmem:[%s13283_s26 + $0x88] sm:$0xff] %vm7058_vm8, %v7043_v37  ;;  %v7725_v20 = vpop.f32.mrb[4].mxu1 }
 0x511   : > { %7075 = vst.msk [vmem:[%s13283_s26 + $0x80] sm:$0xff] %vm7058_vm8, %v7042_v23  ;;  %v7763_v61 = vadd.f32 %v7725_v20, %v14553_v46  ;;  %v6768_v15 = vpop.f32.mrb[5].mxu1 }
 0x512   : > { %v7764_v27 = vadd.f32 %v6768_v15, %v14554_v40 }
 0x513   : > { %v6887_v12 = vadd.f32 %v7763_v61, %v13268_v17 }
 0x514   : > { %v7949_v34 = vpop.eup %7948  ;;  %v6886_v8 = vadd.f32 %v7764_v27, %v13268_v17 }
 0x515   : > { %v7951_v56 = vpop.eup %7950  ;;  %v6981_v30 = vadd.f32 1.0, %v7949_v34  ;;  %v6919_v48 = vmul.f32 0.5, %v6887_v12 }
 0x516   : > { %v6980_v43 = vadd.f32 1.0, %v7951_v56  ;;  %v6918_v13 = vmul.f32 0.5, %v6886_v8 }
 0x517   : > { %v7013_v3 = vmul.f32 0.5, %v6981_v30  ;;  %7952 = vtanh.f32 %v6919_v48  ;;  %v14562_v30 = vld [vmem:[#allocation30_spill] sm:$0xff] }
 0x518   : > { %v7012_v11 = vmul.f32 0.5, %v6980_v43  ;;  %7954 = vtanh.f32 %v6918_v13 }
 0x519   : > { %v7045_v53 = vmul.f32 %v7013_v3, %v6885_v26 }
 0x51a   : > { %v7044_v59 = vmul.f32 %v7012_v11, %v6884_v44 }
 0x51b   : > { %7078 = vst.msk [vmem:[%s13283_s26 + $0x98] sm:$0xff] %vm7058_vm8, %v7045_v53 }
 0x51c   : > { %7077 = vst.msk [vmem:[%s13283_s26 + $0x90] sm:$0xff] %vm7058_vm8, %v7044_v59  ;;  %v7728_v9 = vpop.f32.mrb[6].mxu1 }
 0x51d   : > { %v7765_v36 = vadd.f32 %v7728_v9, %v14555_v18  ;;  %v6778_v62 = vpop.f32.mrb[7].mxu1 }
 0x51e   : > { %v7766_v1 = vadd.f32 %v6778_v62, %v14556_v54 }
 0x51f   : > { %v6889_v7 = vadd.f32 %v7765_v36, %v13268_v17 }
 0x520   : > { %v6888_v22 = vadd.f32 %v7766_v1, %v13268_v17 }
 0x521   : > { %v7953_v42 = vpop.eup %7952  ;;  %v6921_v55 = vmul.f32 0.5, %v6889_v7 }
 0x522   : > { %v7955_v28 = vpop.eup %7954  ;;  %v6983_v0 = vadd.f32 1.0, %v7953_v42  ;;  %v6920_v38 = vmul.f32 0.5, %v6888_v22 }
 0x523   : > { %v6982_v16 = vadd.f32 1.0, %v7955_v28  ;;  %7956 = vtanh.f32 %v6921_v55 }
 0x524   : > { %v7015_v47 = vmul.f32 0.5, %v6983_v0  ;;  %7958 = vtanh.f32 %v6920_v38 }
 0x525   : > { %v7014_v14 = vmul.f32 0.5, %v6982_v16 }
 0x526   : > { %v7047_v32 = vmul.f32 %v7015_v47, %v6887_v12  ;;  %v14561_v12 = vld [vmem:[#allocation11_spill] sm:$0xff] }
 0x527   : > { %v7046_v41 = vmul.f32 %v7014_v14, %v6886_v8 }
 0x528   : > { %7080 = vst.msk [vmem:[%s13283_s26 + $0xa8] sm:$0xff] %vm7058_vm8, %v7047_v32  ;;  %v7731_v51 = vpop.f32.mrb[8].mxu1 }
 0x529   : > { %7079 = vst.msk [vmem:[%s13283_s26 + $0xa0] sm:$0xff] %vm7058_vm8, %v7046_v41  ;;  %v7767_v2 = vadd.f32 %v7731_v51, %v14557_v58  ;;  %v6788_v10 = vpop.f32.mrb[9].mxu1  ;;  %v14563_v51 = vld [vmem:[#allocation39_spill] sm:$0xff] }
 0x52a   : > { %v7768_v50 = vadd.f32 %v6788_v10, %v14558_v19  ;;  %v14564_v10 = vld [vmem:[#allocation29_spill] sm:$0xff] }
 0x52b   : > { %v6891_v57 = vadd.f32 %v7767_v2, %v13268_v17 }
 0x52c   : > { %v6890_v45 = vadd.f32 %v7768_v50, %v13268_v17 }
 0x52d   : > { %v7957_v31 = vpop.eup %7956  ;;  %v6923_v29 = vmul.f32 0.5, %v6891_v57 }
 0x52e   : > { %v7959_v52 = vpop.eup %7958  ;;  %v6985_v6 = vadd.f32 1.0, %v7957_v31  ;;  %v6922_v33 = vmul.f32 0.5, %v6890_v45 }
 0x52f   : > { %v6984_v60 = vadd.f32 1.0, %v7959_v52  ;;  %7960 = vtanh.f32 %v6923_v29 }
 0x530   : > { %v7017_v63 = vmul.f32 0.5, %v6985_v6  ;;  %7962 = vtanh.f32 %v6922_v33 }
 0x531   : > { %v7016_v26 = vmul.f32 0.5, %v6984_v60 }
 0x532   : > { %v7734_v44 = vpop.f32.mrb[10].mxu1  ;;  %v7049_v24 = vmul.f32 %v7017_v63, %v6889_v7 }
 0x533   : > { %v7769_v35 = vadd.f32 %v7734_v44, %v14559_v49  ;;  %v6798_v39 = vpop.f32.mrb[11].mxu1  ;;  %v7048_v25 = vmul.f32 %v7016_v26, %v6888_v22 }
 0x534   : > { %v7770_v4 = vadd.f32 %v6798_v39, %v14560_v5  ;;  %7082 = vst.msk [vmem:[%s13283_s26 + $0xb8] sm:$0xff] %vm7058_vm8, %v7049_v24 }
 0x535   : > { %v6893_v21 = vadd.f32 %v7769_v35, %v13268_v17  ;;  %7081 = vst.msk [vmem:[%s13283_s26 + $0xb0] sm:$0xff] %vm7058_vm8, %v7048_v25 }
 0x536   : > { %v6892_v37 = vadd.f32 %v7770_v4, %v13268_v17 }
 0x537   : > { %v6925_v23 = vmul.f32 0.5, %v6893_v21 }
 0x538   : > { %v6924_v20 = vmul.f32 0.5, %v6892_v37 }
 0x539   : > { %7964 = vtanh.f32 %v6925_v23  ;;  %v7961_v46 = vpop.eup %7960 }
 0x53a   : > { %7966 = vtanh.f32 %v6924_v20  ;;  %v7963_v61 = vpop.eup %7962  ;;  %v6987_v15 = vadd.f32 1.0, %v7961_v46 }
 0x53b   : > { %v7737_v40 = vpop.f32.mrb[12].mxu1  ;;  %v6986_v27 = vadd.f32 1.0, %v7963_v61 }
 0x53c   : > { %v7771_v34 = vadd.f32 %v7737_v40, %v14561_v12  ;;  %v6808_v8 = vpop.f32.mrb[13].mxu1  ;;  %v7019_v56 = vmul.f32 0.5, %v6987_v15 }
 0x53d   : > { %v7772_v48 = vadd.f32 %v6808_v8, %v14562_v30  ;;  %v7018_v43 = vmul.f32 0.5, %v6986_v27 }
 0x53e   : > { %v6895_v13 = vadd.f32 %v7771_v34, %v13268_v17  ;;  %v7051_v3 = vmul.f32 %v7019_v56, %v6891_v57 }
 0x53f   : > { %v6894_v11 = vadd.f32 %v7772_v48, %v13268_v17  ;;  %v7050_v53 = vmul.f32 %v7018_v43, %v6890_v45 }
 0x540   : > { %v6927_v59 = vmul.f32 0.5, %v6895_v13  ;;  %7084 = vst.msk [vmem:[%s13283_s26 + $0xc8] sm:$0xff] %vm7058_vm8, %v7051_v3 }
 0x541   : > { %v6926_v9 = vmul.f32 0.5, %v6894_v11  ;;  %7083 = vst.msk [vmem:[%s13283_s26 + $0xc0] sm:$0xff] %vm7058_vm8, %v7050_v53 }
 0x542   : > { %7968 = vtanh.f32 %v6927_v59 }
 0x543   : > { %v7965_v18 = vpop.eup %7964  ;;  %7970 = vtanh.f32 %v6926_v9 }
 0x544   : > { %v7967_v36 = vpop.eup %7966  ;;  %v6989_v62 = vadd.f32 1.0, %v7965_v18 }
 0x545   : > { %v6988_v54 = vadd.f32 1.0, %v7967_v36 }
 0x546   : > { %v7021_v1 = vmul.f32 0.5, %v6989_v62 }
 0x547   : > { %v7020_v7 = vmul.f32 0.5, %v6988_v54 }
 0x548   : > { %v7053_v22 = vmul.f32 %v7021_v1, %v6893_v21 }
 0x549   : > { %v7052_v42 = vmul.f32 %v7020_v7, %v6892_v37 }
 0x54a   : > { %7086 = vst.msk [vmem:[%s13283_s26 + $0xd8] sm:$0xff] %vm7058_vm8, %v7053_v22 }
 0x54b   : > { %7085 = vst.msk [vmem:[%s13283_s26 + $0xd0] sm:$0xff] %vm7058_vm8, %v7052_v42 }
 0x54c   : > { %v7969_v55 = vpop.eup %7968 }
 0x54d   : > { %v7971_v28 = vpop.eup %7970  ;;  %v6991_v0 = vadd.f32 1.0, %v7969_v55 }
 0x54e   : > { %v6990_v38 = vadd.f32 1.0, %v7971_v28 }
 0x54f   : > { %v7023_v16 = vmul.f32 0.5, %v6991_v0 }
 0x550   : > { %v7022_v47 = vmul.f32 0.5, %v6990_v38 }
 0x551   : > { %v7055_v14 = vmul.f32 %v7023_v16, %v6895_v13 }
 0x552   : > { %v7054_v32 = vmul.f32 %v7022_v47, %v6894_v11 }
 0x553   : > { %7088 = vst.msk [vmem:[%s13283_s26 + $0xe8] sm:$0xff] %vm7058_vm8, %v7055_v14 }
 0x554   : > { %7087 = vst.msk [vmem:[%s13283_s26 + $0xe0] sm:$0xff] %vm7058_vm8, %v7054_v32 }
 0x561   : > { %v7740_v41 = vpop.f32.mrb[14].mxu1 }
 0x562   : > { %v7773_v58 = vadd.f32 %v7740_v41, %v14563_v51  ;;  %v6818_v2 = vpop.f32.mrb[15].mxu1 }
 0x563   : > { %v7774_v19 = vadd.f32 %v6818_v2, %v14564_v10 }
 0x564   : > { %v6897_v50 = vadd.f32 %v7773_v58, %v13268_v17 }
 0x565   : > { %v6896_v57 = vadd.f32 %v7774_v19, %v13268_v17 }
 0x566   : > { %v6929_v45 = vmul.f32 0.5, %v6897_v50 }
 0x567   : > { %v6928_v31 = vmul.f32 0.5, %v6896_v57 }
 0x568   : > { %7972 = vtanh.f32 %v6929_v45 }
 0x569   : > { %7974 = vtanh.f32 %v6928_v31 }
 0x572   : > { %v7973_v29 = vpop.eup %7972 }
 0x573   : > { %v7975_v52 = vpop.eup %7974  ;;  %v6993_v6 = vadd.f32 1.0, %v7973_v29 }
 0x574   : > { %v6992_v33 = vadd.f32 1.0, %v7975_v52 }
 0x575   : > { %v7025_v60 = vmul.f32 0.5, %v6993_v6 }
 0x576   : > { %v7024_v63 = vmul.f32 0.5, %v6992_v33 }
 0x577   : > { %v7057_v26 = vmul.f32 %v7025_v60, %v6897_v50 }
 0x578   : > { %v7056_v44 = vmul.f32 %v7024_v63, %v6896_v57 }
 0x579   : > { %7090 = vst.msk [vmem:[%s13283_s26 + $0xf8] sm:$0xff] %vm7058_vm8, %v7057_v26 }
 0x57a   : > { %7089 = vst.msk [vmem:[%s13283_s26 + $0xf0] sm:$0xff] %vm7058_vm8, %v7056_v44 }
 0x57b PF: > { %s15_s18 = sadd.s32 1, %s8026_s18  }
 0x57c   : > { %p12_p4 = scmp.ge.s32.totalorder %s15_s18, 4  }
 0x57e   :  { %14 = sbr.rel (!%p12_p4) target bundleno = 1 (0x1), region = 72 }

</bundles_post_ra>
